<compile_context>
chip_gen: v6e
topology: v6e:2x2x1
jax: 0.10.0
libtpu: 0.0.40
codegen_flags: <defaults>
</compile_context>

<pallas_src>
import math
from functools import partial

import jax
import jax.numpy as jnp
from jax import lax
from jax.experimental import pallas as pl
from jax.experimental.pallas import tpu as pltpu

EPS = 1e-5     # nn.LayerNorm default eps
B_ROWS = 16    # padded per-layer row count in the f32 bias/LN slab (14 used)


def _vmem_spec():
    return pl.BlockSpec(memory_space=pltpu.MemorySpace.VMEM)


def _layernorm(x, g, b):
    mu = jnp.mean(x, axis=-1, keepdims=True)
    xc = x - mu
    var = jnp.mean(xc * xc, axis=-1, keepdims=True)
    return xc * lax.rsqrt(var + EPS) * g + b


# --------------------------- fused transformer kernel ------------------------
def make_fused_kernel(nhead, num_layers, embed_dim):
    E = embed_dim
    D = E // nhead

    def attn_core(q, k, v, wo, bo):
        """q, k, v: (L, E) f32 (q is pre-scaled via folded weights).
        wo: (E, E) bf16 (pre-transposed).  Returns (L, E) f32 attn output."""
        qb = q.astype(jnp.bfloat16)       # cast once, slice per head after
        kb = k.astype(jnp.bfloat16)
        vb = v.astype(jnp.bfloat16)
        hos = []
        # Heads are data-independent; the static unroll lets Mosaic interleave
        # head h+1's MXU pushes with head h's softmax (VPU/EUP).
        for h in range(nhead):
            qh = qb[:, h * D:(h + 1) * D]
            kh = kb[:, h * D:(h + 1) * D]
            # scores = qh @ kh^T by contracting the last axes (no kh.T copy)
            s = lax.dot_general(qh, kh, (((1,), (1,)), ((), ())),
                                preferred_element_type=jnp.float32)
            s = s - jnp.max(s, axis=-1, keepdims=True)
            e = jnp.exp(s)
            p = e * pl.reciprocal(jnp.sum(e, axis=-1, keepdims=True), approx=True)
            vh = vb[:, h * D:(h + 1) * D]
            ho = jnp.dot(p.astype(jnp.bfloat16), vh,
                         preferred_element_type=jnp.float32)
            hos.append(ho.astype(jnp.bfloat16))
        # one K=E output projection; head sum happens in the MXU f32 accumulator
        ho_cat = jnp.concatenate(hos, axis=-1)                   # (L, E) bf16
        return jnp.dot(ho_cat, wo, preferred_element_type=jnp.float32) + bo

    def attn_weights(q, k, attn_ref):
        """Last layer's returned raw_attn: f32 scores + exact divide."""
        ps = []
        for h in range(nhead):
            qh = q[:, h * D:(h + 1) * D]
            kh = k[:, h * D:(h + 1) * D]
            s = lax.dot_general(qh, kh, (((1,), (1,)), ((), ())),
                                preferred_element_type=jnp.float32)
            s = s - jnp.max(s, axis=-1, keepdims=True)
            e = jnp.exp(s)
            ps.append(e / jnp.sum(e, axis=-1, keepdims=True))
        # head-major, sublane-stacked (nhead*L, L): wrapper does a pure reshape
        attn_ref[...] = jnp.concatenate(ps, axis=0)

    def kernel(f1_ref, f2_ref, w_ref, b_ref, attn_ref):
        f1 = f1_ref[...]
        f2 = f2_ref[...]

        for l in range(num_layers):                       # statically unrolled
            last = (l == num_layers - 1)
            wl = w_ref[l * E:(l + 1) * E, :]              # (E, 8E) bf16
            bl = b_ref[l * B_ROWS:(l + 1) * B_ROWS, :]    # (B_ROWS, E) f32

            s_wqkv = wl[:, 0:3 * E]
            c_wq = wl[:, 3 * E:4 * E]
            c_wkv = wl[:, 4 * E:6 * E]
            s_wo = wl[:, 6 * E:7 * E]
            c_wo = wl[:, 7 * E:8 * E]

            def row(i, _bl=bl):
                return _bl[i:i + 1, :]                    # (1, E) f32

            # -------- TransformerSelfAttnLayer on feat_t1 --------
            f1n = _layernorm(f1, row(0), row(1))
            qkv = jnp.dot(f1n.astype(jnp.bfloat16), s_wqkv,
                          preferred_element_type=jnp.float32)
            q = qkv[:, 0:E] + row(2)          # 1/sqrt(D) folded into Wq / bq
            k = qkv[:, E:2 * E] + row(3)
            v = qkv[:, 2 * E:3 * E] + row(4)
            f1 = f1 + attn_core(q, k, v, s_wo, row(5))

            # -------- TransformerCrossAttnLayer --------
            f1n = _layernorm(f1, row(6), row(7))          # norm1 shared by both
            f2n = _layernorm(f2, row(6), row(7))

            # direction 1: query = norm1(f2), key = value = norm1(f1)
            q = jnp.dot(f2n.astype(jnp.bfloat16), c_wq,
                        preferred_element_type=jnp.float32) + row(10)
            kv = jnp.dot(f1n.astype(jnp.bfloat16), c_wkv,
                         preferred_element_type=jnp.float32)
            k = kv[:, 0:E] + row(11)
            v = kv[:, E:2 * E] + row(12)
            f2 = f2 + attn_core(q, k, v, c_wo, row(13))

            # direction 2: query = norm1(f1) (pre-update), key = value = norm2(f2)
            f2n2 = _layernorm(f2, row(8), row(9))
            q = jnp.dot(f1n.astype(jnp.bfloat16), c_wq,
                        preferred_element_type=jnp.float32) + row(10)
            if last:
                # Only raw_attn is returned by the module: project only the K
                # half and skip the dead V / output projection / f1 residual.
                k = jnp.dot(f2n2.astype(jnp.bfloat16), c_wkv[:, 0:E],
                            preferred_element_type=jnp.float32) + row(11)
                attn_weights(q, k, attn_ref)
            else:
                kv = jnp.dot(f2n2.astype(jnp.bfloat16), c_wkv,
                             preferred_element_type=jnp.float32)
                k = kv[:, 0:E] + row(11)
                v = kv[:, E:2 * E] + row(12)
                f1 = f1 + attn_core(q, k, v, c_wo, row(13))

    return kernel


# ---------------------------------- wrapper -----------------------------------
def transformer3d_forward(feat_t1, feat_t2, pos_enc_1, pos_enc_2, params, *,
                          nhead, embed_dim, num_layers):
    n, c, h, w = feat_t1.shape
    assert c == embed_dim
    L = n * h * w
    # Same memory reinterpretation as torch's .contiguous().view(n*h*w, c).
    f1 = feat_t1.reshape(L, c)
    f2 = feat_t2.reshape(L, c)
    if pos_enc_1 is not None:
        # matches `feat_t1 += pos_enc_1`; fused by XLA, saves 2 kernel DMAs and
        # the no-pos-enc path costs nothing.
        f1 = f1 + pos_enc_1.reshape(L, embed_dim)
        f2 = f2 + pos_enc_2.reshape(L, embed_dim)

    # ONE fused, gridless pallas_call for the whole layer stack; activations
    # never leave VMEM.  Only the last layer's raw attention is written back.
    attn = pl.pallas_call(
        make_fused_kernel(nhead, num_layers, embed_dim),
        out_shape=jax.ShapeDtypeStruct((nhead * L, L), jnp.float32),
        in_specs=[_vmem_spec()] * 4,
        out_specs=_vmem_spec(),
        compiler_params=pltpu.CompilerParams(vmem_limit_bytes=32 * 1024 * 1024),
    )(f1, f2, params["w"], params["b"])

    # head-major sublane-stacked (nhead*L, L) -> (nhead, L, L): pure reshape
    return attn.reshape(nhead, L, L)


# ------------------------------ parameter handling ----------------------------
def init_raw_params(key, embed_dim, num_layers):
    """torch-convention params: W is (out, in), y = x @ W.T + b."""
    ones = jnp.ones((embed_dim,), jnp.float32)
    zeros = jnp.zeros((embed_dim,), jnp.float32)

    def attn_p(k):
        ks = jax.random.split(k, 4)
        std = 0.02
        return {
            "wq": jax.random.normal(ks[0], (embed_dim, embed_dim), jnp.float32) * std,
            "wk": jax.random.normal(ks[1], (embed_dim, embed_dim), jnp.float32) * std,
            "wv": jax.random.normal(ks[2], (embed_dim, embed_dim), jnp.float32) * std,
            "wo": jax.random.normal(ks[3], (embed_dim, embed_dim), jnp.float32) * std,
            "bq": zeros, "bk": zeros, "bv": zeros, "bo": zeros,
        }

    keys = jax.random.split(key, 2 * num_layers)
    self_layers, cross_layers = [], []
    for i in range(num_layers):
        self_layers.append({"norm1_g": ones, "norm1_b": zeros,
                            "attn": attn_p(keys[2 * i])})
        cross_layers.append({"norm1_g": ones, "norm1_b": zeros,
                             "norm2_g": ones, "norm2_b": zeros,
                             "attn": attn_p(keys[2 * i + 1])})
    return {"self_layers": self_layers, "cross_layers": cross_layers}


def prepare_params(raw, nhead, embed_dim, num_layers):
    """Pack the whole stack into two slabs (built once, outside the hot path):
      w: (num_layers*E, 8E) bf16  = [wqkv | wq | wkv | wo_self | wo_cross] / layer
      b: (num_layers*16, E) f32   = LN params + biases (14 rows used per layer)
    Weights are pre-transposed to (E_in, E_out); 1/sqrt(D) is folded into the
    Q weight columns and bq."""
    E = embed_dim
    D = E // nhead
    scale = 1.0 / math.sqrt(D)

    w_blocks, b_blocks = [], []
    for l in range(num_layers):
        ps = raw["self_layers"][l]
        pc = raw["cross_layers"][l]
        sa, ca = ps["attn"], pc["attn"]

        s_wqkv = jnp.concatenate(
            [sa["wq"].T * scale, sa["wk"].T, sa["wv"].T], axis=1)   # (E, 3E)
        c_wq = ca["wq"].T * scale                                   # (E, E)
        c_wkv = jnp.concatenate([ca["wk"].T, ca["wv"].T], axis=1)   # (E, 2E)
        w_blocks.append(jnp.concatenate(
            [s_wqkv, c_wq, c_wkv, sa["wo"].T, ca["wo"].T], axis=1))  # (E, 8E)

        rows = [ps["norm1_g"], ps["norm1_b"],
                sa["bq"] * scale, sa["bk"], sa["bv"], sa["bo"],
                pc["norm1_g"], pc["norm1_b"], pc["norm2_g"], pc["norm2_b"],
                ca["bq"] * scale, ca["bk"], ca["bv"], ca["bo"]]
        blk = jnp.stack(rows, axis=0)                                # (14, E)
        pad = jnp.zeros((B_ROWS - blk.shape[0], E), jnp.float32)
        b_blocks.append(jnp.concatenate([blk, pad], axis=0))         # (16, E)

    return {"w": jnp.concatenate(w_blocks, axis=0).astype(jnp.bfloat16),
            "b": jnp.concatenate(b_blocks, axis=0).astype(jnp.float32)}


# ----------------------------------- Main ------------------------------------
if __name__ == "__main__":
    n, c, h, w = 1, 32, 8, 8          # c == embed_dim (required by LayerNorm)
    embed_dim, nhead, num_layers = 32, 4, 2

    key = jax.random.PRNGKey(0)
    k1, k2, k3, k4, kp = jax.random.split(key, 5)
    feat_t1 = jax.random.normal(k1, (n, c, h, w), jnp.float32)
    feat_t2 = jax.random.normal(k2, (n, c, h, w), jnp.float32)
    pos_enc_1 = jax.random.normal(k3, (n, c, h, w), jnp.float32) * 0.1
    pos_enc_2 = jax.random.normal(k4, (n, c, h, w), jnp.float32) * 0.1

    params = prepare_params(init_raw_params(kp, embed_dim, num_layers),
                            nhead, embed_dim, num_layers)

    fwd = jax.jit(partial(transformer3d_forward, nhead=nhead,
                          embed_dim=embed_dim, num_layers=num_layers))
    attn_3d = fwd(feat_t1, feat_t2, pos_enc_1, pos_enc_2, params)
    attn_3d = jax.block_until_ready(attn_3d)

    L = n * h * w
    assert attn_3d.shape == (nhead, L, L), attn_3d.shape
    assert bool(jnp.all(jnp.isfinite(attn_3d)))
    # rows of softmax attention sum to 1 (exact divide on the returned path)
    assert bool(jnp.allclose(jnp.sum(attn_3d, axis=-1), 1.0, atol=1e-4))
    print("KERNEL_OK")
</pallas_src>

<mosaic_0001>
module attributes {stable_mosaic.version = 11 : i64} {
  func.func @kernel(%arg0: memref<64x32xf32, #tpu.memory_space<vmem>>, %arg1: memref<64x32xf32, #tpu.memory_space<vmem>>, %arg2: memref<64x256xbf16, #tpu.memory_space<vmem>>, %arg3: memref<32x32xf32, #tpu.memory_space<vmem>>, %arg4: memref<256x64xf32, #tpu.memory_space<vmem>>) attributes {dimension_semantics = [], scalar_prefetch = 0 : i64, scratch_operands = 0 : i64, tpu.core_type = #tpu.core_type<tc>} {
    %c0 = arith.constant 0 : index
    %c0_0 = arith.constant 0 : index
    %0 = vector.load %arg0[%c0, %c0_0] : memref<64x32xf32, #tpu.memory_space<vmem>>, vector<64x32xf32>
    %c0_1 = arith.constant 0 : index
    %c0_2 = arith.constant 0 : index
    %1 = vector.load %arg1[%c0_1, %c0_2] : memref<64x32xf32, #tpu.memory_space<vmem>>, vector<64x32xf32>
    %c0_3 = arith.constant 0 : index
    %c0_4 = arith.constant 0 : index
    %2 = vector.load %arg2[%c0_3, %c0_4] : memref<64x256xbf16, #tpu.memory_space<vmem>>, vector<32x256xbf16>
    %c0_5 = arith.constant 0 : index
    %c0_6 = arith.constant 0 : index
    %3 = vector.load %arg3[%c0_5, %c0_6] : memref<32x32xf32, #tpu.memory_space<vmem>>, vector<16x32xf32>
    %4 = vector.extract_strided_slice %2 {offsets = [0, 0], sizes = [32, 96], strides = [1, 1]} : vector<32x256xbf16> to vector<32x96xbf16>
    %5 = vector.extract_strided_slice %2 {offsets = [0, 96], sizes = [32, 32], strides = [1, 1]} : vector<32x256xbf16> to vector<32x32xbf16>
    %6 = vector.extract_strided_slice %2 {offsets = [0, 128], sizes = [32, 64], strides = [1, 1]} : vector<32x256xbf16> to vector<32x64xbf16>
    %7 = vector.extract_strided_slice %2 {offsets = [0, 192], sizes = [32, 32], strides = [1, 1]} : vector<32x256xbf16> to vector<32x32xbf16>
    %8 = vector.extract_strided_slice %2 {offsets = [0, 224], sizes = [32, 32], strides = [1, 1]} : vector<32x256xbf16> to vector<32x32xbf16>
    %9 = vector.extract_strided_slice %3 {offsets = [0, 0], sizes = [1, 32], strides = [1, 1]} : vector<16x32xf32> to vector<1x32xf32>
    %10 = vector.extract_strided_slice %3 {offsets = [1, 0], sizes = [1, 32], strides = [1, 1]} : vector<16x32xf32> to vector<1x32xf32>
    %cst = arith.constant dense<0.000000e+00> : vector<64xf32>
    %11 = vector.multi_reduction <add>, %0, %cst [1] : vector<64x32xf32> to vector<64xf32>
    %12 = vector.shape_cast %11 : vector<64xf32> to vector<64x1xf32>
    %cst_7 = arith.constant 3.200000e+01 : f32
    %13 = vector.broadcast %cst_7 : f32 to vector<64x1xf32>
    %14 = arith.divf %12, %13 : vector<64x1xf32>
    %15 = vector.broadcast %14 : vector<64x1xf32> to vector<64x32xf32>
    %16 = arith.subf %0, %15 : vector<64x32xf32>
    %17 = arith.mulf %16, %16 : vector<64x32xf32>
    %cst_8 = arith.constant dense<0.000000e+00> : vector<64xf32>
    %18 = vector.multi_reduction <add>, %17, %cst_8 [1] : vector<64x32xf32> to vector<64xf32>
    %19 = vector.shape_cast %18 : vector<64xf32> to vector<64x1xf32>
    %cst_9 = arith.constant 3.200000e+01 : f32
    %20 = vector.broadcast %cst_9 : f32 to vector<64x1xf32>
    %21 = arith.divf %19, %20 : vector<64x1xf32>
    %cst_10 = arith.constant 9.99999974E-6 : f32
    %22 = vector.broadcast %cst_10 : f32 to vector<64x1xf32>
    %23 = arith.addf %21, %22 : vector<64x1xf32>
    %24 = math.rsqrt %23 : vector<64x1xf32>
    %25 = vector.broadcast %24 : vector<64x1xf32> to vector<64x32xf32>
    %26 = arith.mulf %16, %25 : vector<64x32xf32>
    %27 = vector.broadcast %9 : vector<1x32xf32> to vector<64x32xf32>
    %28 = arith.mulf %26, %27 : vector<64x32xf32>
    %29 = vector.broadcast %10 : vector<1x32xf32> to vector<64x32xf32>
    %30 = arith.addf %28, %29 : vector<64x32xf32>
    %31 = arith.truncf %30 : vector<64x32xf32> to vector<64x32xbf16>
    %cst_11 = arith.constant dense<0.000000e+00> : vector<64x96xf32>
    %32 = tpu.matmul %31, %4, %cst_11 {dimension_numbers = #tpu.dot_dimension_numbers<[1], [0], [0], [1], [0, 0, 1, 1], [], []>} : vector<64x32xbf16>, vector<32x96xbf16>, vector<64x96xf32> -> vector<64x96xf32>
    %33 = vector.extract_strided_slice %32 {offsets = [0, 0], sizes = [64, 32], strides = [1, 1]} : vector<64x96xf32> to vector<64x32xf32>
    %34 = vector.extract_strided_slice %3 {offsets = [2, 0], sizes = [1, 32], strides = [1, 1]} : vector<16x32xf32> to vector<1x32xf32>
    %35 = vector.broadcast %34 : vector<1x32xf32> to vector<64x32xf32>
    %36 = arith.addf %33, %35 : vector<64x32xf32>
    %37 = vector.extract_strided_slice %32 {offsets = [0, 32], sizes = [64, 32], strides = [1, 1]} : vector<64x96xf32> to vector<64x32xf32>
    %38 = vector.extract_strided_slice %3 {offsets = [3, 0], sizes = [1, 32], strides = [1, 1]} : vector<16x32xf32> to vector<1x32xf32>
    %39 = vector.broadcast %38 : vector<1x32xf32> to vector<64x32xf32>
    %40 = arith.addf %37, %39 : vector<64x32xf32>
    %41 = vector.extract_strided_slice %32 {offsets = [0, 64], sizes = [64, 32], strides = [1, 1]} : vector<64x96xf32> to vector<64x32xf32>
    %42 = vector.extract_strided_slice %3 {offsets = [4, 0], sizes = [1, 32], strides = [1, 1]} : vector<16x32xf32> to vector<1x32xf32>
    %43 = vector.broadcast %42 : vector<1x32xf32> to vector<64x32xf32>
    %44 = arith.addf %41, %43 : vector<64x32xf32>
    %45 = vector.extract_strided_slice %3 {offsets = [5, 0], sizes = [1, 32], strides = [1, 1]} : vector<16x32xf32> to vector<1x32xf32>
    %46 = arith.truncf %36 : vector<64x32xf32> to vector<64x32xbf16>
    %47 = arith.truncf %40 : vector<64x32xf32> to vector<64x32xbf16>
    %48 = arith.truncf %44 : vector<64x32xf32> to vector<64x32xbf16>
    %49 = vector.extract_strided_slice %46 {offsets = [0, 0], sizes = [64, 8], strides = [1, 1]} : vector<64x32xbf16> to vector<64x8xbf16>
    %50 = vector.extract_strided_slice %47 {offsets = [0, 0], sizes = [64, 8], strides = [1, 1]} : vector<64x32xbf16> to vector<64x8xbf16>
    %cst_12 = arith.constant dense<0.000000e+00> : vector<64x64xf32>
    %51 = tpu.matmul %49, %50, %cst_12 {dimension_numbers = #tpu.dot_dimension_numbers<[1], [1], [0], [0], [0, 0, 1, 0], [], []>} : vector<64x8xbf16>, vector<64x8xbf16>, vector<64x64xf32> -> vector<64x64xf32>
    %cst_13 = arith.constant dense<0xFF800000> : vector<64xf32>
    %52 = vector.multi_reduction <maximumf>, %51, %cst_13 [1] : vector<64x64xf32> to vector<64xf32>
    %53 = vector.shape_cast %52 : vector<64xf32> to vector<64x1xf32>
    %54 = vector.broadcast %53 : vector<64x1xf32> to vector<64x64xf32>
    %55 = arith.subf %51, %54 : vector<64x64xf32>
    %56 = math.exp %55 : vector<64x64xf32>
    %cst_14 = arith.constant dense<0.000000e+00> : vector<64xf32>
    %57 = vector.multi_reduction <add>, %56, %cst_14 [1] : vector<64x64xf32> to vector<64xf32>
    %58 = vector.shape_cast %57 : vector<64xf32> to vector<64x1xf32>
    %59 = tpu.reciprocal %58 {approx = true} : vector<64x1xf32> -> vector<64x1xf32>
    %60 = vector.broadcast %59 : vector<64x1xf32> to vector<64x64xf32>
    %61 = arith.mulf %56, %60 : vector<64x64xf32>
    %62 = vector.extract_strided_slice %48 {offsets = [0, 0], sizes = [64, 8], strides = [1, 1]} : vector<64x32xbf16> to vector<64x8xbf16>
    %63 = arith.truncf %61 : vector<64x64xf32> to vector<64x64xbf16>
    %cst_15 = arith.constant dense<0.000000e+00> : vector<64x8xf32>
    %64 = tpu.matmul %63, %62, %cst_15 {dimension_numbers = #tpu.dot_dimension_numbers<[1], [0], [0], [1], [0, 0, 1, 1], [], []>} : vector<64x64xbf16>, vector<64x8xbf16>, vector<64x8xf32> -> vector<64x8xf32>
    %65 = arith.truncf %64 : vector<64x8xf32> to vector<64x8xbf16>
    %66 = vector.extract_strided_slice %46 {offsets = [0, 8], sizes = [64, 8], strides = [1, 1]} : vector<64x32xbf16> to vector<64x8xbf16>
    %67 = vector.extract_strided_slice %47 {offsets = [0, 8], sizes = [64, 8], strides = [1, 1]} : vector<64x32xbf16> to vector<64x8xbf16>
    %cst_16 = arith.constant dense<0.000000e+00> : vector<64x64xf32>
    %68 = tpu.matmul %66, %67, %cst_16 {dimension_numbers = #tpu.dot_dimension_numbers<[1], [1], [0], [0], [0, 0, 1, 0], [], []>} : vector<64x8xbf16>, vector<64x8xbf16>, vector<64x64xf32> -> vector<64x64xf32>
    %cst_17 = arith.constant dense<0xFF800000> : vector<64xf32>
    %69 = vector.multi_reduction <maximumf>, %68, %cst_17 [1] : vector<64x64xf32> to vector<64xf32>
    %70 = vector.shape_cast %69 : vector<64xf32> to vector<64x1xf32>
    %71 = vector.broadcast %70 : vector<64x1xf32> to vector<64x64xf32>
    %72 = arith.subf %68, %71 : vector<64x64xf32>
    %73 = math.exp %72 : vector<64x64xf32>
    %cst_18 = arith.constant dense<0.000000e+00> : vector<64xf32>
    %74 = vector.multi_reduction <add>, %73, %cst_18 [1] : vector<64x64xf32> to vector<64xf32>
    %75 = vector.shape_cast %74 : vector<64xf32> to vector<64x1xf32>
    %76 = tpu.reciprocal %75 {approx = true} : vector<64x1xf32> -> vector<64x1xf32>
    %77 = vector.broadcast %76 : vector<64x1xf32> to vector<64x64xf32>
    %78 = arith.mulf %73, %77 : vector<64x64xf32>
    %79 = vector.extract_strided_slice %48 {offsets = [0, 8], sizes = [64, 8], strides = [1, 1]} : vector<64x32xbf16> to vector<64x8xbf16>
    %80 = arith.truncf %78 : vector<64x64xf32> to vector<64x64xbf16>
    %cst_19 = arith.constant dense<0.000000e+00> : vector<64x8xf32>
    %81 = tpu.matmul %80, %79, %cst_19 {dimension_numbers = #tpu.dot_dimension_numbers<[1], [0], [0], [1], [0, 0, 1, 1], [], []>} : vector<64x64xbf16>, vector<64x8xbf16>, vector<64x8xf32> -> vector<64x8xf32>
    %82 = arith.truncf %81 : vector<64x8xf32> to vector<64x8xbf16>
    %83 = vector.extract_strided_slice %46 {offsets = [0, 16], sizes = [64, 8], strides = [1, 1]} : vector<64x32xbf16> to vector<64x8xbf16>
    %84 = vector.extract_strided_slice %47 {offsets = [0, 16], sizes = [64, 8], strides = [1, 1]} : vector<64x32xbf16> to vector<64x8xbf16>
    %cst_20 = arith.constant dense<0.000000e+00> : vector<64x64xf32>
    %85 = tpu.matmul %83, %84, %cst_20 {dimension_numbers = #tpu.dot_dimension_numbers<[1], [1], [0], [0], [0, 0, 1, 0], [], []>} : vector<64x8xbf16>, vector<64x8xbf16>, vector<64x64xf32> -> vector<64x64xf32>
    %cst_21 = arith.constant dense<0xFF800000> : vector<64xf32>
    %86 = vector.multi_reduction <maximumf>, %85, %cst_21 [1] : vector<64x64xf32> to vector<64xf32>
    %87 = vector.shape_cast %86 : vector<64xf32> to vector<64x1xf32>
    %88 = vector.broadcast %87 : vector<64x1xf32> to vector<64x64xf32>
    %89 = arith.subf %85, %88 : vector<64x64xf32>
    %90 = math.exp %89 : vector<64x64xf32>
    %cst_22 = arith.constant dense<0.000000e+00> : vector<64xf32>
    %91 = vector.multi_reduction <add>, %90, %cst_22 [1] : vector<64x64xf32> to vector<64xf32>
    %92 = vector.shape_cast %91 : vector<64xf32> to vector<64x1xf32>
    %93 = tpu.reciprocal %92 {approx = true} : vector<64x1xf32> -> vector<64x1xf32>
    %94 = vector.broadcast %93 : vector<64x1xf32> to vector<64x64xf32>
    %95 = arith.mulf %90, %94 : vector<64x64xf32>
    %96 = vector.extract_strided_slice %48 {offsets = [0, 16], sizes = [64, 8], strides = [1, 1]} : vector<64x32xbf16> to vector<64x8xbf16>
    %97 = arith.truncf %95 : vector<64x64xf32> to vector<64x64xbf16>
    %cst_23 = arith.constant dense<0.000000e+00> : vector<64x8xf32>
    %98 = tpu.matmul %97, %96, %cst_23 {dimension_numbers = #tpu.dot_dimension_numbers<[1], [0], [0], [1], [0, 0, 1, 1], [], []>} : vector<64x64xbf16>, vector<64x8xbf16>, vector<64x8xf32> -> vector<64x8xf32>
    %99 = arith.truncf %98 : vector<64x8xf32> to vector<64x8xbf16>
    %100 = vector.extract_strided_slice %46 {offsets = [0, 24], sizes = [64, 8], strides = [1, 1]} : vector<64x32xbf16> to vector<64x8xbf16>
    %101 = vector.extract_strided_slice %47 {offsets = [0, 24], sizes = [64, 8], strides = [1, 1]} : vector<64x32xbf16> to vector<64x8xbf16>
    %cst_24 = arith.constant dense<0.000000e+00> : vector<64x64xf32>
    %102 = tpu.matmul %100, %101, %cst_24 {dimension_numbers = #tpu.dot_dimension_numbers<[1], [1], [0], [0], [0, 0, 1, 0], [], []>} : vector<64x8xbf16>, vector<64x8xbf16>, vector<64x64xf32> -> vector<64x64xf32>
    %cst_25 = arith.constant dense<0xFF800000> : vector<64xf32>
    %103 = vector.multi_reduction <maximumf>, %102, %cst_25 [1] : vector<64x64xf32> to vector<64xf32>
    %104 = vector.shape_cast %103 : vector<64xf32> to vector<64x1xf32>
    %105 = vector.broadcast %104 : vector<64x1xf32> to vector<64x64xf32>
    %106 = arith.subf %102, %105 : vector<64x64xf32>
    %107 = math.exp %106 : vector<64x64xf32>
    %cst_26 = arith.constant dense<0.000000e+00> : vector<64xf32>
    %108 = vector.multi_reduction <add>, %107, %cst_26 [1] : vector<64x64xf32> to vector<64xf32>
    %109 = vector.shape_cast %108 : vector<64xf32> to vector<64x1xf32>
    %110 = tpu.reciprocal %109 {approx = true} : vector<64x1xf32> -> vector<64x1xf32>
    %111 = vector.broadcast %110 : vector<64x1xf32> to vector<64x64xf32>
    %112 = arith.mulf %107, %111 : vector<64x64xf32>
    %113 = vector.extract_strided_slice %48 {offsets = [0, 24], sizes = [64, 8], strides = [1, 1]} : vector<64x32xbf16> to vector<64x8xbf16>
    %114 = arith.truncf %112 : vector<64x64xf32> to vector<64x64xbf16>
    %cst_27 = arith.constant dense<0.000000e+00> : vector<64x8xf32>
    %115 = tpu.matmul %114, %113, %cst_27 {dimension_numbers = #tpu.dot_dimension_numbers<[1], [0], [0], [1], [0, 0, 1, 1], [], []>} : vector<64x64xbf16>, vector<64x8xbf16>, vector<64x8xf32> -> vector<64x8xf32>
    %116 = arith.truncf %115 : vector<64x8xf32> to vector<64x8xbf16>
    %117 = tpu.concatenate %65, %82, %99, %116 in 1 : vector<64x8xbf16>, vector<64x8xbf16>, vector<64x8xbf16>, vector<64x8xbf16> -> vector<64x32xbf16>
    %cst_28 = arith.constant dense<0.000000e+00> : vector<64x32xf32>
    %118 = tpu.matmul %117, %7, %cst_28 {dimension_numbers = #tpu.dot_dimension_numbers<[1], [0], [0], [1], [0, 0, 1, 1], [], []>} : vector<64x32xbf16>, vector<32x32xbf16>, vector<64x32xf32> -> vector<64x32xf32>
    %119 = vector.broadcast %45 : vector<1x32xf32> to vector<64x32xf32>
    %120 = arith.addf %118, %119 : vector<64x32xf32>
    %121 = arith.addf %0, %120 : vector<64x32xf32>
    %122 = vector.extract_strided_slice %3 {offsets = [6, 0], sizes = [1, 32], strides = [1, 1]} : vector<16x32xf32> to vector<1x32xf32>
    %123 = vector.extract_strided_slice %3 {offsets = [7, 0], sizes = [1, 32], strides = [1, 1]} : vector<16x32xf32> to vector<1x32xf32>
    %cst_29 = arith.constant dense<0.000000e+00> : vector<64xf32>
    %124 = vector.multi_reduction <add>, %121, %cst_29 [1] : vector<64x32xf32> to vector<64xf32>
    %125 = vector.shape_cast %124 : vector<64xf32> to vector<64x1xf32>
    %cst_30 = arith.constant 3.200000e+01 : f32
    %126 = vector.broadcast %cst_30 : f32 to vector<64x1xf32>
    %127 = arith.divf %125, %126 : vector<64x1xf32>
    %128 = vector.broadcast %127 : vector<64x1xf32> to vector<64x32xf32>
    %129 = arith.subf %121, %128 : vector<64x32xf32>
    %130 = arith.mulf %129, %129 : vector<64x32xf32>
    %cst_31 = arith.constant dense<0.000000e+00> : vector<64xf32>
    %131 = vector.multi_reduction <add>, %130, %cst_31 [1] : vector<64x32xf32> to vector<64xf32>
    %132 = vector.shape_cast %131 : vector<64xf32> to vector<64x1xf32>
    %cst_32 = arith.constant 3.200000e+01 : f32
    %133 = vector.broadcast %cst_32 : f32 to vector<64x1xf32>
    %134 = arith.divf %132, %133 : vector<64x1xf32>
    %cst_33 = arith.constant 9.99999974E-6 : f32
    %135 = vector.broadcast %cst_33 : f32 to vector<64x1xf32>
    %136 = arith.addf %134, %135 : vector<64x1xf32>
    %137 = math.rsqrt %136 : vector<64x1xf32>
    %138 = vector.broadcast %137 : vector<64x1xf32> to vector<64x32xf32>
    %139 = arith.mulf %129, %138 : vector<64x32xf32>
    %140 = vector.broadcast %122 : vector<1x32xf32> to vector<64x32xf32>
    %141 = arith.mulf %139, %140 : vector<64x32xf32>
    %142 = vector.broadcast %123 : vector<1x32xf32> to vector<64x32xf32>
    %143 = arith.addf %141, %142 : vector<64x32xf32>
    %144 = vector.extract_strided_slice %3 {offsets = [6, 0], sizes = [1, 32], strides = [1, 1]} : vector<16x32xf32> to vector<1x32xf32>
    %145 = vector.extract_strided_slice %3 {offsets = [7, 0], sizes = [1, 32], strides = [1, 1]} : vector<16x32xf32> to vector<1x32xf32>
    %cst_34 = arith.constant dense<0.000000e+00> : vector<64xf32>
    %146 = vector.multi_reduction <add>, %1, %cst_34 [1] : vector<64x32xf32> to vector<64xf32>
    %147 = vector.shape_cast %146 : vector<64xf32> to vector<64x1xf32>
    %cst_35 = arith.constant 3.200000e+01 : f32
    %148 = vector.broadcast %cst_35 : f32 to vector<64x1xf32>
    %149 = arith.divf %147, %148 : vector<64x1xf32>
    %150 = vector.broadcast %149 : vector<64x1xf32> to vector<64x32xf32>
    %151 = arith.subf %1, %150 : vector<64x32xf32>
    %152 = arith.mulf %151, %151 : vector<64x32xf32>
    %cst_36 = arith.constant dense<0.000000e+00> : vector<64xf32>
    %153 = vector.multi_reduction <add>, %152, %cst_36 [1] : vector<64x32xf32> to vector<64xf32>
    %154 = vector.shape_cast %153 : vector<64xf32> to vector<64x1xf32>
    %cst_37 = arith.constant 3.200000e+01 : f32
    %155 = vector.broadcast %cst_37 : f32 to vector<64x1xf32>
    %156 = arith.divf %154, %155 : vector<64x1xf32>
    %cst_38 = arith.constant 9.99999974E-6 : f32
    %157 = vector.broadcast %cst_38 : f32 to vector<64x1xf32>
    %158 = arith.addf %156, %157 : vector<64x1xf32>
    %159 = math.rsqrt %158 : vector<64x1xf32>
    %160 = vector.broadcast %159 : vector<64x1xf32> to vector<64x32xf32>
    %161 = arith.mulf %151, %160 : vector<64x32xf32>
    %162 = vector.broadcast %144 : vector<1x32xf32> to vector<64x32xf32>
    %163 = arith.mulf %161, %162 : vector<64x32xf32>
    %164 = vector.broadcast %145 : vector<1x32xf32> to vector<64x32xf32>
    %165 = arith.addf %163, %164 : vector<64x32xf32>
    %166 = arith.truncf %165 : vector<64x32xf32> to vector<64x32xbf16>
    %cst_39 = arith.constant dense<0.000000e+00> : vector<64x32xf32>
    %167 = tpu.matmul %166, %5, %cst_39 {dimension_numbers = #tpu.dot_dimension_numbers<[1], [0], [0], [1], [0, 0, 1, 1], [], []>} : vector<64x32xbf16>, vector<32x32xbf16>, vector<64x32xf32> -> vector<64x32xf32>
    %168 = vector.extract_strided_slice %3 {offsets = [10, 0], sizes = [1, 32], strides = [1, 1]} : vector<16x32xf32> to vector<1x32xf32>
    %169 = vector.broadcast %168 : vector<1x32xf32> to vector<64x32xf32>
    %170 = arith.addf %167, %169 : vector<64x32xf32>
    %171 = arith.truncf %143 : vector<64x32xf32> to vector<64x32xbf16>
    %cst_40 = arith.constant dense<0.000000e+00> : vector<64x64xf32>
    %172 = tpu.matmul %171, %6, %cst_40 {dimension_numbers = #tpu.dot_dimension_numbers<[1], [0], [0], [1], [0, 0, 1, 1], [], []>} : vector<64x32xbf16>, vector<32x64xbf16>, vector<64x64xf32> -> vector<64x64xf32>
    %173 = vector.extract_strided_slice %172 {offsets = [0, 0], sizes = [64, 32], strides = [1, 1]} : vector<64x64xf32> to vector<64x32xf32>
    %174 = vector.extract_strided_slice %3 {offsets = [11, 0], sizes = [1, 32], strides = [1, 1]} : vector<16x32xf32> to vector<1x32xf32>
    %175 = vector.broadcast %174 : vector<1x32xf32> to vector<64x32xf32>
    %176 = arith.addf %173, %175 : vector<64x32xf32>
    %177 = vector.extract_strided_slice %172 {offsets = [0, 32], sizes = [64, 32], strides = [1, 1]} : vector<64x64xf32> to vector<64x32xf32>
    %178 = vector.extract_strided_slice %3 {offsets = [12, 0], sizes = [1, 32], strides = [1, 1]} : vector<16x32xf32> to vector<1x32xf32>
    %179 = vector.broadcast %178 : vector<1x32xf32> to vector<64x32xf32>
    %180 = arith.addf %177, %179 : vector<64x32xf32>
    %181 = vector.extract_strided_slice %3 {offsets = [13, 0], sizes = [1, 32], strides = [1, 1]} : vector<16x32xf32> to vector<1x32xf32>
    %182 = arith.truncf %170 : vector<64x32xf32> to vector<64x32xbf16>
    %183 = arith.truncf %176 : vector<64x32xf32> to vector<64x32xbf16>
    %184 = arith.truncf %180 : vector<64x32xf32> to vector<64x32xbf16>
    %185 = vector.extract_strided_slice %182 {offsets = [0, 0], sizes = [64, 8], strides = [1, 1]} : vector<64x32xbf16> to vector<64x8xbf16>
    %186 = vector.extract_strided_slice %183 {offsets = [0, 0], sizes = [64, 8], strides = [1, 1]} : vector<64x32xbf16> to vector<64x8xbf16>
    %cst_41 = arith.constant dense<0.000000e+00> : vector<64x64xf32>
    %187 = tpu.matmul %185, %186, %cst_41 {dimension_numbers = #tpu.dot_dimension_numbers<[1], [1], [0], [0], [0, 0, 1, 0], [], []>} : vector<64x8xbf16>, vector<64x8xbf16>, vector<64x64xf32> -> vector<64x64xf32>
    %cst_42 = arith.constant dense<0xFF800000> : vector<64xf32>
    %188 = vector.multi_reduction <maximumf>, %187, %cst_42 [1] : vector<64x64xf32> to vector<64xf32>
    %189 = vector.shape_cast %188 : vector<64xf32> to vector<64x1xf32>
    %190 = vector.broadcast %189 : vector<64x1xf32> to vector<64x64xf32>
    %191 = arith.subf %187, %190 : vector<64x64xf32>
    %192 = math.exp %191 : vector<64x64xf32>
    %cst_43 = arith.constant dense<0.000000e+00> : vector<64xf32>
    %193 = vector.multi_reduction <add>, %192, %cst_43 [1] : vector<64x64xf32> to vector<64xf32>
    %194 = vector.shape_cast %193 : vector<64xf32> to vector<64x1xf32>
    %195 = tpu.reciprocal %194 {approx = true} : vector<64x1xf32> -> vector<64x1xf32>
    %196 = vector.broadcast %195 : vector<64x1xf32> to vector<64x64xf32>
    %197 = arith.mulf %192, %196 : vector<64x64xf32>
    %198 = vector.extract_strided_slice %184 {offsets = [0, 0], sizes = [64, 8], strides = [1, 1]} : vector<64x32xbf16> to vector<64x8xbf16>
    %199 = arith.truncf %197 : vector<64x64xf32> to vector<64x64xbf16>
    %cst_44 = arith.constant dense<0.000000e+00> : vector<64x8xf32>
    %200 = tpu.matmul %199, %198, %cst_44 {dimension_numbers = #tpu.dot_dimension_numbers<[1], [0], [0], [1], [0, 0, 1, 1], [], []>} : vector<64x64xbf16>, vector<64x8xbf16>, vector<64x8xf32> -> vector<64x8xf32>
    %201 = arith.truncf %200 : vector<64x8xf32> to vector<64x8xbf16>
    %202 = vector.extract_strided_slice %182 {offsets = [0, 8], sizes = [64, 8], strides = [1, 1]} : vector<64x32xbf16> to vector<64x8xbf16>
    %203 = vector.extract_strided_slice %183 {offsets = [0, 8], sizes = [64, 8], strides = [1, 1]} : vector<64x32xbf16> to vector<64x8xbf16>
    %cst_45 = arith.constant dense<0.000000e+00> : vector<64x64xf32>
    %204 = tpu.matmul %202, %203, %cst_45 {dimension_numbers = #tpu.dot_dimension_numbers<[1], [1], [0], [0], [0, 0, 1, 0], [], []>} : vector<64x8xbf16>, vector<64x8xbf16>, vector<64x64xf32> -> vector<64x64xf32>
    %cst_46 = arith.constant dense<0xFF800000> : vector<64xf32>
    %205 = vector.multi_reduction <maximumf>, %204, %cst_46 [1] : vector<64x64xf32> to vector<64xf32>
    %206 = vector.shape_cast %205 : vector<64xf32> to vector<64x1xf32>
    %207 = vector.broadcast %206 : vector<64x1xf32> to vector<64x64xf32>
    %208 = arith.subf %204, %207 : vector<64x64xf32>
    %209 = math.exp %208 : vector<64x64xf32>
    %cst_47 = arith.constant dense<0.000000e+00> : vector<64xf32>
    %210 = vector.multi_reduction <add>, %209, %cst_47 [1] : vector<64x64xf32> to vector<64xf32>
    %211 = vector.shape_cast %210 : vector<64xf32> to vector<64x1xf32>
    %212 = tpu.reciprocal %211 {approx = true} : vector<64x1xf32> -> vector<64x1xf32>
    %213 = vector.broadcast %212 : vector<64x1xf32> to vector<64x64xf32>
    %214 = arith.mulf %209, %213 : vector<64x64xf32>
    %215 = vector.extract_strided_slice %184 {offsets = [0, 8], sizes = [64, 8], strides = [1, 1]} : vector<64x32xbf16> to vector<64x8xbf16>
    %216 = arith.truncf %214 : vector<64x64xf32> to vector<64x64xbf16>
    %cst_48 = arith.constant dense<0.000000e+00> : vector<64x8xf32>
    %217 = tpu.matmul %216, %215, %cst_48 {dimension_numbers = #tpu.dot_dimension_numbers<[1], [0], [0], [1], [0, 0, 1, 1], [], []>} : vector<64x64xbf16>, vector<64x8xbf16>, vector<64x8xf32> -> vector<64x8xf32>
    %218 = arith.truncf %217 : vector<64x8xf32> to vector<64x8xbf16>
    %219 = vector.extract_strided_slice %182 {offsets = [0, 16], sizes = [64, 8], strides = [1, 1]} : vector<64x32xbf16> to vector<64x8xbf16>
    %220 = vector.extract_strided_slice %183 {offsets = [0, 16], sizes = [64, 8], strides = [1, 1]} : vector<64x32xbf16> to vector<64x8xbf16>
    %cst_49 = arith.constant dense<0.000000e+00> : vector<64x64xf32>
    %221 = tpu.matmul %219, %220, %cst_49 {dimension_numbers = #tpu.dot_dimension_numbers<[1], [1], [0], [0], [0, 0, 1, 0], [], []>} : vector<64x8xbf16>, vector<64x8xbf16>, vector<64x64xf32> -> vector<64x64xf32>
    %cst_50 = arith.constant dense<0xFF800000> : vector<64xf32>
    %222 = vector.multi_reduction <maximumf>, %221, %cst_50 [1] : vector<64x64xf32> to vector<64xf32>
    %223 = vector.shape_cast %222 : vector<64xf32> to vector<64x1xf32>
    %224 = vector.broadcast %223 : vector<64x1xf32> to vector<64x64xf32>
    %225 = arith.subf %221, %224 : vector<64x64xf32>
    %226 = math.exp %225 : vector<64x64xf32>
    %cst_51 = arith.constant dense<0.000000e+00> : vector<64xf32>
    %227 = vector.multi_reduction <add>, %226, %cst_51 [1] : vector<64x64xf32> to vector<64xf32>
    %228 = vector.shape_cast %227 : vector<64xf32> to vector<64x1xf32>
    %229 = tpu.reciprocal %228 {approx = true} : vector<64x1xf32> -> vector<64x1xf32>
    %230 = vector.broadcast %229 : vector<64x1xf32> to vector<64x64xf32>
    %231 = arith.mulf %226, %230 : vector<64x64xf32>
    %232 = vector.extract_strided_slice %184 {offsets = [0, 16], sizes = [64, 8], strides = [1, 1]} : vector<64x32xbf16> to vector<64x8xbf16>
    %233 = arith.truncf %231 : vector<64x64xf32> to vector<64x64xbf16>
    %cst_52 = arith.constant dense<0.000000e+00> : vector<64x8xf32>
    %234 = tpu.matmul %233, %232, %cst_52 {dimension_numbers = #tpu.dot_dimension_numbers<[1], [0], [0], [1], [0, 0, 1, 1], [], []>} : vector<64x64xbf16>, vector<64x8xbf16>, vector<64x8xf32> -> vector<64x8xf32>
    %235 = arith.truncf %234 : vector<64x8xf32> to vector<64x8xbf16>
    %236 = vector.extract_strided_slice %182 {offsets = [0, 24], sizes = [64, 8], strides = [1, 1]} : vector<64x32xbf16> to vector<64x8xbf16>
    %237 = vector.extract_strided_slice %183 {offsets = [0, 24], sizes = [64, 8], strides = [1, 1]} : vector<64x32xbf16> to vector<64x8xbf16>
    %cst_53 = arith.constant dense<0.000000e+00> : vector<64x64xf32>
    %238 = tpu.matmul %236, %237, %cst_53 {dimension_numbers = #tpu.dot_dimension_numbers<[1], [1], [0], [0], [0, 0, 1, 0], [], []>} : vector<64x8xbf16>, vector<64x8xbf16>, vector<64x64xf32> -> vector<64x64xf32>
    %cst_54 = arith.constant dense<0xFF800000> : vector<64xf32>
    %239 = vector.multi_reduction <maximumf>, %238, %cst_54 [1] : vector<64x64xf32> to vector<64xf32>
    %240 = vector.shape_cast %239 : vector<64xf32> to vector<64x1xf32>
    %241 = vector.broadcast %240 : vector<64x1xf32> to vector<64x64xf32>
    %242 = arith.subf %238, %241 : vector<64x64xf32>
    %243 = math.exp %242 : vector<64x64xf32>
    %cst_55 = arith.constant dense<0.000000e+00> : vector<64xf32>
    %244 = vector.multi_reduction <add>, %243, %cst_55 [1] : vector<64x64xf32> to vector<64xf32>
    %245 = vector.shape_cast %244 : vector<64xf32> to vector<64x1xf32>
    %246 = tpu.reciprocal %245 {approx = true} : vector<64x1xf32> -> vector<64x1xf32>
    %247 = vector.broadcast %246 : vector<64x1xf32> to vector<64x64xf32>
    %248 = arith.mulf %243, %247 : vector<64x64xf32>
    %249 = vector.extract_strided_slice %184 {offsets = [0, 24], sizes = [64, 8], strides = [1, 1]} : vector<64x32xbf16> to vector<64x8xbf16>
    %250 = arith.truncf %248 : vector<64x64xf32> to vector<64x64xbf16>
    %cst_56 = arith.constant dense<0.000000e+00> : vector<64x8xf32>
    %251 = tpu.matmul %250, %249, %cst_56 {dimension_numbers = #tpu.dot_dimension_numbers<[1], [0], [0], [1], [0, 0, 1, 1], [], []>} : vector<64x64xbf16>, vector<64x8xbf16>, vector<64x8xf32> -> vector<64x8xf32>
    %252 = arith.truncf %251 : vector<64x8xf32> to vector<64x8xbf16>
    %253 = tpu.concatenate %201, %218, %235, %252 in 1 : vector<64x8xbf16>, vector<64x8xbf16>, vector<64x8xbf16>, vector<64x8xbf16> -> vector<64x32xbf16>
    %cst_57 = arith.constant dense<0.000000e+00> : vector<64x32xf32>
    %254 = tpu.matmul %253, %8, %cst_57 {dimension_numbers = #tpu.dot_dimension_numbers<[1], [0], [0], [1], [0, 0, 1, 1], [], []>} : vector<64x32xbf16>, vector<32x32xbf16>, vector<64x32xf32> -> vector<64x32xf32>
    %255 = vector.broadcast %181 : vector<1x32xf32> to vector<64x32xf32>
    %256 = arith.addf %254, %255 : vector<64x32xf32>
    %257 = arith.addf %1, %256 : vector<64x32xf32>
    %258 = vector.extract_strided_slice %3 {offsets = [8, 0], sizes = [1, 32], strides = [1, 1]} : vector<16x32xf32> to vector<1x32xf32>
    %259 = vector.extract_strided_slice %3 {offsets = [9, 0], sizes = [1, 32], strides = [1, 1]} : vector<16x32xf32> to vector<1x32xf32>
    %cst_58 = arith.constant dense<0.000000e+00> : vector<64xf32>
    %260 = vector.multi_reduction <add>, %257, %cst_58 [1] : vector<64x32xf32> to vector<64xf32>
    %261 = vector.shape_cast %260 : vector<64xf32> to vector<64x1xf32>
    %cst_59 = arith.constant 3.200000e+01 : f32
    %262 = vector.broadcast %cst_59 : f32 to vector<64x1xf32>
    %263 = arith.divf %261, %262 : vector<64x1xf32>
    %264 = vector.broadcast %263 : vector<64x1xf32> to vector<64x32xf32>
    %265 = arith.subf %257, %264 : vector<64x32xf32>
    %266 = arith.mulf %265, %265 : vector<64x32xf32>
    %cst_60 = arith.constant dense<0.000000e+00> : vector<64xf32>
    %267 = vector.multi_reduction <add>, %266, %cst_60 [1] : vector<64x32xf32> to vector<64xf32>
    %268 = vector.shape_cast %267 : vector<64xf32> to vector<64x1xf32>
    %cst_61 = arith.constant 3.200000e+01 : f32
    %269 = vector.broadcast %cst_61 : f32 to vector<64x1xf32>
    %270 = arith.divf %268, %269 : vector<64x1xf32>
    %cst_62 = arith.constant 9.99999974E-6 : f32
    %271 = vector.broadcast %cst_62 : f32 to vector<64x1xf32>
    %272 = arith.addf %270, %271 : vector<64x1xf32>
    %273 = math.rsqrt %272 : vector<64x1xf32>
    %274 = vector.broadcast %273 : vector<64x1xf32> to vector<64x32xf32>
    %275 = arith.mulf %265, %274 : vector<64x32xf32>
    %276 = vector.broadcast %258 : vector<1x32xf32> to vector<64x32xf32>
    %277 = arith.mulf %275, %276 : vector<64x32xf32>
    %278 = vector.broadcast %259 : vector<1x32xf32> to vector<64x32xf32>
    %279 = arith.addf %277, %278 : vector<64x32xf32>
    %280 = arith.truncf %143 : vector<64x32xf32> to vector<64x32xbf16>
    %cst_63 = arith.constant dense<0.000000e+00> : vector<64x32xf32>
    %281 = tpu.matmul %280, %5, %cst_63 {dimension_numbers = #tpu.dot_dimension_numbers<[1], [0], [0], [1], [0, 0, 1, 1], [], []>} : vector<64x32xbf16>, vector<32x32xbf16>, vector<64x32xf32> -> vector<64x32xf32>
    %282 = vector.extract_strided_slice %3 {offsets = [10, 0], sizes = [1, 32], strides = [1, 1]} : vector<16x32xf32> to vector<1x32xf32>
    %283 = vector.broadcast %282 : vector<1x32xf32> to vector<64x32xf32>
    %284 = arith.addf %281, %283 : vector<64x32xf32>
    %285 = arith.truncf %279 : vector<64x32xf32> to vector<64x32xbf16>
    %cst_64 = arith.constant dense<0.000000e+00> : vector<64x64xf32>
    %286 = tpu.matmul %285, %6, %cst_64 {dimension_numbers = #tpu.dot_dimension_numbers<[1], [0], [0], [1], [0, 0, 1, 1], [], []>} : vector<64x32xbf16>, vector<32x64xbf16>, vector<64x64xf32> -> vector<64x64xf32>
    %287 = vector.extract_strided_slice %286 {offsets = [0, 0], sizes = [64, 32], strides = [1, 1]} : vector<64x64xf32> to vector<64x32xf32>
    %288 = vector.extract_strided_slice %3 {offsets = [11, 0], sizes = [1, 32], strides = [1, 1]} : vector<16x32xf32> to vector<1x32xf32>
    %289 = vector.broadcast %288 : vector<1x32xf32> to vector<64x32xf32>
    %290 = arith.addf %287, %289 : vector<64x32xf32>
    %291 = vector.extract_strided_slice %286 {offsets = [0, 32], sizes = [64, 32], strides = [1, 1]} : vector<64x64xf32> to vector<64x32xf32>
    %292 = vector.extract_strided_slice %3 {offsets = [12, 0], sizes = [1, 32], strides = [1, 1]} : vector<16x32xf32> to vector<1x32xf32>
    %293 = vector.broadcast %292 : vector<1x32xf32> to vector<64x32xf32>
    %294 = arith.addf %291, %293 : vector<64x32xf32>
    %295 = vector.extract_strided_slice %3 {offsets = [13, 0], sizes = [1, 32], strides = [1, 1]} : vector<16x32xf32> to vector<1x32xf32>
    %296 = arith.truncf %284 : vector<64x32xf32> to vector<64x32xbf16>
    %297 = arith.truncf %290 : vector<64x32xf32> to vector<64x32xbf16>
    %298 = arith.truncf %294 : vector<64x32xf32> to vector<64x32xbf16>
    %299 = vector.extract_strided_slice %296 {offsets = [0, 0], sizes = [64, 8], strides = [1, 1]} : vector<64x32xbf16> to vector<64x8xbf16>
    %300 = vector.extract_strided_slice %297 {offsets = [0, 0], sizes = [64, 8], strides = [1, 1]} : vector<64x32xbf16> to vector<64x8xbf16>
    %cst_65 = arith.constant dense<0.000000e+00> : vector<64x64xf32>
    %301 = tpu.matmul %299, %300, %cst_65 {dimension_numbers = #tpu.dot_dimension_numbers<[1], [1], [0], [0], [0, 0, 1, 0], [], []>} : vector<64x8xbf16>, vector<64x8xbf16>, vector<64x64xf32> -> vector<64x64xf32>
    %cst_66 = arith.constant dense<0xFF800000> : vector<64xf32>
    %302 = vector.multi_reduction <maximumf>, %301, %cst_66 [1] : vector<64x64xf32> to vector<64xf32>
    %303 = vector.shape_cast %302 : vector<64xf32> to vector<64x1xf32>
    %304 = vector.broadcast %303 : vector<64x1xf32> to vector<64x64xf32>
    %305 = arith.subf %301, %304 : vector<64x64xf32>
    %306 = math.exp %305 : vector<64x64xf32>
    %cst_67 = arith.constant dense<0.000000e+00> : vector<64xf32>
    %307 = vector.multi_reduction <add>, %306, %cst_67 [1] : vector<64x64xf32> to vector<64xf32>
    %308 = vector.shape_cast %307 : vector<64xf32> to vector<64x1xf32>
    %309 = tpu.reciprocal %308 {approx = true} : vector<64x1xf32> -> vector<64x1xf32>
    %310 = vector.broadcast %309 : vector<64x1xf32> to vector<64x64xf32>
    %311 = arith.mulf %306, %310 : vector<64x64xf32>
    %312 = vector.extract_strided_slice %298 {offsets = [0, 0], sizes = [64, 8], strides = [1, 1]} : vector<64x32xbf16> to vector<64x8xbf16>
    %313 = arith.truncf %311 : vector<64x64xf32> to vector<64x64xbf16>
    %cst_68 = arith.constant dense<0.000000e+00> : vector<64x8xf32>
    %314 = tpu.matmul %313, %312, %cst_68 {dimension_numbers = #tpu.dot_dimension_numbers<[1], [0], [0], [1], [0, 0, 1, 1], [], []>} : vector<64x64xbf16>, vector<64x8xbf16>, vector<64x8xf32> -> vector<64x8xf32>
    %315 = arith.truncf %314 : vector<64x8xf32> to vector<64x8xbf16>
    %316 = vector.extract_strided_slice %296 {offsets = [0, 8], sizes = [64, 8], strides = [1, 1]} : vector<64x32xbf16> to vector<64x8xbf16>
    %317 = vector.extract_strided_slice %297 {offsets = [0, 8], sizes = [64, 8], strides = [1, 1]} : vector<64x32xbf16> to vector<64x8xbf16>
    %cst_69 = arith.constant dense<0.000000e+00> : vector<64x64xf32>
    %318 = tpu.matmul %316, %317, %cst_69 {dimension_numbers = #tpu.dot_dimension_numbers<[1], [1], [0], [0], [0, 0, 1, 0], [], []>} : vector<64x8xbf16>, vector<64x8xbf16>, vector<64x64xf32> -> vector<64x64xf32>
    %cst_70 = arith.constant dense<0xFF800000> : vector<64xf32>
    %319 = vector.multi_reduction <maximumf>, %318, %cst_70 [1] : vector<64x64xf32> to vector<64xf32>
    %320 = vector.shape_cast %319 : vector<64xf32> to vector<64x1xf32>
    %321 = vector.broadcast %320 : vector<64x1xf32> to vector<64x64xf32>
    %322 = arith.subf %318, %321 : vector<64x64xf32>
    %323 = math.exp %322 : vector<64x64xf32>
    %cst_71 = arith.constant dense<0.000000e+00> : vector<64xf32>
    %324 = vector.multi_reduction <add>, %323, %cst_71 [1] : vector<64x64xf32> to vector<64xf32>
    %325 = vector.shape_cast %324 : vector<64xf32> to vector<64x1xf32>
    %326 = tpu.reciprocal %325 {approx = true} : vector<64x1xf32> -> vector<64x1xf32>
    %327 = vector.broadcast %326 : vector<64x1xf32> to vector<64x64xf32>
    %328 = arith.mulf %323, %327 : vector<64x64xf32>
    %329 = vector.extract_strided_slice %298 {offsets = [0, 8], sizes = [64, 8], strides = [1, 1]} : vector<64x32xbf16> to vector<64x8xbf16>
    %330 = arith.truncf %328 : vector<64x64xf32> to vector<64x64xbf16>
    %cst_72 = arith.constant dense<0.000000e+00> : vector<64x8xf32>
    %331 = tpu.matmul %330, %329, %cst_72 {dimension_numbers = #tpu.dot_dimension_numbers<[1], [0], [0], [1], [0, 0, 1, 1], [], []>} : vector<64x64xbf16>, vector<64x8xbf16>, vector<64x8xf32> -> vector<64x8xf32>
    %332 = arith.truncf %331 : vector<64x8xf32> to vector<64x8xbf16>
    %333 = vector.extract_strided_slice %296 {offsets = [0, 16], sizes = [64, 8], strides = [1, 1]} : vector<64x32xbf16> to vector<64x8xbf16>
    %334 = vector.extract_strided_slice %297 {offsets = [0, 16], sizes = [64, 8], strides = [1, 1]} : vector<64x32xbf16> to vector<64x8xbf16>
    %cst_73 = arith.constant dense<0.000000e+00> : vector<64x64xf32>
    %335 = tpu.matmul %333, %334, %cst_73 {dimension_numbers = #tpu.dot_dimension_numbers<[1], [1], [0], [0], [0, 0, 1, 0], [], []>} : vector<64x8xbf16>, vector<64x8xbf16>, vector<64x64xf32> -> vector<64x64xf32>
    %cst_74 = arith.constant dense<0xFF800000> : vector<64xf32>
    %336 = vector.multi_reduction <maximumf>, %335, %cst_74 [1] : vector<64x64xf32> to vector<64xf32>
    %337 = vector.shape_cast %336 : vector<64xf32> to vector<64x1xf32>
    %338 = vector.broadcast %337 : vector<64x1xf32> to vector<64x64xf32>
    %339 = arith.subf %335, %338 : vector<64x64xf32>
    %340 = math.exp %339 : vector<64x64xf32>
    %cst_75 = arith.constant dense<0.000000e+00> : vector<64xf32>
    %341 = vector.multi_reduction <add>, %340, %cst_75 [1] : vector<64x64xf32> to vector<64xf32>
    %342 = vector.shape_cast %341 : vector<64xf32> to vector<64x1xf32>
    %343 = tpu.reciprocal %342 {approx = true} : vector<64x1xf32> -> vector<64x1xf32>
    %344 = vector.broadcast %343 : vector<64x1xf32> to vector<64x64xf32>
    %345 = arith.mulf %340, %344 : vector<64x64xf32>
    %346 = vector.extract_strided_slice %298 {offsets = [0, 16], sizes = [64, 8], strides = [1, 1]} : vector<64x32xbf16> to vector<64x8xbf16>
    %347 = arith.truncf %345 : vector<64x64xf32> to vector<64x64xbf16>
    %cst_76 = arith.constant dense<0.000000e+00> : vector<64x8xf32>
    %348 = tpu.matmul %347, %346, %cst_76 {dimension_numbers = #tpu.dot_dimension_numbers<[1], [0], [0], [1], [0, 0, 1, 1], [], []>} : vector<64x64xbf16>, vector<64x8xbf16>, vector<64x8xf32> -> vector<64x8xf32>
    %349 = arith.truncf %348 : vector<64x8xf32> to vector<64x8xbf16>
    %350 = vector.extract_strided_slice %296 {offsets = [0, 24], sizes = [64, 8], strides = [1, 1]} : vector<64x32xbf16> to vector<64x8xbf16>
    %351 = vector.extract_strided_slice %297 {offsets = [0, 24], sizes = [64, 8], strides = [1, 1]} : vector<64x32xbf16> to vector<64x8xbf16>
    %cst_77 = arith.constant dense<0.000000e+00> : vector<64x64xf32>
    %352 = tpu.matmul %350, %351, %cst_77 {dimension_numbers = #tpu.dot_dimension_numbers<[1], [1], [0], [0], [0, 0, 1, 0], [], []>} : vector<64x8xbf16>, vector<64x8xbf16>, vector<64x64xf32> -> vector<64x64xf32>
    %cst_78 = arith.constant dense<0xFF800000> : vector<64xf32>
    %353 = vector.multi_reduction <maximumf>, %352, %cst_78 [1] : vector<64x64xf32> to vector<64xf32>
    %354 = vector.shape_cast %353 : vector<64xf32> to vector<64x1xf32>
    %355 = vector.broadcast %354 : vector<64x1xf32> to vector<64x64xf32>
    %356 = arith.subf %352, %355 : vector<64x64xf32>
    %357 = math.exp %356 : vector<64x64xf32>
    %cst_79 = arith.constant dense<0.000000e+00> : vector<64xf32>
    %358 = vector.multi_reduction <add>, %357, %cst_79 [1] : vector<64x64xf32> to vector<64xf32>
    %359 = vector.shape_cast %358 : vector<64xf32> to vector<64x1xf32>
    %360 = tpu.reciprocal %359 {approx = true} : vector<64x1xf32> -> vector<64x1xf32>
    %361 = vector.broadcast %360 : vector<64x1xf32> to vector<64x64xf32>
    %362 = arith.mulf %357, %361 : vector<64x64xf32>
    %363 = vector.extract_strided_slice %298 {offsets = [0, 24], sizes = [64, 8], strides = [1, 1]} : vector<64x32xbf16> to vector<64x8xbf16>
    %364 = arith.truncf %362 : vector<64x64xf32> to vector<64x64xbf16>
    %cst_80 = arith.constant dense<0.000000e+00> : vector<64x8xf32>
    %365 = tpu.matmul %364, %363, %cst_80 {dimension_numbers = #tpu.dot_dimension_numbers<[1], [0], [0], [1], [0, 0, 1, 1], [], []>} : vector<64x64xbf16>, vector<64x8xbf16>, vector<64x8xf32> -> vector<64x8xf32>
    %366 = arith.truncf %365 : vector<64x8xf32> to vector<64x8xbf16>
    %367 = tpu.concatenate %315, %332, %349, %366 in 1 : vector<64x8xbf16>, vector<64x8xbf16>, vector<64x8xbf16>, vector<64x8xbf16> -> vector<64x32xbf16>
    %cst_81 = arith.constant dense<0.000000e+00> : vector<64x32xf32>
    %368 = tpu.matmul %367, %8, %cst_81 {dimension_numbers = #tpu.dot_dimension_numbers<[1], [0], [0], [1], [0, 0, 1, 1], [], []>} : vector<64x32xbf16>, vector<32x32xbf16>, vector<64x32xf32> -> vector<64x32xf32>
    %369 = vector.broadcast %295 : vector<1x32xf32> to vector<64x32xf32>
    %370 = arith.addf %368, %369 : vector<64x32xf32>
    %371 = arith.addf %121, %370 : vector<64x32xf32>
    %c32 = arith.constant 32 : index
    %c0_82 = arith.constant 0 : index
    %372 = vector.load %arg2[%c32, %c0_82] : memref<64x256xbf16, #tpu.memory_space<vmem>>, vector<32x256xbf16>
    %c16 = arith.constant 16 : index
    %c0_83 = arith.constant 0 : index
    %373 = vector.load %arg3[%c16, %c0_83] : memref<32x32xf32, #tpu.memory_space<vmem>>, vector<16x32xf32>
    %374 = vector.extract_strided_slice %372 {offsets = [0, 0], sizes = [32, 96], strides = [1, 1]} : vector<32x256xbf16> to vector<32x96xbf16>
    %375 = vector.extract_strided_slice %372 {offsets = [0, 96], sizes = [32, 32], strides = [1, 1]} : vector<32x256xbf16> to vector<32x32xbf16>
    %376 = vector.extract_strided_slice %372 {offsets = [0, 128], sizes = [32, 64], strides = [1, 1]} : vector<32x256xbf16> to vector<32x64xbf16>
    %377 = vector.extract_strided_slice %372 {offsets = [0, 192], sizes = [32, 32], strides = [1, 1]} : vector<32x256xbf16> to vector<32x32xbf16>
    %378 = vector.extract_strided_slice %372 {offsets = [0, 224], sizes = [32, 32], strides = [1, 1]} : vector<32x256xbf16> to vector<32x32xbf16>
    %379 = vector.extract_strided_slice %373 {offsets = [0, 0], sizes = [1, 32], strides = [1, 1]} : vector<16x32xf32> to vector<1x32xf32>
    %380 = vector.extract_strided_slice %373 {offsets = [1, 0], sizes = [1, 32], strides = [1, 1]} : vector<16x32xf32> to vector<1x32xf32>
    %cst_84 = arith.constant dense<0.000000e+00> : vector<64xf32>
    %381 = vector.multi_reduction <add>, %371, %cst_84 [1] : vector<64x32xf32> to vector<64xf32>
    %382 = vector.shape_cast %381 : vector<64xf32> to vector<64x1xf32>
    %cst_85 = arith.constant 3.200000e+01 : f32
    %383 = vector.broadcast %cst_85 : f32 to vector<64x1xf32>
    %384 = arith.divf %382, %383 : vector<64x1xf32>
    %385 = vector.broadcast %384 : vector<64x1xf32> to vector<64x32xf32>
    %386 = arith.subf %371, %385 : vector<64x32xf32>
    %387 = arith.mulf %386, %386 : vector<64x32xf32>
    %cst_86 = arith.constant dense<0.000000e+00> : vector<64xf32>
    %388 = vector.multi_reduction <add>, %387, %cst_86 [1] : vector<64x32xf32> to vector<64xf32>
    %389 = vector.shape_cast %388 : vector<64xf32> to vector<64x1xf32>
    %cst_87 = arith.constant 3.200000e+01 : f32
    %390 = vector.broadcast %cst_87 : f32 to vector<64x1xf32>
    %391 = arith.divf %389, %390 : vector<64x1xf32>
    %cst_88 = arith.constant 9.99999974E-6 : f32
    %392 = vector.broadcast %cst_88 : f32 to vector<64x1xf32>
    %393 = arith.addf %391, %392 : vector<64x1xf32>
    %394 = math.rsqrt %393 : vector<64x1xf32>
    %395 = vector.broadcast %394 : vector<64x1xf32> to vector<64x32xf32>
    %396 = arith.mulf %386, %395 : vector<64x32xf32>
    %397 = vector.broadcast %379 : vector<1x32xf32> to vector<64x32xf32>
    %398 = arith.mulf %396, %397 : vector<64x32xf32>
    %399 = vector.broadcast %380 : vector<1x32xf32> to vector<64x32xf32>
    %400 = arith.addf %398, %399 : vector<64x32xf32>
    %401 = arith.truncf %400 : vector<64x32xf32> to vector<64x32xbf16>
    %cst_89 = arith.constant dense<0.000000e+00> : vector<64x96xf32>
    %402 = tpu.matmul %401, %374, %cst_89 {dimension_numbers = #tpu.dot_dimension_numbers<[1], [0], [0], [1], [0, 0, 1, 1], [], []>} : vector<64x32xbf16>, vector<32x96xbf16>, vector<64x96xf32> -> vector<64x96xf32>
    %403 = vector.extract_strided_slice %402 {offsets = [0, 0], sizes = [64, 32], strides = [1, 1]} : vector<64x96xf32> to vector<64x32xf32>
    %404 = vector.extract_strided_slice %373 {offsets = [2, 0], sizes = [1, 32], strides = [1, 1]} : vector<16x32xf32> to vector<1x32xf32>
    %405 = vector.broadcast %404 : vector<1x32xf32> to vector<64x32xf32>
    %406 = arith.addf %403, %405 : vector<64x32xf32>
    %407 = vector.extract_strided_slice %402 {offsets = [0, 32], sizes = [64, 32], strides = [1, 1]} : vector<64x96xf32> to vector<64x32xf32>
    %408 = vector.extract_strided_slice %373 {offsets = [3, 0], sizes = [1, 32], strides = [1, 1]} : vector<16x32xf32> to vector<1x32xf32>
    %409 = vector.broadcast %408 : vector<1x32xf32> to vector<64x32xf32>
    %410 = arith.addf %407, %409 : vector<64x32xf32>
    %411 = vector.extract_strided_slice %402 {offsets = [0, 64], sizes = [64, 32], strides = [1, 1]} : vector<64x96xf32> to vector<64x32xf32>
    %412 = vector.extract_strided_slice %373 {offsets = [4, 0], sizes = [1, 32], strides = [1, 1]} : vector<16x32xf32> to vector<1x32xf32>
    %413 = vector.broadcast %412 : vector<1x32xf32> to vector<64x32xf32>
    %414 = arith.addf %411, %413 : vector<64x32xf32>
    %415 = vector.extract_strided_slice %373 {offsets = [5, 0], sizes = [1, 32], strides = [1, 1]} : vector<16x32xf32> to vector<1x32xf32>
    %416 = arith.truncf %406 : vector<64x32xf32> to vector<64x32xbf16>
    %417 = arith.truncf %410 : vector<64x32xf32> to vector<64x32xbf16>
    %418 = arith.truncf %414 : vector<64x32xf32> to vector<64x32xbf16>
    %419 = vector.extract_strided_slice %416 {offsets = [0, 0], sizes = [64, 8], strides = [1, 1]} : vector<64x32xbf16> to vector<64x8xbf16>
    %420 = vector.extract_strided_slice %417 {offsets = [0, 0], sizes = [64, 8], strides = [1, 1]} : vector<64x32xbf16> to vector<64x8xbf16>
    %cst_90 = arith.constant dense<0.000000e+00> : vector<64x64xf32>
    %421 = tpu.matmul %419, %420, %cst_90 {dimension_numbers = #tpu.dot_dimension_numbers<[1], [1], [0], [0], [0, 0, 1, 0], [], []>} : vector<64x8xbf16>, vector<64x8xbf16>, vector<64x64xf32> -> vector<64x64xf32>
    %cst_91 = arith.constant dense<0xFF800000> : vector<64xf32>
    %422 = vector.multi_reduction <maximumf>, %421, %cst_91 [1] : vector<64x64xf32> to vector<64xf32>
    %423 = vector.shape_cast %422 : vector<64xf32> to vector<64x1xf32>
    %424 = vector.broadcast %423 : vector<64x1xf32> to vector<64x64xf32>
    %425 = arith.subf %421, %424 : vector<64x64xf32>
    %426 = math.exp %425 : vector<64x64xf32>
    %cst_92 = arith.constant dense<0.000000e+00> : vector<64xf32>
    %427 = vector.multi_reduction <add>, %426, %cst_92 [1] : vector<64x64xf32> to vector<64xf32>
    %428 = vector.shape_cast %427 : vector<64xf32> to vector<64x1xf32>
    %429 = tpu.reciprocal %428 {approx = true} : vector<64x1xf32> -> vector<64x1xf32>
    %430 = vector.broadcast %429 : vector<64x1xf32> to vector<64x64xf32>
    %431 = arith.mulf %426, %430 : vector<64x64xf32>
    %432 = vector.extract_strided_slice %418 {offsets = [0, 0], sizes = [64, 8], strides = [1, 1]} : vector<64x32xbf16> to vector<64x8xbf16>
    %433 = arith.truncf %431 : vector<64x64xf32> to vector<64x64xbf16>
    %cst_93 = arith.constant dense<0.000000e+00> : vector<64x8xf32>
    %434 = tpu.matmul %433, %432, %cst_93 {dimension_numbers = #tpu.dot_dimension_numbers<[1], [0], [0], [1], [0, 0, 1, 1], [], []>} : vector<64x64xbf16>, vector<64x8xbf16>, vector<64x8xf32> -> vector<64x8xf32>
    %435 = arith.truncf %434 : vector<64x8xf32> to vector<64x8xbf16>
    %436 = vector.extract_strided_slice %416 {offsets = [0, 8], sizes = [64, 8], strides = [1, 1]} : vector<64x32xbf16> to vector<64x8xbf16>
    %437 = vector.extract_strided_slice %417 {offsets = [0, 8], sizes = [64, 8], strides = [1, 1]} : vector<64x32xbf16> to vector<64x8xbf16>
    %cst_94 = arith.constant dense<0.000000e+00> : vector<64x64xf32>
    %438 = tpu.matmul %436, %437, %cst_94 {dimension_numbers = #tpu.dot_dimension_numbers<[1], [1], [0], [0], [0, 0, 1, 0], [], []>} : vector<64x8xbf16>, vector<64x8xbf16>, vector<64x64xf32> -> vector<64x64xf32>
    %cst_95 = arith.constant dense<0xFF800000> : vector<64xf32>
    %439 = vector.multi_reduction <maximumf>, %438, %cst_95 [1] : vector<64x64xf32> to vector<64xf32>
    %440 = vector.shape_cast %439 : vector<64xf32> to vector<64x1xf32>
    %441 = vector.broadcast %440 : vector<64x1xf32> to vector<64x64xf32>
    %442 = arith.subf %438, %441 : vector<64x64xf32>
    %443 = math.exp %442 : vector<64x64xf32>
    %cst_96 = arith.constant dense<0.000000e+00> : vector<64xf32>
    %444 = vector.multi_reduction <add>, %443, %cst_96 [1] : vector<64x64xf32> to vector<64xf32>
    %445 = vector.shape_cast %444 : vector<64xf32> to vector<64x1xf32>
    %446 = tpu.reciprocal %445 {approx = true} : vector<64x1xf32> -> vector<64x1xf32>
    %447 = vector.broadcast %446 : vector<64x1xf32> to vector<64x64xf32>
    %448 = arith.mulf %443, %447 : vector<64x64xf32>
    %449 = vector.extract_strided_slice %418 {offsets = [0, 8], sizes = [64, 8], strides = [1, 1]} : vector<64x32xbf16> to vector<64x8xbf16>
    %450 = arith.truncf %448 : vector<64x64xf32> to vector<64x64xbf16>
    %cst_97 = arith.constant dense<0.000000e+00> : vector<64x8xf32>
    %451 = tpu.matmul %450, %449, %cst_97 {dimension_numbers = #tpu.dot_dimension_numbers<[1], [0], [0], [1], [0, 0, 1, 1], [], []>} : vector<64x64xbf16>, vector<64x8xbf16>, vector<64x8xf32> -> vector<64x8xf32>
    %452 = arith.truncf %451 : vector<64x8xf32> to vector<64x8xbf16>
    %453 = vector.extract_strided_slice %416 {offsets = [0, 16], sizes = [64, 8], strides = [1, 1]} : vector<64x32xbf16> to vector<64x8xbf16>
    %454 = vector.extract_strided_slice %417 {offsets = [0, 16], sizes = [64, 8], strides = [1, 1]} : vector<64x32xbf16> to vector<64x8xbf16>
    %cst_98 = arith.constant dense<0.000000e+00> : vector<64x64xf32>
    %455 = tpu.matmul %453, %454, %cst_98 {dimension_numbers = #tpu.dot_dimension_numbers<[1], [1], [0], [0], [0, 0, 1, 0], [], []>} : vector<64x8xbf16>, vector<64x8xbf16>, vector<64x64xf32> -> vector<64x64xf32>
    %cst_99 = arith.constant dense<0xFF800000> : vector<64xf32>
    %456 = vector.multi_reduction <maximumf>, %455, %cst_99 [1] : vector<64x64xf32> to vector<64xf32>
    %457 = vector.shape_cast %456 : vector<64xf32> to vector<64x1xf32>
    %458 = vector.broadcast %457 : vector<64x1xf32> to vector<64x64xf32>
    %459 = arith.subf %455, %458 : vector<64x64xf32>
    %460 = math.exp %459 : vector<64x64xf32>
    %cst_100 = arith.constant dense<0.000000e+00> : vector<64xf32>
    %461 = vector.multi_reduction <add>, %460, %cst_100 [1] : vector<64x64xf32> to vector<64xf32>
    %462 = vector.shape_cast %461 : vector<64xf32> to vector<64x1xf32>
    %463 = tpu.reciprocal %462 {approx = true} : vector<64x1xf32> -> vector<64x1xf32>
    %464 = vector.broadcast %463 : vector<64x1xf32> to vector<64x64xf32>
    %465 = arith.mulf %460, %464 : vector<64x64xf32>
    %466 = vector.extract_strided_slice %418 {offsets = [0, 16], sizes = [64, 8], strides = [1, 1]} : vector<64x32xbf16> to vector<64x8xbf16>
    %467 = arith.truncf %465 : vector<64x64xf32> to vector<64x64xbf16>
    %cst_101 = arith.constant dense<0.000000e+00> : vector<64x8xf32>
    %468 = tpu.matmul %467, %466, %cst_101 {dimension_numbers = #tpu.dot_dimension_numbers<[1], [0], [0], [1], [0, 0, 1, 1], [], []>} : vector<64x64xbf16>, vector<64x8xbf16>, vector<64x8xf32> -> vector<64x8xf32>
    %469 = arith.truncf %468 : vector<64x8xf32> to vector<64x8xbf16>
    %470 = vector.extract_strided_slice %416 {offsets = [0, 24], sizes = [64, 8], strides = [1, 1]} : vector<64x32xbf16> to vector<64x8xbf16>
    %471 = vector.extract_strided_slice %417 {offsets = [0, 24], sizes = [64, 8], strides = [1, 1]} : vector<64x32xbf16> to vector<64x8xbf16>
    %cst_102 = arith.constant dense<0.000000e+00> : vector<64x64xf32>
    %472 = tpu.matmul %470, %471, %cst_102 {dimension_numbers = #tpu.dot_dimension_numbers<[1], [1], [0], [0], [0, 0, 1, 0], [], []>} : vector<64x8xbf16>, vector<64x8xbf16>, vector<64x64xf32> -> vector<64x64xf32>
    %cst_103 = arith.constant dense<0xFF800000> : vector<64xf32>
    %473 = vector.multi_reduction <maximumf>, %472, %cst_103 [1] : vector<64x64xf32> to vector<64xf32>
    %474 = vector.shape_cast %473 : vector<64xf32> to vector<64x1xf32>
    %475 = vector.broadcast %474 : vector<64x1xf32> to vector<64x64xf32>
    %476 = arith.subf %472, %475 : vector<64x64xf32>
    %477 = math.exp %476 : vector<64x64xf32>
    %cst_104 = arith.constant dense<0.000000e+00> : vector<64xf32>
    %478 = vector.multi_reduction <add>, %477, %cst_104 [1] : vector<64x64xf32> to vector<64xf32>
    %479 = vector.shape_cast %478 : vector<64xf32> to vector<64x1xf32>
    %480 = tpu.reciprocal %479 {approx = true} : vector<64x1xf32> -> vector<64x1xf32>
    %481 = vector.broadcast %480 : vector<64x1xf32> to vector<64x64xf32>
    %482 = arith.mulf %477, %481 : vector<64x64xf32>
    %483 = vector.extract_strided_slice %418 {offsets = [0, 24], sizes = [64, 8], strides = [1, 1]} : vector<64x32xbf16> to vector<64x8xbf16>
    %484 = arith.truncf %482 : vector<64x64xf32> to vector<64x64xbf16>
    %cst_105 = arith.constant dense<0.000000e+00> : vector<64x8xf32>
    %485 = tpu.matmul %484, %483, %cst_105 {dimension_numbers = #tpu.dot_dimension_numbers<[1], [0], [0], [1], [0, 0, 1, 1], [], []>} : vector<64x64xbf16>, vector<64x8xbf16>, vector<64x8xf32> -> vector<64x8xf32>
    %486 = arith.truncf %485 : vector<64x8xf32> to vector<64x8xbf16>
    %487 = tpu.concatenate %435, %452, %469, %486 in 1 : vector<64x8xbf16>, vector<64x8xbf16>, vector<64x8xbf16>, vector<64x8xbf16> -> vector<64x32xbf16>
    %cst_106 = arith.constant dense<0.000000e+00> : vector<64x32xf32>
    %488 = tpu.matmul %487, %377, %cst_106 {dimension_numbers = #tpu.dot_dimension_numbers<[1], [0], [0], [1], [0, 0, 1, 1], [], []>} : vector<64x32xbf16>, vector<32x32xbf16>, vector<64x32xf32> -> vector<64x32xf32>
    %489 = vector.broadcast %415 : vector<1x32xf32> to vector<64x32xf32>
    %490 = arith.addf %488, %489 : vector<64x32xf32>
    %491 = arith.addf %371, %490 : vector<64x32xf32>
    %492 = vector.extract_strided_slice %373 {offsets = [6, 0], sizes = [1, 32], strides = [1, 1]} : vector<16x32xf32> to vector<1x32xf32>
    %493 = vector.extract_strided_slice %373 {offsets = [7, 0], sizes = [1, 32], strides = [1, 1]} : vector<16x32xf32> to vector<1x32xf32>
    %cst_107 = arith.constant dense<0.000000e+00> : vector<64xf32>
    %494 = vector.multi_reduction <add>, %491, %cst_107 [1] : vector<64x32xf32> to vector<64xf32>
    %495 = vector.shape_cast %494 : vector<64xf32> to vector<64x1xf32>
    %cst_108 = arith.constant 3.200000e+01 : f32
    %496 = vector.broadcast %cst_108 : f32 to vector<64x1xf32>
    %497 = arith.divf %495, %496 : vector<64x1xf32>
    %498 = vector.broadcast %497 : vector<64x1xf32> to vector<64x32xf32>
    %499 = arith.subf %491, %498 : vector<64x32xf32>
    %500 = arith.mulf %499, %499 : vector<64x32xf32>
    %cst_109 = arith.constant dense<0.000000e+00> : vector<64xf32>
    %501 = vector.multi_reduction <add>, %500, %cst_109 [1] : vector<64x32xf32> to vector<64xf32>
    %502 = vector.shape_cast %501 : vector<64xf32> to vector<64x1xf32>
    %cst_110 = arith.constant 3.200000e+01 : f32
    %503 = vector.broadcast %cst_110 : f32 to vector<64x1xf32>
    %504 = arith.divf %502, %503 : vector<64x1xf32>
    %cst_111 = arith.constant 9.99999974E-6 : f32
    %505 = vector.broadcast %cst_111 : f32 to vector<64x1xf32>
    %506 = arith.addf %504, %505 : vector<64x1xf32>
    %507 = math.rsqrt %506 : vector<64x1xf32>
    %508 = vector.broadcast %507 : vector<64x1xf32> to vector<64x32xf32>
    %509 = arith.mulf %499, %508 : vector<64x32xf32>
    %510 = vector.broadcast %492 : vector<1x32xf32> to vector<64x32xf32>
    %511 = arith.mulf %509, %510 : vector<64x32xf32>
    %512 = vector.broadcast %493 : vector<1x32xf32> to vector<64x32xf32>
    %513 = arith.addf %511, %512 : vector<64x32xf32>
    %514 = vector.extract_strided_slice %373 {offsets = [6, 0], sizes = [1, 32], strides = [1, 1]} : vector<16x32xf32> to vector<1x32xf32>
    %515 = vector.extract_strided_slice %373 {offsets = [7, 0], sizes = [1, 32], strides = [1, 1]} : vector<16x32xf32> to vector<1x32xf32>
    %cst_112 = arith.constant dense<0.000000e+00> : vector<64xf32>
    %516 = vector.multi_reduction <add>, %257, %cst_112 [1] : vector<64x32xf32> to vector<64xf32>
    %517 = vector.shape_cast %516 : vector<64xf32> to vector<64x1xf32>
    %cst_113 = arith.constant 3.200000e+01 : f32
    %518 = vector.broadcast %cst_113 : f32 to vector<64x1xf32>
    %519 = arith.divf %517, %518 : vector<64x1xf32>
    %520 = vector.broadcast %519 : vector<64x1xf32> to vector<64x32xf32>
    %521 = arith.subf %257, %520 : vector<64x32xf32>
    %522 = arith.mulf %521, %521 : vector<64x32xf32>
    %cst_114 = arith.constant dense<0.000000e+00> : vector<64xf32>
    %523 = vector.multi_reduction <add>, %522, %cst_114 [1] : vector<64x32xf32> to vector<64xf32>
    %524 = vector.shape_cast %523 : vector<64xf32> to vector<64x1xf32>
    %cst_115 = arith.constant 3.200000e+01 : f32
    %525 = vector.broadcast %cst_115 : f32 to vector<64x1xf32>
    %526 = arith.divf %524, %525 : vector<64x1xf32>
    %cst_116 = arith.constant 9.99999974E-6 : f32
    %527 = vector.broadcast %cst_116 : f32 to vector<64x1xf32>
    %528 = arith.addf %526, %527 : vector<64x1xf32>
    %529 = math.rsqrt %528 : vector<64x1xf32>
    %530 = vector.broadcast %529 : vector<64x1xf32> to vector<64x32xf32>
    %531 = arith.mulf %521, %530 : vector<64x32xf32>
    %532 = vector.broadcast %514 : vector<1x32xf32> to vector<64x32xf32>
    %533 = arith.mulf %531, %532 : vector<64x32xf32>
    %534 = vector.broadcast %515 : vector<1x32xf32> to vector<64x32xf32>
    %535 = arith.addf %533, %534 : vector<64x32xf32>
    %536 = arith.truncf %535 : vector<64x32xf32> to vector<64x32xbf16>
    %cst_117 = arith.constant dense<0.000000e+00> : vector<64x32xf32>
    %537 = tpu.matmul %536, %375, %cst_117 {dimension_numbers = #tpu.dot_dimension_numbers<[1], [0], [0], [1], [0, 0, 1, 1], [], []>} : vector<64x32xbf16>, vector<32x32xbf16>, vector<64x32xf32> -> vector<64x32xf32>
    %538 = vector.extract_strided_slice %373 {offsets = [10, 0], sizes = [1, 32], strides = [1, 1]} : vector<16x32xf32> to vector<1x32xf32>
    %539 = vector.broadcast %538 : vector<1x32xf32> to vector<64x32xf32>
    %540 = arith.addf %537, %539 : vector<64x32xf32>
    %541 = arith.truncf %513 : vector<64x32xf32> to vector<64x32xbf16>
    %cst_118 = arith.constant dense<0.000000e+00> : vector<64x64xf32>
    %542 = tpu.matmul %541, %376, %cst_118 {dimension_numbers = #tpu.dot_dimension_numbers<[1], [0], [0], [1], [0, 0, 1, 1], [], []>} : vector<64x32xbf16>, vector<32x64xbf16>, vector<64x64xf32> -> vector<64x64xf32>
    %543 = vector.extract_strided_slice %542 {offsets = [0, 0], sizes = [64, 32], strides = [1, 1]} : vector<64x64xf32> to vector<64x32xf32>
    %544 = vector.extract_strided_slice %373 {offsets = [11, 0], sizes = [1, 32], strides = [1, 1]} : vector<16x32xf32> to vector<1x32xf32>
    %545 = vector.broadcast %544 : vector<1x32xf32> to vector<64x32xf32>
    %546 = arith.addf %543, %545 : vector<64x32xf32>
    %547 = vector.extract_strided_slice %542 {offsets = [0, 32], sizes = [64, 32], strides = [1, 1]} : vector<64x64xf32> to vector<64x32xf32>
    %548 = vector.extract_strided_slice %373 {offsets = [12, 0], sizes = [1, 32], strides = [1, 1]} : vector<16x32xf32> to vector<1x32xf32>
    %549 = vector.broadcast %548 : vector<1x32xf32> to vector<64x32xf32>
    %550 = arith.addf %547, %549 : vector<64x32xf32>
    %551 = vector.extract_strided_slice %373 {offsets = [13, 0], sizes = [1, 32], strides = [1, 1]} : vector<16x32xf32> to vector<1x32xf32>
    %552 = arith.truncf %540 : vector<64x32xf32> to vector<64x32xbf16>
    %553 = arith.truncf %546 : vector<64x32xf32> to vector<64x32xbf16>
    %554 = arith.truncf %550 : vector<64x32xf32> to vector<64x32xbf16>
    %555 = vector.extract_strided_slice %552 {offsets = [0, 0], sizes = [64, 8], strides = [1, 1]} : vector<64x32xbf16> to vector<64x8xbf16>
    %556 = vector.extract_strided_slice %553 {offsets = [0, 0], sizes = [64, 8], strides = [1, 1]} : vector<64x32xbf16> to vector<64x8xbf16>
    %cst_119 = arith.constant dense<0.000000e+00> : vector<64x64xf32>
    %557 = tpu.matmul %555, %556, %cst_119 {dimension_numbers = #tpu.dot_dimension_numbers<[1], [1], [0], [0], [0, 0, 1, 0], [], []>} : vector<64x8xbf16>, vector<64x8xbf16>, vector<64x64xf32> -> vector<64x64xf32>
    %cst_120 = arith.constant dense<0xFF800000> : vector<64xf32>
    %558 = vector.multi_reduction <maximumf>, %557, %cst_120 [1] : vector<64x64xf32> to vector<64xf32>
    %559 = vector.shape_cast %558 : vector<64xf32> to vector<64x1xf32>
    %560 = vector.broadcast %559 : vector<64x1xf32> to vector<64x64xf32>
    %561 = arith.subf %557, %560 : vector<64x64xf32>
    %562 = math.exp %561 : vector<64x64xf32>
    %cst_121 = arith.constant dense<0.000000e+00> : vector<64xf32>
    %563 = vector.multi_reduction <add>, %562, %cst_121 [1] : vector<64x64xf32> to vector<64xf32>
    %564 = vector.shape_cast %563 : vector<64xf32> to vector<64x1xf32>
    %565 = tpu.reciprocal %564 {approx = true} : vector<64x1xf32> -> vector<64x1xf32>
    %566 = vector.broadcast %565 : vector<64x1xf32> to vector<64x64xf32>
    %567 = arith.mulf %562, %566 : vector<64x64xf32>
    %568 = vector.extract_strided_slice %554 {offsets = [0, 0], sizes = [64, 8], strides = [1, 1]} : vector<64x32xbf16> to vector<64x8xbf16>
    %569 = arith.truncf %567 : vector<64x64xf32> to vector<64x64xbf16>
    %cst_122 = arith.constant dense<0.000000e+00> : vector<64x8xf32>
    %570 = tpu.matmul %569, %568, %cst_122 {dimension_numbers = #tpu.dot_dimension_numbers<[1], [0], [0], [1], [0, 0, 1, 1], [], []>} : vector<64x64xbf16>, vector<64x8xbf16>, vector<64x8xf32> -> vector<64x8xf32>
    %571 = arith.truncf %570 : vector<64x8xf32> to vector<64x8xbf16>
    %572 = vector.extract_strided_slice %552 {offsets = [0, 8], sizes = [64, 8], strides = [1, 1]} : vector<64x32xbf16> to vector<64x8xbf16>
    %573 = vector.extract_strided_slice %553 {offsets = [0, 8], sizes = [64, 8], strides = [1, 1]} : vector<64x32xbf16> to vector<64x8xbf16>
    %cst_123 = arith.constant dense<0.000000e+00> : vector<64x64xf32>
    %574 = tpu.matmul %572, %573, %cst_123 {dimension_numbers = #tpu.dot_dimension_numbers<[1], [1], [0], [0], [0, 0, 1, 0], [], []>} : vector<64x8xbf16>, vector<64x8xbf16>, vector<64x64xf32> -> vector<64x64xf32>
    %cst_124 = arith.constant dense<0xFF800000> : vector<64xf32>
    %575 = vector.multi_reduction <maximumf>, %574, %cst_124 [1] : vector<64x64xf32> to vector<64xf32>
    %576 = vector.shape_cast %575 : vector<64xf32> to vector<64x1xf32>
    %577 = vector.broadcast %576 : vector<64x1xf32> to vector<64x64xf32>
    %578 = arith.subf %574, %577 : vector<64x64xf32>
    %579 = math.exp %578 : vector<64x64xf32>
    %cst_125 = arith.constant dense<0.000000e+00> : vector<64xf32>
    %580 = vector.multi_reduction <add>, %579, %cst_125 [1] : vector<64x64xf32> to vector<64xf32>
    %581 = vector.shape_cast %580 : vector<64xf32> to vector<64x1xf32>
    %582 = tpu.reciprocal %581 {approx = true} : vector<64x1xf32> -> vector<64x1xf32>
    %583 = vector.broadcast %582 : vector<64x1xf32> to vector<64x64xf32>
    %584 = arith.mulf %579, %583 : vector<64x64xf32>
    %585 = vector.extract_strided_slice %554 {offsets = [0, 8], sizes = [64, 8], strides = [1, 1]} : vector<64x32xbf16> to vector<64x8xbf16>
    %586 = arith.truncf %584 : vector<64x64xf32> to vector<64x64xbf16>
    %cst_126 = arith.constant dense<0.000000e+00> : vector<64x8xf32>
    %587 = tpu.matmul %586, %585, %cst_126 {dimension_numbers = #tpu.dot_dimension_numbers<[1], [0], [0], [1], [0, 0, 1, 1], [], []>} : vector<64x64xbf16>, vector<64x8xbf16>, vector<64x8xf32> -> vector<64x8xf32>
    %588 = arith.truncf %587 : vector<64x8xf32> to vector<64x8xbf16>
    %589 = vector.extract_strided_slice %552 {offsets = [0, 16], sizes = [64, 8], strides = [1, 1]} : vector<64x32xbf16> to vector<64x8xbf16>
    %590 = vector.extract_strided_slice %553 {offsets = [0, 16], sizes = [64, 8], strides = [1, 1]} : vector<64x32xbf16> to vector<64x8xbf16>
    %cst_127 = arith.constant dense<0.000000e+00> : vector<64x64xf32>
    %591 = tpu.matmul %589, %590, %cst_127 {dimension_numbers = #tpu.dot_dimension_numbers<[1], [1], [0], [0], [0, 0, 1, 0], [], []>} : vector<64x8xbf16>, vector<64x8xbf16>, vector<64x64xf32> -> vector<64x64xf32>
    %cst_128 = arith.constant dense<0xFF800000> : vector<64xf32>
    %592 = vector.multi_reduction <maximumf>, %591, %cst_128 [1] : vector<64x64xf32> to vector<64xf32>
    %593 = vector.shape_cast %592 : vector<64xf32> to vector<64x1xf32>
    %594 = vector.broadcast %593 : vector<64x1xf32> to vector<64x64xf32>
    %595 = arith.subf %591, %594 : vector<64x64xf32>
    %596 = math.exp %595 : vector<64x64xf32>
    %cst_129 = arith.constant dense<0.000000e+00> : vector<64xf32>
    %597 = vector.multi_reduction <add>, %596, %cst_129 [1] : vector<64x64xf32> to vector<64xf32>
    %598 = vector.shape_cast %597 : vector<64xf32> to vector<64x1xf32>
    %599 = tpu.reciprocal %598 {approx = true} : vector<64x1xf32> -> vector<64x1xf32>
    %600 = vector.broadcast %599 : vector<64x1xf32> to vector<64x64xf32>
    %601 = arith.mulf %596, %600 : vector<64x64xf32>
    %602 = vector.extract_strided_slice %554 {offsets = [0, 16], sizes = [64, 8], strides = [1, 1]} : vector<64x32xbf16> to vector<64x8xbf16>
    %603 = arith.truncf %601 : vector<64x64xf32> to vector<64x64xbf16>
    %cst_130 = arith.constant dense<0.000000e+00> : vector<64x8xf32>
    %604 = tpu.matmul %603, %602, %cst_130 {dimension_numbers = #tpu.dot_dimension_numbers<[1], [0], [0], [1], [0, 0, 1, 1], [], []>} : vector<64x64xbf16>, vector<64x8xbf16>, vector<64x8xf32> -> vector<64x8xf32>
    %605 = arith.truncf %604 : vector<64x8xf32> to vector<64x8xbf16>
    %606 = vector.extract_strided_slice %552 {offsets = [0, 24], sizes = [64, 8], strides = [1, 1]} : vector<64x32xbf16> to vector<64x8xbf16>
    %607 = vector.extract_strided_slice %553 {offsets = [0, 24], sizes = [64, 8], strides = [1, 1]} : vector<64x32xbf16> to vector<64x8xbf16>
    %cst_131 = arith.constant dense<0.000000e+00> : vector<64x64xf32>
    %608 = tpu.matmul %606, %607, %cst_131 {dimension_numbers = #tpu.dot_dimension_numbers<[1], [1], [0], [0], [0, 0, 1, 0], [], []>} : vector<64x8xbf16>, vector<64x8xbf16>, vector<64x64xf32> -> vector<64x64xf32>
    %cst_132 = arith.constant dense<0xFF800000> : vector<64xf32>
    %609 = vector.multi_reduction <maximumf>, %608, %cst_132 [1] : vector<64x64xf32> to vector<64xf32>
    %610 = vector.shape_cast %609 : vector<64xf32> to vector<64x1xf32>
    %611 = vector.broadcast %610 : vector<64x1xf32> to vector<64x64xf32>
    %612 = arith.subf %608, %611 : vector<64x64xf32>
    %613 = math.exp %612 : vector<64x64xf32>
    %cst_133 = arith.constant dense<0.000000e+00> : vector<64xf32>
    %614 = vector.multi_reduction <add>, %613, %cst_133 [1] : vector<64x64xf32> to vector<64xf32>
    %615 = vector.shape_cast %614 : vector<64xf32> to vector<64x1xf32>
    %616 = tpu.reciprocal %615 {approx = true} : vector<64x1xf32> -> vector<64x1xf32>
    %617 = vector.broadcast %616 : vector<64x1xf32> to vector<64x64xf32>
    %618 = arith.mulf %613, %617 : vector<64x64xf32>
    %619 = vector.extract_strided_slice %554 {offsets = [0, 24], sizes = [64, 8], strides = [1, 1]} : vector<64x32xbf16> to vector<64x8xbf16>
    %620 = arith.truncf %618 : vector<64x64xf32> to vector<64x64xbf16>
    %cst_134 = arith.constant dense<0.000000e+00> : vector<64x8xf32>
    %621 = tpu.matmul %620, %619, %cst_134 {dimension_numbers = #tpu.dot_dimension_numbers<[1], [0], [0], [1], [0, 0, 1, 1], [], []>} : vector<64x64xbf16>, vector<64x8xbf16>, vector<64x8xf32> -> vector<64x8xf32>
    %622 = arith.truncf %621 : vector<64x8xf32> to vector<64x8xbf16>
    %623 = tpu.concatenate %571, %588, %605, %622 in 1 : vector<64x8xbf16>, vector<64x8xbf16>, vector<64x8xbf16>, vector<64x8xbf16> -> vector<64x32xbf16>
    %cst_135 = arith.constant dense<0.000000e+00> : vector<64x32xf32>
    %624 = tpu.matmul %623, %378, %cst_135 {dimension_numbers = #tpu.dot_dimension_numbers<[1], [0], [0], [1], [0, 0, 1, 1], [], []>} : vector<64x32xbf16>, vector<32x32xbf16>, vector<64x32xf32> -> vector<64x32xf32>
    %625 = vector.broadcast %551 : vector<1x32xf32> to vector<64x32xf32>
    %626 = arith.addf %624, %625 : vector<64x32xf32>
    %627 = arith.addf %257, %626 : vector<64x32xf32>
    %628 = vector.extract_strided_slice %373 {offsets = [8, 0], sizes = [1, 32], strides = [1, 1]} : vector<16x32xf32> to vector<1x32xf32>
    %629 = vector.extract_strided_slice %373 {offsets = [9, 0], sizes = [1, 32], strides = [1, 1]} : vector<16x32xf32> to vector<1x32xf32>
    %cst_136 = arith.constant dense<0.000000e+00> : vector<64xf32>
    %630 = vector.multi_reduction <add>, %627, %cst_136 [1] : vector<64x32xf32> to vector<64xf32>
    %631 = vector.shape_cast %630 : vector<64xf32> to vector<64x1xf32>
    %cst_137 = arith.constant 3.200000e+01 : f32
    %632 = vector.broadcast %cst_137 : f32 to vector<64x1xf32>
    %633 = arith.divf %631, %632 : vector<64x1xf32>
    %634 = vector.broadcast %633 : vector<64x1xf32> to vector<64x32xf32>
    %635 = arith.subf %627, %634 : vector<64x32xf32>
    %636 = arith.mulf %635, %635 : vector<64x32xf32>
    %cst_138 = arith.constant dense<0.000000e+00> : vector<64xf32>
    %637 = vector.multi_reduction <add>, %636, %cst_138 [1] : vector<64x32xf32> to vector<64xf32>
    %638 = vector.shape_cast %637 : vector<64xf32> to vector<64x1xf32>
    %cst_139 = arith.constant 3.200000e+01 : f32
    %639 = vector.broadcast %cst_139 : f32 to vector<64x1xf32>
    %640 = arith.divf %638, %639 : vector<64x1xf32>
    %cst_140 = arith.constant 9.99999974E-6 : f32
    %641 = vector.broadcast %cst_140 : f32 to vector<64x1xf32>
    %642 = arith.addf %640, %641 : vector<64x1xf32>
    %643 = math.rsqrt %642 : vector<64x1xf32>
    %644 = vector.broadcast %643 : vector<64x1xf32> to vector<64x32xf32>
    %645 = arith.mulf %635, %644 : vector<64x32xf32>
    %646 = vector.broadcast %628 : vector<1x32xf32> to vector<64x32xf32>
    %647 = arith.mulf %645, %646 : vector<64x32xf32>
    %648 = vector.broadcast %629 : vector<1x32xf32> to vector<64x32xf32>
    %649 = arith.addf %647, %648 : vector<64x32xf32>
    %650 = arith.truncf %513 : vector<64x32xf32> to vector<64x32xbf16>
    %cst_141 = arith.constant dense<0.000000e+00> : vector<64x32xf32>
    %651 = tpu.matmul %650, %375, %cst_141 {dimension_numbers = #tpu.dot_dimension_numbers<[1], [0], [0], [1], [0, 0, 1, 1], [], []>} : vector<64x32xbf16>, vector<32x32xbf16>, vector<64x32xf32> -> vector<64x32xf32>
    %652 = vector.extract_strided_slice %373 {offsets = [10, 0], sizes = [1, 32], strides = [1, 1]} : vector<16x32xf32> to vector<1x32xf32>
    %653 = vector.broadcast %652 : vector<1x32xf32> to vector<64x32xf32>
    %654 = arith.addf %651, %653 : vector<64x32xf32>
    %655 = arith.truncf %649 : vector<64x32xf32> to vector<64x32xbf16>
    %656 = vector.extract_strided_slice %376 {offsets = [0, 0], sizes = [32, 32], strides = [1, 1]} : vector<32x64xbf16> to vector<32x32xbf16>
    %cst_142 = arith.constant dense<0.000000e+00> : vector<64x32xf32>
    %657 = tpu.matmul %655, %656, %cst_142 {dimension_numbers = #tpu.dot_dimension_numbers<[1], [0], [0], [1], [0, 0, 1, 1], [], []>} : vector<64x32xbf16>, vector<32x32xbf16>, vector<64x32xf32> -> vector<64x32xf32>
    %658 = vector.extract_strided_slice %373 {offsets = [11, 0], sizes = [1, 32], strides = [1, 1]} : vector<16x32xf32> to vector<1x32xf32>
    %659 = vector.broadcast %658 : vector<1x32xf32> to vector<64x32xf32>
    %660 = arith.addf %657, %659 : vector<64x32xf32>
    %661 = vector.extract_strided_slice %654 {offsets = [0, 0], sizes = [64, 8], strides = [1, 1]} : vector<64x32xf32> to vector<64x8xf32>
    %662 = vector.extract_strided_slice %660 {offsets = [0, 0], sizes = [64, 8], strides = [1, 1]} : vector<64x32xf32> to vector<64x8xf32>
    %cst_143 = arith.constant dense<0.000000e+00> : vector<64x64xf32>
    %663 = tpu.matmul %661, %662, %cst_143 {dimension_numbers = #tpu.dot_dimension_numbers<[1], [1], [0], [0], [0, 0, 1, 0], [], []>} : vector<64x8xf32>, vector<64x8xf32>, vector<64x64xf32> -> vector<64x64xf32>
    %cst_144 = arith.constant dense<0xFF800000> : vector<64xf32>
    %664 = vector.multi_reduction <maximumf>, %663, %cst_144 [1] : vector<64x64xf32> to vector<64xf32>
    %665 = vector.shape_cast %664 : vector<64xf32> to vector<64x1xf32>
    %666 = vector.broadcast %665 : vector<64x1xf32> to vector<64x64xf32>
    %667 = arith.subf %663, %666 : vector<64x64xf32>
    %668 = math.exp %667 : vector<64x64xf32>
    %cst_145 = arith.constant dense<0.000000e+00> : vector<64xf32>
    %669 = vector.multi_reduction <add>, %668, %cst_145 [1] : vector<64x64xf32> to vector<64xf32>
    %670 = vector.shape_cast %669 : vector<64xf32> to vector<64x1xf32>
    %671 = vector.broadcast %670 : vector<64x1xf32> to vector<64x64xf32>
    %672 = arith.divf %668, %671 : vector<64x64xf32>
    %673 = vector.extract_strided_slice %654 {offsets = [0, 8], sizes = [64, 8], strides = [1, 1]} : vector<64x32xf32> to vector<64x8xf32>
    %674 = vector.extract_strided_slice %660 {offsets = [0, 8], sizes = [64, 8], strides = [1, 1]} : vector<64x32xf32> to vector<64x8xf32>
    %cst_146 = arith.constant dense<0.000000e+00> : vector<64x64xf32>
    %675 = tpu.matmul %673, %674, %cst_146 {dimension_numbers = #tpu.dot_dimension_numbers<[1], [1], [0], [0], [0, 0, 1, 0], [], []>} : vector<64x8xf32>, vector<64x8xf32>, vector<64x64xf32> -> vector<64x64xf32>
    %cst_147 = arith.constant dense<0xFF800000> : vector<64xf32>
    %676 = vector.multi_reduction <maximumf>, %675, %cst_147 [1] : vector<64x64xf32> to vector<64xf32>
    %677 = vector.shape_cast %676 : vector<64xf32> to vector<64x1xf32>
    %678 = vector.broadcast %677 : vector<64x1xf32> to vector<64x64xf32>
    %679 = arith.subf %675, %678 : vector<64x64xf32>
    %680 = math.exp %679 : vector<64x64xf32>
    %cst_148 = arith.constant dense<0.000000e+00> : vector<64xf32>
    %681 = vector.multi_reduction <add>, %680, %cst_148 [1] : vector<64x64xf32> to vector<64xf32>
    %682 = vector.shape_cast %681 : vector<64xf32> to vector<64x1xf32>
    %683 = vector.broadcast %682 : vector<64x1xf32> to vector<64x64xf32>
    %684 = arith.divf %680, %683 : vector<64x64xf32>
    %685 = vector.extract_strided_slice %654 {offsets = [0, 16], sizes = [64, 8], strides = [1, 1]} : vector<64x32xf32> to vector<64x8xf32>
    %686 = vector.extract_strided_slice %660 {offsets = [0, 16], sizes = [64, 8], strides = [1, 1]} : vector<64x32xf32> to vector<64x8xf32>
    %cst_149 = arith.constant dense<0.000000e+00> : vector<64x64xf32>
    %687 = tpu.matmul %685, %686, %cst_149 {dimension_numbers = #tpu.dot_dimension_numbers<[1], [1], [0], [0], [0, 0, 1, 0], [], []>} : vector<64x8xf32>, vector<64x8xf32>, vector<64x64xf32> -> vector<64x64xf32>
    %cst_150 = arith.constant dense<0xFF800000> : vector<64xf32>
    %688 = vector.multi_reduction <maximumf>, %687, %cst_150 [1] : vector<64x64xf32> to vector<64xf32>
    %689 = vector.shape_cast %688 : vector<64xf32> to vector<64x1xf32>
    %690 = vector.broadcast %689 : vector<64x1xf32> to vector<64x64xf32>
    %691 = arith.subf %687, %690 : vector<64x64xf32>
    %692 = math.exp %691 : vector<64x64xf32>
    %cst_151 = arith.constant dense<0.000000e+00> : vector<64xf32>
    %693 = vector.multi_reduction <add>, %692, %cst_151 [1] : vector<64x64xf32> to vector<64xf32>
    %694 = vector.shape_cast %693 : vector<64xf32> to vector<64x1xf32>
    %695 = vector.broadcast %694 : vector<64x1xf32> to vector<64x64xf32>
    %696 = arith.divf %692, %695 : vector<64x64xf32>
    %697 = vector.extract_strided_slice %654 {offsets = [0, 24], sizes = [64, 8], strides = [1, 1]} : vector<64x32xf32> to vector<64x8xf32>
    %698 = vector.extract_strided_slice %660 {offsets = [0, 24], sizes = [64, 8], strides = [1, 1]} : vector<64x32xf32> to vector<64x8xf32>
    %cst_152 = arith.constant dense<0.000000e+00> : vector<64x64xf32>
    %699 = tpu.matmul %697, %698, %cst_152 {dimension_numbers = #tpu.dot_dimension_numbers<[1], [1], [0], [0], [0, 0, 1, 0], [], []>} : vector<64x8xf32>, vector<64x8xf32>, vector<64x64xf32> -> vector<64x64xf32>
    %cst_153 = arith.constant dense<0xFF800000> : vector<64xf32>
    %700 = vector.multi_reduction <maximumf>, %699, %cst_153 [1] : vector<64x64xf32> to vector<64xf32>
    %701 = vector.shape_cast %700 : vector<64xf32> to vector<64x1xf32>
    %702 = vector.broadcast %701 : vector<64x1xf32> to vector<64x64xf32>
    %703 = arith.subf %699, %702 : vector<64x64xf32>
    %704 = math.exp %703 : vector<64x64xf32>
    %cst_154 = arith.constant dense<0.000000e+00> : vector<64xf32>
    %705 = vector.multi_reduction <add>, %704, %cst_154 [1] : vector<64x64xf32> to vector<64xf32>
    %706 = vector.shape_cast %705 : vector<64xf32> to vector<64x1xf32>
    %707 = vector.broadcast %706 : vector<64x1xf32> to vector<64x64xf32>
    %708 = arith.divf %704, %707 : vector<64x64xf32>
    %709 = tpu.concatenate %672, %684, %696, %708 in 0 : vector<64x64xf32>, vector<64x64xf32>, vector<64x64xf32>, vector<64x64xf32> -> vector<256x64xf32>
    %c0_155 = arith.constant 0 : index
    %c0_156 = arith.constant 0 : index
    %710 = vector.load %arg4[%c0_155, %c0_156] : memref<256x64xf32, #tpu.memory_space<vmem>>, vector<256x64xf32>
    tpu.vector_store %arg4[%c0_155, %c0_156], %709 {strides = array<i32>} : memref<256x64xf32, #tpu.memory_space<vmem>>, vector<256x64xf32>,
    return
  }
}

</mosaic_0001>

<bundles_post_ra>
// kernel: transformer3d_forward.1
= control target key start
LH: loop header
LB: loop body
LE: loop exit
PB: predicated region body
PF: predicated region fallthrough
CT: control target
= control target key end

     0   :  { %vm41_vm0 = vcmask 261120   ;;  %s16606_s0 = inlined_call_operand.vmem [shape: f32[64,32], index: 0, kind: input, shape index: {}]   ;;  %s16607_s1 = inlined_call_operand.vmem [shape: f32[64,32], index: 1, kind: input, shape index: {}]   ;;  %s16608_s2 = inlined_call_operand.vmem [shape: bf16[64,256], index: 2, kind: input, shape index: {}]   ;;  %s16609_s3 = inlined_call_operand.vmem [shape: f32[32,32], index: 3, kind: input, shape index: {}]   ;;  %s16610_s4 = inlined_call_operand.hbm [shape: f32[256,64], index: 4, kind: output, shape index: {}]  }
   0x1   :  { %v19_v0 = vld [vmem:[%s16606_s0] sm:$0xff]  ;;  %v21_v1 = vld [vmem:[%s16606_s0 + $0x10] sm:$0xff]  ;;  %v20_v2 = vld [vmem:[%s16606_s0 + $0x8] sm:$0xff] }
   0x2   :  { %v42_v3 = vsel %vm41_vm0, %v19_v0, 0.0  ;;  %v48_v4 = vsel %vm41_vm0, %v21_v1, 0.0  ;;  %v22_v5 = vld [vmem:[%s16606_s0 + $0x18] sm:$0xff]  ;;  %v23_v6 = vld [vmem:[%s16606_s0 + $0x20] sm:$0xff]  ;;  %v24_v7 = vld [vmem:[%s16606_s0 + $0x28] sm:$0xff]  ;;  %v45_v8 = vsel %vm41_vm0, %v20_v2, 0.0 }
   0x3   :  { %43 = vadd.xlane.f32.xlu0 %v42_v3  ;;  %49 = vadd.xlane.f32.xlu1 %v48_v4  ;;  %v51_v9 = vsel %vm41_vm0, %v22_v5, 0.0 }
   0x4   :  { %9 = vsyncpa [#allocation3], 0  ;;  %v54_v10 = vsel %vm41_vm0, %v23_v6, 0.0  ;;  %v57_v11 = vsel %vm41_vm0, %v24_v7, 0.0  ;;  %v25_v12 = vld [vmem:[%s16606_s0 + $0x30] sm:$0xff]  ;;  %v26_v13 = vld [vmem:[%s16606_s0 + $0x38] sm:$0xff]  ;;  %v147_v58 = vlaneseq }
   0x5   :  { %v60_v14 = vsel %vm41_vm0, %v25_v12, 0.0  ;;  %v63_v15 = vsel %vm41_vm0, %v26_v13, 0.0  ;;  %v11431_v56 = vld [vmem:[%s16608_s2 + $0x10] ss:$8 sps:$4 sm:$0xff]   ;;  %v11434_v57 = vld [vmem:[%s16608_s2] ss:$8 sps:$4 sm:$0xff]  }
   0x6   :  { %10402 = vmatprep.subr.bf16.mxu0 %v11431_v56  ;;  %v12494_v59 = vshrl.u32 %v147_v58, 7  ;;  %v12502_v61 = vld [vmem:[%s16609_s3] sm:$0xff]  ;;  %s12374_s11 = smov 32   ;;  %vm332_vm1 = vcmask 64512   ;;  %s12375_s12 = smov 96   ;;  %vm422_vm2 = vcmask 523264  }
   0x7   :  { %46 = vadd.xlane.f32.xlu0 %v45_v8  ;;  %52 = vadd.xlane.f32.xlu1 %v51_v9  ;;  %s12376_s13 = smov 64   ;;  %s12377_s14 = smov 88   ;;  %vm1534_vm3 = vcmask 130048   ;;  %vm1543_vm4 = vcmask 195584  }
   0x8   :  { %10403 = vmatpush3.bf16.msra.mxu0 %v11431_v56  ;;  %v12497_v60 = vsub.s32 3, %v12494_v59  ;;  %s12378_s15 = smov 120   ;;  %s12379_s16 = smov 56  }
   0x9   :  { %10404 = vmatprep.subr.bf16.mxu0 %v11434_v57  ;;  %s12380_s17 = smov 80   ;;  %s12381_s18 = smov 112  }
   0xa   :  { %16651 = vst [vmem:[#allocation5_spill] sm:$0xff] %v12497_v60  ;;  %v279_v62 = vrot.slane %v12502_v61, %v12497_v60  ;;  %s12382_s19 = smov 48   ;;  %s12383_s20 = smov 72  }
   0xb   :  { %55 = vadd.xlane.f32.xlu0 %v54_v10  ;;  %58 = vadd.xlane.f32.xlu1 %v57_v11  ;;  %s12384_s21 = smov 104   ;;  %s12385_s22 = smov 40  }
   0xc   :  { %10405 = vmatpush3.bf16.msra.mxu0 %v11434_v57  ;;  %s12386_s27 = smov 16   ;;  %s12387_s28 = smov 8  }
   0xd   :  { %s12388_s29 = smov 24  }
   0xf   :  { %61 = vadd.xlane.f32.xlu0 %v60_v14  ;;  %64 = vadd.xlane.f32.xlu1 %v63_v15 }
  0x8c   :  { %v44_v16 = vpop.xlane.xlu0 %43  ;;  %v50_v17 = vpop.xlane.xlu1 %49 }
  0x8d   :  { %v67_v18 = vmul.f32 0.03125, %v44_v16  ;;  %v69_v19 = vmul.f32 0.03125, %v50_v17 }
  0x8f   :  { %v12448_v20 = vsub.f32 %v19_v0, %v67_v18  ;;  %v12450_v21 = vsub.f32 %v21_v1, %v69_v19 }
  0x90   :  { %v47_v22 = vpop.xlane.xlu0 %46  ;;  %v53_v23 = vpop.xlane.xlu1 %52 }
  0x91   :  { %v68_v24 = vmul.f32 0.03125, %v47_v22  ;;  %v70_v25 = vmul.f32 0.03125, %v53_v23  ;;  %v83_v26 = vmul.f32 %v12448_v20, %v12448_v20  ;;  %v85_v27 = vmul.f32 %v12450_v21, %v12450_v21 }
  0x92   :  { %v12508_v22 = vsub.s32 0, %v12494_v59 }
  0x93   :  { %v12456_v28 = vsub.f32 %v20_v2, %v68_v24  ;;  %v12458_v29 = vsub.f32 %v22_v5, %v70_v25  ;;  %v91_v30 = vsel %vm41_vm0, %v83_v26, 0.0  ;;  %v97_v33 = vsel %vm41_vm0, %v85_v27, 0.0 }
  0x94   :  { %92 = vadd.xlane.f32.xlu0 %v91_v30  ;;  %v56_v31 = vpop.xlane.xlu0 %55  ;;  %v59_v32 = vpop.xlane.xlu1 %58  ;;  %16652 = vst [vmem:[#allocation6_spill] sm:$0xff] %v12508_v22  ;;  %v150_v30 = vrot.slane %v12502_v61, %v12508_v22 }
  0x95   :  { %v71_v34 = vmul.f32 0.03125, %v56_v31  ;;  %v72_v35 = vmul.f32 0.03125, %v59_v32  ;;  %v84_v36 = vmul.f32 %v12456_v28, %v12456_v28  ;;  %v86_v37 = vmul.f32 %v12458_v29, %v12458_v29 }
  0x96   :  { %v12514_v31 = vsub.s32 1, %v12494_v59 }
  0x97   :  { %v12466_v38 = vsub.f32 %v23_v6, %v71_v34  ;;  %v12468_v39 = vsub.f32 %v24_v7, %v72_v35  ;;  %v94_v40 = vsel %vm41_vm0, %v84_v36, 0.0  ;;  %v100_v43 = vsel %vm41_vm0, %v86_v37, 0.0 }
  0x98   :  { %98 = vadd.xlane.f32.xlu0 %v97_v33  ;;  %95 = vadd.xlane.f32.xlu1 %v94_v40  ;;  %v62_v41 = vpop.xlane.xlu0 %61  ;;  %v65_v42 = vpop.xlane.xlu1 %64  ;;  %16653 = vst [vmem:[#allocation7_spill] sm:$0xff] %v12514_v31  ;;  %v162_v36 = vrot.slane %v12502_v61, %v12514_v31 }
  0x99   :  { %v73_v44 = vmul.f32 0.03125, %v62_v41  ;;  %v74_v45 = vmul.f32 0.03125, %v65_v42  ;;  %v87_v46 = vmul.f32 %v12466_v38, %v12466_v38  ;;  %v88_v47 = vmul.f32 %v12468_v39, %v12468_v39 }
  0x9b   :  { %v12476_v48 = vsub.f32 %v25_v12, %v73_v44  ;;  %v12478_v49 = vsub.f32 %v26_v13, %v74_v45  ;;  %v103_v50 = vsel %vm41_vm0, %v87_v46, 0.0  ;;  %v106_v51 = vsel %vm41_vm0, %v88_v47, 0.0 }
  0x9c   :  { %101 = vadd.xlane.f32.xlu1 %v100_v43  ;;  %104 = vadd.xlane.f32.xlu0 %v103_v50 }
  0x9d   :  { %v89_v52 = vmul.f32 %v12476_v48, %v12476_v48  ;;  %v90_v53 = vmul.f32 %v12478_v49, %v12478_v49 }
  0x9f   :  { %v109_v54 = vsel %vm41_vm0, %v89_v52, 0.0  ;;  %v112_v55 = vsel %vm41_vm0, %v90_v53, 0.0 }
  0xa0   :  { %107 = vadd.xlane.f32.xlu1 %v106_v51  ;;  %110 = vadd.xlane.f32.xlu0 %v109_v54 }
  0xa4   :  { %113 = vadd.xlane.f32.xlu1 %v112_v55 }
  0xb6   :  { %281 = vrot.lane.b32.xlu0 %v279_v62, %s12374_s11 }
 0x11d   :  { %v93_v63 = vpop.xlane.xlu0 %92 }
 0x11e   :  { %v115_v0 = vmul.f32 0.03125, %v93_v63 }
 0x120   :  { %v123_v1 = vadd.f32 1e-05, %v115_v0 }
 0x121   :  { %v96_v2 = vpop.xlane.xlu1 %95  ;;  %v99_v3 = vpop.xlane.xlu0 %98 }
 0x122   :  { %11443 = vrsqrt.f32 %v123_v1  ;;  %v116_v4 = vmul.f32 0.03125, %v96_v2  ;;  %v117_v5 = vmul.f32 0.03125, %v99_v3 }
 0x124   :  { %v124_v6 = vadd.f32 1e-05, %v116_v4  ;;  %v125_v7 = vadd.f32 1e-05, %v117_v5  ;;  %v12532_v4 = vsub.s32 2, %v12494_v59 }
 0x125   :  { %v102_v8 = vpop.xlane.xlu1 %101  ;;  %v105_v9 = vpop.xlane.xlu0 %104 }
 0x126   :  { %11445 = vrsqrt.f32 %v124_v6  ;;  %v118_v10 = vmul.f32 0.03125, %v102_v8  ;;  %v119_v11 = vmul.f32 0.03125, %v105_v9  ;;  %16654 = vst [vmem:[#allocation8_spill] sm:$0xff] %v12532_v4 }
 0x127   :  { %11447 = vrsqrt.f32 %v125_v7 }
 0x128   :  { %v126_v12 = vadd.f32 1e-05, %v118_v10  ;;  %v127_v13 = vadd.f32 1e-05, %v119_v11 }
 0x129   :  { %v108_v14 = vpop.xlane.xlu1 %107  ;;  %v111_v15 = vpop.xlane.xlu0 %110 }
 0x12a   :  { %11449 = vrsqrt.f32 %v126_v12  ;;  %v120_v16 = vmul.f32 0.03125, %v108_v14  ;;  %v121_v17 = vmul.f32 0.03125, %v111_v15 }
 0x12b   :  { %11451 = vrsqrt.f32 %v127_v13 }
 0x12c   :  { %v128_v18 = vadd.f32 1e-05, %v120_v16  ;;  %v129_v19 = vadd.f32 1e-05, %v121_v17 }
 0x12d   :  { %v114_v23 = vpop.xlane.xlu1 %113  ;;  %v282_v7 = vpop.permute.xlu0 %281 }
 0x12e   :  { %11453 = vrsqrt.f32 %v128_v18  ;;  %v122_v24 = vmul.f32 0.03125, %v114_v23 }
 0x12f   :  { %v11444_v25 = vpop.eup %11443  ;;  %11455 = vrsqrt.f32 %v129_v19 }
 0x130   :  { %v130_v26 = vadd.f32 1e-05, %v122_v24  ;;  %v139_v27 = vmul.f32 %v11444_v25, %v12448_v20 }
 0x132   :  { %11457 = vrsqrt.f32 %v130_v26  ;;  %v151_v35 = vmul.f32 %v150_v30, %v139_v27 }
 0x133   :  { %v11446_v32 = vpop.eup %11445 }
 0x134   :  { %v11448_v33 = vpop.eup %11447  ;;  %v140_v34 = vmul.f32 %v11446_v32, %v12456_v28  ;;  %v163_v42 = vadd.f32 %v162_v36, %v151_v35 }
 0x135   :  { %v141_v37 = vmul.f32 %v11448_v33, %v12450_v21 }
 0x136   :  { %v152_v40 = vmul.f32 %v150_v30, %v140_v34 }
 0x137   :  { %v11450_v41 = vpop.eup %11449  ;;  %v153_v45 = vmul.f32 %v150_v30, %v141_v37 }
 0x138   :  { %v11452_v20 = vpop.eup %11451  ;;  %v164_v43 = vadd.f32 %v162_v36, %v152_v40  ;;  %v142_v44 = vmul.f32 %v11450_v41, %v12458_v29 }
 0x139   :  { %v143_v46 = vmul.f32 %v11452_v20, %v12466_v38  ;;  %v165_v52 = vadd.f32 %v162_v36, %v153_v45 }
 0x13a   :  { %v171_v47 = vpack.c.bf16 %v164_v43, %v163_v42  ;;  %v154_v50 = vmul.f32 %v150_v30, %v142_v44 }
 0x13b   :  { %v11454_v51 = vpop.eup %11453  ;;  %v155_v54 = vmul.f32 %v150_v30, %v143_v46 }
 0x13c   :  { %v11456_v28 = vpop.eup %11455  ;;  %10406 = vmatprep.mubr.msk.bf16.mxu0 %vm41_vm0, %v171_v47  ;;  %v166_v53 = vadd.f32 %v162_v36, %v154_v50  ;;  %v144_v21 = vmul.f32 %v11454_v51, %v12468_v39 }
 0x13d   :  { %v145_v55 = vmul.f32 %v11456_v28, %v12476_v48  ;;  %v167_v29 = vadd.f32 %v162_v36, %v155_v54 }
 0x13e   :  { %v172_v56 = vpack.c.bf16 %v166_v53, %v165_v52  ;;  %v156_v57 = vmul.f32 %v150_v30, %v144_v21 }
 0x13f   :  { %v11458_v58 = vpop.eup %11457  ;;  %v157_v63 = vmul.f32 %v150_v30, %v145_v55 }
 0x140   :  { %10407 = vmatmul.mubr.msk.bf16.vlgmr.msra.gmra.mxu0 %vm41_vm0, %v172_v56  ;;  %v168_v38 = vadd.f32 %v162_v36, %v156_v57  ;;  %v146_v62 = vmul.f32 %v11458_v58, %v12478_v49  ;;  %v267_v49 = vrot.slane %v12502_v61, %v12532_v4 }
 0x141   :  { %v169_v2 = vadd.f32 %v162_v36, %v157_v63 }
 0x142   :  { %v173_v0 = vpack.c.bf16 %v168_v38, %v167_v29  ;;  %v158_v1 = vmul.f32 %v150_v30, %v146_v62 }
 0x144   :  { %10410 = vmatprep.mubr.msk.bf16.mxu0 %vm41_vm0, %v173_v0  ;;  %v170_v3 = vadd.f32 %v162_v36, %v158_v1  ;;  %v12617_v0 = vsub.s32 4, %v12494_v59 }
 0x146   :  { %v174_v39 = vpack.c.bf16 %v170_v3, %v169_v2  ;;  %16655 = vst [vmem:[#allocation9_spill] sm:$0xff] %v12617_v0  ;;  %v295_v3 = vrot.slane %v12502_v61, %v12617_v0 }
 0x148   :  { %10411 = vmatmul.mubr.msk.bf16.gmra.mxu0 %vm41_vm0, %v174_v39 }
 0x200   :  { %v12529_v48 = vpop.f32.mrf.mxu0 }
 0x201   :  { %v286_v32 = vadd.f32 %v12529_v48, %v282_v7  ;;  %v270_v45 = vadd.f32 %v12529_v48, %v267_v49 }
 0x202   :  { %v12534_v5 = vpop.f32.mrf.mxu0 }
 0x203   :  { %v268_v9 = vadd.f32 %v267_v49, %v12534_v5  ;;  %v284_v10 = vadd.f32 %v282_v7, %v12534_v5 }
 0x204   :  { %v12536_v6 = vpop.f32.mrf.mxu0 }
 0x205   :  { %v287_v27 = vadd.f32 %v12536_v6, %v282_v7  ;;  %v271_v43 = vadd.f32 %v12536_v6, %v267_v49 }
 0x206   :  { %v12540_v8 = vpop.f32.mrf.mxu0 }
 0x207   :  { %v269_v11 = vadd.f32 %v267_v49, %v12540_v8  ;;  %v285_v12 = vadd.f32 %v282_v7, %v12540_v8  ;;  %v12576_v33 = vpack.c.bf16 %v287_v27, %v286_v32  ;;  %v12592_v47 = vpack.c.bf16 %v271_v43, %v270_v45 }
 0x208   :  { %v12546_v13 = vpop.f32.mrf.mxu0 }
 0x209   :  { %v12548_v14 = vpack.c.bf16 %v269_v11, %v268_v9  ;;  %v12550_v15 = vpack.c.bf16 %v285_v12, %v284_v10  ;;  %v290_v18 = vadd.f32 %v12546_v13, %v282_v7  ;;  %v274_v28 = vadd.f32 %v12546_v13, %v267_v49 }
 0x20a   :  { %v12552_v16 = vpop.f32.mrf.mxu0 }
 0x20b   :  { %10422 = vmatprep.mubr.msk.bf16.mxu1 %vm332_vm1, %v12548_v14  ;;  %324 = vrot.lane.b32.xlu0 %v12550_v15, %s12375_s12  ;;  %v288_v26 = vadd.f32 %v282_v7, %v12552_v16  ;;  %v272_v46 = vadd.f32 %v267_v49, %v12552_v16 }
 0x20c   :  { %v12558_v17 = vpop.f32.mrf.mxu0 }
 0x20d   :  { %v291_v19 = vadd.f32 %v12558_v17, %v282_v7  ;;  %v275_v51 = vadd.f32 %v12558_v17, %v267_v49 }
 0x20e   :  { %v12562_v23 = vpop.f32.mrf.mxu0 }
 0x20f   :  { %v12564_v24 = vpack.c.bf16 %v291_v19, %v290_v18  ;;  %v289_v25 = vadd.f32 %v282_v7, %v12562_v23  ;;  %v273_v44 = vadd.f32 %v267_v49, %v12562_v23  ;;  %v12602_v52 = vpack.c.bf16 %v275_v51, %v274_v28 }
 0x211   :  { %330 = vrot.lane.b32.xlu1 %v12564_v24, %s12375_s12  ;;  %v12571_v30 = vpack.c.bf16 %v289_v25, %v288_v26  ;;  %v12594_v50 = vpack.c.bf16 %v273_v44, %v272_v46 }
 0x215   :  { %328 = vrot.lane.b32.xlu1 %v12571_v30, %s12375_s12 }
 0x219   :  { %326 = vrot.lane.b32.xlu1 %v12576_v33, %s12375_s12 }
 0x27d   :  { %v325_v20 = vpop.permute.xlu0 %324 }
 0x27e   :  { %v346_v42 = vsel %vm332_vm1, %v325_v20, 0 }
 0x283   :  { %v331_v34 = vpop.permute.xlu1 %330 }
 0x284   :  { %11334 = vmatprep.subr.msk.bf16.mxu1 %vm332_vm1, %v331_v34  ;;  %v355_v35 = vsel %vm332_vm1, %v331_v34, 0 }
 0x285   :  { %10415 = vmatpush3.bf16.xpose.msra.mxu1 %v355_v35 }
 0x287   :  { %v329_v36 = vpop.permute.xlu1 %328 }
 0x288   :  { %11335 = vmatprep.subr.msk.bf16.mxu1 %vm332_vm1, %v329_v36  ;;  %v352_v37 = vsel %vm332_vm1, %v329_v36, 0 }
 0x28b   :  { %v327_v40 = vpop.permute.xlu1 %326 }
 0x28c   :  { %v349_v41 = vsel %vm332_vm1, %v327_v40, 0 }
 0x28d   :  { %10417 = vmatpush3.bf16.xpose.msra.mxu1 %v352_v37 }
 0x28e   :  { %11336 = vmatprep.subr.msk.bf16.mxu1 %vm332_vm1, %v327_v40 }
 0x295   :  { %10419 = vmatpush3.bf16.xpose.msra.mxu1 %v349_v41 }
 0x296   :  { %11337 = vmatprep.subr.msk.bf16.mxu1 %vm332_vm1, %v325_v20 }
 0x29d   :  { %10421 = vmatpush3.bf16.xpose.msra.mxu1 %v346_v42 }
 0x2a4   :  { %10423 = vmatmul.mubr.msk.bf16.vlgmr.msra.gmra.mxu1 %vm332_vm1, %v12592_v47 }
 0x2a5   :  { %10426 = vmatprep.mubr.msk.bf16.mxu1 %vm332_vm1, %v12594_v50 }
 0x2ac   :  { %10427 = vmatmul.mubr.msk.bf16.gmra.mxu1 %vm332_vm1, %v12602_v52 }
 0x364   :  { %v10424_v53 = vpop.f32.mrf.mxu1 }
 0x365   :  { %v429_v21 = vsel %vm422_vm2, %v10424_v53, -inf }
 0x366   :  { %430 = vmax.xlane.f32.xlu0 %v429_v21  ;;  %v391_v54 = vpop.f32.mrf.mxu1 }
 0x367   :  { %v423_v55 = vsel %vm422_vm2, %v391_v54, -inf }
 0x368   :  { %424 = vmax.xlane.f32.xlu1 %v423_v55  ;;  %v10425_v56 = vpop.f32.mrf.mxu1 }
 0x369   :  { %v432_v62 = vsel %vm422_vm2, %v10425_v56, -inf }
 0x36a   :  { %v394_v57 = vpop.f32.mrf.mxu1 }
 0x36b   :  { %v426_v58 = vsel %vm422_vm2, %v394_v57, -inf }
 0x36c   :  { %427 = vmax.xlane.f32.xlu0 %v426_v58  ;;  %v12609_v29 = vpop.f32.mrf.mxu1 }
 0x36d   :  { %v441_v49 = vsel %vm422_vm2, %v12609_v29, -inf }
 0x36e   :  { %v12611_v38 = vpop.f32.mrf.mxu1 }
 0x36f   :  { %v435_v7 = vsel %vm422_vm2, %v12611_v38, -inf }
 0x370   :  { %433 = vmax.xlane.f32.xlu0 %v432_v62  ;;  %v12614_v63 = vpop.f32.mrf.mxu1 }
 0x371   :  { %v444_v1 = vsel %vm422_vm2, %v12614_v63, -inf }
 0x372   :  { %v410_v2 = vpop.f32.mrf.mxu1 }
 0x373   :  { %v438_v39 = vsel %vm422_vm2, %v410_v2, -inf }
 0x374   :  { %445 = vmax.xlane.f32.xlu0 %v444_v1 }
 0x378   :  { %439 = vmax.xlane.f32.xlu0 %v438_v39 }
 0x379   :  { %297 = vrot.lane.b32.xlu1 %v295_v3, %s12376_s13 }
 0x39d   :  { %442 = vmax.xlane.f32.xlu1 %v441_v49 }
 0x3a1   :  { %436 = vmax.xlane.f32.xlu1 %v435_v7 }
 0x3ef   :  { %v431_v19 = vpop.xlane.xlu0 %430 }
 0x3f1   :  { %v425_v9 = vpop.xlane.xlu1 %424 }
 0x3f2   :  { %v447_v36 = vsub.f32 %v391_v54, %v425_v9 }
 0x3f4   :  { %v455_v40 = vmul.f32 1.442695, %v447_v36 }
 0x3f5   :  { %v298_v10 = vpop.permute.xlu1 %297 }
 0x3f6   :  { %v306_v11 = vadd.f32 %v12546_v13, %v298_v10  ;;  %v307_v61 = vadd.f32 %v12558_v17, %v298_v10  ;;  %v304_v12 = vadd.f32 %v298_v10, %v12552_v16  ;;  %v305_v18 = vadd.f32 %v298_v10, %v12562_v23  ;;  %v428_v13 = vpop.xlane.xlu0 %427 }
 0x3f7   :  { %v302_v26 = vadd.f32 %v12529_v48, %v298_v10  ;;  %v303_v27 = vadd.f32 %v12536_v6, %v298_v10  ;;  %v300_v16 = vadd.f32 %v298_v10, %v12534_v5  ;;  %v301_v23 = vadd.f32 %v298_v10, %v12540_v8 }
 0x3f8   :  { %v12633_v25 = vpack.c.bf16 %v307_v61, %v306_v11  ;;  %v12637_v32 = vpack.c.bf16 %v305_v18, %v304_v12  ;;  %v449_v6 = vsub.f32 %v10424_v53, %v431_v19  ;;  %v448_v5 = vsub.f32 %v394_v57, %v428_v13 }
 0x3f9   :  { %v12643_v17 = vpack.c.bf16 %v303_v27, %v302_v26  ;;  %v12649_v48 = vpack.c.bf16 %v301_v23, %v300_v16 }
 0x3fa   :  { %525 = vrot.lane.b32.xlu1 %v12633_v25, %s12376_s13  ;;  %523 = vrot.lane.b32.xlu0 %v12637_v32, %s12376_s13  ;;  %v434_v34 = vpop.xlane.xlu0 %433  ;;  %v459_v35 = vmul.f32 1.442695, %v449_v6  ;;  %v457_v42 = vmul.f32 1.442695, %v448_v5 }
 0x3fb   :  { %v450_v41 = vsub.f32 %v10425_v56, %v434_v34 }
 0x3fc   :  { %11459 = vpow2.f32 %v459_v35 }
 0x3fd   :  { %11461 = vpow2.f32 %v455_v40  ;;  %v461_v20 = vmul.f32 1.442695, %v450_v41 }
 0x3fe   :  { %521 = vrot.lane.b32.xlu1 %v12643_v17, %s12376_s13  ;;  %v446_v37 = vpop.xlane.xlu0 %445 }
 0x3ff   :  { %11463 = vpow2.f32 %v461_v20  ;;  %v454_v62 = vsub.f32 %v12614_v63, %v446_v37 }
 0x400   :  { %11465 = vpow2.f32 %v457_v42 }
 0x401   :  { %v469_v49 = vmul.f32 1.442695, %v454_v62 }
 0x402   :  { %519 = vrot.lane.b32.xlu1 %v12649_v48, %s12376_s13  ;;  %v440_v8 = vpop.xlane.xlu0 %439 }
 0x403   :  { %v452_v43 = vsub.f32 %v410_v2, %v440_v8 }
 0x405   :  { %v465_v44 = vmul.f32 1.442695, %v452_v43 }
 0x407   :  { %11467 = vpow2.f32 %v465_v44 }
 0x409   :  { %v12653_v45 = vpop.eup %11459 }
 0x40a   :  { %v477_v46 = vsel %vm422_vm2, %v12653_v45, 0.0  ;;  %v12657_v51 = vpop.eup %11461 }
 0x40b   :  { %v471_v28 = vsel %vm422_vm2, %v12657_v51, 0.0 }
 0x40c   :  { %v12661_v53 = vpop.eup %11463 }
 0x40d   :  { %v480_v21 = vsel %vm422_vm2, %v12661_v53, 0.0  ;;  %v12665_v54 = vpop.eup %11465 }
 0x40e   :  { %v474_v55 = vsel %vm422_vm2, %v12665_v54, 0.0 }
 0x414   :  { %v12669_v56 = vpop.eup %11467 }
 0x415   :  { %v486_v2 = vsel %vm422_vm2, %v12669_v56, 0.0 }
 0x419   :  { %478 = vadd.xlane.f32.xlu0 %v477_v46 }
 0x41d   :  { %472 = vadd.xlane.f32.xlu0 %v471_v28 }
 0x421   :  { %481 = vadd.xlane.f32.xlu0 %v480_v21 }
 0x425   :  { %475 = vadd.xlane.f32.xlu0 %v474_v55 }
 0x426   :  { %v443_v57 = vpop.xlane.xlu1 %442 }
 0x427   :  { %v453_v58 = vsub.f32 %v12609_v29, %v443_v57 }
 0x429   :  { %v467_v1 = vmul.f32 1.442695, %v453_v58  ;;  %487 = vadd.xlane.f32.xlu0 %v486_v2 }
 0x42a   :  { %v437_v3 = vpop.xlane.xlu1 %436 }
 0x42b   :  { %11469 = vpow2.f32 %v467_v1  ;;  %v451_v39 = vsub.f32 %v12611_v38, %v437_v3 }
 0x42d   :  { %v463_v7 = vmul.f32 1.442695, %v451_v39 }
 0x42f   :  { %11471 = vpow2.f32 %v463_v7 }
 0x430   :  { %11473 = vpow2.f32 %v469_v49 }
 0x438   :  { %v12676_v9 = vpop.eup %11469 }
 0x439   :  { %v489_v29 = vsel %vm422_vm2, %v12676_v9, 0.0 }
 0x43a   :  { %490 = vadd.xlane.f32.xlu1 %v489_v29 }
 0x43c   :  { %v12680_v63 = vpop.eup %11471 }
 0x43d   :  { %v483_v10 = vsel %vm422_vm2, %v12680_v63, 0.0  ;;  %v12684_v11 = vpop.eup %11473 }
 0x43e   :  { %484 = vadd.xlane.f32.xlu1 %v483_v10  ;;  %v492_v38 = vsel %vm422_vm2, %v12684_v11, 0.0 }
 0x43f   :  { %630 = vrot.lane.b32.xlu0 %v12564_v24, %s12377_s14 }
 0x442   :  { %493 = vadd.xlane.f32.xlu1 %v492_v38 }
 0x443   :  { %616 = vrot.lane.b32.xlu0 %v12548_v14, %s12378_s15 }
 0x447   :  { %620 = vrot.lane.b32.xlu0 %v12594_v50, %s12378_s15 }
 0x453   :  { %628 = vrot.lane.b32.xlu1 %v12571_v30, %s12377_s14 }
 0x457   :  { %626 = vrot.lane.b32.xlu1 %v12576_v33, %s12377_s14 }
 0x45b   :  { %624 = vrot.lane.b32.xlu1 %v12550_v15, %s12377_s14 }
 0x45f   :  { %618 = vrot.lane.b32.xlu1 %v12592_v47, %s12378_s15 }
 0x463   :  { %622 = vrot.lane.b32.xlu1 %v12602_v52, %s12378_s15 }
 0x46c   :  { %v526_v61 = vpop.permute.xlu1 %525  ;;  %v524_v12 = vpop.permute.xlu0 %523 }
 0x46d   :  { %10430 = vmatprep.subr.bf16.mxu0 %v526_v61 }
 0x46e   :  { %10431 = vmatpush3.bf16.msra.mxu0 %v526_v61 }
 0x46f   :  { %10432 = vmatprep.subr.bf16.mxu0 %v524_v12 }
 0x470   :  { %v522_v18 = vpop.permute.xlu1 %521 }
 0x472   :  { %10433 = vmatpush3.bf16.msra.mxu0 %v524_v12 }
 0x473   :  { %10434 = vmatprep.subr.bf16.mxu0 %v522_v18 }
 0x474   :  { %v520_v19 = vpop.permute.xlu1 %519 }
 0x476   :  { %10435 = vmatpush3.bf16.msra.mxu0 %v522_v18 }
 0x477   :  { %10436 = vmatprep.subr.bf16.mxu0 %v520_v19 }
 0x47a   :  { %10437 = vmatpush3.bf16.msra.mxu0 %v520_v19 }
 0x4a2   :  { %v479_v26 = vpop.xlane.xlu0 %478 }
 0x4a6   :  { %v473_v27 = vpop.xlane.xlu0 %472 }
 0x4aa   :  { %v482_v13 = vpop.xlane.xlu0 %481 }
 0x4ab   :  { %11475 = vrcp.f32 %v482_v13 }
 0x4ac   :  { %11477 = vrcp.f32 %v473_v27 }
 0x4ad   :  { %11479 = vrcp.f32 %v479_v26 }
 0x4ae   :  { %v476_v16 = vpop.xlane.xlu0 %475 }
 0x4af   :  { %11481 = vrcp.f32 %v476_v16 }
 0x4b2   :  { %v488_v23 = vpop.xlane.xlu0 %487 }
 0x4b3   :  { %11483 = vrcp.f32 %v488_v23 }
 0x4b6   :  { %v631_v6 = vpop.permute.xlu0 %630 }
 0x4b7   :  { %11338 = vmatprep.subr.msk.bf16.mxu0 %vm332_vm1, %v631_v6  ;;  %v654_v43 = vsel %vm332_vm1, %v631_v6, 0 }
 0x4b8   :  { %v11476_v34 = vpop.eup %11475 }
 0x4b9   :  { %v11478_v35 = vpop.eup %11477  ;;  %v506_v40 = vmul.f32 %v11476_v34, %v12661_v53 }
 0x4ba   :  { %v11480_v36 = vpop.eup %11479  ;;  %v503_v41 = vmul.f32 %v11478_v35, %v12657_v51  ;;  %v617_v29 = vpop.permute.xlu0 %616 }
 0x4bb   :  { %v505_v20 = vmul.f32 %v11480_v36, %v12653_v45 }
 0x4bc   :  { %v11482_v37 = vpop.eup %11481 }
 0x4bd   :  { %v504_v5 = vmul.f32 %v11482_v37, %v12665_v54  ;;  %v512_v42 = vpack.c.bf16 %v506_v40, %v505_v20 }
 0x4be   :  { %v621_v10 = vpop.permute.xlu0 %620 }
 0x4bf   :  { %v511_v8 = vpack.c.bf16 %v504_v5, %v503_v41 }
 0x4c0   :  { %v11484_v53 = vpop.eup %11483 }
 0x4c1   :  { %10438 = vmatprep.mubr.msk.bf16.mxu0 %vm422_vm2, %v511_v8  ;;  %v508_v57 = vmul.f32 %v11484_v53, %v12669_v56 }
 0x4c2   :  { %10439 = vmatmul.mubr.msk.bf16.vlgmr.msra.gmra.mxu0 %vm422_vm2, %v512_v42 }
 0x4c3   :  { %v491_v44 = vpop.xlane.xlu1 %490  ;;  %10447 = vmatpush3.bf16.xpose.msra.mxu0 %v654_v43 }
 0x4c7   :  { %v485_v46 = vpop.xlane.xlu1 %484 }
 0x4c8   :  { %11485 = vrcp.f32 %v485_v46 }
 0x4c9   :  { %11487 = vrcp.f32 %v491_v44 }
 0x4cb   :  { %v494_v28 = vpop.xlane.xlu1 %493 }
 0x4cc   :  { %11489 = vrcp.f32 %v494_v28 }
 0x4cf   :  { %v629_v51 = vpop.permute.xlu1 %628 }
 0x4d0   :  { %11339 = vmatprep.subr.msk.bf16.mxu0 %vm332_vm1, %v629_v51  ;;  %v651_v45 = vsel %vm332_vm1, %v629_v51, 0 }
 0x4d1   :  { %10449 = vmatpush3.bf16.xpose.msra.mxu0 %v651_v45 }
 0x4d3   :  { %v627_v21 = vpop.permute.xlu1 %626 }
 0x4d4   :  { %11340 = vmatprep.subr.msk.bf16.mxu0 %vm332_vm1, %v627_v21  ;;  %v648_v62 = vsel %vm332_vm1, %v627_v21, 0 }
 0x4d5   :  { %v11486_v54 = vpop.eup %11485 }
 0x4d6   :  { %v507_v55 = vmul.f32 %v11486_v54, %v12680_v63  ;;  %v11488_v58 = vpop.eup %11487 }
 0x4d7   :  { %v625_v3 = vpop.permute.xlu1 %624  ;;  %v509_v39 = vmul.f32 %v11488_v58, %v12676_v9 }
 0x4d8   :  { %v513_v1 = vpack.c.bf16 %v508_v57, %v507_v55  ;;  %v645_v56 = vsel %vm332_vm1, %v625_v3, 0 }
 0x4d9   :  { %v11490_v2 = vpop.eup %11489  ;;  %10451 = vmatpush3.bf16.xpose.msra.mxu0 %v648_v62 }
 0x4da   :  { %10442 = vmatprep.mubr.msk.bf16.mxu0 %vm422_vm2, %v513_v1  ;;  %11341 = vmatprep.subr.msk.bf16.mxu0 %vm332_vm1, %v625_v3  ;;  %v510_v49 = vmul.f32 %v11490_v2, %v12684_v11 }
 0x4db   :  { %v619_v63 = vpop.permute.xlu1 %618 }
 0x4dc   :  { %v514_v7 = vpack.c.bf16 %v510_v49, %v509_v39 }
 0x4de   :  { %10443 = vmatmul.mubr.msk.bf16.gmra.mxu0 %vm422_vm2, %v514_v7 }
 0x4df   :  { %10454 = vmatprep.mubr.msk.bf16.mxu0 %vm332_vm1, %v617_v29  ;;  %v623_v38 = vpop.permute.xlu1 %622 }
 0x4e1   :  { %10453 = vmatpush3.bf16.xpose.msra.mxu0 %v645_v56 }
 0x4e8   :  { %10455 = vmatmul.mubr.msk.bf16.vlgmr.msra.gmra.mxu0 %vm332_vm1, %v619_v63 }
 0x4e9   :  { %10458 = vmatprep.mubr.msk.bf16.mxu0 %vm332_vm1, %v621_v10 }
 0x4f0   :  { %10459 = vmatmul.mubr.msk.bf16.gmra.mxu0 %vm332_vm1, %v623_v38 }
 0x582   :  { %v12728_v9 = vpop.f32.mrf.mxu0 }
 0x584   :  { %v12730_v11 = vpop.f32.mrf.mxu0 }
 0x586   :  { %v12732_v61 = vpop.f32.mrf.mxu0 }
 0x587   :  { %v609_v12 = vpack.c.bf16 %v12732_v61, %v12728_v9 }
 0x588   :  { %v12736_v18 = vpop.f32.mrf.mxu0 }
 0x59e   :  { %v12738_v19 = vpop.f32.mrf.mxu0 }
 0x5a0   :  { %v12740_v26 = vpop.f32.mrf.mxu0 }
 0x5a2   :  { %v12742_v27 = vpop.f32.mrf.mxu0 }
 0x5a4   :  { %v12746_v16 = vpop.f32.mrf.mxu0 }
 0x5a8   :  { %v10456_v23 = vpop.f32.mrf.mxu0 }
 0x5a9   :  { %v727_v37 = vsel %vm422_vm2, %v10456_v23, -inf }
 0x5aa   :  { %v690_v6 = vpop.f32.mrf.mxu0 }
 0x5ab   :  { %v721_v34 = vsel %vm422_vm2, %v690_v6, -inf }
 0x5ac   :  { %722 = vmax.xlane.f32.xlu0 %v721_v34  ;;  %v10457_v35 = vpop.f32.mrf.mxu0 }
 0x5ad   :  { %v730_v20 = vsel %vm422_vm2, %v10457_v35, -inf }
 0x5ae   :  { %v693_v36 = vpop.f32.mrf.mxu0 }
 0x5af   :  { %v724_v40 = vsel %vm422_vm2, %v693_v36, -inf }
 0x5b0   :  { %728 = vmax.xlane.f32.xlu0 %v727_v37  ;;  %725 = vmax.xlane.f32.xlu1 %v724_v40  ;;  %v10460_v41 = vpop.f32.mrf.mxu0 }
 0x5b1   :  { %v739_v44 = vsel %vm422_vm2, %v10460_v41, -inf }
 0x5b2   :  { %v706_v5 = vpop.f32.mrf.mxu0 }
 0x5b3   :  { %v733_v28 = vsel %vm422_vm2, %v706_v5, -inf }
 0x5b4   :  { %731 = vmax.xlane.f32.xlu0 %v730_v20  ;;  %v10461_v8 = vpop.f32.mrf.mxu0 }
 0x5b5   :  { %v742_v42 = vsel %vm422_vm2, %v10461_v8, -inf }
 0x5b6   :  { %743 = vmax.xlane.f32.xlu1 %v742_v42  ;;  %v709_v43 = vpop.f32.mrf.mxu0 }
 0x5b7   :  { %v736_v46 = vsel %vm422_vm2, %v709_v43, -inf }
 0x5b8   :  { %740 = vmax.xlane.f32.xlu0 %v739_v44 }
 0x5ba   :  { %737 = vmax.xlane.f32.xlu1 %v736_v46 }
 0x5bc   :  { %734 = vmax.xlane.f32.xlu0 %v733_v28 }
 0x5cb   :  { %817 = vrot.lane.b32.xlu1 %v12637_v32, %s12379_s16 }
 0x5cf   :  { %815 = vrot.lane.b32.xlu1 %v12643_v17, %s12379_s16 }
 0x5d2   :  { %819 = vrot.lane.b32.xlu0 %v12633_v25, %s12379_s16 }
 0x5d3   :  { %813 = vrot.lane.b32.xlu1 %v12649_v48, %s12379_s16 }
 0x635   :  { %v723_v51 = vpop.xlane.xlu0 %722 }
 0x636   :  { %v745_v45 = vsub.f32 %v690_v6, %v723_v51 }
 0x638   :  { %v753_v58 = vmul.f32 1.442695, %v745_v45 }
 0x639   :  { %v726_v53 = vpop.xlane.xlu1 %725  ;;  %v729_v21 = vpop.xlane.xlu0 %728 }
 0x63a   :  { %v747_v54 = vsub.f32 %v10456_v23, %v729_v21  ;;  %v746_v55 = vsub.f32 %v693_v36, %v726_v53 }
 0x63c   :  { %v757_v57 = vmul.f32 1.442695, %v747_v54  ;;  %v755_v3 = vmul.f32 1.442695, %v746_v55 }
 0x63d   :  { %v732_v62 = vpop.xlane.xlu0 %731 }
 0x63e   :  { %v748_v1 = vsub.f32 %v10457_v35, %v732_v62  ;;  %11491 = vpow2.f32 %v757_v57 }
 0x63f   :  { %v744_v2 = vpop.xlane.xlu1 %743  ;;  %11493 = vpow2.f32 %v753_v58 }
 0x640   :  { %v759_v39 = vmul.f32 1.442695, %v748_v1  ;;  %v752_v49 = vsub.f32 %v10461_v8, %v744_v2 }
 0x641   :  { %v741_v7 = vpop.xlane.xlu0 %740 }
 0x642   :  { %11495 = vpow2.f32 %v759_v39  ;;  %v751_v29 = vsub.f32 %v10460_v41, %v741_v7  ;;  %v767_v10 = vmul.f32 1.442695, %v752_v49 }
 0x643   :  { %v738_v56 = vpop.xlane.xlu1 %737  ;;  %11497 = vpow2.f32 %v755_v3 }
 0x644   :  { %v765_v63 = vmul.f32 1.442695, %v751_v29  ;;  %v750_v38 = vsub.f32 %v709_v43, %v738_v56 }
 0x645   :  { %v735_v23 = vpop.xlane.xlu0 %734 }
 0x646   :  { %11499 = vpow2.f32 %v765_v63  ;;  %v749_v6 = vsub.f32 %v706_v5, %v735_v23  ;;  %v763_v35 = vmul.f32 1.442695, %v750_v38 }
 0x647   :  { %v818_v34 = vpop.permute.xlu1 %817  ;;  %11501 = vpow2.f32 %v767_v10 }
 0x648   :  { %v761_v36 = vmul.f32 1.442695, %v749_v6 }
 0x649   :  { %v820_v37 = vpop.permute.xlu0 %819 }
 0x64a   :  { %11503 = vpow2.f32 %v761_v36  ;;  %10462 = vmatprep.subr.bf16.mxu1 %v820_v37 }
 0x64b   :  { %10463 = vmatpush3.bf16.msra.mxu1 %v820_v37  ;;  %v12764_v40 = vpop.eup %11491  ;;  %11505 = vpow2.f32 %v763_v35  ;;  %v816_v41 = vpop.permute.xlu1 %815 }
 0x64c   :  { %10464 = vmatprep.subr.bf16.mxu1 %v818_v34  ;;  %v775_v20 = vsel %vm422_vm2, %v12764_v40, 0.0  ;;  %v11494_v8 = vpop.eup %11493 }
 0x64d   :  { %776 = vadd.xlane.f32.xlu0 %v775_v20  ;;  %v769_v44 = vsel %vm422_vm2, %v11494_v8, 0.0 }
 0x64f   :  { %v11496_v42 = vpop.eup %11495  ;;  %10465 = vmatpush3.bf16.msra.mxu1 %v818_v34  ;;  %v814_v28 = vpop.permute.xlu1 %813 }
 0x650   :  { %10466 = vmatprep.subr.bf16.mxu1 %v816_v41  ;;  %v778_v5 = vsel %vm422_vm2, %v11496_v42, 0.0  ;;  %v11498_v43 = vpop.eup %11497 }
 0x651   :  { %779 = vadd.xlane.f32.xlu1 %v778_v5  ;;  %770 = vadd.xlane.f32.xlu0 %v769_v44  ;;  %v772_v51 = vsel %vm422_vm2, %v11498_v43, 0.0 }
 0x653   :  { %v12770_v46 = vpop.eup %11499  ;;  %10467 = vmatpush3.bf16.msra.mxu1 %v816_v41 }
 0x654   :  { %10468 = vmatprep.subr.bf16.mxu1 %v814_v28  ;;  %v787_v45 = vsel %vm422_vm2, %v12770_v46, 0.0  ;;  %v11502_v53 = vpop.eup %11501 }
 0x655   :  { %773 = vadd.xlane.f32.xlu1 %v772_v51  ;;  %788 = vadd.xlane.f32.xlu0 %v787_v45  ;;  %v790_v55 = vsel %vm422_vm2, %v11502_v53, 0.0 }
 0x657   :  { %v11504_v21 = vpop.eup %11503  ;;  %10469 = vmatpush3.bf16.msra.mxu1 %v814_v28 }
 0x658   :  { %v781_v54 = vsel %vm422_vm2, %v11504_v21, 0.0  ;;  %v11506_v57 = vpop.eup %11505 }
 0x659   :  { %782 = vadd.xlane.f32.xlu1 %v781_v54  ;;  %791 = vadd.xlane.f32.xlu0 %v790_v55  ;;  %v784_v58 = vsel %vm422_vm2, %v11506_v57, 0.0 }
 0x65d   :  { %785 = vadd.xlane.f32.xlu0 %v784_v58 }
 0x66a   :  { %918 = vrot.lane.b32.xlu1 %v12571_v30, %s12380_s17 }
 0x66e   :  { %916 = vrot.lane.b32.xlu1 %v12576_v33, %s12380_s17 }
 0x672   :  { %914 = vrot.lane.b32.xlu1 %v12550_v15, %s12380_s17 }
 0x673   :  { %920 = vrot.lane.b32.xlu0 %v12564_v24, %s12380_s17 }
 0x676   :  { %908 = vrot.lane.b32.xlu1 %v12592_v47, %s12381_s18 }
 0x677   :  { %906 = vrot.lane.b32.xlu0 %v12548_v14, %s12381_s18 }
 0x67a   :  { %912 = vrot.lane.b32.xlu1 %v12602_v52, %s12381_s18 }
 0x67b   :  { %910 = vrot.lane.b32.xlu0 %v12594_v50, %s12381_s18 }
 0x6d6   :  { %v777_v62 = vpop.xlane.xlu0 %776 }
 0x6da   :  { %v780_v1 = vpop.xlane.xlu1 %779  ;;  %v771_v2 = vpop.xlane.xlu0 %770 }
 0x6db   :  { %11507 = vrcp.f32 %v780_v1 }
 0x6dc   :  { %11509 = vrcp.f32 %v771_v2 }
 0x6dd   :  { %11511 = vrcp.f32 %v777_v62 }
 0x6de   :  { %v774_v3 = vpop.xlane.xlu1 %773  ;;  %v789_v39 = vpop.xlane.xlu0 %788 }
 0x6df   :  { %11513 = vrcp.f32 %v774_v3 }
 0x6e2   :  { %v783_v49 = vpop.xlane.xlu1 %782  ;;  %v792_v7 = vpop.xlane.xlu0 %791 }
 0x6e3   :  { %11515 = vrcp.f32 %v792_v7 }
 0x6e4   :  { %11517 = vrcp.f32 %v783_v49 }
 0x6e5   :  { %11519 = vrcp.f32 %v789_v39 }
 0x6e6   :  { %v786_v29 = vpop.xlane.xlu0 %785  ;;  %v919_v28 = vpop.permute.xlu1 %918 }
 0x6e7   :  { %11521 = vrcp.f32 %v786_v29  ;;  %v941_v62 = vsel %vm332_vm1, %v919_v28, 0 }
 0x6e8   :  { %v11508_v56 = vpop.eup %11507 }
 0x6e9   :  { %v11510_v63 = vpop.eup %11509  ;;  %v804_v6 = vmul.f32 %v11508_v56, %v11496_v42 }
 0x6ea   :  { %v11512_v10 = vpop.eup %11511  ;;  %v921_v38 = vpop.permute.xlu0 %920  ;;  %v801_v34 = vmul.f32 %v11510_v63, %v11494_v8 }
 0x6eb   :  { %11342 = vmatprep.subr.msk.bf16.mxu1 %vm332_vm1, %v921_v38  ;;  %v803_v35 = vmul.f32 %v11512_v10, %v12764_v40  ;;  %v944_v5 = vsel %vm332_vm1, %v921_v38, 0  ;;  %v917_v1 = vpop.permute.xlu1 %916 }
 0x6ec   :  { %v11514_v23 = vpop.eup %11513 }
 0x6ed   :  { %v802_v36 = vmul.f32 %v11514_v23, %v11498_v43  ;;  %v810_v41 = vpack.c.bf16 %v804_v6, %v803_v35 }
 0x6ee   :  { %v907_v58 = vpop.permute.xlu0 %906 }
 0x6ef   :  { %v809_v37 = vpack.c.bf16 %v802_v36, %v801_v34 }
 0x6f0   :  { %v11516_v20 = vpop.eup %11515 }
 0x6f1   :  { %10470 = vmatprep.mubr.msk.bf16.mxu1 %vm422_vm2, %v809_v37  ;;  %v11518_v44 = vpop.eup %11517  ;;  %v808_v8 = vmul.f32 %v11516_v20, %v11502_v53  ;;  %v938_v53 = vsel %vm332_vm1, %v917_v1, 0 }
 0x6f2   :  { %10471 = vmatmul.mubr.msk.bf16.vlgmr.msra.gmra.mxu1 %vm422_vm2, %v810_v41  ;;  %v11520_v51 = vpop.eup %11519  ;;  %v805_v43 = vmul.f32 %v11518_v44, %v11504_v21  ;;  %v915_v21 = vpop.permute.xlu1 %914 }
 0x6f3   :  { %10479 = vmatpush3.bf16.xpose.msra.mxu1 %v944_v5  ;;  %v807_v40 = vmul.f32 %v11520_v51, %v12770_v46  ;;  %v935_v46 = vsel %vm332_vm1, %v915_v21, 0  ;;  %v911_v2 = vpop.permute.xlu0 %910 }
 0x6f4   :  { %11343 = vmatprep.subr.msk.bf16.mxu1 %vm332_vm1, %v919_v28  ;;  %v11522_v42 = vpop.eup %11521 }
 0x6f5   :  { %v806_v45 = vmul.f32 %v11522_v42, %v11506_v57  ;;  %v812_v55 = vpack.c.bf16 %v808_v8, %v807_v40 }
 0x6f6   :  { %v909_v57 = vpop.permute.xlu1 %908 }
 0x6f7   :  { %v811_v54 = vpack.c.bf16 %v806_v45, %v805_v43 }
 0x6f9   :  { %10474 = vmatprep.mubr.msk.bf16.mxu1 %vm422_vm2, %v811_v54 }
 0x6fa   :  { %10475 = vmatmul.mubr.msk.bf16.gmra.mxu1 %vm422_vm2, %v812_v55  ;;  %v913_v3 = vpop.permute.xlu1 %912 }
 0x6fb   :  { %10481 = vmatpush3.bf16.xpose.msra.mxu1 %v941_v62  ;;  %10486 = vmatprep.mubr.msk.bf16.mxu1 %vm332_vm1, %v907_v58 }
 0x6fc   :  { %11344 = vmatprep.subr.msk.bf16.mxu1 %vm332_vm1, %v917_v1 }
 0x703   :  { %10483 = vmatpush3.bf16.xpose.msra.mxu1 %v938_v53 }
 0x704   :  { %11345 = vmatprep.subr.msk.bf16.mxu1 %vm332_vm1, %v915_v21 }
 0x70b   :  { %10485 = vmatpush3.bf16.xpose.msra.mxu1 %v935_v46 }
 0x712   :  { %10487 = vmatmul.mubr.msk.bf16.vlgmr.msra.gmra.mxu1 %vm332_vm1, %v909_v57 }
 0x713   :  { %10490 = vmatprep.mubr.msk.bf16.mxu1 %vm332_vm1, %v911_v2 }
 0x71a   :  { %10491 = vmatmul.mubr.msk.bf16.gmra.mxu1 %vm332_vm1, %v913_v3 }
 0x7b2   :  { %v12812_v39 = vpop.f32.mrf.mxu1 }
 0x7b4   :  { %v12814_v49 = vpop.f32.mrf.mxu1 }
 0x7b6   :  { %v12816_v7 = vpop.f32.mrf.mxu1 }
 0x7b7   :  { %v903_v29 = vpack.c.bf16 %v12816_v7, %v12812_v39 }
 0x7b8   :  { %v12820_v56 = vpop.f32.mrf.mxu1 }
 0x7ba   :  { %v12822_v63 = vpop.f32.mrf.mxu1 }
 0x7bc   :  { %v12824_v10 = vpop.f32.mrf.mxu1 }
 0x7be   :  { %v12826_v38 = vpop.f32.mrf.mxu1 }
 0x7bf   :  { %v905_v23 = vpack.c.bf16 %v12826_v38, %v12822_v63 }
 0x7c0   :  { %v12830_v6 = vpop.f32.mrf.mxu1 }
 0x7d2   :  { %v10488_v34 = vpop.f32.mrf.mxu1 }
 0x7d3   :  { %v1017_v20 = vsel %vm422_vm2, %v10488_v34, -inf }
 0x7d4   :  { %v980_v36 = vpop.f32.mrf.mxu1 }
 0x7d5   :  { %v1011_v35 = vsel %vm422_vm2, %v980_v36, -inf }
 0x7d6   :  { %1012 = vmax.xlane.f32.xlu0 %v1011_v35  ;;  %v10489_v37 = vpop.f32.mrf.mxu1 }
 0x7d7   :  { %v1020_v51 = vsel %vm422_vm2, %v10489_v37, -inf }
 0x7d8   :  { %v983_v41 = vpop.f32.mrf.mxu1 }
 0x7d9   :  { %v1014_v5 = vsel %vm422_vm2, %v983_v41, -inf }
 0x7da   :  { %1018 = vmax.xlane.f32.xlu0 %v1017_v20  ;;  %1015 = vmax.xlane.f32.xlu1 %v1014_v5  ;;  %v10492_v44 = vpop.f32.mrf.mxu1 }
 0x7db   :  { %v1029_v45 = vsel %vm422_vm2, %v10492_v44, -inf }
 0x7dc   :  { %v996_v28 = vpop.f32.mrf.mxu1 }
 0x7dd   :  { %v1023_v54 = vsel %vm422_vm2, %v996_v28, -inf }
 0x7de   :  { %1021 = vmax.xlane.f32.xlu0 %v1020_v51  ;;  %v10493_v42 = vpop.f32.mrf.mxu1 }
 0x7df   :  { %v1032_v8 = vsel %vm422_vm2, %v10493_v42, -inf }
 0x7e0   :  { %1033 = vmax.xlane.f32.xlu1 %v1032_v8  ;;  %v999_v43 = vpop.f32.mrf.mxu1 }
 0x7e1   :  { %v1026_v40 = vsel %vm422_vm2, %v999_v43, -inf }
 0x7e2   :  { %1030 = vmax.xlane.f32.xlu0 %v1029_v45 }
 0x7e4   :  { %1027 = vmax.xlane.f32.xlu1 %v1026_v40 }
 0x7e6   :  { %1024 = vmax.xlane.f32.xlu0 %v1023_v54 }
 0x7f5   :  { %1107 = vrot.lane.b32.xlu1 %v12637_v32, %s12382_s19 }
 0x7f9   :  { %1105 = vrot.lane.b32.xlu1 %v12643_v17, %s12382_s19 }
 0x7fc   :  { %1109 = vrot.lane.b32.xlu0 %v12633_v25, %s12382_s19 }
 0x7fd   :  { %1103 = vrot.lane.b32.xlu1 %v12649_v48, %s12382_s19 }
 0x85f   :  { %v1013_v55 = vpop.xlane.xlu0 %1012 }
 0x860   :  { %v1035_v58 = vsub.f32 %v980_v36, %v1013_v55 }
 0x862   :  { %v1043_v57 = vmul.f32 1.442695, %v1035_v58 }
 0x863   :  { %v1016_v62 = vpop.xlane.xlu1 %1015  ;;  %v1019_v1 = vpop.xlane.xlu0 %1018 }
 0x864   :  { %v1037_v53 = vsub.f32 %v10488_v34, %v1019_v1  ;;  %v1036_v21 = vsub.f32 %v983_v41, %v1016_v62 }
 0x866   :  { %v1047_v46 = vmul.f32 1.442695, %v1037_v53  ;;  %v1045_v20 = vmul.f32 1.442695, %v1036_v21 }
 0x867   :  { %v1022_v2 = vpop.xlane.xlu0 %1021 }
 0x868   :  { %v1038_v3 = vsub.f32 %v10489_v37, %v1022_v2  ;;  %11523 = vpow2.f32 %v1047_v46 }
 0x869   :  { %v1034_v35 = vpop.xlane.xlu1 %1033  ;;  %11525 = vpow2.f32 %v1043_v57 }
 0x86a   :  { %v1049_v5 = vmul.f32 1.442695, %v1038_v3  ;;  %v1042_v51 = vsub.f32 %v10493_v42, %v1034_v35 }
 0x86b   :  { %v1031_v8 = vpop.xlane.xlu0 %1030 }
 0x86c   :  { %11527 = vpow2.f32 %v1049_v5  ;;  %v1041_v45 = vsub.f32 %v10492_v44, %v1031_v8  ;;  %v1057_v54 = vmul.f32 1.442695, %v1042_v51 }
 0x86d   :  { %v1028_v40 = vpop.xlane.xlu1 %1027  ;;  %11529 = vpow2.f32 %v1045_v20 }
 0x86e   :  { %v1055_v36 = vmul.f32 1.442695, %v1041_v45  ;;  %v1040_v55 = vsub.f32 %v999_v43, %v1028_v40 }
 0x86f   :  { %v1025_v34 = vpop.xlane.xlu0 %1024 }
 0x870   :  { %11531 = vpow2.f32 %v1055_v36  ;;  %v1039_v41 = vsub.f32 %v996_v28, %v1025_v34  ;;  %v1053_v37 = vmul.f32 1.442695, %v1040_v55 }
 0x871   :  { %v1108_v58 = vpop.permute.xlu1 %1107  ;;  %11533 = vpow2.f32 %v1057_v54 }
 0x872   :  { %v1051_v62 = vmul.f32 1.442695, %v1039_v41 }
 0x873   :  { %v1110_v1 = vpop.permute.xlu0 %1109 }
 0x874   :  { %11535 = vpow2.f32 %v1051_v62  ;;  %10494 = vmatprep.subr.bf16.mxu0 %v1110_v1 }
 0x875   :  { %10495 = vmatpush3.bf16.msra.mxu0 %v1110_v1  ;;  %v12848_v42 = vpop.eup %11523  ;;  %11537 = vpow2.f32 %v1053_v37  ;;  %v1106_v44 = vpop.permute.xlu1 %1105 }
 0x876   :  { %10496 = vmatprep.subr.bf16.mxu0 %v1108_v58  ;;  %v1065_v53 = vsel %vm422_vm2, %v12848_v42, 0.0  ;;  %v11526_v43 = vpop.eup %11525 }
 0x877   :  { %1066 = vadd.xlane.f32.xlu0 %v1065_v53  ;;  %v1059_v57 = vsel %vm422_vm2, %v11526_v43, 0.0 }
 0x879   :  { %v11528_v21 = vpop.eup %11527  ;;  %10497 = vmatpush3.bf16.msra.mxu0 %v1108_v58  ;;  %v1104_v3 = vpop.permute.xlu1 %1103 }
 0x87a   :  { %10498 = vmatprep.subr.bf16.mxu0 %v1106_v44  ;;  %v1068_v28 = vsel %vm422_vm2, %v11528_v21, 0.0  ;;  %v11530_v46 = vpop.eup %11529 }
 0x87b   :  { %1069 = vadd.xlane.f32.xlu1 %v1068_v28  ;;  %1060 = vadd.xlane.f32.xlu0 %v1059_v57  ;;  %v1062_v35 = vsel %vm422_vm2, %v11530_v46, 0.0 }
 0x87d   :  { %v12854_v2 = vpop.eup %11531  ;;  %10499 = vmatpush3.bf16.msra.mxu0 %v1106_v44 }
 0x87e   :  { %10500 = vmatprep.subr.bf16.mxu0 %v1104_v3  ;;  %v1077_v20 = vsel %vm422_vm2, %v12854_v2, 0.0  ;;  %v11534_v5 = vpop.eup %11533 }
 0x87f   :  { %1063 = vadd.xlane.f32.xlu1 %v1062_v35  ;;  %1078 = vadd.xlane.f32.xlu0 %v1077_v20  ;;  %v1080_v45 = vsel %vm422_vm2, %v11534_v5, 0.0 }
 0x881   :  { %v11536_v51 = vpop.eup %11535  ;;  %10501 = vmatpush3.bf16.msra.mxu0 %v1104_v3 }
 0x882   :  { %v1071_v8 = vsel %vm422_vm2, %v11536_v51, 0.0  ;;  %v11538_v40 = vpop.eup %11537 }
 0x883   :  { %1072 = vadd.xlane.f32.xlu1 %v1071_v8  ;;  %1081 = vadd.xlane.f32.xlu0 %v1080_v45  ;;  %v1074_v36 = vsel %vm422_vm2, %v11538_v40, 0.0 }
 0x887   :  { %1075 = vadd.xlane.f32.xlu0 %v1074_v36 }
 0x894   :  { %1208 = vrot.lane.b32.xlu1 %v12571_v30, %s12383_s20 }
 0x898   :  { %1206 = vrot.lane.b32.xlu1 %v12576_v33, %s12383_s20 }
 0x89c   :  { %1204 = vrot.lane.b32.xlu1 %v12550_v15, %s12383_s20 }
 0x89d   :  { %1210 = vrot.lane.b32.xlu0 %v12564_v24, %s12383_s20 }
 0x8a0   :  { %1198 = vrot.lane.b32.xlu1 %v12592_v47, %s12384_s21 }
 0x8a1   :  { %1196 = vrot.lane.b32.xlu0 %v12548_v14, %s12384_s21 }
 0x8a4   :  { %1202 = vrot.lane.b32.xlu1 %v12602_v52, %s12384_s21 }
 0x8a5   :  { %1200 = vrot.lane.b32.xlu0 %v12594_v50, %s12384_s21 }
 0x900   :  { %v1067_v30 = vpop.xlane.xlu0 %1066 }
 0x904   :  { %v1070_v33 = vpop.xlane.xlu1 %1069  ;;  %v1061_v54 = vpop.xlane.xlu0 %1060 }
 0x905   :  { %11539 = vrcp.f32 %v1070_v33 }
 0x906   :  { %11541 = vrcp.f32 %v1061_v54 }
 0x907   :  { %11543 = vrcp.f32 %v1067_v30 }
 0x908   :  { %v1064_v15 = vpop.xlane.xlu1 %1063  ;;  %v1079_v24 = vpop.xlane.xlu0 %1078 }
 0x909   :  { %11545 = vrcp.f32 %v1064_v15 }
 0x90c   :  { %v1073_v55 = vpop.xlane.xlu1 %1072  ;;  %v1082_v47 = vpop.xlane.xlu0 %1081 }
 0x90d   :  { %11547 = vrcp.f32 %v1082_v47 }
 0x90e   :  { %11549 = vrcp.f32 %v1073_v55 }
 0x90f   :  { %11551 = vrcp.f32 %v1079_v24 }
 0x910   :  { %v1076_v14 = vpop.xlane.xlu0 %1075  ;;  %v1209_v20 = vpop.permute.xlu1 %1208 }
 0x911   :  { %11553 = vrcp.f32 %v1076_v14  ;;  %v1231_v54 = vsel %vm332_vm1, %v1209_v20, 0 }
 0x912   :  { %v11540_v52 = vpop.eup %11539 }
 0x913   :  { %v11542_v34 = vpop.eup %11541  ;;  %v1094_v62 = vmul.f32 %v11540_v52, %v11528_v21 }
 0x914   :  { %v11544_v41 = vpop.eup %11543  ;;  %v1211_v50 = vpop.permute.xlu0 %1210  ;;  %v1091_v37 = vmul.f32 %v11542_v34, %v11526_v43 }
 0x915   :  { %11346 = vmatprep.subr.msk.bf16.mxu0 %vm332_vm1, %v1211_v50  ;;  %v1093_v44 = vmul.f32 %v11544_v41, %v12848_v42  ;;  %v1234_v3 = vsel %vm332_vm1, %v1211_v50, 0  ;;  %v1207_v15 = vpop.permute.xlu1 %1206 }
 0x916   :  { %v11546_v58 = vpop.eup %11545 }
 0x917   :  { %v1092_v1 = vmul.f32 %v11546_v58, %v11530_v46  ;;  %v1100_v28 = vpack.c.bf16 %v1094_v62, %v1093_v44 }
 0x918   :  { %v1197_v33 = vpop.permute.xlu0 %1196 }
 0x919   :  { %v1099_v53 = vpack.c.bf16 %v1092_v1, %v1091_v37 }
 0x91a   :  { %v11548_v57 = vpop.eup %11547 }
 0x91b   :  { %10502 = vmatprep.mubr.msk.bf16.mxu0 %vm422_vm2, %v1099_v53  ;;  %v11550_v35 = vpop.eup %11549  ;;  %v1098_v43 = vmul.f32 %v11548_v57, %v11534_v5  ;;  %v1228_v5 = vsel %vm332_vm1, %v1207_v15, 0 }
 0x91c   :  { %10503 = vmatmul.mubr.msk.bf16.vlgmr.msra.gmra.mxu0 %vm422_vm2, %v1100_v28  ;;  %v11552_v8 = vpop.eup %11551  ;;  %v1095_v46 = vmul.f32 %v11550_v35, %v11536_v51  ;;  %v1205_v51 = vpop.permute.xlu1 %1204 }
 0x91d   :  { %10511 = vmatpush3.bf16.xpose.msra.mxu0 %v1234_v3  ;;  %v1097_v42 = vmul.f32 %v11552_v8, %v12854_v2  ;;  %v1225_v2 = vsel %vm332_vm1, %v1205_v51, 0  ;;  %v1201_v24 = vpop.permute.xlu0 %1200 }
 0x91e   :  { %11347 = vmatprep.subr.msk.bf16.mxu0 %vm332_vm1, %v1209_v20  ;;  %v11554_v21 = vpop.eup %11553 }
 0x91f   :  { %v1096_v45 = vmul.f32 %v11554_v21, %v11538_v40  ;;  %v1102_v30 = vpack.c.bf16 %v1098_v43, %v1097_v42 }
 0x920   :  { %v1199_v40 = vpop.permute.xlu1 %1198 }
 0x921   :  { %v1101_v36 = vpack.c.bf16 %v1096_v45, %v1095_v46 }
 0x923   :  { %10506 = vmatprep.mubr.msk.bf16.mxu0 %vm422_vm2, %v1101_v36 }
 0x924   :  { %10507 = vmatmul.mubr.msk.bf16.gmra.mxu0 %vm422_vm2, %v1102_v30  ;;  %v1203_v55 = vpop.permute.xlu1 %1202 }
 0x925   :  { %10513 = vmatpush3.bf16.xpose.msra.mxu0 %v1231_v54  ;;  %10518 = vmatprep.mubr.msk.bf16.mxu0 %vm332_vm1, %v1197_v33 }
 0x926   :  { %11348 = vmatprep.subr.msk.bf16.mxu0 %vm332_vm1, %v1207_v15 }
 0x92d   :  { %10515 = vmatpush3.bf16.xpose.msra.mxu0 %v1228_v5 }
 0x92e   :  { %11349 = vmatprep.subr.msk.bf16.mxu0 %vm332_vm1, %v1205_v51 }
 0x935   :  { %10517 = vmatpush3.bf16.xpose.msra.mxu0 %v1225_v2 }
 0x93c   :  { %10519 = vmatmul.mubr.msk.bf16.vlgmr.msra.gmra.mxu0 %vm332_vm1, %v1199_v40 }
 0x93d   :  { %10522 = vmatprep.mubr.msk.bf16.mxu0 %vm332_vm1, %v1201_v24 }
 0x944   :  { %10523 = vmatmul.mubr.msk.bf16.gmra.mxu0 %vm332_vm1, %v1203_v55 }
 0x9dc   :  { %v12896_v47 = vpop.f32.mrf.mxu0 }
 0x9de   :  { %v12898_v14 = vpop.f32.mrf.mxu0 }
 0x9e0   :  { %v12900_v52 = vpop.f32.mrf.mxu0 }
 0x9e1   :  { %v1193_v34 = vpack.c.bf16 %v12900_v52, %v12896_v47 }
 0x9e2   :  { %v12904_v41 = vpop.f32.mrf.mxu0 }
 0x9e4   :  { %v12906_v50 = vpop.f32.mrf.mxu0 }
 0x9e6   :  { %v12908_v58 = vpop.f32.mrf.mxu0 }
 0x9e8   :  { %v12910_v62 = vpop.f32.mrf.mxu0 }
 0x9e9   :  { %v1195_v37 = vpack.c.bf16 %v12910_v62, %v12906_v50  ;;  %v608_v50 = vpack.c.bf16 %v12736_v18, %v12730_v11 }
 0x9ea   :  { %v12914_v1 = vpop.f32.mrf.mxu0 }
 0x9fc   :  { %v10520_v44 = vpop.f32.mrf.mxu0 }
 0x9fd   :  { %v1307_v35 = vsel %vm422_vm2, %v10520_v44, -inf }
 0x9fe   :  { %v1270_v53 = vpop.f32.mrf.mxu0 }
 0x9ff   :  { %v1301_v28 = vsel %vm422_vm2, %v1270_v53, -inf }
 0xa00   :  { %1302 = vmax.xlane.f32.xlu0 %v1301_v28  ;;  %v10521_v57 = vpop.f32.mrf.mxu0 }
 0xa01   :  { %v1310_v43 = vsel %vm422_vm2, %v10521_v57, -inf }
 0xa02   :  { %v1273_v3 = vpop.f32.mrf.mxu0 }
 0xa03   :  { %v1304_v20 = vsel %vm422_vm2, %v1273_v3, -inf }
 0xa04   :  { %1308 = vmax.xlane.f32.xlu0 %v1307_v35  ;;  %1305 = vmax.xlane.f32.xlu1 %v1304_v20  ;;  %v10524_v8 = vpop.f32.mrf.mxu0 }
 0xa05   :  { %v1319_v30 = vsel %vm422_vm2, %v10524_v8, -inf }
 0xa06   :  { %v1286_v21 = vpop.f32.mrf.mxu0 }
 0xa07   :  { %v1313_v42 = vsel %vm422_vm2, %v1286_v21, -inf }
 0xa08   :  { %1311 = vmax.xlane.f32.xlu0 %v1310_v43  ;;  %v12920_v46 = vpop.f32.mrf.mxu0 }
 0xa09   :  { %v1322_v33 = vsel %vm422_vm2, %v12920_v46, -inf }
 0xa0a   :  { %v12922_v45 = vpop.f32.mrf.mxu0 }
 0xa0b   :  { %v1316_v36 = vsel %vm422_vm2, %v12922_v45, -inf }
 0xa0c   :  { %1314 = vmax.xlane.f32.xlu0 %v1313_v42  ;;  %1317 = vmax.xlane.f32.xlu1 %v1316_v36 }
 0xa10   :  { %1320 = vmax.xlane.f32.xlu0 %v1319_v30  ;;  %1323 = vmax.xlane.f32.xlu1 %v1322_v33 }
 0xa89   :  { %v1303_v54 = vpop.xlane.xlu0 %1302 }
 0xa8a   :  { %v1325_v15 = vsub.f32 %v1270_v53, %v1303_v54 }
 0xa8c   :  { %v1333_v55 = vmul.f32 1.442695, %v1325_v15 }
 0xa8d   :  { %v1306_v5 = vpop.xlane.xlu1 %1305  ;;  %v1309_v51 = vpop.xlane.xlu0 %1308 }
 0xa8e   :  { %v1327_v2 = vsub.f32 %v10520_v44, %v1309_v51  ;;  %v1326_v40 = vsub.f32 %v1273_v3, %v1306_v5 }
 0xa90   :  { %v1337_v24 = vmul.f32 1.442695, %v1327_v2  ;;  %v1335_v20 = vmul.f32 1.442695, %v1326_v40 }
 0xa91   :  { %v1312_v28 = vpop.xlane.xlu0 %1311 }
 0xa92   :  { %v1328_v35 = vsub.f32 %v10521_v57, %v1312_v28  ;;  %11555 = vpow2.f32 %v1337_v24  ;;  %v12958_v28 = vld [vmem:[%s16608_s2 + $0x14] ss:$8 sps:$4 sm:$0xff]  }
 0xa93   :  { %11557 = vpow2.f32 %v1333_v55 }
 0xa94   :  { %v1339_v43 = vmul.f32 1.442695, %v1328_v35 }
 0xa95   :  { %v1315_v42 = vpop.xlane.xlu0 %1314  ;;  %v1318_v24 = vpop.xlane.xlu1 %1317 }
 0xa96   :  { %11559 = vpow2.f32 %v1339_v43  ;;  %v1329_v36 = vsub.f32 %v1286_v21, %v1315_v42 }
 0xa97   :  { %11561 = vpow2.f32 %v1335_v20  ;;  %v12966_v20 = vld [vmem:[%s16608_s2 + $0x4] ss:$8 sps:$4 sm:$0xff]  }
 0xa98   :  { %v1341_v53 = vmul.f32 1.442695, %v1329_v36 }
 0xa99   :  { %v1321_v30 = vpop.xlane.xlu0 %1320  ;;  %v1324_v55 = vpop.xlane.xlu1 %1323 }
 0xa9a   :  { %v1331_v33 = vsub.f32 %v10524_v8, %v1321_v30  ;;  %v1332_v35 = vsub.f32 %v12920_v46, %v1324_v55  ;;  %v904_v46 = vpack.c.bf16 %v12830_v6, %v12824_v10 }
 0xa9c   :  { %v1345_v13 = vmul.f32 1.442695, %v1331_v33 }
 0xa9e   :  { %11563 = vpow2.f32 %v1345_v13 }
 0xa9f   :  { %v12930_v54 = vpop.eup %11555  ;;  %11565 = vpow2.f32 %v1341_v53 }
 0xaa0   :  { %v1355_v44 = vsel %vm422_vm2, %v12930_v54, 0.0  ;;  %v12934_v57 = vpop.eup %11557 }
 0xaa1   :  { %1356 = vadd.xlane.f32.xlu0 %v1355_v44  ;;  %v1349_v8 = vsel %vm422_vm2, %v12934_v57, 0.0 }
 0xaa3   :  { %v12936_v3 = vpop.eup %11559 }
 0xaa4   :  { %v1358_v15 = vsel %vm422_vm2, %v12936_v3, 0.0  ;;  %v11562_v21 = vpop.eup %11561 }
 0xaa5   :  { %1359 = vadd.xlane.f32.xlu1 %v1358_v15  ;;  %1350 = vadd.xlane.f32.xlu0 %v1349_v8  ;;  %v1352_v13 = vsel %vm422_vm2, %v11562_v21, 0.0 }
 0xaa9   :  { %1353 = vadd.xlane.f32.xlu1 %v1352_v13 }
 0xaab   :  { %v12943_v5 = vpop.eup %11563 }
 0xaac   :  { %v1367_v51 = vsel %vm422_vm2, %v12943_v5, 0.0  ;;  %v12947_v2 = vpop.eup %11565 }
 0xaad   :  { %1368 = vadd.xlane.f32.xlu0 %v1367_v51  ;;  %v1361_v40 = vsel %vm422_vm2, %v12947_v2, 0.0 }
 0xab1   :  { %1362 = vadd.xlane.f32.xlu0 %v1361_v40 }
 0xaba   :  { %1397 = vrot.lane.b32.xlu1 %v12637_v32, %s12385_s22  ;;  %v1330_v32 = vsub.f32 %v12922_v45, %v1318_v24 }
 0xabc   :  { %v1343_v43 = vmul.f32 1.442695, %v1330_v32 }
 0xabe   :  { %1395 = vrot.lane.b32.xlu1 %v12643_v17, %s12385_s22  ;;  %v1347_v17 = vmul.f32 1.442695, %v1332_v35 }
 0xac0   :  { %11567 = vpow2.f32 %v1347_v17 }
 0xac1   :  { %11569 = vpow2.f32 %v1343_v43 }
 0xac7   :  { %1399 = vrot.lane.b32.xlu0 %v12633_v25, %s12385_s22  ;;  %v1192_v25 = vpack.c.bf16 %v12904_v41, %v12898_v14  ;;  %v902_v14 = vpack.c.bf16 %v12820_v56, %v12814_v49 }
 0xacb   :  { %1564 = vrot.lane.b32.xlu0 %v12958_v28, %s12376_s13 }
 0xacd   :  { %v11568_v45 = vpop.eup %11567 }
 0xace   :  { %v1370_v42 = vsel %vm422_vm2, %v11568_v45, 0.0  ;;  %v11570_v36 = vpop.eup %11569 }
 0xacf   :  { %1562 = vrot.lane.b32.xlu0 %v12966_v20, %s12376_s13  ;;  %v1364_v30 = vsel %vm422_vm2, %v11570_v36, 0.0 }
 0xad3   :  { %1502 = vrot.lane.b32.xlu0 %v1192_v25, %s12386_s27 }
 0xad7   :  { %1494 = vrot.lane.b32.xlu0 %v904_v46, %s12387_s28 }
 0xae2   :  { %1371 = vadd.xlane.f32.xlu1 %v1370_v42 }
 0xae6   :  { %1365 = vadd.xlane.f32.xlu1 %v1364_v30 }
 0xaf7   :  { %1393 = vrot.lane.b32.xlu1 %v12649_v48, %s12385_s22 }
 0xafb   :  { %1490 = vrot.lane.b32.xlu1 %v902_v14, %s12387_s28 }
 0xaff   :  { %1492 = vrot.lane.b32.xlu1 %v903_v29, %s12387_s28 }
 0xb03   :  { %1504 = vrot.lane.b32.xlu1 %v1193_v34, %s12386_s27 }
 0xb07   :  { %1496 = vrot.lane.b32.xlu1 %v905_v23, %s12387_s28 }
 0xb2a   :  { %v1357_v48 = vpop.xlane.xlu0 %1356 }
 0xb2e   :  { %v1360_v10 = vpop.xlane.xlu1 %1359  ;;  %v1351_v49 = vpop.xlane.xlu0 %1350 }
 0xb2f   :  { %11571 = vrcp.f32 %v1351_v49 }
 0xb32   :  { %v1354_v56 = vpop.xlane.xlu1 %1353 }
 0xb33   :  { %11573 = vrcp.f32 %v1354_v56 }
 0xb34   :  { %11575 = vrcp.f32 %v1360_v10 }
 0xb35   :  { %11577 = vrcp.f32 %v1357_v48 }
 0xb36   :  { %v1369_v6 = vpop.xlane.xlu0 %1368  ;;  %v1398_v7 = vpop.permute.xlu1 %1397 }
 0xb3a   :  { %v1363_v41 = vpop.xlane.xlu0 %1362  ;;  %v1396_v38 = vpop.permute.xlu1 %1395 }
 0xb3c   :  { %v11572_v39 = vpop.eup %11571 }
 0xb3d   :  { %v1381_v47 = vmul.f32 %v11572_v39, %v12934_v57 }
 0xb3e   :  { %v1400_v29 = vpop.permute.xlu0 %1399 }
 0xb3f   :  { %10526 = vmatprep.subr.bf16.mxu1 %v1400_v29 }
 0xb40   :  { %v11574_v33 = vpop.eup %11573  ;;  %10527 = vmatpush3.bf16.msra.mxu1 %v1400_v29 }
 0xb41   :  { %v1382_v52 = vmul.f32 %v11574_v33, %v11562_v21  ;;  %10528 = vmatprep.subr.bf16.mxu1 %v1398_v7  ;;  %v11576_v34 = vpop.eup %11575 }
 0xb42   :  { %v11578_v44 = vpop.eup %11577  ;;  %v1384_v57 = vmul.f32 %v11576_v34, %v12936_v3  ;;  %v1565_v15 = vpop.permute.xlu0 %1564  ;;  %v16656_v34 = vpack.c.bf16 %v12742_v27, %v12738_v19  ;;  %v13054_v19 = vld [vmem:[%s16609_s3] sm:$0xff] }
 0xb43   :  { %v1389_v63 = vpack.c.bf16 %v1382_v52, %v1381_v47  ;;  %v1383_v8 = vmul.f32 %v11578_v44, %v12930_v54 }
 0xb44   :  { %10529 = vmatpush3.bf16.msra.mxu1 %v1398_v7 }
 0xb45   :  { %10534 = vmatprep.mubr.msk.bf16.mxu1 %vm422_vm2, %v1389_v63  ;;  %10530 = vmatprep.subr.bf16.mxu1 %v1396_v38  ;;  %v1390_v13 = vpack.c.bf16 %v1384_v57, %v1383_v8 }
 0xb46   :  { %v1563_v51 = vpop.permute.xlu0 %1562 }
 0xb48   :  { %10531 = vmatpush3.bf16.msra.mxu1 %v1396_v38 }
 0xb6b   :  { %v1372_v23 = vpop.xlane.xlu1 %1371 }
 0xb6c   :  { %11579 = vrcp.f32 %v1372_v23 }
 0xb6d   :  { %11581 = vrcp.f32 %v1363_v41 }
 0xb6e   :  { %11583 = vrcp.f32 %v1369_v6 }
 0xb6f   :  { %v1366_v53 = vpop.xlane.xlu1 %1365 }
 0xb70   :  { %11585 = vrcp.f32 %v1366_v53 }
 0xb73   :  { %v1394_v21 = vpop.permute.xlu1 %1393 }
 0xb74   :  { %10532 = vmatprep.subr.bf16.mxu1 %v1394_v21 }
 0xb75   :  { %10533 = vmatpush3.bf16.msra.mxu1 %v1394_v21 }
 0xb76   :  { %10542 = vmatprep.subr.bf16.mxu1 %v1565_v15 }
 0xb77   :  { %v1491_v41 = vpop.permute.xlu1 %1490 }
 0xb78   :  { %10535 = vmatmul.mubr.msk.bf16.vlgmr.msra.gmra.mxu1 %vm422_vm2, %v1390_v13  ;;  %v1524_v7 = vsel %vm332_vm1, %v608_v50, %v1491_v41 }
 0xb79   :  { %10543 = vmatpush3.bf16.msra.mxu1 %v1565_v15  ;;  %v11580_v40 = vpop.eup %11579 }
 0xb7a   :  { %10544 = vmatprep.subr.bf16.mxu1 %v1563_v51  ;;  %v11582_v24 = vpop.eup %11581  ;;  %v1388_v32 = vmul.f32 %v11580_v40, %v11568_v45  ;;  %v12324_v40 = vld [vmem:[%s16606_s0] sm:$0xff] }
 0xb7b   :  { %v11584_v55 = vpop.eup %11583  ;;  %v1385_v3 = vmul.f32 %v11582_v24, %v12947_v2  ;;  %v1493_v39 = vpop.permute.xlu1 %1492 }
 0xb7c   :  { %v1387_v54 = vmul.f32 %v11584_v55, %v12943_v5  ;;  %v1194_v5 = vpack.c.bf16 %v12914_v1, %v12908_v58  ;;  %v1503_v1 = vpop.permute.xlu0 %1502  ;;  %v1527_v33 = vsel %vm332_vm1, %v609_v12, %v1493_v39  ;;  %v610_v12 = vpack.c.bf16 %v12746_v16, %v12740_v26 }
 0xb7d   :  { %v11586_v35 = vpop.eup %11585  ;;  %10545 = vmatpush3.bf16.msra.mxu1 %v1563_v51  ;;  %v1536_v47 = vsel %vm1534_vm3, %v1524_v7, %v1503_v1  ;;  %v13049_v26 = vsub.s32 5, %v12494_v59  ;;  %v12329_v1 = vld [vmem:[%s16606_s0 + $0x30] sm:$0xff]  ;;  %v12331_v7 = vld [vmem:[%s16606_s0 + $0x38] sm:$0xff] }
 0xb7e   :  { %v1386_v17 = vmul.f32 %v11586_v35, %v11570_v36  ;;  %10566 = vmatprep.subr.bf16.mxu1 %v12958_v28  ;;  %v1392_v25 = vpack.c.bf16 %v1388_v32, %v1387_v54  ;;  %v12325_v35 = vld [vmem:[%s16606_s0 + $0x10] sm:$0xff] }
 0xb7f   :  { %v1505_v58 = vpop.permute.xlu1 %1504  ;;  %v1555_v27 = vrot.slane %v13054_v19, %v13049_v26 }
 0xb80   :  { %v1391_v43 = vpack.c.bf16 %v1386_v17, %v1385_v3  ;;  %v1538_v63 = vsel %vm1534_vm3, %v1527_v33, %v1505_v58 }
 0xb82   :  { %10538 = vmatprep.mubr.msk.bf16.mxu1 %vm422_vm2, %v1391_v43  ;;  %v12326_v43 = vld [vmem:[%s16606_s0 + $0x8] sm:$0xff] }
 0xb83   :  { %10539 = vmatmul.mubr.msk.bf16.gmra.mxu1 %vm422_vm2, %v1392_v25  ;;  %v1497_v62 = vpop.permute.xlu1 %1496 }
 0xb84   :  { %v1533_v53 = vsel %vm332_vm1, %v16656_v34, %v1497_v62  ;;  %v12330_v62 = vld [vmem:[%s16606_s0 + $0x28] sm:$0xff] }
 0xc38   :  { %v10536_v46 = vpop.f32.mrf.mxu1 }
 0xc3a   :  { %v1451_v42 = vpop.f32.mrf.mxu1 }
 0xc3c   :  { %v10537_v30 = vpop.f32.mrf.mxu1 }
 0xc3d   :  { %v1483_v14 = vpack.c.bf16 %v10537_v30, %v10536_v46  ;;  %v12327_v46 = vld [vmem:[%s16606_s0 + $0x18] sm:$0xff] }
 0xc3e   :  { %v1454_v48 = vpop.f32.mrf.mxu1 }
 0xc3f   :  { %v1482_v45 = vpack.c.bf16 %v1454_v48, %v1451_v42  ;;  %1516 = vrot.lane.b32.xlu1 %v1483_v14, %s12388_s29 }
 0xc41   :  { %1514 = vrot.lane.b32.xlu0 %v1482_v45, %s12388_s29 }
 0xc43   :  { %1508 = vrot.lane.b32.xlu1 %v1195_v37, %s12386_s27  ;;  %v10540_v2 = vpop.f32.mrf.mxu1  ;;  %v1495_v37 = vpop.permute.xlu0 %1494 }
 0xc44   :  { %v1530_v18 = vsel %vm332_vm1, %v610_v12, %v1495_v37 }
 0xc45   :  { %1506 = vrot.lane.b32.xlu0 %v1194_v5, %s12386_s27  ;;  %v1467_v36 = vpop.f32.mrf.mxu1 }
 0xc47   :  { %v10541_v10 = vpop.f32.mrf.mxu1 }
 0xc48   :  { %v1485_v49 = vpack.c.bf16 %v10541_v10, %v10540_v2 }
 0xc49   :  { %v1470_v56 = vpop.f32.mrf.mxu1 }
 0xc4a   :  { %v1484_v6 = vpack.c.bf16 %v1470_v56, %v1467_v36  ;;  %1520 = vrot.lane.b32.xlu1 %v1485_v49, %s12388_s29  ;;  %v12328_v49 = vld [vmem:[%s16606_s0 + $0x20] sm:$0xff] }
 0xc4c   :  { %1518 = vrot.lane.b32.xlu0 %v1484_v6, %s12388_s29 }
 0xcb1   :  { %v1517_v29 = vpop.permute.xlu1 %1516 }
 0xcb2   :  { %v1547_v11 = vsel %vm1543_vm4, %v1538_v63, %v1517_v29 }
 0xcb3   :  { %v1515_v52 = vpop.permute.xlu0 %1514 }
 0xcb4   :  { %v1545_v38 = vsel %vm1543_vm4, %v1536_v47, %v1515_v52  ;;  %v13113_v47 = vld [vmem:[%s16607_s1] sm:$0xff] }
 0xcb5   :  { %10546 = vmatprep.mubr.msk.bf16.mxu1 %vm41_vm0, %v1545_v38  ;;  %v1509_v9 = vpop.permute.xlu1 %1508  ;;  %v1777_v63 = vsel %vm41_vm0, %v13113_v47, 0.0  ;;  %v13122_v38 = vld [vmem:[%s16607_s1 + $0x8] sm:$0xff] }
 0xcb6   :  { %10547 = vmatmul.mubr.msk.bf16.vlgmr.msra.gmra.mxu1 %vm41_vm0, %v1547_v11  ;;  %v1542_v57 = vsel %vm1534_vm3, %v1533_v53, %v1509_v9  ;;  %v13129_v9 = vld [vmem:[%s16607_s1 + $0x10] sm:$0xff] }
 0xcb7   :  { %10567 = vmatpush3.bf16.msra.mxu1 %v12958_v28  ;;  %v1507_v61 = vpop.permute.xlu0 %1506  ;;  %v1783_v12 = vsel %vm41_vm0, %v13129_v9, 0.0 }
 0xcb8   :  { %10568 = vmatprep.subr.bf16.mxu1 %v12966_v20  ;;  %v1540_v44 = vsel %vm1534_vm3, %v1530_v18, %v1507_v61  ;;  %v1780_v61 = vsel %vm41_vm0, %v13122_v38, 0.0  ;;  %v13138_v18 = vld [vmem:[%s16607_s1 + $0x18] sm:$0xff] }
 0xcb9   :  { %v1786_v34 = vsel %vm41_vm0, %v13138_v18, 0.0 }
 0xcbb   :  { %10569 = vmatpush3.bf16.msra.mxu1 %v12966_v20 }
 0xcbc   :  { %v1521_v23 = vpop.permute.xlu1 %1520 }
 0xcbd   :  { %v1551_v21 = vsel %vm1543_vm4, %v1542_v57, %v1521_v23  ;;  %v13143_v23 = vld [vmem:[%s16607_s1 + $0x20] sm:$0xff] }
 0xcbe   :  { %v1519_v28 = vpop.permute.xlu0 %1518  ;;  %v1789_v53 = vsel %vm41_vm0, %v13143_v23, 0.0 }
 0xcbf   :  { %v1549_v15 = vsel %vm1543_vm4, %v1540_v44, %v1519_v28  ;;  %v13152_v44 = vld [vmem:[%s16607_s1 + $0x28] sm:$0xff]  ;;  %v13157_v28 = vld [vmem:[%s16607_s1 + $0x30] sm:$0xff] }
 0xcc0   :  { %10550 = vmatprep.mubr.msk.bf16.mxu1 %vm41_vm0, %v1549_v15  ;;  %v1792_v57 = vsel %vm41_vm0, %v13152_v44, 0.0  ;;  %v1795_v15 = vsel %vm41_vm0, %v13157_v28, 0.0 }
 0xcc1   :  { %10551 = vmatmul.mubr.msk.bf16.gmra.mxu1 %vm41_vm0, %v1551_v21  ;;  %v13166_v21 = vld [vmem:[%s16607_s1 + $0x38] sm:$0xff] }
 0xd76   :  { %v10548_v16 = vpop.f32.mrf.mxu1 }
 0xd77   :  { %v1619_v8 = vadd.f32 %v10548_v16, %v1555_v27 }
 0xd78   :  { %v1610_v20 = vpop.f32.mrf.mxu1 }
 0xd79   :  { %v1611_v13 = vadd.f32 %v1610_v20, %v1555_v27  ;;  %v13066_v32 = vadd.f32 %v12325_v35, %v1619_v8 }
 0xd7a   :  { %v10549_v51 = vpop.f32.mrf.mxu1 }
 0xd7b   :  { %v13061_v24 = vadd.f32 %v12324_v40, %v1611_v13  ;;  %16658 = vst [vmem:[#allocation11_spill] sm:$0xff] %v13066_v32  ;;  %v1622_v3 = vadd.f32 %v10549_v51, %v1555_v27  ;;  %v1655_v48 = vsel %vm41_vm0, %v13066_v32, 0.0 }
 0xd7c   :  { %v1613_v55 = vpop.f32.mrf.mxu1 }
 0xd7d   :  { %16657 = vst [vmem:[#allocation10_spill] sm:$0xff] %v13061_v24  ;;  %v1614_v17 = vadd.f32 %v1613_v55, %v1555_v27  ;;  %v1649_v54 = vsel %vm41_vm0, %v13061_v24, 0.0  ;;  %v13078_v42 = vadd.f32 %v12327_v46, %v1622_v3 }
 0xd7e   :  { %1650 = vadd.xlane.f32.xlu0 %v1649_v54 }
 0xd7f   :  { %v13073_v25 = vadd.f32 %v12326_v43, %v1614_v17  ;;  %16660 = vst [vmem:[#allocation13_spill] sm:$0xff] %v13078_v42  ;;  %v1658_v10 = vsel %vm41_vm0, %v13078_v42, 0.0 }
 0xd81   :  { %16659 = vst [vmem:[#allocation12_spill] sm:$0xff] %v13073_v25  ;;  %v10552_v30 = vpop.f32.mrf.mxu1  ;;  %v1652_v14 = vsel %vm41_vm0, %v13073_v25, 0.0 }
 0xd82   :  { %1653 = vadd.xlane.f32.xlu1 %v1652_v14  ;;  %1656 = vadd.xlane.f32.xlu0 %v1655_v48  ;;  %v1635_v2 = vadd.f32 %v10552_v30, %v1555_v27 }
 0xd83   :  { %v1626_v45 = vpop.f32.mrf.mxu1 }
 0xd84   :  { %v1627_v5 = vadd.f32 %v1626_v45, %v1555_v27  ;;  %v13096_v50 = vadd.f32 %v12329_v1, %v1635_v2 }
 0xd85   :  { %v10553_v36 = vpop.f32.mrf.mxu1 }
 0xd86   :  { %v13089_v56 = vadd.f32 %v12328_v49, %v1627_v5  ;;  %1659 = vadd.xlane.f32.xlu0 %v1658_v10  ;;  %v1638_v41 = vadd.f32 %v10553_v36, %v1555_v27  ;;  %16662 = vst [vmem:[#allocation15_spill] sm:$0xff] %v13096_v50  ;;  %v1667_v52 = vsel %vm41_vm0, %v13096_v50, 0.0 }
 0xd87   :  { %v1629_v6 = vpop.f32.mrf.mxu1 }
 0xd88   :  { %16661 = vst [vmem:[#allocation14_spill] sm:$0xff] %v13089_v56  ;;  %v1630_v39 = vadd.f32 %v1629_v6, %v1555_v27  ;;  %v1661_v58 = vsel %vm41_vm0, %v13089_v56, 0.0  ;;  %v13106_v29 = vadd.f32 %v12331_v7, %v1638_v41  ;;  %v1798_v27 = vsel %vm41_vm0, %v13166_v21, 0.0 }
 0xd8a   :  { %v13101_v37 = vadd.f32 %v12330_v62, %v1630_v39  ;;  %1662 = vadd.xlane.f32.xlu0 %v1661_v58  ;;  %16664 = vst [vmem:[#allocation17_spill] sm:$0xff] %v13106_v29  ;;  %v1670_v11 = vsel %vm41_vm0, %v13106_v29, 0.0 }
 0xd8c   :  { %16663 = vst [vmem:[#allocation16_spill] sm:$0xff] %v13101_v37  ;;  %v1664_v33 = vsel %vm41_vm0, %v13101_v37, 0.0 }
 0xd8d   :  { %1665 = vadd.xlane.f32.xlu1 %v1664_v33 }
 0xd8e   :  { %1668 = vadd.xlane.f32.xlu0 %v1667_v52 }
 0xd91   :  { %1671 = vadd.xlane.f32.xlu1 %v1670_v11 }
 0xd92   :  { %1778 = vadd.xlane.f32.xlu0 %v1777_v63 }
 0xd95   :  { %1781 = vadd.xlane.f32.xlu1 %v1780_v61 }
 0xd96   :  { %1784 = vadd.xlane.f32.xlu0 %v1783_v12 }
 0xd99   :  { %1787 = vadd.xlane.f32.xlu1 %v1786_v34 }
 0xd9a   :  { %1790 = vadd.xlane.f32.xlu0 %v1789_v53 }
 0xd9d   :  { %1793 = vadd.xlane.f32.xlu1 %v1792_v57 }
 0xd9e   :  { %1796 = vadd.xlane.f32.xlu0 %v1795_v15 }
 0xda1   :  { %1799 = vadd.xlane.f32.xlu1 %v1798_v27 }
 0xe07   :  { %v1651_v16 = vpop.xlane.xlu0 %1650 }
 0xe08   :  { %v1673_v20 = vmul.f32 0.03125, %v1651_v16 }
 0xe0a   :  { %v13171_v8 = vsub.f32 %v13061_v24, %v1673_v20 }
 0xe0b   :  { %v1654_v13 = vpop.xlane.xlu1 %1653  ;;  %v1657_v51 = vpop.xlane.xlu0 %1656 }
 0xe0c   :  { %v1674_v40 = vmul.f32 0.03125, %v1654_v13  ;;  %v1675_v55 = vmul.f32 0.03125, %v1657_v51  ;;  %v1689_v35 = vmul.f32 %v13171_v8, %v13171_v8 }
 0xe0e   :  { %v13176_v3 = vsub.f32 %v13073_v25, %v1674_v40  ;;  %v13179_v17 = vsub.f32 %v13066_v32, %v1675_v55  ;;  %v1697_v54 = vsel %vm41_vm0, %v1689_v35, 0.0 }
 0xe0f   :  { %1698 = vadd.xlane.f32.xlu0 %v1697_v54  ;;  %v1660_v43 = vpop.xlane.xlu0 %1659 }
 0xe10   :  { %v1676_v46 = vmul.f32 0.03125, %v1660_v43  ;;  %v1690_v30 = vmul.f32 %v13176_v3, %v13176_v3  ;;  %v1691_v14 = vmul.f32 %v13179_v17, %v13179_v17 }
 0xe12   :  { %v13187_v48 = vsub.f32 %v13078_v42, %v1676_v46  ;;  %v1700_v45 = vsel %vm41_vm0, %v1690_v30, 0.0  ;;  %v1703_v5 = vsel %vm41_vm0, %v1691_v14, 0.0 }
 0xe13   :  { %1701 = vadd.xlane.f32.xlu1 %v1700_v45  ;;  %1704 = vadd.xlane.f32.xlu0 %v1703_v5  ;;  %v1663_v2 = vpop.xlane.xlu0 %1662 }
 0xe14   :  { %v1677_v36 = vmul.f32 0.03125, %v1663_v2  ;;  %v1692_v10 = vmul.f32 %v13187_v48, %v13187_v48 }
 0xe16   :  { %v13194_v49 = vsub.f32 %v13089_v56, %v1677_v36  ;;  %v1666_v6 = vpop.xlane.xlu1 %1665  ;;  %v1706_v41 = vsel %vm41_vm0, %v1692_v10, 0.0 }
 0xe17   :  { %v1678_v39 = vmul.f32 0.03125, %v1666_v6  ;;  %1707 = vadd.xlane.f32.xlu1 %v1706_v41  ;;  %v1669_v58 = vpop.xlane.xlu0 %1668 }
 0xe18   :  { %v1679_v1 = vmul.f32 0.03125, %v1669_v58  ;;  %v1693_v62 = vmul.f32 %v13194_v49, %v13194_v49 }
 0xe19   :  { %v13200_v7 = vsub.f32 %v13101_v37, %v1678_v39 }
 0xe1a   :  { %v13203_v33 = vsub.f32 %v13096_v50, %v1679_v1  ;;  %v1672_v52 = vpop.xlane.xlu1 %1671  ;;  %v1709_v63 = vsel %vm41_vm0, %v1693_v62, 0.0 }
 0xe1b   :  { %v1680_v11 = vmul.f32 0.03125, %v1672_v52  ;;  %1710 = vadd.xlane.f32.xlu0 %v1709_v63  ;;  %v1779_v61 = vpop.xlane.xlu0 %1778  ;;  %v1694_v12 = vmul.f32 %v13200_v7, %v13200_v7 }
 0xe1c   :  { %v1801_v34 = vmul.f32 0.03125, %v1779_v61  ;;  %v1695_v53 = vmul.f32 %v13203_v33, %v13203_v33 }
 0xe1d   :  { %v13211_v57 = vsub.f32 %v13106_v29, %v1680_v11  ;;  %v1712_v15 = vsel %vm41_vm0, %v1694_v12, 0.0 }
 0xe1e   :  { %v13215_v27 = vsub.f32 %v13113_v47, %v1801_v34  ;;  %v1782_v16 = vpop.xlane.xlu1 %1781  ;;  %1713 = vadd.xlane.f32.xlu1 %v1712_v15  ;;  %v1715_v20 = vsel %vm41_vm0, %v1695_v53, 0.0 }
 0xe1f   :  { %v1802_v13 = vmul.f32 0.03125, %v1782_v16  ;;  %1716 = vadd.xlane.f32.xlu0 %v1715_v20  ;;  %v1785_v51 = vpop.xlane.xlu0 %1784  ;;  %v1696_v40 = vmul.f32 %v13211_v57, %v13211_v57 }
 0xe20   :  { %v1803_v55 = vmul.f32 0.03125, %v1785_v51  ;;  %v1817_v35 = vmul.f32 %v13215_v27, %v13215_v27 }
 0xe21   :  { %v13223_v54 = vsub.f32 %v13122_v38, %v1802_v13  ;;  %v1718_v47 = vsel %vm41_vm0, %v1696_v40, 0.0  ;;  %v12332_v13 = vld [vmem:[%s16608_s2] ss:$8 sps:$4 sm:$0xff]  }
 0xe22   :  { %v13227_v43 = vsub.f32 %v13129_v9, %v1803_v55  ;;  %v1788_v46 = vpop.xlane.xlu1 %1787  ;;  %1719 = vadd.xlane.f32.xlu1 %v1718_v47  ;;  %v1825_v30 = vsel %vm41_vm0, %v1817_v35, 0.0 }
 0xe23   :  { %v1804_v14 = vmul.f32 0.03125, %v1788_v46  ;;  %1826 = vadd.xlane.f32.xlu0 %v1825_v30  ;;  %v1791_v45 = vpop.xlane.xlu0 %1790  ;;  %v1818_v5 = vmul.f32 %v13223_v54, %v13223_v54 }
 0xe24   :  { %v1805_v2 = vmul.f32 0.03125, %v1791_v45  ;;  %v1819_v38 = vmul.f32 %v13227_v43, %v13227_v43 }
 0xe25   :  { %v13235_v36 = vsub.f32 %v13138_v18, %v1804_v14  ;;  %v1828_v9 = vsel %vm41_vm0, %v1818_v5, 0.0 }
 0xe26   :  { %v13239_v10 = vsub.f32 %v13143_v23, %v1805_v2  ;;  %v1794_v6 = vpop.xlane.xlu1 %1793  ;;  %1829 = vadd.xlane.f32.xlu1 %v1828_v9  ;;  %v1831_v41 = vsel %vm41_vm0, %v1819_v38, 0.0 }
 0xe27   :  { %v1806_v39 = vmul.f32 0.03125, %v1794_v6  ;;  %1832 = vadd.xlane.f32.xlu0 %v1831_v41  ;;  %v1797_v58 = vpop.xlane.xlu0 %1796  ;;  %v1820_v1 = vmul.f32 %v13235_v36, %v13235_v36  ;;  %v16612_v41 = vsub.s32 6, %v12494_v59 }
 0xe28   :  { %v1807_v62 = vmul.f32 0.03125, %v1797_v58  ;;  %v1821_v18 = vmul.f32 %v13239_v10, %v13239_v10 }
 0xe29   :  { %v13247_v52 = vsub.f32 %v13152_v44, %v1806_v39  ;;  %v1834_v23 = vsel %vm41_vm0, %v1820_v1, 0.0 }
 0xe2a   :  { %v13251_v63 = vsub.f32 %v13157_v28, %v1807_v62  ;;  %v1800_v11 = vpop.xlane.xlu1 %1799  ;;  %1835 = vadd.xlane.f32.xlu1 %v1834_v23  ;;  %v1837_v61 = vsel %vm41_vm0, %v1821_v18, 0.0 }
 0xe2b   :  { %v1808_v12 = vmul.f32 0.03125, %v1800_v11  ;;  %1838 = vadd.xlane.f32.xlu0 %v1837_v61  ;;  %v1822_v34 = vmul.f32 %v13247_v52, %v13247_v52  ;;  %v13278_v11 = vrot.slane %v13054_v19, %v16612_v41  ;;  %v16611_v61 = vsub.s32 7, %v12494_v59 }
 0xe2c   :  { %v1823_v53 = vmul.f32 %v13251_v63, %v13251_v63 }
 0xe2d   :  { %v13259_v44 = vsub.f32 %v13166_v21, %v1808_v12  ;;  %v1840_v15 = vsel %vm41_vm0, %v1822_v34, 0.0  ;;  %v12333_v21 = vld [vmem:[%s16608_s2 + $0x10] ss:$8 sps:$4 sm:$0xff]  }
 0xe2e   :  { %1841 = vadd.xlane.f32.xlu1 %v1840_v15  ;;  %v1843_v28 = vsel %vm41_vm0, %v1823_v53, 0.0 }
 0xe2f   :  { %1844 = vadd.xlane.f32.xlu0 %v1843_v28  ;;  %v1824_v16 = vmul.f32 %v13259_v44, %v13259_v44 }
 0xe31   :  { %v1846_v20 = vsel %vm41_vm0, %v1824_v16, 0.0 }
 0xe32   :  { %1847 = vadd.xlane.f32.xlu1 %v1846_v20 }
 0xe43   :  { %1905 = vrot.lane.b32.xlu1 %v12332_v13, %s12374_s11 }
 0xe45   :  { %1907 = vrot.lane.b32.xlu0 %v12333_v21, %s12374_s11  ;;  %v13285_v21 = vrot.slane %v13054_v19, %v16611_v61 }
 0xe98   :  { %v1699_v51 = vpop.xlane.xlu0 %1698 }
 0xe99   :  { %v1721_v40 = vmul.f32 0.03125, %v1699_v51 }
 0xe9b   :  { %v1729_v55 = vadd.f32 1e-05, %v1721_v40 }
 0xe9c   :  { %v1702_v35 = vpop.xlane.xlu1 %1701  ;;  %v1705_v47 = vpop.xlane.xlu0 %1704 }
 0xe9d   :  { %11587 = vrsqrt.f32 %v1729_v55  ;;  %v1722_v46 = vmul.f32 0.03125, %v1702_v35  ;;  %v1723_v30 = vmul.f32 0.03125, %v1705_v47 }
 0xe9f   :  { %v1730_v14 = vadd.f32 1e-05, %v1722_v46  ;;  %v1731_v45 = vadd.f32 1e-05, %v1723_v30 }
 0xea0   :  { %v1708_v5 = vpop.xlane.xlu1 %1707 }
 0xea1   :  { %11589 = vrsqrt.f32 %v1730_v14  ;;  %v1724_v2 = vmul.f32 0.03125, %v1708_v5 }
 0xea2   :  { %11591 = vrsqrt.f32 %v1731_v45 }
 0xea3   :  { %v1732_v38 = vadd.f32 1e-05, %v1724_v2 }
 0xea4   :  { %v1711_v9 = vpop.xlane.xlu0 %1710 }
 0xea5   :  { %11593 = vrsqrt.f32 %v1732_v38  ;;  %v1725_v6 = vmul.f32 0.03125, %v1711_v9 }
 0xea7   :  { %v1733_v39 = vadd.f32 1e-05, %v1725_v6  ;;  %v1714_v58 = vpop.xlane.xlu1 %1713 }
 0xea8   :  { %v1726_v1 = vmul.f32 0.03125, %v1714_v58  ;;  %v1717_v62 = vpop.xlane.xlu0 %1716 }
 0xea9   :  { %11595 = vrsqrt.f32 %v1733_v39  ;;  %v1727_v18 = vmul.f32 0.03125, %v1717_v62 }
 0xeaa   :  { %v11588_v23 = vpop.eup %11587  ;;  %v1734_v12 = vadd.f32 1e-05, %v1726_v1 }
 0xeab   :  { %v1735_v34 = vadd.f32 1e-05, %v1727_v18  ;;  %v1720_v53 = vpop.xlane.xlu1 %1719  ;;  %v1745_v15 = vmul.f32 %v11588_v23, %v13171_v8 }
 0xeac   :  { %11597 = vrsqrt.f32 %v1734_v12  ;;  %v1728_v28 = vmul.f32 0.03125, %v1720_v53  ;;  %v1827_v16 = vpop.xlane.xlu0 %1826 }
 0xead   :  { %11599 = vrsqrt.f32 %v1735_v34  ;;  %v1849_v20 = vmul.f32 0.03125, %v1827_v16  ;;  %v1757_v40 = vmul.f32 %v13278_v11, %v1745_v15 }
 0xeae   :  { %v11590_v13 = vpop.eup %11589  ;;  %v1736_v51 = vadd.f32 1e-05, %v1728_v28 }
 0xeaf   :  { %v11592_v55 = vpop.eup %11591  ;;  %v1857_v35 = vadd.f32 1e-05, %v1849_v20  ;;  %v1830_v47 = vpop.xlane.xlu1 %1829  ;;  %v1746_v46 = vmul.f32 %v11590_v13, %v13176_v3  ;;  %v1769_v38 = vadd.f32 %v13285_v21, %v1757_v40 }
 0xeb0   :  { %v1747_v8 = vmul.f32 %v11592_v55, %v13179_v17  ;;  %11601 = vrsqrt.f32 %v1736_v51  ;;  %v1850_v30 = vmul.f32 0.03125, %v1830_v47  ;;  %v1833_v14 = vpop.xlane.xlu0 %1832 }
 0xeb1   :  { %11603 = vrsqrt.f32 %v1857_v35  ;;  %v1851_v45 = vmul.f32 0.03125, %v1833_v14  ;;  %v1758_v5 = vmul.f32 %v13278_v11, %v1746_v46 }
 0xeb2   :  { %v11594_v2 = vpop.eup %11593  ;;  %v1858_v19 = vadd.f32 1e-05, %v1850_v30  ;;  %v1759_v9 = vmul.f32 %v13278_v11, %v1747_v8 }
 0xeb3   :  { %v1748_v6 = vmul.f32 %v11594_v2, %v13187_v48  ;;  %v1859_v39 = vadd.f32 1e-05, %v1851_v45  ;;  %v1836_v58 = vpop.xlane.xlu1 %1835  ;;  %v1770_v3 = vadd.f32 %v13285_v21, %v1758_v5 }
 0xeb4   :  { %11605 = vrsqrt.f32 %v1858_v19  ;;  %v1852_v17 = vmul.f32 0.03125, %v1836_v58  ;;  %v1839_v1 = vpop.xlane.xlu0 %1838  ;;  %v1771_v48 = vadd.f32 %v13285_v21, %v1759_v9 }
 0xeb5   :  { %v1760_v62 = vmul.f32 %v13278_v11, %v1748_v6  ;;  %11607 = vrsqrt.f32 %v1859_v39  ;;  %v1853_v18 = vmul.f32 0.03125, %v1839_v1  ;;  %v13296_v23 = vpack.c.bf16 %v1770_v3, %v1769_v38 }
 0xeb6   :  { %v11596_v12 = vpop.eup %11595  ;;  %v1860_v34 = vadd.f32 1e-05, %v1852_v17 }
 0xeb7   :  { %v1861_v53 = vadd.f32 1e-05, %v1853_v18  ;;  %v1842_v15 = vpop.xlane.xlu1 %1841  ;;  %10570 = vmatprep.mubr.msk.bf16.mxu1 %vm41_vm0, %v13296_v23  ;;  %v1772_v28 = vadd.f32 %v13285_v21, %v1760_v62  ;;  %v1749_v16 = vmul.f32 %v11596_v12, %v13194_v49 }
 0xeb8   :  { %11609 = vrsqrt.f32 %v1860_v34  ;;  %v1854_v20 = vmul.f32 0.03125, %v1842_v15  ;;  %v1845_v13 = vpop.xlane.xlu0 %1844 }
 0xeb9   :  { %v11598_v51 = vpop.eup %11597  ;;  %11611 = vrsqrt.f32 %v1861_v53  ;;  %v1855_v40 = vmul.f32 0.03125, %v1845_v13  ;;  %v13303_v55 = vpack.c.bf16 %v1772_v28, %v1771_v48  ;;  %v1761_v8 = vmul.f32 %v13278_v11, %v1749_v16 }
 0xeba   :  { %v11600_v35 = vpop.eup %11599  ;;  %v1862_v47 = vadd.f32 1e-05, %v1854_v20  ;;  %v1750_v46 = vmul.f32 %v11598_v51, %v13200_v7 }
 0xebb   :  { %v1863_v30 = vadd.f32 1e-05, %v1855_v40  ;;  %v1848_v14 = vpop.xlane.xlu1 %1847  ;;  %10571 = vmatmul.mubr.msk.bf16.vlgmr.msra.gmra.mxu1 %vm41_vm0, %v13303_v55  ;;  %v1751_v49 = vmul.f32 %v11600_v35, %v13203_v33  ;;  %v1773_v6 = vadd.f32 %v13285_v21, %v1761_v8 }
 0xebc   :  { %11613 = vrsqrt.f32 %v1862_v47  ;;  %v1856_v45 = vmul.f32 0.03125, %v1848_v14  ;;  %v1762_v5 = vmul.f32 %v13278_v11, %v1750_v46  ;;  %v13311_v2 = vpop.permute.xlu0 %1907 }
 0xebd   :  { %v11602_v19 = vpop.eup %11601  ;;  %11615 = vrsqrt.f32 %v1863_v30  ;;  %10554 = vmatprep.subr.bf16.mxu0 %v13311_v2  ;;  %v1763_v7 = vmul.f32 %v13278_v11, %v1751_v49 }
 0xebe   :  { %v11604_v38 = vpop.eup %11603  ;;  %v1864_v9 = vadd.f32 1e-05, %v1856_v45  ;;  %v1774_v39 = vadd.f32 %v13285_v21, %v1762_v5  ;;  %v1752_v33 = vmul.f32 %v11602_v19, %v13211_v57  ;;  %10555 = vmatpush3.bf16.msra.mxu0 %v13311_v2 }
 0xebf   :  { %v13319_v58 = vpop.permute.xlu1 %1905  ;;  %v1873_v3 = vmul.f32 %v11604_v38, %v13215_v27  ;;  %v1775_v18 = vadd.f32 %v13285_v21, %v1763_v7 }
 0xec0   :  { %11617 = vrsqrt.f32 %v1864_v9  ;;  %v13322_v17 = vpack.c.bf16 %v1774_v39, %v1773_v6  ;;  %v1764_v1 = vmul.f32 %v13278_v11, %v1752_v33  ;;  %10556 = vmatprep.subr.bf16.mxu0 %v13319_v58 }
 0xec1   :  { %v11606_v62 = vpop.eup %11605  ;;  %v1881_v27 = vmul.f32 %v1873_v3, %v13278_v11 }
 0xec2   :  { %v11608_v12 = vpop.eup %11607  ;;  %10574 = vmatprep.mubr.msk.bf16.mxu1 %vm41_vm0, %v13322_v17  ;;  %v1776_v57 = vadd.f32 %v13285_v21, %v1764_v1  ;;  %v1874_v34 = vmul.f32 %v11606_v62, %v13223_v54  ;;  %10557 = vmatpush3.bf16.msra.mxu0 %v13319_v58 }
 0xec3   :  { %v1875_v53 = vmul.f32 %v11608_v12, %v13227_v43  ;;  %v1889_v54 = vadd.f32 %v1881_v27, %v13285_v21 }
 0xec4   :  { %v13334_v15 = vpack.c.bf16 %v1776_v57, %v1775_v18  ;;  %v1882_v48 = vmul.f32 %v1874_v34, %v13278_v11 }
 0xec5   :  { %v11610_v28 = vpop.eup %11609  ;;  %v1883_v20 = vmul.f32 %v1875_v53, %v13278_v11 }
 0xec6   :  { %v11612_v16 = vpop.eup %11611  ;;  %v1876_v13 = vmul.f32 %v11610_v28, %v13235_v36  ;;  %10575 = vmatmul.mubr.msk.bf16.gmra.mxu1 %vm41_vm0, %v13334_v15  ;;  %v1890_v51 = vadd.f32 %v1882_v48, %v13285_v21 }
 0xec7   :  { %v1877_v40 = vmul.f32 %v11612_v16, %v13239_v10  ;;  %v1891_v8 = vadd.f32 %v1883_v20, %v13285_v21 }
 0xec8   :  { %v1884_v43 = vmul.f32 %v1876_v13, %v13278_v11  ;;  %v1897_v35 = vpack.c.bf16 %v1890_v51, %v1889_v54 }
 0xec9   :  { %v11614_v47 = vpop.eup %11613  ;;  %v1885_v14 = vmul.f32 %v1877_v40, %v13278_v11 }
 0xeca   :  { %v11616_v46 = vpop.eup %11615  ;;  %10558 = vmatprep.mubr.msk.bf16.mxu0 %vm41_vm0, %v1897_v35  ;;  %v1892_v36 = vadd.f32 %v1884_v43, %v13285_v21  ;;  %v1878_v30 = vmul.f32 %v11614_v47, %v13247_v52 }
 0xecb   :  { %v1879_v49 = vmul.f32 %v11616_v46, %v13251_v63  ;;  %v1893_v19 = vadd.f32 %v1885_v14, %v13285_v21 }
 0xecc   :  { %v1898_v45 = vpack.c.bf16 %v1892_v36, %v1891_v8  ;;  %v1886_v10 = vmul.f32 %v1878_v30, %v13278_v11 }
 0xecd   :  { %v11618_v5 = vpop.eup %11617  ;;  %v1887_v9 = vmul.f32 %v1879_v49, %v13278_v11 }
 0xece   :  { %10559 = vmatmul.mubr.msk.bf16.vlgmr.msra.gmra.mxu0 %vm41_vm0, %v1898_v45  ;;  %v1894_v7 = vadd.f32 %v1886_v10, %v13285_v21  ;;  %v1880_v38 = vmul.f32 %v11618_v5, %v13259_v44 }
 0xecf   :  { %v1895_v63 = vadd.f32 %v1887_v9, %v13285_v21 }
 0xed0   :  { %v1899_v6 = vpack.c.bf16 %v1894_v7, %v1893_v19  ;;  %v1888_v52 = vmul.f32 %v1880_v38, %v13278_v11  ;;  %v13373_v11 = vld [vmem:[%s16609_s3 + $0x8] sm:$0xff] }
 0xed1   :  { %v13407_v43 = vrot.slane %v13373_v11, %v12532_v4 }
 0xed2   :  { %10562 = vmatprep.mubr.msk.bf16.mxu0 %vm41_vm0, %v1899_v6  ;;  %v1896_v39 = vadd.f32 %v1888_v52, %v13285_v21  ;;  %v13381_v21 = vrot.slane %v13373_v11, %v12497_v60 }
 0xed4   :  { %v1900_v33 = vpack.c.bf16 %v1896_v39, %v1895_v63  ;;  %16665 = vst [vmem:[#allocation18_spill] sm:$0xff] %v13381_v21 }
 0xed6   :  { %10563 = vmatmul.mubr.msk.bf16.gmra.mxu0 %vm41_vm0, %v1900_v33 }
 0xf7b   :  { %v13362_v3 = vpop.f32.mrf.mxu1 }
 0xf7c   :  { %v2077_v46 = vadd.f32 %v13362_v3, %v13381_v21 }
 0xf7d   :  { %v13364_v1 = vpop.f32.mrf.mxu1 }
 0xf7e   :  { %v2075_v5 = vadd.f32 %v13381_v21, %v13364_v1 }
 0xf7f   :  { %v13366_v62 = vpop.f32.mrf.mxu1 }
 0xf80   :  { %v2078_v35 = vadd.f32 %v13366_v62, %v13381_v21 }
 0xf81   :  { %v13368_v44 = vpop.f32.mrf.mxu1 }
 0xf82   :  { %v13415_v30 = vpack.c.bf16 %v2078_v35, %v2077_v46  ;;  %v2076_v45 = vadd.f32 %v13381_v21, %v13368_v44 }
 0xf84   :  { %v13429_v19 = vpack.c.bf16 %v2076_v45, %v2075_v5  ;;  %v2127_v38 = vsel %vm332_vm1, %v13415_v30, 0 }
 0xf86   :  { %v13375_v18 = vpop.f32.mrf.mxu1  ;;  %v2124_v52 = vsel %vm332_vm1, %v13429_v19, 0 }
 0xf87   :  { %v2081_v34 = vadd.f32 %v13375_v18, %v13381_v21 }
 0xf88   :  { %v13377_v12 = vpop.f32.mrf.mxu1 }
 0xf89   :  { %v2079_v48 = vadd.f32 %v13381_v21, %v13377_v12 }
 0xf8a   :  { %v13383_v57 = vpop.f32.mrf.mxu1 }
 0xf8b   :  { %v2082_v27 = vadd.f32 %v13383_v57, %v13381_v21 }
 0xf8c   :  { %v13389_v53 = vpop.f32.mrf.mxu1 }
 0xf8d   :  { %v13393_v28 = vpack.c.bf16 %v2082_v27, %v2081_v34  ;;  %v2080_v16 = vadd.f32 %v13381_v21, %v13389_v53 }
 0xf8e   :  { %v10560_v20 = vpop.f32.mrf.mxu0 }
 0xf8f   :  { %v13397_v13 = vpack.c.bf16 %v2080_v16, %v2079_v48  ;;  %11350 = vmatprep.subr.msk.bf16.mxu0 %vm332_vm1, %v13393_v28  ;;  %v2133_v54 = vsel %vm332_vm1, %v13393_v28, 0  ;;  %v1966_v33 = vadd.f32 %v10560_v20, %v13407_v43 }
 0xf90   :  { %v1957_v51 = vpop.f32.mrf.mxu0  ;;  %10579 = vmatpush3.bf16.xpose.msra.mxu0 %v2133_v54 }
 0xf91   :  { %11351 = vmatprep.subr.msk.bf16.mxu0 %vm332_vm1, %v13397_v13  ;;  %v1958_v8 = vadd.f32 %v1957_v51, %v13407_v43  ;;  %v2130_v49 = vsel %vm332_vm1, %v13397_v13, 0 }
 0xf92   :  { %v10561_v40 = vpop.f32.mrf.mxu0 }
 0xf93   :  { %v1969_v63 = vadd.f32 %v10561_v40, %v13407_v43 }
 0xf94   :  { %v1960_v47 = vpop.f32.mrf.mxu0 }
 0xf95   :  { %v1961_v36 = vadd.f32 %v1960_v47, %v13407_v43  ;;  %v13441_v27 = vpack.c.bf16 %v1969_v63, %v1966_v33 }
 0xf96   :  { %v10564_v10 = vpop.f32.mrf.mxu0 }
 0xf97   :  { %v13417_v14 = vpack.c.bf16 %v1961_v36, %v1958_v8  ;;  %v1982_v54 = vadd.f32 %v10564_v10, %v13407_v43 }
 0xf98   :  { %10581 = vmatpush3.bf16.xpose.msra.mxu0 %v2130_v49  ;;  %v1973_v7 = vpop.f32.mrf.mxu0 }
 0xf99   :  { %11352 = vmatprep.subr.msk.bf16.mxu0 %vm332_vm1, %v13415_v30  ;;  %10586 = vmatprep.mubr.msk.bf16.mxu0 %vm332_vm1, %v13417_v14  ;;  %v1974_v34 = vadd.f32 %v1973_v7, %v13407_v43 }
 0xf9a   :  { %v10565_v9 = vpop.f32.mrf.mxu0 }
 0xf9b   :  { %v1985_v16 = vadd.f32 %v10565_v9, %v13407_v43 }
 0xf9c   :  { %v1976_v6 = vpop.f32.mrf.mxu0 }
 0xf9d   :  { %v1977_v39 = vadd.f32 %v1976_v6, %v13407_v43  ;;  %v13451_v51 = vpack.c.bf16 %v1985_v16, %v1982_v54 }
 0xf9f   :  { %v13443_v48 = vpack.c.bf16 %v1977_v39, %v1974_v34 }
 0xfa0   :  { %10583 = vmatpush3.bf16.xpose.msra.mxu0 %v2127_v38  ;;  %v2086_v38 = vrot.slane %v13373_v11, %v12617_v0 }
 0xfa1   :  { %11353 = vmatprep.subr.msk.bf16.mxu0 %vm332_vm1, %v13429_v19 }
 0xfa8   :  { %10585 = vmatpush3.bf16.xpose.msra.mxu0 %v2124_v52 }
 0xfaf   :  { %10587 = vmatmul.mubr.msk.bf16.vlgmr.msra.gmra.mxu0 %vm332_vm1, %v13441_v27 }
 0xfb0   :  { %10590 = vmatprep.mubr.msk.bf16.mxu0 %vm332_vm1, %v13443_v48 }
 0xfb7   :  { %10591 = vmatmul.mubr.msk.bf16.gmra.mxu0 %vm332_vm1, %v13451_v51 }
0x106f   :  { %v13455_v20 = vpop.f32.mrf.mxu0 }
0x1070   :  { %v2206_v49 = vsel %vm422_vm2, %v13455_v20, -inf }
0x1071   :  { %v13457_v40 = vpop.f32.mrf.mxu0 }
0x1072   :  { %v2200_v35 = vsel %vm422_vm2, %v13457_v40, -inf }
0x1073   :  { %2201 = vmax.xlane.f32.xlu1 %v2200_v35  ;;  %v13461_v47 = vpop.f32.mrf.mxu0 }
0x1074   :  { %v2209_v8 = vsel %vm422_vm2, %v13461_v47, -inf }
0x1075   :  { %v13463_v46 = vpop.f32.mrf.mxu0 }
0x1076   :  { %v2203_v36 = vsel %vm422_vm2, %v13463_v46, -inf }
0x1077   :  { %2210 = vmax.xlane.f32.xlu1 %v2209_v8  ;;  %2204 = vmax.xlane.f32.xlu0 %v2203_v36  ;;  %v10592_v45 = vpop.f32.mrf.mxu0 }
0x1078   :  { %v2218_v10 = vsel %vm422_vm2, %v10592_v45, -inf }
0x1079   :  { %v2185_v5 = vpop.f32.mrf.mxu0 }
0x107a   :  { %v2212_v7 = vsel %vm422_vm2, %v2185_v5, -inf }
0x107b   :  { %2207 = vmax.xlane.f32.xlu0 %v2206_v49 }
0x107f   :  { %2219 = vmax.xlane.f32.xlu0 %v2218_v10 }
0x1083   :  { %2213 = vmax.xlane.f32.xlu0 %v2212_v7  ;;  %v10593_v7 = vpop.f32.mrf.mxu0 }
0x1099   :  { %2088 = vrot.lane.b32.xlu0 %v2086_v38, %s12374_s11 }
0x1100   :  { %v2205_v9 = vpop.xlane.xlu0 %2204 }
0x1104   :  { %v2208_v6 = vpop.xlane.xlu0 %2207 }
0x1108   :  { %v2220_v52 = vpop.xlane.xlu0 %2219 }
0x110c   :  { %v2214_v63 = vpop.xlane.xlu0 %2213 }
0x110d   :  { %v2228_v49 = vsub.f32 %v2185_v5, %v2214_v63  ;;  %v2202_v5 = vpop.xlane.xlu1 %2201 }
0x110e   :  { %v2224_v63 = vsub.f32 %v13457_v40, %v2202_v5 }
0x110f   :  { %v2240_v10 = vmul.f32 1.442695, %v2228_v49 }
0x1110   :  { %v13476_v39 = vpop.permute.xlu0 %2088 }
0x1111   :  { %16666 = vst [vmem:[#allocation19_spill] sm:$0xff] %v13476_v39  ;;  %v2097_v33 = vadd.f32 %v13375_v18, %v13476_v39  ;;  %v2098_v34 = vadd.f32 %v13383_v57, %v13476_v39  ;;  %v2095_v16 = vadd.f32 %v13476_v39, %v13377_v12  ;;  %v2096_v11 = vadd.f32 %v13476_v39, %v13389_v53 }
0x1112   :  { %v2093_v8 = vadd.f32 %v13362_v3, %v13476_v39  ;;  %v2094_v36 = vadd.f32 %v13366_v62, %v13476_v39  ;;  %v2091_v12 = vadd.f32 %v13476_v39, %v13364_v1  ;;  %v2092_v57 = vadd.f32 %v13476_v39, %v13368_v44  ;;  %v2188_v44 = vpop.f32.mrf.mxu0 }
0x1113   :  { %v13486_v54 = vpack.c.bf16 %v2098_v34, %v2097_v33  ;;  %v13488_v35 = vpack.c.bf16 %v2096_v11, %v2095_v16  ;;  %v2230_v62 = vsub.f32 %v10592_v45, %v2220_v52  ;;  %v2221_v1 = vsel %vm422_vm2, %v10593_v7, -inf }
0x1114   :  { %v13498_v18 = vpack.c.bf16 %v2094_v36, %v2093_v8  ;;  %v13506_v3 = vpack.c.bf16 %v2092_v57, %v2091_v12  ;;  %v2215_v34 = vsel %vm422_vm2, %v2188_v44, -inf  ;;  %v2226_v52 = vsub.f32 %v13455_v20, %v2208_v6  ;;  %v2211_v8 = vpop.xlane.xlu1 %2210 }
0x1115   :  { %2302 = vrot.lane.b32.xlu1 %v13486_v54, %s12375_s12  ;;  %2300 = vrot.lane.b32.xlu0 %v13488_v35, %s12375_s12  ;;  %v2244_v53 = vmul.f32 1.442695, %v2230_v62  ;;  %v2232_v36 = vmul.f32 1.442695, %v2224_v63  ;;  %v2227_v12 = vsub.f32 %v13461_v47, %v2211_v8  ;;  %v2225_v62 = vsub.f32 %v13463_v46, %v2205_v9 }
0x1116   :  { %v2236_v11 = vmul.f32 1.442695, %v2226_v52 }
0x1117   :  { %11619 = vpow2.f32 %v2244_v53  ;;  %v2238_v57 = vmul.f32 1.442695, %v2227_v12  ;;  %v2234_v53 = vmul.f32 1.442695, %v2225_v62 }
0x1118   :  { %11621 = vpow2.f32 %v2240_v10 }
0x1119   :  { %2298 = vrot.lane.b32.xlu0 %v13498_v18, %s12375_s12  ;;  %11623 = vpow2.f32 %v2236_v11 }
0x111a   :  { %11625 = vpow2.f32 %v2232_v36 }
0x111b   :  { %11627 = vpow2.f32 %v2238_v57 }
0x111c   :  { %11629 = vpow2.f32 %v2234_v53 }
0x111d   :  { %2296 = vrot.lane.b32.xlu0 %v13506_v3, %s12375_s12 }
0x1124   :  { %v13511_v38 = vpop.eup %11619 }
0x1125   :  { %v2266_v33 = vsel %vm422_vm2, %v13511_v38, 0.0  ;;  %v13516_v16 = vpop.eup %11621 }
0x1126   :  { %v2260_v45 = vsel %vm422_vm2, %v13516_v16, 0.0  ;;  %v13526_v49 = vpop.eup %11623 }
0x1127   :  { %v2254_v20 = vsel %vm422_vm2, %v13526_v49, 0.0  ;;  %v11626_v6 = vpop.eup %11625 }
0x1128   :  { %v2248_v40 = vsel %vm422_vm2, %v11626_v6, 0.0  ;;  %v11628_v10 = vpop.eup %11627 }
0x1129   :  { %v2257_v47 = vsel %vm422_vm2, %v11628_v10, 0.0 }
0x1139   :  { %2222 = vmax.xlane.f32.xlu1 %v2221_v1  ;;  %v11630_v1 = vpop.eup %11629 }
0x113a   :  { %v2251_v46 = vsel %vm422_vm2, %v11630_v1, 0.0 }
0x113c   :  { %2267 = vadd.xlane.f32.xlu0 %v2266_v33 }
0x113d   :  { %2216 = vmax.xlane.f32.xlu1 %v2215_v34 }
0x1140   :  { %2261 = vadd.xlane.f32.xlu0 %v2260_v45 }
0x114e   :  { %2411 = vrot.lane.b32.xlu1 %v13393_v28, %s12378_s15 }
0x1172   :  { %2255 = vadd.xlane.f32.xlu1 %v2254_v20 }
0x1176   :  { %2249 = vadd.xlane.f32.xlu1 %v2248_v40 }
0x117a   :  { %2258 = vadd.xlane.f32.xlu1 %v2257_v47 }
0x117e   :  { %2252 = vadd.xlane.f32.xlu1 %v2251_v46 }
0x1187   :  { %v2303_v9 = vpop.permute.xlu1 %2302  ;;  %v2301_v33 = vpop.permute.xlu0 %2300 }
0x1188   :  { %10594 = vmatprep.subr.bf16.mxu1 %v2303_v9 }
0x1189   :  { %10595 = vmatpush3.bf16.msra.mxu1 %v2303_v9 }
0x118a   :  { %10596 = vmatprep.subr.bf16.mxu1 %v2301_v33 }
0x118b   :  { %v2299_v34 = vpop.permute.xlu0 %2298 }
0x118d   :  { %10597 = vmatpush3.bf16.msra.mxu1 %v2301_v33 }
0x118e   :  { %10598 = vmatprep.subr.bf16.mxu1 %v2299_v34 }
0x118f   :  { %2409 = vrot.lane.b32.xlu1 %v13397_v13, %s12378_s15  ;;  %v2297_v45 = vpop.permute.xlu0 %2296 }
0x1191   :  { %10599 = vmatpush3.bf16.msra.mxu1 %v2299_v34 }
0x1192   :  { %10600 = vmatprep.subr.bf16.mxu1 %v2297_v45 }
0x1195   :  { %10601 = vmatpush3.bf16.msra.mxu1 %v2297_v45 }
0x11c2   :  { %v2223_v5 = vpop.xlane.xlu1 %2222 }
0x11c3   :  { %v2231_v52 = vsub.f32 %v10593_v7, %v2223_v5 }
0x11c5   :  { %v2246_v63 = vmul.f32 1.442695, %v2231_v52 }
0x11c6   :  { %v2217_v11 = vpop.xlane.xlu1 %2216 }
0x11c7   :  { %11631 = vpow2.f32 %v2246_v63  ;;  %v2229_v8 = vsub.f32 %v2188_v44, %v2217_v11 }
0x11c9   :  { %v2242_v36 = vmul.f32 1.442695, %v2229_v8 }
0x11ca   :  { %v2412_v12 = vpop.permute.xlu1 %2411 }
0x11cb   :  { %11633 = vpow2.f32 %v2242_v36  ;;  %11354 = vmatprep.subr.msk.bf16.mxu1 %vm332_vm1, %v2412_v12  ;;  %v2435_v36 = vsel %vm332_vm1, %v2412_v12, 0 }
0x11d4   :  { %v11632_v57 = vpop.eup %11631 }
0x11d5   :  { %v2269_v62 = vsel %vm422_vm2, %v11632_v57, 0.0 }
0x11d6   :  { %2270 = vadd.xlane.f32.xlu0 %v2269_v62 }
0x11d8   :  { %v11634_v53 = vpop.eup %11633 }
0x11d9   :  { %v2263_v20 = vsel %vm422_vm2, %v11634_v53, 0.0 }
0x11da   :  { %2264 = vadd.xlane.f32.xlu1 %v2263_v20 }
0x11eb   :  { %2407 = vrot.lane.b32.xlu1 %v13415_v30, %s12378_s15 }
0x11ec   :  { %2405 = vrot.lane.b32.xlu0 %v13429_v19, %s12378_s15 }
0x11ef   :  { %2393 = vrot.lane.b32.xlu1 %v13417_v14, %s12378_s15 }
0x11f0   :  { %2395 = vrot.lane.b32.xlu0 %v13441_v27, %s12378_s15 }
0x11f3   :  { %2397 = vrot.lane.b32.xlu1 %v13443_v48, %s12378_s15 }
0x11f4   :  { %2399 = vrot.lane.b32.xlu0 %v13451_v51, %s12378_s15 }
0x11f7   :  { %2600 = vrot.lane.b32.xlu1 %v13486_v54, %s12377_s14 }
0x11fb   :  { %v2256_v7 = vpop.xlane.xlu1 %2255 }
0x11ff   :  { %v2250_v44 = vpop.xlane.xlu1 %2249 }
0x1203   :  { %v2259_v40 = vpop.xlane.xlu1 %2258 }
0x1204   :  { %11635 = vrcp.f32 %v2259_v40 }
0x1205   :  { %11637 = vrcp.f32 %v2250_v44 }
0x1206   :  { %11639 = vrcp.f32 %v2256_v7 }
0x1207   :  { %v2253_v47 = vpop.xlane.xlu1 %2252 }
0x1208   :  { %11641 = vrcp.f32 %v2253_v47 }
0x120b   :  { %v2410_v62 = vpop.permute.xlu1 %2409 }
0x120c   :  { %v2432_v20 = vsel %vm332_vm1, %v2410_v62, 0 }
0x1211   :  { %v11636_v46 = vpop.eup %11635 }
0x1212   :  { %v11638_v9 = vpop.eup %11637  ;;  %v2283_v45 = vmul.f32 %v11636_v46, %v11628_v10  ;;  %v2268_v10 = vpop.xlane.xlu0 %2267 }
0x1213   :  { %v11640_v33 = vpop.eup %11639  ;;  %v2280_v5 = vmul.f32 %v11638_v9, %v11626_v6 }
0x1214   :  { %v2282_v63 = vmul.f32 %v11640_v33, %v13526_v49 }
0x1215   :  { %v11642_v34 = vpop.eup %11641 }
0x1216   :  { %v2281_v52 = vmul.f32 %v11642_v34, %v11630_v1  ;;  %v2289_v8 = vpack.c.bf16 %v2283_v45, %v2282_v63  ;;  %v2262_v6 = vpop.xlane.xlu0 %2261 }
0x1218   :  { %v2288_v11 = vpack.c.bf16 %v2281_v52, %v2280_v5 }
0x121a   :  { %10602 = vmatprep.mubr.msk.bf16.mxu1 %vm422_vm2, %v2288_v11 }
0x121b   :  { %10603 = vmatmul.mubr.msk.bf16.vlgmr.msra.gmra.mxu1 %vm422_vm2, %v2289_v8 }
0x121c   :  { %10611 = vmatpush3.bf16.xpose.msra.mxu1 %v2435_v36 }
0x121d   :  { %11355 = vmatprep.subr.msk.bf16.mxu1 %vm332_vm1, %v2410_v62 }
0x1224   :  { %10613 = vmatpush3.bf16.xpose.msra.mxu1 %v2432_v20 }
0x125f   :  { %v2271_v1 = vpop.xlane.xlu0 %2270 }
0x1260   :  { %11643 = vrcp.f32 %v2271_v1 }
0x1261   :  { %11645 = vrcp.f32 %v2262_v6 }
0x1262   :  { %11647 = vrcp.f32 %v2268_v10 }
0x1263   :  { %v2265_v49 = vpop.xlane.xlu1 %2264  ;;  %v2406_v44 = vpop.permute.xlu0 %2405 }
0x1264   :  { %11649 = vrcp.f32 %v2265_v49  ;;  %v2426_v34 = vsel %vm332_vm1, %v2406_v44, 0 }
0x1267   :  { %v2408_v7 = vpop.permute.xlu1 %2407  ;;  %v2396_v20 = vpop.permute.xlu0 %2395 }
0x1268   :  { %11356 = vmatprep.subr.msk.bf16.mxu1 %vm332_vm1, %v2408_v7  ;;  %v2429_v12 = vsel %vm332_vm1, %v2408_v7, 0 }
0x1269   :  { %10615 = vmatpush3.bf16.xpose.msra.mxu1 %v2429_v12 }
0x126a   :  { %11357 = vmatprep.subr.msk.bf16.mxu1 %vm332_vm1, %v2406_v44 }
0x126b   :  { %v2394_v40 = vpop.permute.xlu1 %2393 }
0x126d   :  { %v11644_v47 = vpop.eup %11643 }
0x126e   :  { %v11646_v46 = vpop.eup %11645  ;;  %v2287_v5 = vmul.f32 %v11644_v47, %v11632_v57 }
0x126f   :  { %v2398_v9 = vpop.permute.xlu1 %2397  ;;  %v11648_v33 = vpop.eup %11647  ;;  %v2284_v52 = vmul.f32 %v11646_v46, %v13516_v16 }
0x1270   :  { %v2286_v8 = vmul.f32 %v11648_v33, %v13511_v38  ;;  %v2400_v16 = vpop.permute.xlu0 %2399 }
0x1271   :  { %v11650_v45 = vpop.eup %11649  ;;  %10617 = vmatpush3.bf16.xpose.msra.mxu1 %v2426_v34 }
0x1272   :  { %v2285_v63 = vmul.f32 %v11650_v45, %v11634_v53  ;;  %v2291_v62 = vpack.c.bf16 %v2287_v5, %v2286_v8 }
0x1273   :  { %v2601_v11 = vpop.permute.xlu1 %2600 }
0x1274   :  { %10626 = vmatprep.subr.bf16.mxu0 %v2601_v11  ;;  %v2290_v36 = vpack.c.bf16 %v2285_v63, %v2284_v52 }
0x1275   :  { %10627 = vmatpush3.bf16.msra.mxu0 %v2601_v11 }
0x1276   :  { %10606 = vmatprep.mubr.msk.bf16.mxu1 %vm422_vm2, %v2290_v36 }
0x1277   :  { %10607 = vmatmul.mubr.msk.bf16.gmra.mxu1 %vm422_vm2, %v2291_v62 }
0x1278   :  { %10618 = vmatprep.mubr.msk.bf16.mxu1 %vm332_vm1, %v2394_v40 }
0x127f   :  { %10619 = vmatmul.mubr.msk.bf16.vlgmr.msra.gmra.mxu1 %vm332_vm1, %v2396_v20 }
0x1280   :  { %10622 = vmatprep.mubr.msk.bf16.mxu1 %vm332_vm1, %v2398_v9 }
0x1287   :  { %10623 = vmatmul.mubr.msk.bf16.gmra.mxu1 %vm332_vm1, %v2400_v16 }
0x12db   :  { %v13570_v57 = vpop.f32.mrf.mxu1 }
0x12dd   :  { %v13572_v38 = vpop.f32.mrf.mxu1 }
0x12df   :  { %v13574_v53 = vpop.f32.mrf.mxu1 }
0x12e1   :  { %v13578_v6 = vpop.f32.mrf.mxu1 }
0x1337   :  { %v13580_v1 = vpop.f32.mrf.mxu1 }
0x1339   :  { %v13582_v49 = vpop.f32.mrf.mxu1 }
0x133b   :  { %v13584_v7 = vpop.f32.mrf.mxu1 }
0x133d   :  { %v13588_v44 = vpop.f32.mrf.mxu1 }
0x133f   :  { %v10620_v40 = vpop.f32.mrf.mxu1 }
0x1340   :  { %v2508_v47 = vsel %vm422_vm2, %v10620_v40, -inf }
0x1341   :  { %2509 = vmax.xlane.f32.xlu0 %v2508_v47  ;;  %v2471_v46 = vpop.f32.mrf.mxu1 }
0x1342   :  { %v2502_v9 = vsel %vm422_vm2, %v2471_v46, -inf }
0x1343   :  { %2503 = vmax.xlane.f32.xlu1 %v2502_v9  ;;  %v10621_v33 = vpop.f32.mrf.mxu1 }
0x1344   :  { %v2511_v34 = vsel %vm422_vm2, %v10621_v33, -inf }
0x1345   :  { %2512 = vmax.xlane.f32.xlu0 %v2511_v34  ;;  %v2474_v45 = vpop.f32.mrf.mxu1 }
0x1346   :  { %v2505_v52 = vsel %vm422_vm2, %v2474_v45, -inf }
0x1347   :  { %v10624_v5 = vpop.f32.mrf.mxu1 }
0x1348   :  { %v2520_v63 = vsel %vm422_vm2, %v10624_v5, -inf }
0x1349   :  { %2506 = vmax.xlane.f32.xlu0 %v2505_v52  ;;  %2521 = vmax.xlane.f32.xlu1 %v2520_v63  ;;  %v2487_v11 = vpop.f32.mrf.mxu1 }
0x134a   :  { %v2514_v36 = vsel %vm422_vm2, %v2487_v11, -inf }
0x134b   :  { %v10625_v8 = vpop.f32.mrf.mxu1 }
0x134c   :  { %v2523_v62 = vsel %vm422_vm2, %v10625_v8, -inf }
0x134d   :  { %2515 = vmax.xlane.f32.xlu1 %v2514_v36  ;;  %2524 = vmax.xlane.f32.xlu0 %v2523_v62  ;;  %v2490_v20 = vpop.f32.mrf.mxu1 }
0x134e   :  { %v2517_v16 = vsel %vm422_vm2, %v2490_v20, -inf }
0x1351   :  { %2518 = vmax.xlane.f32.xlu0 %v2517_v16 }
0x135e   :  { %2596 = vrot.lane.b32.xlu1 %v13498_v18, %s12377_s14 }
0x1367   :  { %2598 = vrot.lane.b32.xlu0 %v13488_v35, %s12377_s14 }
0x13ca   :  { %v2510_v47 = vpop.xlane.xlu0 %2509 }
0x13cb   :  { %v2528_v9 = vsub.f32 %v10620_v40, %v2510_v47 }
0x13cc   :  { %v2504_v34 = vpop.xlane.xlu1 %2503 }
0x13cd   :  { %v2538_v52 = vmul.f32 1.442695, %v2528_v9  ;;  %v2526_v63 = vsub.f32 %v2471_v46, %v2504_v34 }
0x13ce   :  { %v2513_v61 = vpop.xlane.xlu0 %2512 }
0x13cf   :  { %11651 = vpow2.f32 %v2538_v52  ;;  %v2534_v41 = vmul.f32 1.442695, %v2526_v63  ;;  %v2529_v36 = vsub.f32 %v10621_v33, %v2513_v61 }
0x13d1   :  { %11653 = vpow2.f32 %v2534_v41  ;;  %v2540_v62 = vmul.f32 1.442695, %v2529_v36 }
0x13d2   :  { %v2507_v12 = vpop.xlane.xlu0 %2506  ;;  %v2522_v10 = vpop.xlane.xlu1 %2521 }
0x13d3   :  { %11655 = vpow2.f32 %v2540_v62  ;;  %v2527_v16 = vsub.f32 %v2474_v45, %v2507_v12  ;;  %v2532_v9 = vsub.f32 %v10624_v5, %v2522_v10 }
0x13d5   :  { %v2536_v0 = vmul.f32 1.442695, %v2527_v16  ;;  %v2546_v52 = vmul.f32 1.442695, %v2532_v9 }
0x13d6   :  { %v2525_v4 = vpop.xlane.xlu0 %2524  ;;  %v2516_v60 = vpop.xlane.xlu1 %2515 }
0x13d7   :  { %11657 = vpow2.f32 %v2536_v0  ;;  %v2530_v34 = vsub.f32 %v2487_v11, %v2516_v60  ;;  %v2533_v63 = vsub.f32 %v10625_v8, %v2525_v4 }
0x13d8   :  { %11659 = vpow2.f32 %v2546_v52 }
0x13d9   :  { %v2542_v36 = vmul.f32 1.442695, %v2530_v34  ;;  %v2548_v16 = vmul.f32 1.442695, %v2533_v63 }
0x13da   :  { %v2519_v29 = vpop.xlane.xlu0 %2518  ;;  %v2597_v33 = vpop.permute.xlu1 %2596 }
0x13db   :  { %v2531_v62 = vsub.f32 %v2490_v20, %v2519_v29  ;;  %11661 = vpow2.f32 %v2542_v36 }
0x13dc   :  { %v13602_v37 = vpop.eup %11651  ;;  %11663 = vpow2.f32 %v2548_v16 }
0x13dd   :  { %v2556_v40 = vsel %vm422_vm2, %v13602_v37, 0.0 }
0x13de   :  { %v13606_v46 = vpop.eup %11653  ;;  %2557 = vadd.xlane.f32.xlu1 %v2556_v40  ;;  %v2599_v61 = vpop.permute.xlu0 %2598  ;;  %v2544_v40 = vmul.f32 1.442695, %v2531_v62 }
0x13df   :  { %10628 = vmatprep.subr.bf16.mxu0 %v2599_v61  ;;  %v2550_v12 = vsel %vm422_vm2, %v13606_v46, 0.0 }
0x13e0   :  { %v13608_v41 = vpop.eup %11655  ;;  %10629 = vmatpush3.bf16.msra.mxu0 %v2599_v61  ;;  %11665 = vpow2.f32 %v2544_v40 }
0x13e1   :  { %10630 = vmatprep.subr.bf16.mxu0 %v2597_v33  ;;  %v2559_v0 = vsel %vm422_vm2, %v13608_v41, 0.0 }
0x13e2   :  { %2560 = vadd.xlane.f32.xlu0 %v2559_v0  ;;  %2551 = vadd.xlane.f32.xlu1 %v2550_v12 }
0x13e4   :  { %v11658_v45 = vpop.eup %11657  ;;  %10631 = vmatpush3.bf16.msra.mxu0 %v2597_v33 }
0x13e5   :  { %v2553_v47 = vsel %vm422_vm2, %v11658_v45, 0.0  ;;  %v13621_v61 = vpop.eup %11659 }
0x13e6   :  { %2554 = vadd.xlane.f32.xlu0 %v2553_v47  ;;  %v2568_v10 = vsel %vm422_vm2, %v13621_v61, 0.0 }
0x13e8   :  { %v13623_v33 = vpop.eup %11661 }
0x13e9   :  { %v13625_v0 = vpop.eup %11663  ;;  %v2562_v60 = vsel %vm422_vm2, %v13623_v33, 0.0 }
0x13ea   :  { %v2571_v5 = vsel %vm422_vm2, %v13625_v0, 0.0 }
0x13ed   :  { %v13631_v4 = vpop.eup %11665 }
0x13ee   :  { %v2565_v29 = vsel %vm422_vm2, %v13631_v4, 0.0 }
0x13f3   :  { %2701 = vrot.lane.b32.xlu1 %v13393_v28, %s12381_s18 }
0x13f7   :  { %2699 = vrot.lane.b32.xlu1 %v13397_v13, %s12381_s18 }
0x13fc   :  { %2594 = vrot.lane.b32.xlu0 %v13506_v3, %s12377_s14 }
0x141b   :  { %2569 = vadd.xlane.f32.xlu0 %v2568_v10  ;;  %2563 = vadd.xlane.f32.xlu1 %v2562_v60 }
0x141f   :  { %2566 = vadd.xlane.f32.xlu0 %v2565_v29  ;;  %2572 = vadd.xlane.f32.xlu1 %v2571_v5 }
0x1430   :  { %2697 = vrot.lane.b32.xlu1 %v13415_v30, %s12381_s18 }
0x1434   :  { %2687 = vrot.lane.b32.xlu1 %v13417_v14, %s12381_s18 }
0x1435   :  { %2695 = vrot.lane.b32.xlu0 %v13429_v19, %s12381_s18 }
0x1438   :  { %2691 = vrot.lane.b32.xlu1 %v13443_v48, %s12381_s18 }
0x1439   :  { %2689 = vrot.lane.b32.xlu0 %v13441_v27, %s12381_s18 }
0x143c   :  { %2890 = vrot.lane.b32.xlu1 %v13486_v54, %s12380_s17 }
0x143d   :  { %2693 = vrot.lane.b32.xlu0 %v13451_v51, %s12381_s18 }
0x1467   :  { %v2558_v11 = vpop.xlane.xlu1 %2557 }
0x146b   :  { %v2561_v8 = vpop.xlane.xlu0 %2560  ;;  %v2552_v20 = vpop.xlane.xlu1 %2551 }
0x146c   :  { %11667 = vrcp.f32 %v2561_v8 }
0x146d   :  { %11669 = vrcp.f32 %v2552_v20 }
0x146e   :  { %11671 = vrcp.f32 %v2558_v11 }
0x146f   :  { %v2555_v12 = vpop.xlane.xlu0 %2554  ;;  %v2702_v9 = vpop.permute.xlu1 %2701 }
0x1470   :  { %11673 = vrcp.f32 %v2555_v12  ;;  %v2725_v5 = vsel %vm332_vm1, %v2702_v9, 0 }
0x1473   :  { %v2595_v47 = vpop.permute.xlu0 %2594  ;;  %v2700_v11 = vpop.permute.xlu1 %2699 }
0x1474   :  { %10632 = vmatprep.subr.bf16.mxu0 %v2595_v47  ;;  %v2722_v8 = vsel %vm332_vm1, %v2700_v11, 0 }
0x1475   :  { %10633 = vmatpush3.bf16.msra.mxu0 %v2595_v47 }
0x1476   :  { %11358 = vmatprep.subr.msk.bf16.mxu0 %vm332_vm1, %v2702_v9 }
0x1479   :  { %v11668_v34 = vpop.eup %11667 }
0x147a   :  { %v11670_v52 = vpop.eup %11669  ;;  %v2585_v62 = vmul.f32 %v11668_v34, %v13608_v41 }
0x147b   :  { %v11672_v63 = vpop.eup %11671  ;;  %v2582_v16 = vmul.f32 %v11670_v52, %v13606_v46 }
0x147c   :  { %v2584_v10 = vmul.f32 %v11672_v63, %v13602_v37 }
0x147d   :  { %v11674_v36 = vpop.eup %11673 }
0x147e   :  { %v2583_v40 = vmul.f32 %v11674_v36, %v11658_v45  ;;  %v2591_v29 = vpack.c.bf16 %v2585_v62, %v2584_v10 }
0x1480   :  { %v2590_v60 = vpack.c.bf16 %v2583_v40, %v2582_v16 }
0x1482   :  { %10634 = vmatprep.mubr.msk.bf16.mxu0 %vm422_vm2, %v2590_v60 }
0x1483   :  { %10635 = vmatmul.mubr.msk.bf16.vlgmr.msra.gmra.mxu0 %vm422_vm2, %v2591_v29 }
0x1484   :  { %10643 = vmatpush3.bf16.xpose.msra.mxu0 %v2725_v5 }
0x1485   :  { %11359 = vmatprep.subr.msk.bf16.mxu0 %vm332_vm1, %v2700_v11 }
0x148c   :  { %10645 = vmatpush3.bf16.xpose.msra.mxu0 %v2722_v8 }
0x14a4   :  { %v2570_v41 = vpop.xlane.xlu0 %2569  ;;  %v2564_v46 = vpop.xlane.xlu1 %2563 }
0x14a5   :  { %11675 = vrcp.f32 %v2564_v46 }
0x14a6   :  { %11677 = vrcp.f32 %v2570_v41 }
0x14a8   :  { %v2567_v37 = vpop.xlane.xlu0 %2566  ;;  %v2573_v45 = vpop.xlane.xlu1 %2572 }
0x14a9   :  { %11679 = vrcp.f32 %v2567_v37 }
0x14aa   :  { %11681 = vrcp.f32 %v2573_v45 }
0x14ac   :  { %v2698_v20 = vpop.permute.xlu1 %2697  ;;  %v2696_v47 = vpop.permute.xlu0 %2695 }
0x14ad   :  { %11360 = vmatprep.subr.msk.bf16.mxu0 %vm332_vm1, %v2698_v20  ;;  %v2719_v12 = vsel %vm332_vm1, %v2698_v20, 0  ;;  %v2716_v36 = vsel %vm332_vm1, %v2696_v47, 0 }
0x14ae   :  { %10647 = vmatpush3.bf16.xpose.msra.mxu0 %v2719_v12 }
0x14af   :  { %11361 = vmatprep.subr.msk.bf16.mxu0 %vm332_vm1, %v2696_v47 }
0x14b0   :  { %v2688_v9 = vpop.permute.xlu1 %2687  ;;  %v2690_v41 = vpop.permute.xlu0 %2689 }
0x14b2   :  { %v11676_v34 = vpop.eup %11675 }
0x14b3   :  { %v11678_v63 = vpop.eup %11677  ;;  %v2586_v40 = vmul.f32 %v11676_v34, %v13623_v33 }
0x14b4   :  { %v2692_v52 = vpop.permute.xlu1 %2691  ;;  %v2588_v29 = vmul.f32 %v11678_v63, %v13621_v61  ;;  %v2694_v33 = vpop.permute.xlu0 %2693 }
0x14b6   :  { %v11680_v62 = vpop.eup %11679  ;;  %10649 = vmatpush3.bf16.xpose.msra.mxu0 %v2716_v36 }
0x14b7   :  { %v11682_v16 = vpop.eup %11681  ;;  %v2587_v10 = vmul.f32 %v11680_v62, %v13631_v4 }
0x14b8   :  { %v2891_v60 = vpop.permute.xlu1 %2890  ;;  %v2589_v5 = vmul.f32 %v11682_v16, %v13625_v0 }
0x14b9   :  { %10658 = vmatprep.subr.bf16.mxu1 %v2891_v60  ;;  %v2592_v11 = vpack.c.bf16 %v2587_v10, %v2586_v40 }
0x14ba   :  { %10659 = vmatpush3.bf16.msra.mxu1 %v2891_v60  ;;  %v2593_v8 = vpack.c.bf16 %v2589_v5, %v2588_v29 }
0x14bb   :  { %10638 = vmatprep.mubr.msk.bf16.mxu0 %vm422_vm2, %v2592_v11 }
0x14bc   :  { %10639 = vmatmul.mubr.msk.bf16.gmra.mxu0 %vm422_vm2, %v2593_v8 }
0x14bd   :  { %10650 = vmatprep.mubr.msk.bf16.mxu0 %vm332_vm1, %v2688_v9 }
0x14c4   :  { %10651 = vmatmul.mubr.msk.bf16.vlgmr.msra.gmra.mxu0 %vm332_vm1, %v2690_v41 }
0x14c5   :  { %10654 = vmatprep.mubr.msk.bf16.mxu0 %vm332_vm1, %v2692_v52 }
0x14cc   :  { %10655 = vmatmul.mubr.msk.bf16.gmra.mxu0 %vm332_vm1, %v2694_v33 }
0x1543   :  { %v13674_v61 = vpop.f32.mrf.mxu0 }
0x1545   :  { %v13676_v0 = vpop.f32.mrf.mxu0 }
0x1547   :  { %v13678_v4 = vpop.f32.mrf.mxu0 }
0x1549   :  { %v13682_v37 = vpop.f32.mrf.mxu0 }
0x157c   :  { %v13684_v45 = vpop.f32.mrf.mxu0 }
0x157e   :  { %v13686_v20 = vpop.f32.mrf.mxu0 }
0x1580   :  { %v13688_v12 = vpop.f32.mrf.mxu0 }
0x1582   :  { %v13692_v9 = vpop.f32.mrf.mxu0 }
0x1584   :  { %v10652_v34 = vpop.f32.mrf.mxu0 }
0x1585   :  { %v2798_v52 = vsel %vm422_vm2, %v10652_v34, -inf }
0x1586   :  { %2799 = vmax.xlane.f32.xlu0 %v2798_v52  ;;  %v2761_v63 = vpop.f32.mrf.mxu0 }
0x1587   :  { %v2792_v36 = vsel %vm422_vm2, %v2761_v63, -inf }
0x1588   :  { %2793 = vmax.xlane.f32.xlu1 %v2792_v36  ;;  %v10653_v62 = vpop.f32.mrf.mxu0 }
0x1589   :  { %v2801_v16 = vsel %vm422_vm2, %v10653_v62, -inf }
0x158a   :  { %2802 = vmax.xlane.f32.xlu0 %v2801_v16  ;;  %v2764_v40 = vpop.f32.mrf.mxu0 }
0x158b   :  { %v2795_v60 = vsel %vm422_vm2, %v2764_v40, -inf }
0x158c   :  { %v10656_v10 = vpop.f32.mrf.mxu0 }
0x158d   :  { %v2810_v29 = vsel %vm422_vm2, %v10656_v10, -inf }
0x158e   :  { %2796 = vmax.xlane.f32.xlu0 %v2795_v60  ;;  %2811 = vmax.xlane.f32.xlu1 %v2810_v29  ;;  %v2777_v5 = vpop.f32.mrf.mxu0 }
0x158f   :  { %v2804_v8 = vsel %vm422_vm2, %v2777_v5, -inf }
0x1590   :  { %v10657_v11 = vpop.f32.mrf.mxu0 }
0x1591   :  { %v2813_v41 = vsel %vm422_vm2, %v10657_v11, -inf }
0x1592   :  { %2805 = vmax.xlane.f32.xlu1 %v2804_v8  ;;  %2814 = vmax.xlane.f32.xlu0 %v2813_v41  ;;  %v2780_v33 = vpop.f32.mrf.mxu0 }
0x1593   :  { %v2807_v52 = vsel %vm422_vm2, %v2780_v33, -inf }
0x1596   :  { %2808 = vmax.xlane.f32.xlu0 %v2807_v52 }
0x15a3   :  { %2886 = vrot.lane.b32.xlu1 %v13498_v18, %s12380_s17 }
0x15ac   :  { %2888 = vrot.lane.b32.xlu0 %v13488_v35, %s12380_s17 }
0x160f   :  { %v2800_v36 = vpop.xlane.xlu0 %2799 }
0x1610   :  { %v2818_v16 = vsub.f32 %v10652_v34, %v2800_v36 }
0x1611   :  { %v2794_v60 = vpop.xlane.xlu1 %2793 }
0x1612   :  { %v2828_v29 = vmul.f32 1.442695, %v2818_v16  ;;  %v2816_v47 = vsub.f32 %v2761_v63, %v2794_v60 }
0x1613   :  { %v2803_v46 = vpop.xlane.xlu0 %2802 }
0x1614   :  { %11683 = vpow2.f32 %v2828_v29  ;;  %v2824_v50 = vmul.f32 1.442695, %v2816_v47  ;;  %v2819_v8 = vsub.f32 %v10653_v62, %v2803_v46 }
0x1616   :  { %11685 = vpow2.f32 %v2824_v50  ;;  %v2830_v41 = vmul.f32 1.442695, %v2819_v8 }
0x1617   :  { %v2797_v56 = vpop.xlane.xlu0 %2796  ;;  %v2812_v42 = vpop.xlane.xlu1 %2811 }
0x1618   :  { %11687 = vpow2.f32 %v2830_v41  ;;  %v2817_v52 = vsub.f32 %v2764_v40, %v2797_v56  ;;  %v2822_v36 = vsub.f32 %v10656_v10, %v2812_v42 }
0x161a   :  { %v2826_v25 = vmul.f32 1.442695, %v2817_v52  ;;  %v2836_v60 = vmul.f32 1.442695, %v2822_v36 }
0x161b   :  { %v2815_v24 = vpop.xlane.xlu0 %2814  ;;  %v2806_v32 = vpop.xlane.xlu1 %2805 }
0x161c   :  { %11689 = vpow2.f32 %v2826_v25  ;;  %v2820_v16 = vsub.f32 %v2777_v5, %v2806_v32  ;;  %v2823_v29 = vsub.f32 %v10657_v11, %v2815_v24 }
0x161d   :  { %11691 = vpow2.f32 %v2836_v60 }
0x161e   :  { %v2832_v8 = vmul.f32 1.442695, %v2820_v16  ;;  %v2838_v52 = vmul.f32 1.442695, %v2823_v29 }
0x161f   :  { %v2809_v21 = vpop.xlane.xlu0 %2808  ;;  %v2887_v47 = vpop.permute.xlu1 %2886 }
0x1620   :  { %v2821_v41 = vsub.f32 %v2780_v33, %v2809_v21  ;;  %11693 = vpow2.f32 %v2832_v8 }
0x1621   :  { %v13706_v39 = vpop.eup %11683  ;;  %11695 = vpow2.f32 %v2838_v52 }
0x1622   :  { %v2846_v34 = vsel %vm422_vm2, %v13706_v39, 0.0 }
0x1623   :  { %v13710_v63 = vpop.eup %11685  ;;  %2847 = vadd.xlane.f32.xlu1 %v2846_v34  ;;  %v2889_v46 = vpop.permute.xlu0 %2888  ;;  %v2834_v34 = vmul.f32 1.442695, %v2821_v41 }
0x1624   :  { %10660 = vmatprep.subr.bf16.mxu1 %v2889_v46  ;;  %v2840_v25 = vsel %vm422_vm2, %v13710_v63, 0.0 }
0x1625   :  { %v11688_v50 = vpop.eup %11687  ;;  %10661 = vmatpush3.bf16.msra.mxu1 %v2889_v46  ;;  %11697 = vpow2.f32 %v2834_v34 }
0x1626   :  { %10662 = vmatprep.subr.bf16.mxu1 %v2887_v47  ;;  %v2849_v56 = vsel %vm422_vm2, %v11688_v50, 0.0 }
0x1627   :  { %2850 = vadd.xlane.f32.xlu0 %v2849_v56  ;;  %2841 = vadd.xlane.f32.xlu1 %v2840_v25 }
0x1629   :  { %v11690_v62 = vpop.eup %11689  ;;  %10663 = vmatpush3.bf16.msra.mxu1 %v2887_v47 }
0x162a   :  { %v2843_v40 = vsel %vm422_vm2, %v11690_v62, 0.0  ;;  %v13722_v46 = vpop.eup %11691 }
0x162b   :  { %2844 = vadd.xlane.f32.xlu0 %v2843_v40  ;;  %v2858_v42 = vsel %vm422_vm2, %v13722_v46, 0.0 }
0x1638   :  { %2991 = vrot.lane.b32.xlu1 %v13393_v28, %s12384_s21  ;;  %v13724_v28 = vpop.eup %11693 }
0x1639   :  { %v2852_v24 = vsel %vm422_vm2, %v13724_v28, 0.0 }
0x163c   :  { %2989 = vrot.lane.b32.xlu1 %v13397_v13, %s12384_s21  ;;  %v13726_v13 = vpop.eup %11695 }
0x163d   :  { %v13732_v32 = vpop.eup %11697  ;;  %v2861_v10 = vsel %vm422_vm2, %v13726_v13, 0.0 }
0x163e   :  { %v2855_v21 = vsel %vm422_vm2, %v13732_v32, 0.0 }
0x1641   :  { %2884 = vrot.lane.b32.xlu0 %v13506_v3, %s12380_s17 }
0x1660   :  { %2859 = vadd.xlane.f32.xlu0 %v2858_v42  ;;  %2853 = vadd.xlane.f32.xlu1 %v2852_v24 }
0x1664   :  { %2856 = vadd.xlane.f32.xlu0 %v2855_v21  ;;  %2862 = vadd.xlane.f32.xlu1 %v2861_v10 }
0x1675   :  { %2987 = vrot.lane.b32.xlu1 %v13415_v30, %s12384_s21 }
0x1679   :  { %2977 = vrot.lane.b32.xlu1 %v13417_v14, %s12384_s21 }
0x167a   :  { %2985 = vrot.lane.b32.xlu0 %v13429_v19, %s12384_s21 }
0x167d   :  { %2981 = vrot.lane.b32.xlu1 %v13443_v48, %s12384_s21 }
0x167e   :  { %2979 = vrot.lane.b32.xlu0 %v13441_v27, %s12384_s21 }
0x1682   :  { %2983 = vrot.lane.b32.xlu0 %v13451_v51, %s12384_s21 }
0x16ac   :  { %v2848_v5 = vpop.xlane.xlu1 %2847 }
0x16b0   :  { %v2851_v11 = vpop.xlane.xlu0 %2850  ;;  %v2842_v33 = vpop.xlane.xlu1 %2841 }
0x16b1   :  { %11699 = vrcp.f32 %v2851_v11 }
0x16b2   :  { %11701 = vrcp.f32 %v2842_v33 }
0x16b3   :  { %11703 = vrcp.f32 %v2848_v5 }
0x16b4   :  { %v2845_v30 = vpop.xlane.xlu0 %2844  ;;  %v2992_v19 = vpop.permute.xlu1 %2991 }
0x16b5   :  { %11705 = vrcp.f32 %v2845_v30  ;;  %v3015_v29 = vsel %vm332_vm1, %v2992_v19, 0 }
0x16b8   :  { %v2885_v14 = vpop.permute.xlu0 %2884  ;;  %v2990_v8 = vpop.permute.xlu1 %2989 }
0x16b9   :  { %10664 = vmatprep.subr.bf16.mxu1 %v2885_v14  ;;  %v3012_v41 = vsel %vm332_vm1, %v2990_v8, 0 }
0x16ba   :  { %10665 = vmatpush3.bf16.msra.mxu1 %v2885_v14 }
0x16bb   :  { %11362 = vmatprep.subr.msk.bf16.mxu1 %vm332_vm1, %v2992_v19 }
0x16be   :  { %v11700_v48 = vpop.eup %11699 }
0x16bf   :  { %v11702_v47 = vpop.eup %11701  ;;  %v2875_v25 = vmul.f32 %v11700_v48, %v11688_v50 }
0x16c0   :  { %v11704_v27 = vpop.eup %11703  ;;  %v2872_v51 = vmul.f32 %v11702_v47, %v13710_v63 }
0x16c1   :  { %v2874_v36 = vmul.f32 %v11704_v27, %v13706_v39 }
0x16c2   :  { %v11706_v56 = vpop.eup %11705 }
0x16c3   :  { %v2873_v40 = vmul.f32 %v11706_v56, %v11690_v62  ;;  %v2881_v60 = vpack.c.bf16 %v2875_v25, %v2874_v36 }
0x16c5   :  { %v2880_v16 = vpack.c.bf16 %v2873_v40, %v2872_v51 }
0x16c7   :  { %10666 = vmatprep.mubr.msk.bf16.mxu1 %vm422_vm2, %v2880_v16 }
0x16c8   :  { %10667 = vmatmul.mubr.msk.bf16.vlgmr.msra.gmra.mxu1 %vm422_vm2, %v2881_v60 }
0x16c9   :  { %10675 = vmatpush3.bf16.xpose.msra.mxu1 %v3015_v29 }
0x16ca   :  { %11363 = vmatprep.subr.msk.bf16.mxu1 %vm332_vm1, %v2990_v8 }
0x16d1   :  { %10677 = vmatpush3.bf16.xpose.msra.mxu1 %v3012_v41 }
0x16e9   :  { %v2860_v50 = vpop.xlane.xlu0 %2859  ;;  %v2854_v63 = vpop.xlane.xlu1 %2853 }
0x16ea   :  { %11707 = vrcp.f32 %v2854_v63 }
0x16eb   :  { %11709 = vrcp.f32 %v2860_v50 }
0x16ed   :  { %v2857_v39 = vpop.xlane.xlu0 %2856  ;;  %v2863_v62 = vpop.xlane.xlu1 %2862 }
0x16ee   :  { %11711 = vrcp.f32 %v2857_v39 }
0x16ef   :  { %11713 = vrcp.f32 %v2863_v62 }
0x16f1   :  { %v2988_v52 = vpop.permute.xlu1 %2987  ;;  %v2986_v42 = vpop.permute.xlu0 %2985 }
0x16f2   :  { %11364 = vmatprep.subr.msk.bf16.mxu1 %vm332_vm1, %v2988_v52  ;;  %v3009_v34 = vsel %vm332_vm1, %v2988_v52, 0  ;;  %v3006_v10 = vsel %vm332_vm1, %v2986_v42, 0 }
0x16f3   :  { %10679 = vmatpush3.bf16.xpose.msra.mxu1 %v3009_v34 }
0x16f4   :  { %11365 = vmatprep.subr.msk.bf16.mxu1 %vm332_vm1, %v2986_v42 }
0x16f5   :  { %v2978_v27 = vpop.permute.xlu1 %2977  ;;  %v2980_v56 = vpop.permute.xlu0 %2979 }
0x16f7   :  { %v11708_v24 = vpop.eup %11707 }
0x16f8   :  { %v11710_v21 = vpop.eup %11709  ;;  %v2876_v33 = vmul.f32 %v11708_v24, %v13724_v28 }
0x16f9   :  { %v2878_v14 = vmul.f32 %v11710_v21, %v13722_v46  ;;  %v2982_v25 = vpop.permute.xlu1 %2981  ;;  %v2984_v46 = vpop.permute.xlu0 %2983 }
0x16fb   :  { %v11712_v5 = vpop.eup %11711  ;;  %10681 = vmatpush3.bf16.xpose.msra.mxu1 %v3006_v10 }
0x16fc   :  { %v11714_v11 = vpop.eup %11713  ;;  %10718 = vmatprep.subr.bf16.mxu1 %v13311_v2  ;;  %v2877_v30 = vmul.f32 %v11712_v5, %v13732_v32 }
0x16fd   :  { %v2879_v19 = vmul.f32 %v11714_v11, %v13726_v13 }
0x16fe   :  { %v2882_v48 = vpack.c.bf16 %v2877_v30, %v2876_v33 }
0x16ff   :  { %v2883_v47 = vpack.c.bf16 %v2879_v19, %v2878_v14 }
0x1700   :  { %10670 = vmatprep.mubr.msk.bf16.mxu1 %vm422_vm2, %v2882_v48 }
0x1701   :  { %10671 = vmatmul.mubr.msk.bf16.gmra.mxu1 %vm422_vm2, %v2883_v47 }
0x1702   :  { %10682 = vmatprep.mubr.msk.bf16.mxu1 %vm332_vm1, %v2978_v27 }
0x1709   :  { %10683 = vmatmul.mubr.msk.bf16.vlgmr.msra.gmra.mxu1 %vm332_vm1, %v2980_v56 }
0x170a   :  { %10719 = vmatpush3.bf16.msra.mxu1 %v13311_v2  ;;  %10686 = vmatprep.mubr.msk.bf16.mxu1 %vm332_vm1, %v2982_v25 }
0x170b   :  { %10720 = vmatprep.subr.bf16.mxu1 %v13319_v58 }
0x170e   :  { %10721 = vmatpush3.bf16.msra.mxu1 %v13319_v58 }
0x1711   :  { %10687 = vmatmul.mubr.msk.bf16.gmra.mxu1 %vm332_vm1, %v2984_v46 }
0x1712   :  { %10722 = vmatprep.mubr.msk.bf16.mxu1 %vm41_vm0, %v13296_v23 }
0x1719   :  { %10723 = vmatmul.mubr.msk.bf16.vlgmr.msra.gmra.mxu1 %vm41_vm0, %v13303_v55 }
0x171a   :  { %10726 = vmatprep.mubr.msk.bf16.mxu1 %vm41_vm0, %v13322_v17 }
0x1721   :  { %10727 = vmatmul.mubr.msk.bf16.gmra.mxu1 %vm41_vm0, %v13334_v15 }
0x1788   :  { %v13784_v2 = vpop.f32.mrf.mxu1 }
0x178a   :  { %v13786_v28 = vpop.f32.mrf.mxu1 }
0x178c   :  { %v13788_v58 = vpop.f32.mrf.mxu1 }
0x178d   :  { %v2974_v13 = vpack.c.bf16 %v13788_v58, %v13784_v2 }
0x178e   :  { %v13792_v32 = vpop.f32.mrf.mxu1 }
0x17c1   :  { %v13794_v23 = vpop.f32.mrf.mxu1 }
0x17c3   :  { %v13796_v55 = vpop.f32.mrf.mxu1 }
0x17c5   :  { %v13798_v51 = vpop.f32.mrf.mxu1 }
0x17c6   :  { %v2976_v17 = vpack.c.bf16 %v13798_v51, %v13794_v23  ;;  %v2385_v23 = vpack.c.bf16 %v13578_v6, %v13572_v38 }
0x17c7   :  { %v13802_v15 = vpop.f32.mrf.mxu1 }
0x17c9   :  { %v10684_v40 = vpop.f32.mrf.mxu1 }
0x17ca   :  { %v3088_v36 = vsel %vm422_vm2, %v10684_v40, -inf }
0x17cb   :  { %3089 = vmax.xlane.f32.xlu0 %v3088_v36  ;;  %v3051_v16 = vpop.f32.mrf.mxu1 }
0x17cc   :  { %v3082_v60 = vsel %vm422_vm2, %v3051_v16, -inf }
0x17cd   :  { %3083 = vmax.xlane.f32.xlu1 %v3082_v60  ;;  %v10685_v29 = vpop.f32.mrf.mxu1 }
0x17ce   :  { %v3091_v39 = vsel %vm422_vm2, %v10685_v29, -inf }
0x17cf   :  { %v3054_v8 = vpop.f32.mrf.mxu1 }
0x17d0   :  { %v3085_v41 = vsel %vm422_vm2, %v3054_v8, -inf }
0x17d1   :  { %3086 = vmax.xlane.f32.xlu0 %v3085_v41  ;;  %v10688_v50 = vpop.f32.mrf.mxu1 }
0x17d2   :  { %v3100_v42 = vsel %vm422_vm2, %v10688_v50, -inf }
0x17d3   :  { %v3067_v63 = vpop.f32.mrf.mxu1 }
0x17d4   :  { %v3094_v62 = vsel %vm422_vm2, %v3067_v63, -inf }
0x17d5   :  { %3092 = vmax.xlane.f32.xlu0 %v3091_v39  ;;  %3095 = vmax.xlane.f32.xlu1 %v3094_v62  ;;  %v10689_v52 = vpop.f32.mrf.mxu1 }
0x17d6   :  { %v3103_v5 = vsel %vm422_vm2, %v10689_v52, -inf }
0x17d7   :  { %v3070_v34 = vpop.f32.mrf.mxu1 }
0x17d8   :  { %v3097_v24 = vsel %vm422_vm2, %v3070_v34, -inf }
0x17d9   :  { %3101 = vmax.xlane.f32.xlu1 %v3100_v42  ;;  %v10724_v21 = vpop.f32.mrf.mxu1  ;;  %3098 = vmax.xlane.f32.xlu0 %v3097_v24 }
0x17da   :  { %v3593_v33 = vadd.f32 %v10724_v21, %v13407_v43 }
0x17db   :  { %v3584_v10 = vpop.f32.mrf.mxu1 }
0x17dc   :  { %v3585_v19 = vadd.f32 %v3584_v10, %v13407_v43 }
0x17dd   :  { %v10725_v11 = vpop.f32.mrf.mxu1  ;;  %3104 = vmax.xlane.f32.xlu0 %v3103_v5 }
0x17de   :  { %v3596_v30 = vadd.f32 %v10725_v11, %v13407_v43 }
0x17df   :  { %v3587_v14 = vpop.f32.mrf.mxu1 }
0x17e0   :  { %v13815_v48 = vpack.c.bf16 %v3596_v30, %v3593_v33  ;;  %v3588_v47 = vadd.f32 %v3587_v14, %v13407_v43 }
0x17e2   :  { %v13818_v27 = vpack.c.bf16 %v3588_v47, %v3585_v19 }
0x17e4   :  { %10750 = vmatprep.mubr.msk.bf16.mxu1 %vm332_vm1, %v13818_v27 }
0x17ea   :  { %3180 = vrot.lane.b32.xlu1 %v13486_v54, %s12383_s20 }
0x1854   :  { %v3090_v56 = vpop.xlane.xlu0 %3089 }
0x1855   :  { %v3108_v25 = vsub.f32 %v10684_v40, %v3090_v56 }
0x1856   :  { %v3084_v46 = vpop.xlane.xlu1 %3083 }
0x1857   :  { %v3118_v36 = vmul.f32 1.442695, %v3108_v25  ;;  %v3106_v60 = vsub.f32 %v3051_v16, %v3084_v46 }
0x1859   :  { %11715 = vpow2.f32 %v3118_v36  ;;  %v3114_v41 = vmul.f32 1.442695, %v3106_v60 }
0x185a   :  { %v3087_v39 = vpop.xlane.xlu0 %3086 }
0x185b   :  { %11717 = vpow2.f32 %v3114_v41  ;;  %v3107_v62 = vsub.f32 %v3054_v8, %v3087_v39 }
0x185d   :  { %v3116_v10 = vmul.f32 1.442695, %v3107_v62 }
0x185e   :  { %v3093_v42 = vpop.xlane.xlu0 %3092  ;;  %v3096_v24 = vpop.xlane.xlu1 %3095 }
0x185f   :  { %v3109_v21 = vsub.f32 %v10685_v29, %v3093_v42  ;;  %v3110_v11 = vsub.f32 %v3067_v63, %v3096_v24 }
0x1861   :  { %v3120_v5 = vmul.f32 1.442695, %v3109_v21  ;;  %v3122_v16 = vmul.f32 1.442695, %v3110_v11  ;;  %v13857_v11 = vld [vmem:[%s16608_s2 + $0x14] ss:$8 sps:$4 sm:$0xff]  }
0x1862   :  { %v3099_v33 = vpop.xlane.xlu0 %3098  ;;  %v3102_v30 = vpop.xlane.xlu1 %3101 }
0x1863   :  { %11719 = vpow2.f32 %v3120_v5  ;;  %v3112_v54 = vsub.f32 %v10688_v50, %v3102_v30  ;;  %v3111_v40 = vsub.f32 %v3070_v34, %v3099_v33  ;;  %v2683_v33 = vpack.c.bf16 %v13682_v37, %v13676_v0 }
0x1864   :  { %11721 = vpow2.f32 %v3116_v10  ;;  %v2685_v0 = vpack.c.bf16 %v13692_v9, %v13686_v20  ;;  %v16668_v37 = vpack.c.bf16 %v13688_v12, %v13684_v45 }
0x1865   :  { %v3126_v14 = vmul.f32 1.442695, %v3112_v54  ;;  %v3124_v63 = vmul.f32 1.442695, %v3111_v40 }
0x1866   :  { %v13824_v19 = vpop.eup %11715  ;;  %v3105_v47 = vpop.xlane.xlu0 %3104 }
0x1867   :  { %v3181_v56 = vpop.permute.xlu1 %3180  ;;  %v3113_v25 = vsub.f32 %v10689_v52, %v3105_v47  ;;  %v3136_v29 = vsel %vm422_vm2, %v13824_v19, 0.0  ;;  %11723 = vpow2.f32 %v3126_v14 }
0x1868   :  { %10690 = vmatprep.subr.bf16.mxu0 %v3181_v56  ;;  %v13828_v8 = vpop.eup %11717  ;;  %3137 = vadd.xlane.f32.xlu1 %v3136_v29  ;;  %11725 = vpow2.f32 %v3122_v16 }
0x1869   :  { %10691 = vmatpush3.bf16.msra.mxu0 %v3181_v56  ;;  %v3128_v50 = vmul.f32 1.442695, %v3113_v25  ;;  %v3130_v34 = vsel %vm422_vm2, %v13828_v8, 0.0 }
0x186b   :  { %11727 = vpow2.f32 %v3128_v50 }
0x186c   :  { %3131 = vadd.xlane.f32.xlu1 %v3130_v34  ;;  %11729 = vpow2.f32 %v3124_v63 }
0x1870   :  { %v13832_v46 = vpop.eup %11719 }
0x1871   :  { %v3139_v52 = vsel %vm422_vm2, %v13832_v46, 0.0  ;;  %v11722_v36 = vpop.eup %11721 }
0x1872   :  { %3140 = vadd.xlane.f32.xlu0 %v3139_v52  ;;  %v3133_v41 = vsel %vm422_vm2, %v11722_v36, 0.0 }
0x1874   :  { %v13836_v60 = vpop.eup %11723 }
0x1875   :  { %v3148_v39 = vsel %vm422_vm2, %v13836_v60, 0.0  ;;  %v13841_v62 = vpop.eup %11725 }
0x1876   :  { %3134 = vadd.xlane.f32.xlu0 %v3133_v41  ;;  %3149 = vadd.xlane.f32.xlu1 %v3148_v39  ;;  %v3142_v10 = vsel %vm422_vm2, %v13841_v62, 0.0 }
0x1878   :  { %v13843_v42 = vpop.eup %11727 }
0x1879   :  { %v3151_v24 = vsel %vm422_vm2, %v13843_v42, 0.0  ;;  %v11730_v21 = vpop.eup %11729 }
0x187a   :  { %3152 = vadd.xlane.f32.xlu0 %v3151_v24  ;;  %3143 = vadd.xlane.f32.xlu1 %v3142_v10  ;;  %v3145_v5 = vsel %vm422_vm2, %v11730_v21, 0.0 }
0x187e   :  { %3146 = vadd.xlane.f32.xlu0 %v3145_v5 }
0x188b   :  { %3176 = vrot.lane.b32.xlu1 %v13498_v18, %s12383_s20  ;;  %v13868_v18 = vld [vmem:[%s16608_s2 + $0x4] ss:$8 sps:$4 sm:$0xff]  }
0x188f   :  { %3174 = vrot.lane.b32.xlu1 %v13506_v3, %s12383_s20  ;;  %v2973_v3 = vpack.c.bf16 %v13792_v32, %v13786_v28 }
0x1893   :  { %3337 = vrot.lane.b32.xlu1 %v13857_v11, %s12374_s11 }
0x1894   :  { %3178 = vrot.lane.b32.xlu0 %v13488_v35, %s12383_s20  ;;  %v16667_v35 = vpack.c.bf16 %v13678_v4, %v13674_v61 }
0x1897   :  { %3335 = vrot.lane.b32.xlu1 %v13868_v18, %s12374_s11 }
0x1898   :  { %3271 = vrot.lane.b32.xlu0 %v2683_v33, %s12387_s28 }
0x189b   :  { %3283 = vrot.lane.b32.xlu1 %v2973_v3, %s12386_s27 }
0x189c   :  { %3273 = vrot.lane.b32.xlu0 %v16667_v35, %s12387_s28 }
0x189f   :  { %3275 = vrot.lane.b32.xlu1 %v2685_v0, %s12387_s28 }
0x18a0   :  { %3285 = vrot.lane.b32.xlu0 %v2974_v13, %s12386_s27 }
0x18a4   :  { %3277 = vrot.lane.b32.xlu0 %v16668_v37, %s12387_s28 }
0x18f1   :  { %v3138_v28 = vpop.xlane.xlu1 %3137 }
0x18f5   :  { %v3132_v32 = vpop.xlane.xlu1 %3131 }
0x18f6   :  { %11731 = vrcp.f32 %v3132_v32 }
0x18fb   :  { %v3141_v30 = vpop.xlane.xlu0 %3140 }
0x18ff   :  { %v3135_v61 = vpop.xlane.xlu0 %3134  ;;  %v3150_v4 = vpop.xlane.xlu1 %3149 }
0x1900   :  { %11733 = vrcp.f32 %v3135_v61 }
0x1901   :  { %11735 = vrcp.f32 %v3141_v30 }
0x1902   :  { %11737 = vrcp.f32 %v3138_v28 }
0x1903   :  { %v3153_v20 = vpop.xlane.xlu0 %3152  ;;  %v3144_v9 = vpop.xlane.xlu1 %3143 }
0x1904   :  { %11739 = vrcp.f32 %v3144_v9  ;;  %v11732_v58 = vpop.eup %11731 }
0x1905   :  { %v3162_v40 = vmul.f32 %v11732_v58, %v13828_v8 }
0x1907   :  { %v3147_v54 = vpop.xlane.xlu0 %3146  ;;  %v3177_v2 = vpop.permute.xlu1 %3176 }
0x1908   :  { %11741 = vrcp.f32 %v3147_v54 }
0x1909   :  { %11743 = vrcp.f32 %v3153_v20 }
0x190a   :  { %11745 = vrcp.f32 %v3150_v4 }
0x190b   :  { %v3179_v13 = vpop.permute.xlu0 %3178  ;;  %v3175_v12 = vpop.permute.xlu1 %3174 }
0x190c   :  { %10692 = vmatprep.subr.bf16.mxu0 %v3179_v13 }
0x190d   :  { %v11734_v45 = vpop.eup %11733  ;;  %10693 = vmatpush3.bf16.msra.mxu0 %v3179_v13 }
0x190e   :  { %10694 = vmatprep.subr.bf16.mxu0 %v3177_v2  ;;  %v3163_v14 = vmul.f32 %v11734_v45, %v11722_v36  ;;  %v11736_v16 = vpop.eup %11735 }
0x190f   :  { %v11738_v56 = vpop.eup %11737  ;;  %v3165_v25 = vmul.f32 %v11736_v16, %v13832_v46  ;;  %v13894_v63 = vpop.permute.xlu1 %3337 }
0x1910   :  { %v3170_v47 = vpack.c.bf16 %v3163_v14, %v3162_v40  ;;  %v3164_v50 = vmul.f32 %v11738_v56, %v13824_v19  ;;  %v3272_v4 = vpop.permute.xlu0 %3271 }
0x1911   :  { %10695 = vmatpush3.bf16.msra.mxu0 %v3177_v2  ;;  %v11740_v29 = vpop.eup %11739  ;;  %v16669_v2 = vpack.c.bf16 %v13574_v53, %v13570_v57  ;;  %v2387_v57 = vpack.c.bf16 %v13588_v44, %v13582_v49 }
0x1912   :  { %10696 = vmatprep.subr.bf16.mxu0 %v3175_v12  ;;  %10698 = vmatprep.mubr.msk.bf16.mxu0 %vm422_vm2, %v3170_v47  ;;  %v3171_v52 = vpack.c.bf16 %v3165_v25, %v3164_v50  ;;  %v3166_v8 = vmul.f32 %v11740_v29, %v13841_v62  ;;  %v16670_v47 = vpack.c.bf16 %v13584_v7, %v13580_v1  ;;  %v13953_v1 = vld [vmem:[%s16609_s3 + $0x8] sm:$0xff] }
0x1913   :  { %v13900_v24 = vpop.permute.xlu1 %3335  ;;  %v13957_v7 = vrot.slane %v13953_v1, %v13049_v26 }
0x1914   :  { %v3274_v20 = vpop.permute.xlu0 %3273 }
0x1915   :  { %v11742_v34 = vpop.eup %11741  ;;  %10697 = vmatpush3.bf16.msra.mxu0 %v3175_v12  ;;  %v3308_v58 = vsel %vm332_vm1, %v16669_v2, %v3274_v20 }
0x1916   :  { %v3167_v36 = vmul.f32 %v11742_v34, %v11730_v21  ;;  %10706 = vmatprep.subr.bf16.mxu0 %v13894_v63  ;;  %v11744_v41 = vpop.eup %11743 }
0x1917   :  { %v11746_v39 = vpop.eup %11745  ;;  %v3169_v19 = vmul.f32 %v11744_v41, %v13843_v42  ;;  %v3284_v54 = vpop.permute.xlu1 %3283 }
0x1918   :  { %10699 = vmatmul.mubr.msk.bf16.vlgmr.msra.gmra.mxu0 %vm422_vm2, %v3171_v52  ;;  %v3172_v46 = vpack.c.bf16 %v3167_v36, %v3166_v8  ;;  %v3168_v62 = vmul.f32 %v11746_v39, %v13836_v60  ;;  %v2975_v60 = vpack.c.bf16 %v13802_v15, %v13796_v55  ;;  %v3286_v9 = vpop.permute.xlu0 %3285  ;;  %v12337_v52 = vld [vmem:[%s16607_s1 + $0x10] sm:$0xff] }
0x1919   :  { %10707 = vmatpush3.bf16.msra.mxu0 %v13894_v63  ;;  %v3318_v12 = vsel %vm1534_vm3, %v3308_v58, %v3286_v9  ;;  %v12344_v58 = vld [vmem:[%s16607_s1 + $0x38] sm:$0xff] }
0x191a   :  { %10702 = vmatprep.mubr.msk.bf16.mxu0 %vm422_vm2, %v3172_v46  ;;  %10708 = vmatprep.subr.bf16.mxu0 %v13900_v24  ;;  %v3173_v21 = vpack.c.bf16 %v3169_v19, %v3168_v62  ;;  %v12338_v46 = vld [vmem:[%s16607_s1] sm:$0xff] }
0x191b   :  { %v3276_v15 = vpop.permute.xlu1 %3275 }
0x191c   :  { %v3278_v55 = vpop.permute.xlu0 %3277  ;;  %v3311_v53 = vsel %vm332_vm1, %v2387_v57, %v3276_v15 }
0x191d   :  { %10709 = vmatpush3.bf16.msra.mxu0 %v13900_v24  ;;  %v3314_v56 = vsel %vm332_vm1, %v16670_v47, %v3278_v55 }
0x191e   :  { %10730 = vmatprep.subr.bf16.mxu0 %v13857_v11 }
0x1920   :  { %10703 = vmatmul.mubr.msk.bf16.gmra.mxu0 %vm422_vm2, %v3173_v21 }
0x19d8   :  { %v10700_v10 = vpop.f32.mrf.mxu0 }
0x19da   :  { %v3232_v5 = vpop.f32.mrf.mxu0 }
0x19dc   :  { %v10701_v33 = vpop.f32.mrf.mxu0 }
0x19dd   :  { %v3264_v3 = vpack.c.bf16 %v10701_v33, %v10700_v10 }
0x19de   :  { %v3235_v35 = vpop.f32.mrf.mxu0 }
0x19df   :  { %v3263_v0 = vpack.c.bf16 %v3235_v35, %v3232_v5  ;;  %3297 = vrot.lane.b32.xlu0 %v3264_v3, %s12388_s29  ;;  %v12339_v3 = vld [vmem:[%s16607_s1 + $0x8] sm:$0xff] }
0x19e0   :  { %v10704_v42 = vpop.f32.mrf.mxu0 }
0x19e1   :  { %3295 = vrot.lane.b32.xlu1 %v3263_v0, %s12388_s29  ;;  %v12340_v0 = vld [vmem:[%s16607_s1 + $0x18] sm:$0xff] }
0x19e2   :  { %v3248_v37 = vpop.f32.mrf.mxu0 }
0x19e3   :  { %3289 = vrot.lane.b32.xlu0 %v2976_v17, %s12386_s27  ;;  %v3305_v17 = vsel %vm332_vm1, %v2385_v23, %v3272_v4 }
0x19e4   :  { %v10705_v28 = vpop.f32.mrf.mxu0  ;;  %v3316_v13 = vsel %vm1534_vm3, %v3305_v17, %v3284_v54  ;;  %v12342_v54 = vld [vmem:[%s16607_s1 + $0x30] sm:$0xff]  ;;  %v12343_v17 = vld [vmem:[%s16607_s1 + $0x28] sm:$0xff] }
0x19e5   :  { %v3266_v32 = vpack.c.bf16 %v10705_v28, %v10704_v42  ;;  %3287 = vrot.lane.b32.xlu1 %v2975_v60, %s12386_s27 }
0x19e6   :  { %v3251_v30 = vpop.f32.mrf.mxu0 }
0x19e7   :  { %v3265_v61 = vpack.c.bf16 %v3251_v30, %v3248_v37  ;;  %3301 = vrot.lane.b32.xlu0 %v3266_v32, %s12388_s29 }
0x19e9   :  { %3299 = vrot.lane.b32.xlu1 %v3265_v61, %s12388_s29  ;;  %v12341_v61 = vld [vmem:[%s16607_s1 + $0x20] sm:$0xff] }
0x1a51   :  { %v3298_v51 = vpop.permute.xlu0 %3297 }
0x1a52   :  { %v3326_v14 = vsel %vm1543_vm4, %v3318_v12, %v3298_v51 }
0x1a53   :  { %v3296_v45 = vpop.permute.xlu1 %3295 }
0x1a54   :  { %v3324_v40 = vsel %vm1543_vm4, %v3316_v13, %v3296_v45 }
0x1a55   :  { %v3290_v16 = vpop.permute.xlu0 %3289  ;;  %10710 = vmatprep.mubr.msk.bf16.mxu0 %vm41_vm0, %v3324_v40 }
0x1a56   :  { %10711 = vmatmul.mubr.msk.bf16.vlgmr.msra.gmra.mxu0 %vm41_vm0, %v3326_v14 }
0x1a57   :  { %v3288_v38 = vpop.permute.xlu1 %3287  ;;  %10731 = vmatpush3.bf16.msra.mxu0 %v13857_v11  ;;  %v3322_v11 = vsel %vm1534_vm3, %v3314_v56, %v3290_v16 }
0x1a58   :  { %10732 = vmatprep.subr.bf16.mxu0 %v13868_v18  ;;  %v3320_v25 = vsel %vm1534_vm3, %v3311_v53, %v3288_v38 }
0x1a59   :  { %v3302_v6 = vpop.permute.xlu0 %3301 }
0x1a5a   :  { %v3330_v49 = vsel %vm1543_vm4, %v3322_v11, %v3302_v6 }
0x1a5b   :  { %v3300_v29 = vpop.permute.xlu1 %3299  ;;  %10733 = vmatpush3.bf16.msra.mxu0 %v13868_v18 }
0x1a5c   :  { %v3328_v50 = vsel %vm1543_vm4, %v3320_v25, %v3300_v29 }
0x1a5d   :  { %10714 = vmatprep.mubr.msk.bf16.mxu0 %vm41_vm0, %v3328_v50 }
0x1a5e   :  { %10715 = vmatmul.mubr.msk.bf16.gmra.mxu0 %vm41_vm0, %v3330_v49 }
0x1b16   :  { %v10712_v44 = vpop.f32.mrf.mxu0 }
0x1b17   :  { %v3392_v18 = vadd.f32 %v10712_v44, %v13957_v7 }
0x1b18   :  { %v3383_v34 = vpop.f32.mrf.mxu0 }
0x1b19   :  { %v13963_v8 = vadd.f32 %v12337_v52, %v3392_v18  ;;  %v3384_v36 = vadd.f32 %v3383_v34, %v13957_v7 }
0x1b1a   :  { %v10713_v41 = vpop.f32.mrf.mxu0 }
0x1b1b   :  { %16671 = vst [vmem:[#allocation20_spill] sm:$0xff] %v13963_v8  ;;  %v13969_v39 = vadd.f32 %v12338_v46, %v3384_v36  ;;  %v3428_v19 = vsel %vm41_vm0, %v13963_v8, 0.0  ;;  %v3395_v62 = vadd.f32 %v10713_v41, %v13957_v7 }
0x1b1c   :  { %3429 = vadd.xlane.f32.xlu0 %v3428_v19  ;;  %v3386_v21 = vpop.f32.mrf.mxu0 }
0x1b1d   :  { %16672 = vst [vmem:[#allocation21_spill] sm:$0xff] %v13969_v39  ;;  %v3387_v10 = vadd.f32 %v3386_v21, %v13957_v7  ;;  %v3422_v5 = vsel %vm41_vm0, %v13969_v39, 0.0  ;;  %v13985_v42 = vadd.f32 %v12340_v0, %v3395_v62 }
0x1b1e   :  { %3423 = vadd.xlane.f32.xlu1 %v3422_v5  ;;  %v10716_v33 = vpop.f32.mrf.mxu0 }
0x1b1f   :  { %v13980_v35 = vadd.f32 %v12339_v3, %v3387_v10  ;;  %16674 = vst [vmem:[#allocation23_spill] sm:$0xff] %v13985_v42  ;;  %v3408_v60 = vadd.f32 %v10716_v33, %v13957_v7  ;;  %v3431_v9 = vsel %vm41_vm0, %v13985_v42, 0.0 }
0x1b20   :  { %v3399_v37 = vpop.f32.mrf.mxu0 }
0x1b21   :  { %16673 = vst [vmem:[#allocation22_spill] sm:$0xff] %v13980_v35  ;;  %v3400_v28 = vadd.f32 %v3399_v37, %v13957_v7  ;;  %v3425_v32 = vsel %vm41_vm0, %v13980_v35, 0.0  ;;  %v14001_v55 = vadd.f32 %v12342_v54, %v3408_v60 }
0x1b22   :  { %3426 = vadd.xlane.f32.xlu0 %v3425_v32  ;;  %v10717_v30 = vpop.f32.mrf.mxu0 }
0x1b23   :  { %v13994_v4 = vadd.f32 %v12341_v61, %v3400_v28  ;;  %16676 = vst [vmem:[#allocation25_spill] sm:$0xff] %v14001_v55  ;;  %v3411_v15 = vadd.f32 %v10717_v30, %v13957_v7  ;;  %v3440_v12 = vsel %vm41_vm0, %v14001_v55, 0.0 }
0x1b24   :  { %v3402_v20 = vpop.f32.mrf.mxu0 }
0x1b25   :  { %16675 = vst [vmem:[#allocation24_spill] sm:$0xff] %v13994_v4  ;;  %v3403_v23 = vadd.f32 %v3402_v20, %v13957_v7  ;;  %v3434_v51 = vsel %vm41_vm0, %v13994_v4, 0.0  ;;  %v14015_v13 = vadd.f32 %v12344_v58, %v3411_v15 }
0x1b26   :  { %3432 = vadd.xlane.f32.xlu0 %v3431_v9  ;;  %3435 = vadd.xlane.f32.xlu1 %v3434_v51 }
0x1b27   :  { %v14010_v2 = vadd.f32 %v12343_v17, %v3403_v23  ;;  %16678 = vst [vmem:[#allocation27_spill] sm:$0xff] %v14015_v13  ;;  %v3443_v40 = vsel %vm41_vm0, %v14015_v13, 0.0 }
0x1b29   :  { %16677 = vst [vmem:[#allocation26_spill] sm:$0xff] %v14010_v2  ;;  %v3437_v45 = vsel %vm41_vm0, %v14010_v2, 0.0 }
0x1b2a   :  { %3438 = vadd.xlane.f32.xlu0 %v3437_v45  ;;  %3441 = vadd.xlane.f32.xlu1 %v3440_v12 }
0x1b2e   :  { %3444 = vadd.xlane.f32.xlu0 %v3443_v40 }
0x1ba5   :  { %v3430_v14 = vpop.xlane.xlu0 %3429 }
0x1ba6   :  { %v3448_v16 = vmul.f32 0.03125, %v3430_v14 }
0x1ba7   :  { %v3424_v38 = vpop.xlane.xlu1 %3423 }
0x1ba8   :  { %v3446_v57 = vmul.f32 0.03125, %v3424_v38  ;;  %v14024_v53 = vsub.f32 %v13963_v8, %v3448_v16 }
0x1baa   :  { %v14027_v6 = vsub.f32 %v13969_v39, %v3446_v57  ;;  %v3464_v50 = vmul.f32 %v14024_v53, %v14024_v53 }
0x1bab   :  { %v3427_v47 = vpop.xlane.xlu0 %3426 }
0x1bac   :  { %v3447_v56 = vmul.f32 0.03125, %v3427_v47  ;;  %v3462_v25 = vmul.f32 %v14027_v6, %v14027_v6  ;;  %v3476_v19 = vsel %vm41_vm0, %v3464_v50, 0.0 }
0x1bae   :  { %v14032_v29 = vsub.f32 %v13980_v35, %v3447_v56  ;;  %v3470_v11 = vsel %vm41_vm0, %v3462_v25, 0.0 }
0x1baf   :  { %v3433_v49 = vpop.xlane.xlu0 %3432  ;;  %3471 = vadd.xlane.f32.xlu1 %v3470_v11  ;;  %v3436_v44 = vpop.xlane.xlu1 %3435 }
0x1bb0   :  { %v3449_v18 = vmul.f32 0.03125, %v3433_v49  ;;  %v3450_v34 = vmul.f32 0.03125, %v3436_v44  ;;  %v3463_v52 = vmul.f32 %v14032_v29, %v14032_v29 }
0x1bb2   :  { %v14040_v36 = vsub.f32 %v13985_v42, %v3449_v18  ;;  %v14043_v41 = vsub.f32 %v13994_v4, %v3450_v34  ;;  %v3473_v46 = vsel %vm41_vm0, %v3463_v52, 0.0 }
0x1bb3   :  { %3474 = vadd.xlane.f32.xlu0 %v3473_v46  ;;  %v3439_v62 = vpop.xlane.xlu0 %3438  ;;  %3477 = vadd.xlane.f32.xlu1 %v3476_v19  ;;  %v3442_v21 = vpop.xlane.xlu1 %3441  ;;  %v5029_v46 = vld [vmem:[%s16609_s3 + $0x10] sm:$0xff] }
0x1bb4   :  { %v3451_v10 = vmul.f32 0.03125, %v3439_v62  ;;  %v3452_v5 = vmul.f32 0.03125, %v3442_v21  ;;  %v3465_v33 = vmul.f32 %v14040_v36, %v14040_v36  ;;  %v3466_v3 = vmul.f32 %v14043_v41, %v14043_v41 }
0x1bb6   :  { %v14052_v0 = vsub.f32 %v14010_v2, %v3451_v10  ;;  %v14055_v37 = vsub.f32 %v14001_v55, %v3452_v5  ;;  %v3479_v60 = vsel %vm41_vm0, %v3465_v33, 0.0  ;;  %v3482_v28 = vsel %vm41_vm0, %v3466_v3, 0.0 }
0x1bb7   :  { %3480 = vadd.xlane.f32.xlu0 %v3479_v60  ;;  %v3445_v32 = vpop.xlane.xlu0 %3444  ;;  %3483 = vadd.xlane.f32.xlu1 %v3482_v28  ;;  %v3529_v33 = vrot.slane %v13953_v1, %v12508_v22  ;;  %v16679_v3 = vsub.s32 6, %v12494_v59 }
0x1bb8   :  { %v3453_v30 = vmul.f32 0.03125, %v3445_v32  ;;  %v3467_v61 = vmul.f32 %v14052_v0, %v14052_v0  ;;  %v3468_v20 = vmul.f32 %v14055_v37, %v14055_v37 }
0x1bb9   :  { %v14078_v60 = vrot.slane %v5029_v46, %v16679_v3 }
0x1bba   :  { %v14064_v9 = vsub.f32 %v14015_v13, %v3453_v30  ;;  %v3485_v54 = vsel %vm41_vm0, %v3467_v61, 0.0  ;;  %v3488_v15 = vsel %vm41_vm0, %v3468_v20, 0.0  ;;  %v16681_v61 = vsub.s32 7, %v12494_v59 }
0x1bbb   :  { %3486 = vadd.xlane.f32.xlu0 %v3485_v54  ;;  %3489 = vadd.xlane.f32.xlu1 %v3488_v15  ;;  %16680 = vst [vmem:[#allocation28_spill] sm:$0xff] %v14078_v60  ;;  %v3541_v15 = vrot.slane %v13953_v1, %v12514_v31 }
0x1bbc   :  { %v3469_v23 = vmul.f32 %v14064_v9, %v14064_v9  ;;  %v14083_v20 = vrot.slane %v5029_v46, %v16681_v61 }
0x1bbe   :  { %v3491_v51 = vsel %vm41_vm0, %v3469_v23, 0.0  ;;  %16682 = vst [vmem:[#allocation29_spill] sm:$0xff] %v14083_v20 }
0x1bbf   :  { %3492 = vadd.xlane.f32.xlu0 %v3491_v51 }
0x1c38   :  { %v3472_v17 = vpop.xlane.xlu1 %3471 }
0x1c39   :  { %v3494_v58 = vmul.f32 0.03125, %v3472_v17 }
0x1c3b   :  { %v3502_v45 = vadd.f32 1e-05, %v3494_v58 }
0x1c3c   :  { %v3475_v12 = vpop.xlane.xlu0 %3474  ;;  %v3478_v40 = vpop.xlane.xlu1 %3477 }
0x1c3d   :  { %11747 = vrsqrt.f32 %v3502_v45  ;;  %v3495_v14 = vmul.f32 0.03125, %v3475_v12  ;;  %v3496_v16 = vmul.f32 0.03125, %v3478_v40 }
0x1c3f   :  { %v3503_v38 = vadd.f32 1e-05, %v3495_v14  ;;  %v3504_v57 = vadd.f32 1e-05, %v3496_v16 }
0x1c40   :  { %v3481_v47 = vpop.xlane.xlu0 %3480  ;;  %v3484_v56 = vpop.xlane.xlu1 %3483 }
0x1c41   :  { %11749 = vrsqrt.f32 %v3503_v38  ;;  %v3497_v25 = vmul.f32 0.03125, %v3481_v47  ;;  %v3498_v11 = vmul.f32 0.03125, %v3484_v56 }
0x1c42   :  { %11751 = vrsqrt.f32 %v3504_v57 }
0x1c43   :  { %v3505_v50 = vadd.f32 1e-05, %v3497_v25  ;;  %v3506_v49 = vadd.f32 1e-05, %v3498_v11 }
0x1c44   :  { %v3487_v44 = vpop.xlane.xlu0 %3486  ;;  %v3490_v18 = vpop.xlane.xlu1 %3489 }
0x1c45   :  { %11753 = vrsqrt.f32 %v3505_v50  ;;  %v3499_v34 = vmul.f32 0.03125, %v3487_v44  ;;  %v3500_v52 = vmul.f32 0.03125, %v3490_v18 }
0x1c46   :  { %11755 = vrsqrt.f32 %v3506_v49 }
0x1c47   :  { %v3507_v19 = vadd.f32 1e-05, %v3499_v34  ;;  %v3508_v62 = vadd.f32 1e-05, %v3500_v52 }
0x1c48   :  { %v3493_v21 = vpop.xlane.xlu0 %3492 }
0x1c49   :  { %11757 = vrsqrt.f32 %v3507_v19  ;;  %v3501_v10 = vmul.f32 0.03125, %v3493_v21 }
0x1c4a   :  { %v11748_v5 = vpop.eup %11747  ;;  %11759 = vrsqrt.f32 %v3508_v62 }
0x1c4b   :  { %v3509_v28 = vadd.f32 1e-05, %v3501_v10  ;;  %v3518_v32 = vmul.f32 %v11748_v5, %v14027_v6 }
0x1c4d   :  { %11761 = vrsqrt.f32 %v3509_v28  ;;  %v3530_v54 = vmul.f32 %v3529_v33, %v3518_v32  ;;  %v6761_v23 = vmul.f32 %v14078_v60, %v3518_v32 }
0x1c4e   :  { %v11750_v30 = vpop.eup %11749 }
0x1c4f   :  { %v11752_v51 = vpop.eup %11751  ;;  %v3519_v17 = vmul.f32 %v11750_v30, %v14032_v29  ;;  %v3542_v59 = vadd.f32 %v3541_v15, %v3530_v54  ;;  %v14093_v14 = vadd.f32 %v6761_v23, %v14083_v20 }
0x1c50   :  { %v3520_v58 = vmul.f32 %v11752_v51, %v14024_v53 }
0x1c51   :  { %v3531_v45 = vmul.f32 %v3529_v33, %v3519_v17  ;;  %v6762_v6 = vmul.f32 %v14078_v60, %v3519_v17 }
0x1c52   :  { %v11754_v12 = vpop.eup %11753  ;;  %v6763_v40 = vmul.f32 %v14078_v60, %v3520_v58  ;;  %v3532_v38 = vmul.f32 %v3529_v33, %v3520_v58 }
0x1c53   :  { %v11756_v16 = vpop.eup %11755  ;;  %v3521_v1 = vmul.f32 %v11754_v12, %v14040_v36  ;;  %v3543_v57 = vadd.f32 %v3541_v15, %v3531_v45  ;;  %v14097_v47 = vadd.f32 %v6762_v6, %v14083_v20 }
0x1c54   :  { %v3522_v53 = vmul.f32 %v11756_v16, %v14043_v41  ;;  %v14104_v49 = vadd.f32 %v6763_v40, %v14083_v20  ;;  %v3544_v41 = vadd.f32 %v3541_v15, %v3532_v38 }
0x1c55   :  { %v3533_v29 = vmul.f32 %v3529_v33, %v3521_v1  ;;  %v6764_v56 = vmul.f32 %v14078_v60, %v3521_v1  ;;  %v3615_v25 = vpack.c.bf16 %v3543_v57, %v3542_v59  ;;  %v16689_v1 = vld [vmem:[#allocation19_spill] sm:$0xff] }
0x1c56   :  { %v11758_v50 = vpop.eup %11757  ;;  %16683 = vst [vmem:[#allocation30_spill] sm:$0xff] %v14104_v49  ;;  %v3534_v44 = vmul.f32 %v3529_v33, %v3522_v53  ;;  %v6765_v36 = vmul.f32 %v14078_v60, %v3522_v53 }
0x1c57   :  { %v11760_v18 = vpop.eup %11759  ;;  %v14108_v34 = vadd.f32 %v6764_v56, %v14083_v20  ;;  %10734 = vmatprep.mubr.msk.bf16.mxu0 %vm41_vm0, %v3615_v25  ;;  %v3545_v52 = vadd.f32 %v3541_v15, %v3533_v29  ;;  %v3523_v46 = vmul.f32 %v11758_v50, %v14052_v0 }
0x1c58   :  { %v3524_v19 = vmul.f32 %v11760_v18, %v14055_v37  ;;  %v3546_v28 = vadd.f32 %v3541_v15, %v3534_v44  ;;  %v14117_v30 = vadd.f32 %v6765_v36, %v14083_v20  ;;  %v16690_v44 = vld [vmem:[#allocation18_spill] sm:$0xff] }
0x1c59   :  { %16684 = vst [vmem:[#allocation31_spill] sm:$0xff] %v14108_v34  ;;  %v3616_v21 = vpack.c.bf16 %v3545_v52, %v3544_v41  ;;  %v3535_v10 = vmul.f32 %v3529_v33, %v3523_v46  ;;  %v6766_v5 = vmul.f32 %v14078_v60, %v3523_v46 }
0x1c5a   :  { %v11762_v3 = vpop.eup %11761  ;;  %v3536_v32 = vmul.f32 %v3529_v33, %v3524_v19  ;;  %16685 = vst [vmem:[#allocation32_spill] sm:$0xff] %v14117_v30  ;;  %v6767_v37 = vmul.f32 %v14078_v60, %v3524_v19 }
0x1c5b   :  { %10735 = vmatmul.mubr.msk.bf16.vlgmr.msra.gmra.mxu0 %vm41_vm0, %v3616_v21  ;;  %v3547_v61 = vadd.f32 %v3541_v15, %v3535_v10  ;;  %v3525_v0 = vmul.f32 %v11762_v3, %v14064_v9  ;;  %v14123_v54 = vadd.f32 %v6766_v5, %v14083_v20 }
0x1c5c   :  { %v3548_v45 = vadd.f32 %v3541_v15, %v3536_v32  ;;  %v14130_v12 = vadd.f32 %v6767_v37, %v14083_v20 }
0x1c5d   :  { %16686 = vst [vmem:[#allocation33_spill] sm:$0xff] %v14123_v54  ;;  %v3617_v23 = vpack.c.bf16 %v3547_v61, %v3546_v28  ;;  %v3537_v51 = vmul.f32 %v3529_v33, %v3525_v0  ;;  %v6768_v17 = vmul.f32 %v14078_v60, %v3525_v0 }
0x1c5e   :  { %16687 = vst [vmem:[#allocation34_spill] sm:$0xff] %v14130_v12 }
0x1c5f   :  { %10738 = vmatprep.mubr.msk.bf16.mxu0 %vm41_vm0, %v3617_v23  ;;  %v3549_v6 = vadd.f32 %v3541_v15, %v3537_v51  ;;  %v14133_v9 = vadd.f32 %v6768_v17, %v14083_v20  ;;  %v10728_v23 = vpop.f32.mrf.mxu1 }
0x1c61   :  { %16688 = vst [vmem:[#allocation35_spill] sm:$0xff] %v14133_v9  ;;  %v3618_v40 = vpack.c.bf16 %v3549_v6, %v3548_v45  ;;  %v3600_v45 = vpop.f32.mrf.mxu1 }
0x1c63   :  { %10739 = vmatmul.mubr.msk.bf16.gmra.mxu0 %vm41_vm0, %v3618_v40 }
0x1d1b   :  { %v10736_v33 = vpop.f32.mrf.mxu0 }
0x1d1c   :  { %v3706_v57 = vadd.f32 %v10736_v33, %v16689_v1  ;;  %v3698_v61 = vadd.f32 %v10736_v33, %v16690_v44  ;;  %v10729_v33 = vpop.f32.mrf.mxu1 }
0x1d1d   :  { %v14138_v16 = vpop.f32.mrf.mxu0 }
0x1d1e   :  { %v3696_v17 = vadd.f32 %v14138_v16, %v16690_v44 }
0x1d1f   :  { %v10737_v38 = vpop.f32.mrf.mxu0 }
0x1d20   :  { %v3707_v15 = vadd.f32 %v10737_v38, %v16689_v1  ;;  %v3699_v32 = vadd.f32 %v10737_v38, %v16690_v44  ;;  %v3603_v38 = vpop.f32.mrf.mxu1 }
0x1d21   :  { %v14142_v53 = vpop.f32.mrf.mxu0 }
0x1d22   :  { %v14144_v29 = vpack.c.bf16 %v3707_v15, %v3706_v57  ;;  %v14174_v0 = vpack.c.bf16 %v3699_v32, %v3698_v61  ;;  %v3697_v51 = vadd.f32 %v14142_v53, %v16690_v44  ;;  %v3604_v15 = vadd.f32 %v3603_v38, %v13407_v43 }
0x1d23   :  { %v10740_v56 = vpop.f32.mrf.mxu0 }
0x1d24   :  { %v3702_v36 = vadd.f32 %v10740_v56, %v16690_v44  ;;  %v3710_v18 = vadd.f32 %v10740_v56, %v16689_v1  ;;  %v14184_v6 = vpack.c.bf16 %v3697_v51, %v3696_v17  ;;  %v3740_v40 = vsel %vm332_vm1, %v14174_v0, 0 }
0x1d25   :  { %v14146_v25 = vpop.f32.mrf.mxu0  ;;  %v3601_v56 = vadd.f32 %v3600_v45, %v13407_v43 }
0x1d26   :  { %v3700_v19 = vadd.f32 %v14146_v25, %v16690_v44  ;;  %v3737_v57 = vsel %vm332_vm1, %v14184_v6, 0 }
0x1d27   :  { %v10741_v50 = vpop.f32.mrf.mxu0 }
0x1d28   :  { %v3703_v41 = vadd.f32 %v10741_v50, %v16690_v44  ;;  %v3711_v52 = vadd.f32 %v10741_v50, %v16689_v1  ;;  %v14194_v50 = vpack.c.bf16 %v3604_v15, %v3601_v56  ;;  %v3708_v56 = vadd.f32 %v14146_v25, %v16689_v1 }
0x1d29   :  { %v14152_v46 = vpop.f32.mrf.mxu0 }
0x1d2a   :  { %v14156_v21 = vpack.c.bf16 %v3703_v41, %v3702_v36  ;;  %v14158_v10 = vpack.c.bf16 %v3711_v52, %v3710_v18  ;;  %v3701_v5 = vadd.f32 %v14152_v46, %v16690_v44  ;;  %v3612_v44 = vadd.f32 %v10729_v33, %v13407_v43 }
0x1d2b   :  { %v3609_v36 = vadd.f32 %v10728_v23, %v13407_v43  ;;  %v3709_v15 = vadd.f32 %v14152_v46, %v16689_v1 }
0x1d2c   :  { %v14162_v3 = vpack.c.bf16 %v3701_v5, %v3700_v19  ;;  %3915 = vrot.lane.b32.xlu1 %v14158_v10, %s12375_s12  ;;  %11366 = vmatprep.subr.msk.bf16.mxu1 %vm332_vm1, %v14156_v21  ;;  %v3746_v28 = vsel %vm332_vm1, %v14156_v21, 0 }
0x1d2d   :  { %10743 = vmatpush3.bf16.xpose.msra.mxu1 %v3746_v28  ;;  %v14202_v18 = vpack.c.bf16 %v3612_v44, %v3609_v36  ;;  %v14226_v44 = vpack.c.bf16 %v3709_v15, %v3708_v56 }
0x1d2e   :  { %11367 = vmatprep.subr.msk.bf16.mxu1 %vm332_vm1, %v14162_v3  ;;  %v3743_v37 = vsel %vm332_vm1, %v14162_v3, 0 }
0x1d35   :  { %10745 = vmatpush3.bf16.xpose.msra.mxu1 %v3743_v37 }
0x1d36   :  { %11368 = vmatprep.subr.msk.bf16.mxu1 %vm332_vm1, %v14174_v0 }
0x1d3d   :  { %10747 = vmatpush3.bf16.xpose.msra.mxu1 %v3740_v40 }
0x1d3e   :  { %11369 = vmatprep.subr.msk.bf16.mxu1 %vm332_vm1, %v14184_v6 }
0x1d45   :  { %10749 = vmatpush3.bf16.xpose.msra.mxu1 %v3737_v57 }
0x1d4c   :  { %10751 = vmatmul.mubr.msk.bf16.vlgmr.msra.gmra.mxu1 %vm332_vm1, %v13815_v48 }
0x1d4d   :  { %10754 = vmatprep.mubr.msk.bf16.mxu1 %vm332_vm1, %v14194_v50 }
0x1d54   :  { %10755 = vmatmul.mubr.msk.bf16.gmra.mxu1 %vm332_vm1, %v14202_v18 }
0x1d9e   :  { %v3916_v41 = vpop.permute.xlu1 %3915 }
0x1d9f   :  { %10758 = vmatprep.subr.bf16.mxu0 %v3916_v41 }
0x1da0   :  { %10759 = vmatpush3.bf16.msra.mxu0 %v3916_v41 }
0x1e0c   :  { %v10752_v52 = vpop.f32.mrf.mxu1 }
0x1e0d   :  { %v3819_v19 = vsel %vm422_vm2, %v10752_v52, -inf }
0x1e0e   :  { %3820 = vmax.xlane.f32.xlu1 %v3819_v19  ;;  %v3782_v5 = vpop.f32.mrf.mxu1 }
0x1e0f   :  { %v3813_v32 = vsel %vm422_vm2, %v3782_v5, -inf }
0x1e10   :  { %v10753_v28 = vpop.f32.mrf.mxu1 }
0x1e11   :  { %v3822_v61 = vsel %vm422_vm2, %v10753_v28, -inf }
0x1e12   :  { %3814 = vmax.xlane.f32.xlu1 %v3813_v32  ;;  %3823 = vmax.xlane.f32.xlu0 %v3822_v61  ;;  %v3785_v43 = vpop.f32.mrf.mxu1 }
0x1e13   :  { %v3816_v23 = vsel %vm422_vm2, %v3785_v43, -inf }
0x1e14   :  { %v14209_v37 = vpop.f32.mrf.mxu1 }
0x1e15   :  { %v3831_v51 = vsel %vm422_vm2, %v14209_v37, -inf }
0x1e16   :  { %3817 = vmax.xlane.f32.xlu0 %v3816_v23  ;;  %3832 = vmax.xlane.f32.xlu1 %v3831_v51  ;;  %v3798_v17 = vpop.f32.mrf.mxu1 }
0x1e17   :  { %v3825_v40 = vsel %vm422_vm2, %v3798_v17, -inf }
0x1e18   :  { %v14214_v45 = vpop.f32.mrf.mxu1 }
0x1e19   :  { %v3834_v33 = vsel %vm422_vm2, %v14214_v45, -inf }
0x1e1a   :  { %3826 = vmax.xlane.f32.xlu1 %v3825_v40  ;;  %3835 = vmax.xlane.f32.xlu0 %v3834_v33  ;;  %v3801_v38 = vpop.f32.mrf.mxu1 }
0x1e1b   :  { %v3828_v57 = vsel %vm422_vm2, %v3801_v38, -inf }
0x1e1e   :  { %3829 = vmax.xlane.f32.xlu0 %v3828_v57 }
0x1e2b   :  { %3911 = vrot.lane.b32.xlu1 %v14144_v29, %s12375_s12 }
0x1e34   :  { %3913 = vrot.lane.b32.xlu0 %v14226_v44, %s12375_s12 }
0x1e97   :  { %v3821_v36 = vpop.xlane.xlu1 %3820 }
0x1e98   :  { %v3839_v41 = vsub.f32 %v10752_v52, %v3821_v36 }
0x1e9a   :  { %v3849_v19 = vmul.f32 1.442695, %v3839_v41 }
0x1e9b   :  { %v3815_v32 = vpop.xlane.xlu1 %3814  ;;  %v3824_v61 = vpop.xlane.xlu0 %3823 }
0x1e9c   :  { %11763 = vpow2.f32 %v3849_v19  ;;  %v3837_v23 = vsub.f32 %v3782_v5, %v3815_v32  ;;  %v3840_v51 = vsub.f32 %v10753_v28, %v3824_v61 }
0x1e9e   :  { %v3845_v40 = vmul.f32 1.442695, %v3837_v23  ;;  %v3851_v33 = vmul.f32 1.442695, %v3840_v51  ;;  %v3705_v23 = vadd.f32 %v14142_v53, %v16689_v1  ;;  %v3704_v51 = vadd.f32 %v14138_v16, %v16689_v1 }
0x1e9f   :  { %v3818_v57 = vpop.xlane.xlu0 %3817  ;;  %v3833_v25 = vpop.xlane.xlu1 %3832 }
0x1ea0   :  { %11765 = vpow2.f32 %v3845_v40  ;;  %v3838_v46 = vsub.f32 %v3785_v43, %v3818_v57  ;;  %v14251_v40 = vpack.c.bf16 %v3705_v23, %v3704_v51  ;;  %v3843_v57 = vsub.f32 %v14209_v37, %v3833_v25 }
0x1ea1   :  { %11767 = vpow2.f32 %v3851_v33 }
0x1ea2   :  { %v3847_v15 = vmul.f32 1.442695, %v3838_v46 }
0x1ea3   :  { %v3836_v56 = vpop.xlane.xlu0 %3835  ;;  %v3827_v59 = vpop.xlane.xlu1 %3826 }
0x1ea4   :  { %11769 = vpow2.f32 %v3847_v15  ;;  %v3841_v33 = vsub.f32 %v3798_v17, %v3827_v59  ;;  %v3844_v15 = vsub.f32 %v14214_v45, %v3836_v56 }
0x1ea6   :  { %v3853_v46 = vmul.f32 1.442695, %v3841_v33  ;;  %v3859_v53 = vmul.f32 1.442695, %v3844_v15 }
0x1ea7   :  { %v3830_v58 = vpop.xlane.xlu0 %3829  ;;  %v3912_v36 = vpop.permute.xlu1 %3911 }
0x1ea8   :  { %11771 = vpow2.f32 %v3853_v46 }
0x1ea9   :  { %v14230_v62 = vpop.eup %11763 }
0x1eaa   :  { %v3867_v52 = vsel %vm422_vm2, %v14230_v62, 0.0 }
0x1eab   :  { %3868 = vadd.xlane.f32.xlu1 %v3867_v52  ;;  %v3914_v5 = vpop.permute.xlu0 %3913  ;;  %v3857_v52 = vmul.f32 1.442695, %v3843_v57 }
0x1eac   :  { %10760 = vmatprep.subr.bf16.mxu0 %v3914_v5 }
0x1ead   :  { %v14234_v28 = vpop.eup %11765  ;;  %10761 = vmatpush3.bf16.msra.mxu0 %v3914_v5  ;;  %v3842_v5 = vsub.f32 %v3801_v38, %v3830_v58  ;;  %11773 = vpow2.f32 %v3857_v52 }
0x1eae   :  { %v14236_v43 = vpop.eup %11767  ;;  %10762 = vmatprep.subr.bf16.mxu0 %v3912_v36  ;;  %v3861_v41 = vsel %vm422_vm2, %v14234_v28, 0.0  ;;  %11775 = vpow2.f32 %v3859_v53 }
0x1eaf   :  { %3862 = vadd.xlane.f32.xlu1 %v3861_v41  ;;  %v3870_v19 = vsel %vm422_vm2, %v14236_v43, 0.0 }
0x1eb0   :  { %3871 = vadd.xlane.f32.xlu0 %v3870_v19 }
0x1eb1   :  { %v11770_v32 = vpop.eup %11769  ;;  %10763 = vmatpush3.bf16.msra.mxu0 %v3912_v36  ;;  %v3855_v36 = vmul.f32 1.442695, %v3842_v5 }
0x1eb2   :  { %v3864_v61 = vsel %vm422_vm2, %v11770_v32, 0.0 }
0x1eb3   :  { %11777 = vpow2.f32 %v3855_v36 }
0x1eb4   :  { %3865 = vadd.xlane.f32.xlu0 %v3864_v61 }
0x1eb5   :  { %v14257_v16 = vpop.eup %11771 }
0x1eb6   :  { %v3873_v59 = vsel %vm422_vm2, %v14257_v16, 0.0 }
0x1eba   :  { %v14259_v1 = vpop.eup %11773 }
0x1ebb   :  { %v14263_v17 = vpop.eup %11775  ;;  %v3879_v37 = vsel %vm422_vm2, %v14259_v1, 0.0 }
0x1ebc   :  { %v3882_v45 = vsel %vm422_vm2, %v14263_v17, 0.0 }
0x1ec0   :  { %4024 = vrot.lane.b32.xlu1 %v14156_v21, %s12378_s15  ;;  %v14267_v58 = vpop.eup %11777 }
0x1ec1   :  { %v3876_v38 = vsel %vm422_vm2, %v14267_v58, 0.0 }
0x1ec4   :  { %4022 = vrot.lane.b32.xlu1 %v14162_v3, %s12378_s15 }
0x1eca   :  { %3909 = vrot.lane.b32.xlu0 %v14251_v40, %s12375_s12 }
0x1ee8   :  { %3874 = vadd.xlane.f32.xlu1 %v3873_v59 }
0x1ee9   :  { %3880 = vadd.xlane.f32.xlu0 %v3879_v37 }
0x1eec   :  { %3883 = vadd.xlane.f32.xlu1 %v3882_v45 }
0x1eed   :  { %3877 = vadd.xlane.f32.xlu0 %v3876_v38 }
0x1efd   :  { %4020 = vrot.lane.b32.xlu1 %v14174_v0, %s12378_s15 }
0x1f01   :  { %4006 = vrot.lane.b32.xlu1 %v13818_v27, %s12378_s15 }
0x1f03   :  { %4018 = vrot.lane.b32.xlu0 %v14184_v6, %s12378_s15 }
0x1f05   :  { %4010 = vrot.lane.b32.xlu1 %v14194_v50, %s12378_s15 }
0x1f07   :  { %4008 = vrot.lane.b32.xlu0 %v13815_v48, %s12378_s15 }
0x1f09   :  { %4213 = vrot.lane.b32.xlu1 %v14158_v10, %s12377_s14 }
0x1f0b   :  { %4012 = vrot.lane.b32.xlu0 %v14202_v18, %s12378_s15 }
0x1f34   :  { %v3869_v25 = vpop.xlane.xlu1 %3868 }
0x1f38   :  { %v3863_v56 = vpop.xlane.xlu1 %3862 }
0x1f39   :  { %v3872_v41 = vpop.xlane.xlu0 %3871 }
0x1f3a   :  { %11779 = vrcp.f32 %v3872_v41 }
0x1f3b   :  { %11781 = vrcp.f32 %v3863_v56 }
0x1f3c   :  { %11783 = vrcp.f32 %v3869_v25  ;;  %v4025_v23 = vpop.permute.xlu1 %4024 }
0x1f3d   :  { %v3866_v19 = vpop.xlane.xlu0 %3865  ;;  %v4048_v37 = vsel %vm332_vm1, %v4025_v23, 0 }
0x1f3e   :  { %11785 = vrcp.f32 %v3866_v19 }
0x1f40   :  { %v4023_v45 = vpop.permute.xlu1 %4022 }
0x1f41   :  { %v3910_v61 = vpop.permute.xlu0 %3909  ;;  %v4045_v38 = vsel %vm332_vm1, %v4023_v45, 0 }
0x1f42   :  { %10764 = vmatprep.subr.bf16.mxu0 %v3910_v61 }
0x1f43   :  { %10765 = vmatpush3.bf16.msra.mxu0 %v3910_v61 }
0x1f44   :  { %11370 = vmatprep.subr.msk.bf16.mxu0 %vm332_vm1, %v4025_v23 }
0x1f47   :  { %v11780_v51 = vpop.eup %11779 }
0x1f48   :  { %v11782_v33 = vpop.eup %11781  ;;  %v3896_v15 = vmul.f32 %v11780_v51, %v14236_v43 }
0x1f49   :  { %v11784_v57 = vpop.eup %11783  ;;  %v3893_v52 = vmul.f32 %v11782_v33, %v14234_v28 }
0x1f4a   :  { %v3895_v53 = vmul.f32 %v11784_v57, %v14230_v62 }
0x1f4b   :  { %v11786_v46 = vpop.eup %11785 }
0x1f4c   :  { %v3894_v5 = vmul.f32 %v11786_v46, %v11770_v32  ;;  %v3902_v59 = vpack.c.bf16 %v3896_v15, %v3895_v53 }
0x1f4e   :  { %v3901_v36 = vpack.c.bf16 %v3894_v5, %v3893_v52 }
0x1f50   :  { %10766 = vmatprep.mubr.msk.bf16.mxu0 %vm422_vm2, %v3901_v36 }
0x1f51   :  { %10767 = vmatmul.mubr.msk.bf16.vlgmr.msra.gmra.mxu0 %vm422_vm2, %v3902_v59 }
0x1f52   :  { %10775 = vmatpush3.bf16.xpose.msra.mxu0 %v4048_v37 }
0x1f53   :  { %11371 = vmatprep.subr.msk.bf16.mxu0 %vm332_vm1, %v4023_v45 }
0x1f5a   :  { %10777 = vmatpush3.bf16.xpose.msra.mxu0 %v4045_v38 }
0x1f71   :  { %v3875_v43 = vpop.xlane.xlu1 %3874 }
0x1f72   :  { %v3881_v28 = vpop.xlane.xlu0 %3880 }
0x1f73   :  { %11787 = vrcp.f32 %v3881_v28 }
0x1f74   :  { %11789 = vrcp.f32 %v3875_v43 }
0x1f75   :  { %v3884_v62 = vpop.xlane.xlu1 %3883 }
0x1f76   :  { %11791 = vrcp.f32 %v3884_v62  ;;  %v3878_v32 = vpop.xlane.xlu0 %3877 }
0x1f77   :  { %11793 = vrcp.f32 %v3878_v32 }
0x1f79   :  { %v4021_v25 = vpop.permute.xlu1 %4020 }
0x1f7a   :  { %11372 = vmatprep.subr.msk.bf16.mxu0 %vm332_vm1, %v4021_v25  ;;  %v4042_v56 = vsel %vm332_vm1, %v4021_v25, 0  ;;  %v4019_v41 = vpop.permute.xlu0 %4018 }
0x1f7b   :  { %10779 = vmatpush3.bf16.xpose.msra.mxu0 %v4042_v56  ;;  %v4039_v33 = vsel %vm332_vm1, %v4019_v41, 0 }
0x1f7c   :  { %11373 = vmatprep.subr.msk.bf16.mxu0 %vm332_vm1, %v4019_v41 }
0x1f7d   :  { %v4007_v19 = vpop.permute.xlu1 %4006 }
0x1f7e   :  { %v4009_v45 = vpop.permute.xlu0 %4008 }
0x1f80   :  { %v11788_v61 = vpop.eup %11787 }
0x1f81   :  { %v4011_v23 = vpop.permute.xlu1 %4010  ;;  %v11790_v51 = vpop.eup %11789  ;;  %v3899_v15 = vmul.f32 %v11788_v61, %v14259_v1 }
0x1f82   :  { %v3897_v53 = vmul.f32 %v11790_v51, %v14257_v16  ;;  %v4013_v1 = vpop.permute.xlu0 %4012 }
0x1f83   :  { %v11792_v57 = vpop.eup %11791  ;;  %10781 = vmatpush3.bf16.xpose.msra.mxu0 %v4039_v33 }
0x1f84   :  { %v11794_v46 = vpop.eup %11793  ;;  %v3900_v52 = vmul.f32 %v11792_v57, %v14263_v17 }
0x1f85   :  { %v4214_v5 = vpop.permute.xlu1 %4213  ;;  %v3898_v36 = vmul.f32 %v11794_v46, %v14267_v58 }
0x1f86   :  { %10790 = vmatprep.subr.bf16.mxu1 %v4214_v5  ;;  %v3904_v59 = vpack.c.bf16 %v3900_v52, %v3899_v15 }
0x1f87   :  { %10791 = vmatpush3.bf16.msra.mxu1 %v4214_v5  ;;  %v3903_v37 = vpack.c.bf16 %v3898_v36, %v3897_v53 }
0x1f89   :  { %10770 = vmatprep.mubr.msk.bf16.mxu0 %vm422_vm2, %v3903_v37 }
0x1f8a   :  { %10771 = vmatmul.mubr.msk.bf16.gmra.mxu0 %vm422_vm2, %v3904_v59 }
0x1f8b   :  { %10782 = vmatprep.mubr.msk.bf16.mxu0 %vm332_vm1, %v4007_v19 }
0x1f92   :  { %10783 = vmatmul.mubr.msk.bf16.vlgmr.msra.gmra.mxu0 %vm332_vm1, %v4009_v45 }
0x1f93   :  { %10786 = vmatprep.mubr.msk.bf16.mxu0 %vm332_vm1, %v4011_v23 }
0x1f9a   :  { %10787 = vmatmul.mubr.msk.bf16.gmra.mxu0 %vm332_vm1, %v4013_v1 }
0x2011   :  { %v14310_v16 = vpop.f32.mrf.mxu0 }
0x2013   :  { %v14312_v17 = vpop.f32.mrf.mxu0 }
0x2015   :  { %v14314_v58 = vpop.f32.mrf.mxu0 }
0x2017   :  { %v14318_v43 = vpop.f32.mrf.mxu0 }
0x204a   :  { %v14320_v28 = vpop.f32.mrf.mxu0 }
0x204c   :  { %v14322_v62 = vpop.f32.mrf.mxu0 }
0x204e   :  { %v14324_v32 = vpop.f32.mrf.mxu0 }
0x2050   :  { %v14328_v56 = vpop.f32.mrf.mxu0 }
0x2052   :  { %v10784_v41 = vpop.f32.mrf.mxu0 }
0x2053   :  { %v4121_v19 = vsel %vm422_vm2, %v10784_v41, -inf }
0x2054   :  { %4122 = vmax.xlane.f32.xlu0 %v4121_v19  ;;  %v4084_v61 = vpop.f32.mrf.mxu0 }
0x2055   :  { %v4115_v23 = vsel %vm422_vm2, %v4084_v61, -inf }
0x2056   :  { %4116 = vmax.xlane.f32.xlu1 %v4115_v23  ;;  %v10785_v51 = vpop.f32.mrf.mxu0 }
0x2057   :  { %v4124_v33 = vsel %vm422_vm2, %v10785_v51, -inf }
0x2058   :  { %4125 = vmax.xlane.f32.xlu0 %v4124_v33  ;;  %v4087_v57 = vpop.f32.mrf.mxu0 }
0x2059   :  { %v4118_v15 = vsel %vm422_vm2, %v4087_v57, -inf }
0x205a   :  { %v10788_v46 = vpop.f32.mrf.mxu0 }
0x205b   :  { %v4133_v52 = vsel %vm422_vm2, %v10788_v46, -inf }
0x205c   :  { %4119 = vmax.xlane.f32.xlu0 %v4118_v15  ;;  %4134 = vmax.xlane.f32.xlu1 %v4133_v52  ;;  %v4100_v5 = vpop.f32.mrf.mxu0 }
0x205d   :  { %v4127_v36 = vsel %vm422_vm2, %v4100_v5, -inf }
0x205e   :  { %v10789_v53 = vpop.f32.mrf.mxu0 }
0x205f   :  { %v4136_v59 = vsel %vm422_vm2, %v10789_v53, -inf }
0x2060   :  { %4128 = vmax.xlane.f32.xlu1 %v4127_v36  ;;  %4137 = vmax.xlane.f32.xlu0 %v4136_v59  ;;  %v4103_v37 = vpop.f32.mrf.mxu0 }
0x2061   :  { %v4130_v45 = vsel %vm422_vm2, %v4103_v37, -inf }
0x2064   :  { %4131 = vmax.xlane.f32.xlu0 %v4130_v45 }
0x2071   :  { %4209 = vrot.lane.b32.xlu1 %v14144_v29, %s12377_s14 }
0x207a   :  { %4211 = vrot.lane.b32.xlu0 %v14226_v44, %s12377_s14 }
0x20dd   :  { %v4123_v1 = vpop.xlane.xlu0 %4122 }
0x20de   :  { %v4141_v19 = vsub.f32 %v10784_v41, %v4123_v1 }
0x20df   :  { %v4117_v23 = vpop.xlane.xlu1 %4116 }
0x20e0   :  { %v4151_v33 = vmul.f32 1.442695, %v4141_v19  ;;  %v4139_v15 = vsub.f32 %v4084_v61, %v4117_v23 }
0x20e1   :  { %v4126_v52 = vpop.xlane.xlu0 %4125 }
0x20e2   :  { %11795 = vpow2.f32 %v4151_v33  ;;  %v4147_v11 = vmul.f32 1.442695, %v4139_v15  ;;  %v4142_v36 = vsub.f32 %v10785_v51, %v4126_v52 }
0x20e4   :  { %11797 = vpow2.f32 %v4147_v11  ;;  %v4153_v59 = vmul.f32 1.442695, %v4142_v36 }
0x20e5   :  { %v4120_v25 = vpop.xlane.xlu0 %4119  ;;  %v4135_v38 = vpop.xlane.xlu1 %4134 }
0x20e6   :  { %11799 = vpow2.f32 %v4153_v59  ;;  %v4140_v45 = vsub.f32 %v4087_v57, %v4120_v25  ;;  %v4145_v33 = vsub.f32 %v10788_v46, %v4135_v38 }
0x20e8   :  { %v4149_v13 = vmul.f32 1.442695, %v4140_v45  ;;  %v4159_v36 = vmul.f32 1.442695, %v4145_v33 }
0x20e9   :  { %v4138_v2 = vpop.xlane.xlu0 %4137  ;;  %v4129_v55 = vpop.xlane.xlu1 %4128 }
0x20ea   :  { %11801 = vpow2.f32 %v4149_v13  ;;  %v4143_v23 = vsub.f32 %v4100_v5, %v4129_v55  ;;  %v4146_v52 = vsub.f32 %v10789_v53, %v4138_v2 }
0x20ec   :  { %v4155_v15 = vmul.f32 1.442695, %v4143_v23  ;;  %v4161_v45 = vmul.f32 1.442695, %v4146_v52 }
0x20ed   :  { %v4132_v4 = vpop.xlane.xlu0 %4131  ;;  %v4210_v1 = vpop.permute.xlu1 %4209 }
0x20ee   :  { %v4144_v59 = vsub.f32 %v4103_v37, %v4132_v4  ;;  %11803 = vpow2.f32 %v4155_v15 }
0x20ef   :  { %v14342_v42 = vpop.eup %11795  ;;  %11805 = vpow2.f32 %v4159_v36 }
0x20f0   :  { %v4169_v41 = vsel %vm422_vm2, %v14342_v42, 0.0  ;;  %11807 = vpow2.f32 %v4161_v45 }
0x20f1   :  { %v14346_v61 = vpop.eup %11797  ;;  %4170 = vadd.xlane.f32.xlu1 %v4169_v41  ;;  %v4212_v51 = vpop.permute.xlu0 %4211  ;;  %v4157_v41 = vmul.f32 1.442695, %v4144_v59 }
0x20f2   :  { %10792 = vmatprep.subr.bf16.mxu1 %v4212_v51  ;;  %v4163_v13 = vsel %vm422_vm2, %v14346_v61, 0.0 }
0x20f3   :  { %v14348_v11 = vpop.eup %11799  ;;  %10793 = vmatpush3.bf16.msra.mxu1 %v4212_v51  ;;  %11809 = vpow2.f32 %v4157_v41 }
0x20f4   :  { %10794 = vmatprep.subr.bf16.mxu1 %v4210_v1  ;;  %v4172_v25 = vsel %vm422_vm2, %v14348_v11, 0.0 }
0x20f5   :  { %4164 = vadd.xlane.f32.xlu1 %v4163_v13  ;;  %4173 = vadd.xlane.f32.xlu0 %v4172_v25 }
0x20f7   :  { %10795 = vmatpush3.bf16.msra.mxu1 %v4210_v1  ;;  %v11802_v57 = vpop.eup %11801 }
0x20f8   :  { %v4166_v19 = vsel %vm422_vm2, %v11802_v57, 0.0 }
0x20f9   :  { %4167 = vadd.xlane.f32.xlu0 %v4166_v19 }
0x20fb   :  { %v14361_v51 = vpop.eup %11803 }
0x20fc   :  { %v14363_v1 = vpop.eup %11805  ;;  %v4175_v13 = vsel %vm422_vm2, %v14361_v51, 0.0 }
0x20fd   :  { %v14367_v25 = vpop.eup %11807  ;;  %v4181_v55 = vsel %vm422_vm2, %v14363_v1, 0.0 }
0x20fe   :  { %v4184_v2 = vsel %vm422_vm2, %v14367_v25, 0.0 }
0x2100   :  { %v14371_v4 = vpop.eup %11809 }
0x2101   :  { %v4178_v38 = vsel %vm422_vm2, %v14371_v4, 0.0 }
0x2106   :  { %4314 = vrot.lane.b32.xlu1 %v14156_v21, %s12381_s18 }
0x210a   :  { %4312 = vrot.lane.b32.xlu1 %v14162_v3, %s12381_s18 }
0x210f   :  { %4207 = vrot.lane.b32.xlu0 %v14251_v40, %s12377_s14 }
0x212e   :  { %4176 = vadd.xlane.f32.xlu1 %v4175_v13  ;;  %4182 = vadd.xlane.f32.xlu0 %v4181_v55 }
0x2132   :  { %4185 = vadd.xlane.f32.xlu1 %v4184_v2  ;;  %4179 = vadd.xlane.f32.xlu0 %v4178_v38 }
0x2143   :  { %4310 = vrot.lane.b32.xlu1 %v14174_v0, %s12381_s18 }
0x2147   :  { %4300 = vrot.lane.b32.xlu1 %v13818_v27, %s12381_s18 }
0x2148   :  { %4308 = vrot.lane.b32.xlu0 %v14184_v6, %s12381_s18 }
0x214b   :  { %4304 = vrot.lane.b32.xlu1 %v14194_v50, %s12381_s18 }
0x214c   :  { %4302 = vrot.lane.b32.xlu0 %v13815_v48, %s12381_s18 }
0x214f   :  { %4503 = vrot.lane.b32.xlu1 %v14158_v10, %s12380_s17 }
0x2150   :  { %4306 = vrot.lane.b32.xlu0 %v14202_v18, %s12381_s18 }
0x217a   :  { %v4171_v46 = vpop.xlane.xlu1 %4170 }
0x217e   :  { %v4174_v5 = vpop.xlane.xlu0 %4173  ;;  %v4165_v53 = vpop.xlane.xlu1 %4164 }
0x217f   :  { %11811 = vrcp.f32 %v4174_v5 }
0x2180   :  { %11813 = vrcp.f32 %v4165_v53 }
0x2181   :  { %11815 = vrcp.f32 %v4171_v46 }
0x2182   :  { %v4168_v37 = vpop.xlane.xlu0 %4167  ;;  %v4315_v23 = vpop.permute.xlu1 %4314 }
0x2183   :  { %11817 = vrcp.f32 %v4168_v37  ;;  %v4338_v38 = vsel %vm332_vm1, %v4315_v23, 0 }
0x2186   :  { %v4208_v19 = vpop.permute.xlu0 %4207  ;;  %v4313_v46 = vpop.permute.xlu1 %4312 }
0x2187   :  { %10796 = vmatprep.subr.bf16.mxu1 %v4208_v19  ;;  %v4335_v5 = vsel %vm332_vm1, %v4313_v46, 0 }
0x2188   :  { %10797 = vmatpush3.bf16.msra.mxu1 %v4208_v19 }
0x2189   :  { %11374 = vmatprep.subr.msk.bf16.mxu1 %vm332_vm1, %v4315_v23 }
0x218c   :  { %v11812_v33 = vpop.eup %11811 }
0x218d   :  { %v11814_v15 = vpop.eup %11813  ;;  %v4198_v59 = vmul.f32 %v11812_v33, %v14348_v11 }
0x218e   :  { %v11816_v52 = vpop.eup %11815  ;;  %v4195_v45 = vmul.f32 %v11814_v15, %v14346_v61 }
0x218f   :  { %v4197_v13 = vmul.f32 %v11816_v52, %v14342_v42 }
0x2190   :  { %v11818_v36 = vpop.eup %11817 }
0x2191   :  { %v4196_v41 = vmul.f32 %v11818_v36, %v11802_v57  ;;  %v4204_v2 = vpack.c.bf16 %v4198_v59, %v4197_v13 }
0x2193   :  { %v4203_v55 = vpack.c.bf16 %v4196_v41, %v4195_v45 }
0x2195   :  { %10798 = vmatprep.mubr.msk.bf16.mxu1 %vm422_vm2, %v4203_v55 }
0x2196   :  { %10799 = vmatmul.mubr.msk.bf16.vlgmr.msra.gmra.mxu1 %vm422_vm2, %v4204_v2 }
0x2197   :  { %10807 = vmatpush3.bf16.xpose.msra.mxu1 %v4338_v38 }
0x2198   :  { %11375 = vmatprep.subr.msk.bf16.mxu1 %vm332_vm1, %v4313_v46 }
0x219f   :  { %10809 = vmatpush3.bf16.xpose.msra.mxu1 %v4335_v5 }
0x21b7   :  { %v4177_v11 = vpop.xlane.xlu1 %4176  ;;  %v4183_v61 = vpop.xlane.xlu0 %4182 }
0x21b8   :  { %11819 = vrcp.f32 %v4183_v61 }
0x21b9   :  { %11821 = vrcp.f32 %v4177_v11 }
0x21bb   :  { %v4186_v42 = vpop.xlane.xlu1 %4185  ;;  %v4180_v57 = vpop.xlane.xlu0 %4179 }
0x21bc   :  { %11823 = vrcp.f32 %v4186_v42 }
0x21bd   :  { %11825 = vrcp.f32 %v4180_v57 }
0x21bf   :  { %v4311_v53 = vpop.permute.xlu1 %4310  ;;  %v4309_v19 = vpop.permute.xlu0 %4308 }
0x21c0   :  { %11376 = vmatprep.subr.msk.bf16.mxu1 %vm332_vm1, %v4311_v53  ;;  %v4332_v37 = vsel %vm332_vm1, %v4311_v53, 0  ;;  %v4329_v36 = vsel %vm332_vm1, %v4309_v19, 0 }
0x21c1   :  { %10811 = vmatpush3.bf16.xpose.msra.mxu1 %v4332_v37 }
0x21c2   :  { %11377 = vmatprep.subr.msk.bf16.mxu1 %vm332_vm1, %v4309_v19 }
0x21c3   :  { %v4301_v23 = vpop.permute.xlu1 %4300  ;;  %v4303_v11 = vpop.permute.xlu0 %4302 }
0x21c5   :  { %v11820_v33 = vpop.eup %11819 }
0x21c6   :  { %v11822_v52 = vpop.eup %11821  ;;  %v4201_v41 = vmul.f32 %v11820_v33, %v14363_v1 }
0x21c7   :  { %v4305_v15 = vpop.permute.xlu1 %4304  ;;  %v4199_v2 = vmul.f32 %v11822_v52, %v14361_v51  ;;  %v4307_v1 = vpop.permute.xlu0 %4306 }
0x21c9   :  { %v11824_v59 = vpop.eup %11823  ;;  %10813 = vmatpush3.bf16.xpose.msra.mxu1 %v4329_v36 }
0x21ca   :  { %v11826_v45 = vpop.eup %11825  ;;  %v4202_v13 = vmul.f32 %v11824_v59, %v14367_v25 }
0x21cb   :  { %v4504_v55 = vpop.permute.xlu1 %4503  ;;  %v4200_v38 = vmul.f32 %v11826_v45, %v14371_v4 }
0x21cc   :  { %10822 = vmatprep.subr.bf16.mxu0 %v4504_v55  ;;  %v4206_v46 = vpack.c.bf16 %v4202_v13, %v4201_v41 }
0x21cd   :  { %10823 = vmatpush3.bf16.msra.mxu0 %v4504_v55  ;;  %v4205_v5 = vpack.c.bf16 %v4200_v38, %v4199_v2 }
0x21cf   :  { %10802 = vmatprep.mubr.msk.bf16.mxu1 %vm422_vm2, %v4205_v5 }
0x21d0   :  { %10803 = vmatmul.mubr.msk.bf16.gmra.mxu1 %vm422_vm2, %v4206_v46 }
0x21d1   :  { %10814 = vmatprep.mubr.msk.bf16.mxu1 %vm332_vm1, %v4301_v23 }
0x21d8   :  { %10815 = vmatmul.mubr.msk.bf16.vlgmr.msra.gmra.mxu1 %vm332_vm1, %v4303_v11 }
0x21d9   :  { %10818 = vmatprep.mubr.msk.bf16.mxu1 %vm332_vm1, %v4305_v15 }
0x21e0   :  { %10819 = vmatmul.mubr.msk.bf16.gmra.mxu1 %vm332_vm1, %v4307_v1 }
0x2256   :  { %v14414_v51 = vpop.f32.mrf.mxu1 }
0x2258   :  { %v14416_v25 = vpop.f32.mrf.mxu1 }
0x225a   :  { %v14418_v4 = vpop.f32.mrf.mxu1 }
0x225c   :  { %v14422_v42 = vpop.f32.mrf.mxu1 }
0x2290   :  { %v14424_v57 = vpop.f32.mrf.mxu1 }
0x2292   :  { %v14426_v53 = vpop.f32.mrf.mxu1 }
0x2294   :  { %v14428_v37 = vpop.f32.mrf.mxu1 }
0x2296   :  { %v14432_v23 = vpop.f32.mrf.mxu1 }
0x2298   :  { %v10816_v33 = vpop.f32.mrf.mxu1 }
0x2299   :  { %v4411_v15 = vsel %vm422_vm2, %v10816_v33, -inf }
0x229a   :  { %4412 = vmax.xlane.f32.xlu0 %v4411_v15  ;;  %v4374_v52 = vpop.f32.mrf.mxu1 }
0x229b   :  { %v4405_v36 = vsel %vm422_vm2, %v4374_v52, -inf }
0x229c   :  { %4406 = vmax.xlane.f32.xlu1 %v4405_v36  ;;  %v10817_v59 = vpop.f32.mrf.mxu1 }
0x229d   :  { %v4414_v45 = vsel %vm422_vm2, %v10817_v59, -inf }
0x229e   :  { %4415 = vmax.xlane.f32.xlu0 %v4414_v45  ;;  %v4377_v41 = vpop.f32.mrf.mxu1 }
0x229f   :  { %v4408_v55 = vsel %vm422_vm2, %v4377_v41, -inf }
0x22a0   :  { %v10820_v13 = vpop.f32.mrf.mxu1 }
0x22a1   :  { %v4423_v2 = vsel %vm422_vm2, %v10820_v13, -inf }
0x22a2   :  { %4409 = vmax.xlane.f32.xlu0 %v4408_v55  ;;  %4424 = vmax.xlane.f32.xlu1 %v4423_v2  ;;  %v4390_v38 = vpop.f32.mrf.mxu1 }
0x22a3   :  { %v4417_v5 = vsel %vm422_vm2, %v4390_v38, -inf }
0x22a4   :  { %v10821_v46 = vpop.f32.mrf.mxu1 }
0x22a5   :  { %v4426_v11 = vsel %vm422_vm2, %v10821_v46, -inf }
0x22a6   :  { %4418 = vmax.xlane.f32.xlu1 %v4417_v5  ;;  %4427 = vmax.xlane.f32.xlu0 %v4426_v11  ;;  %v4393_v1 = vpop.f32.mrf.mxu1 }
0x22a7   :  { %v4420_v15 = vsel %vm422_vm2, %v4393_v1, -inf }
0x22aa   :  { %4421 = vmax.xlane.f32.xlu0 %v4420_v15 }
0x22b7   :  { %4499 = vrot.lane.b32.xlu1 %v14144_v29, %s12380_s17 }
0x22c0   :  { %4501 = vrot.lane.b32.xlu0 %v14226_v44, %s12380_s17 }
0x2323   :  { %v4413_v36 = vpop.xlane.xlu0 %4412 }
0x2324   :  { %v4431_v45 = vsub.f32 %v10816_v33, %v4413_v36 }
0x2325   :  { %v4407_v55 = vpop.xlane.xlu1 %4406 }
0x2326   :  { %v4441_v2 = vmul.f32 1.442695, %v4431_v45  ;;  %v4429_v19 = vsub.f32 %v4374_v52, %v4407_v55 }
0x2327   :  { %v4416_v61 = vpop.xlane.xlu0 %4415 }
0x2328   :  { %11827 = vpow2.f32 %v4441_v2  ;;  %v4437_v35 = vmul.f32 1.442695, %v4429_v19  ;;  %v4432_v5 = vsub.f32 %v10817_v59, %v4416_v61 }
0x232a   :  { %11829 = vpow2.f32 %v4437_v35  ;;  %v4443_v11 = vmul.f32 1.442695, %v4432_v5 }
0x232b   :  { %v4410_v8 = vpop.xlane.xlu0 %4409  ;;  %v4425_v39 = vpop.xlane.xlu1 %4424 }
0x232c   :  { %11831 = vpow2.f32 %v4443_v11  ;;  %v4430_v15 = vsub.f32 %v4377_v41, %v4410_v8  ;;  %v4435_v45 = vsub.f32 %v10820_v13, %v4425_v39 }
0x232e   :  { %v4439_v12 = vmul.f32 1.442695, %v4430_v15  ;;  %v4449_v5 = vmul.f32 1.442695, %v4435_v45 }
0x232f   :  { %v4428_v9 = vpop.xlane.xlu0 %4427  ;;  %v4419_v20 = vpop.xlane.xlu1 %4418 }
0x2330   :  { %11833 = vpow2.f32 %v4439_v12  ;;  %v4433_v36 = vsub.f32 %v4390_v38, %v4419_v20  ;;  %v4436_v2 = vsub.f32 %v10821_v46, %v4428_v9 }
0x2332   :  { %v4445_v55 = vmul.f32 1.442695, %v4433_v36  ;;  %v4451_v15 = vmul.f32 1.442695, %v4436_v2 }
0x2333   :  { %v4422_v30 = vpop.xlane.xlu0 %4421  ;;  %v4500_v19 = vpop.permute.xlu1 %4499 }
0x2334   :  { %v4434_v11 = vsub.f32 %v4393_v1, %v4422_v30  ;;  %11835 = vpow2.f32 %v4445_v55 }
0x2335   :  { %v14446_v54 = vpop.eup %11827  ;;  %11837 = vpow2.f32 %v4449_v5 }
0x2336   :  { %v4459_v33 = vsel %vm422_vm2, %v14446_v54, 0.0  ;;  %11839 = vpow2.f32 %v4451_v15 }
0x2337   :  { %v14450_v52 = vpop.eup %11829  ;;  %4460 = vadd.xlane.f32.xlu1 %v4459_v33  ;;  %v4502_v61 = vpop.permute.xlu0 %4501  ;;  %v4447_v33 = vmul.f32 1.442695, %v4434_v11 }
0x2338   :  { %10824 = vmatprep.subr.bf16.mxu0 %v4502_v61  ;;  %v4453_v8 = vsel %vm422_vm2, %v14450_v52, 0.0 }
0x2339   :  { %v11832_v35 = vpop.eup %11831  ;;  %10825 = vmatpush3.bf16.msra.mxu0 %v4502_v61  ;;  %11841 = vpow2.f32 %v4447_v33 }
0x233a   :  { %10826 = vmatprep.subr.bf16.mxu0 %v4500_v19  ;;  %v4462_v12 = vsel %vm422_vm2, %v11832_v35, 0.0 }
0x233b   :  { %4454 = vadd.xlane.f32.xlu1 %v4453_v8  ;;  %4463 = vadd.xlane.f32.xlu0 %v4462_v12 }
0x233d   :  { %10827 = vmatpush3.bf16.msra.mxu0 %v4500_v19  ;;  %v11834_v59 = vpop.eup %11833 }
0x233e   :  { %v4456_v41 = vsel %vm422_vm2, %v11834_v59, 0.0 }
0x233f   :  { %4457 = vadd.xlane.f32.xlu0 %v4456_v41 }
0x2341   :  { %v14462_v61 = vpop.eup %11835 }
0x234c   :  { %4604 = vrot.lane.b32.xlu1 %v14156_v21, %s12384_s21  ;;  %v14464_v21 = vpop.eup %11837 }
0x234d   :  { %v14468_v19 = vpop.eup %11839  ;;  %v4471_v39 = vsel %vm422_vm2, %v14464_v21, 0.0 }
0x234e   :  { %v14472_v20 = vpop.eup %11841  ;;  %v4474_v30 = vsel %vm422_vm2, %v14468_v19, 0.0 }
0x234f   :  { %v4468_v9 = vsel %vm422_vm2, %v14472_v20, 0.0 }
0x2350   :  { %4602 = vrot.lane.b32.xlu1 %v14162_v3, %s12384_s21  ;;  %v4465_v3 = vsel %vm422_vm2, %v14462_v61, 0.0 }
0x2355   :  { %4497 = vrot.lane.b32.xlu0 %v14251_v40, %s12380_s17 }
0x2374   :  { %4466 = vadd.xlane.f32.xlu1 %v4465_v3  ;;  %4472 = vadd.xlane.f32.xlu0 %v4471_v39 }
0x2378   :  { %4475 = vadd.xlane.f32.xlu1 %v4474_v30  ;;  %4469 = vadd.xlane.f32.xlu0 %v4468_v9 }
0x2389   :  { %4600 = vrot.lane.b32.xlu1 %v14174_v0, %s12384_s21 }
0x238d   :  { %4590 = vrot.lane.b32.xlu1 %v13818_v27, %s12384_s21 }
0x238e   :  { %4598 = vrot.lane.b32.xlu0 %v14184_v6, %s12384_s21 }
0x2391   :  { %4594 = vrot.lane.b32.xlu1 %v14194_v50, %s12384_s21 }
0x2392   :  { %4592 = vrot.lane.b32.xlu0 %v13815_v48, %s12384_s21 }
0x2396   :  { %4596 = vrot.lane.b32.xlu0 %v14202_v18, %s12384_s21 }
0x23c0   :  { %v4461_v13 = vpop.xlane.xlu1 %4460 }
0x23c4   :  { %v4464_v38 = vpop.xlane.xlu0 %4463  ;;  %v4455_v46 = vpop.xlane.xlu1 %4454 }
0x23c5   :  { %11843 = vrcp.f32 %v4464_v38 }
0x23c6   :  { %11845 = vrcp.f32 %v4455_v46 }
0x23c7   :  { %11847 = vrcp.f32 %v4461_v13 }
0x23c8   :  { %v4458_v0 = vpop.xlane.xlu0 %4457  ;;  %v4605_v6 = vpop.permute.xlu1 %4604 }
0x23c9   :  { %11849 = vrcp.f32 %v4458_v0  ;;  %v4628_v2 = vsel %vm332_vm1, %v4605_v6, 0 }
0x23cc   :  { %v4498_v27 = vpop.permute.xlu0 %4497  ;;  %v4603_v5 = vpop.permute.xlu1 %4602 }
0x23cd   :  { %10828 = vmatprep.subr.bf16.mxu0 %v4498_v27  ;;  %v4625_v11 = vsel %vm332_vm1, %v4603_v5, 0 }
0x23ce   :  { %10829 = vmatpush3.bf16.msra.mxu0 %v4498_v27 }
0x23cf   :  { %11378 = vmatprep.subr.msk.bf16.mxu0 %vm332_vm1, %v4605_v6 }
0x23d2   :  { %v11844_v50 = vpop.eup %11843 }
0x23d3   :  { %v11846_v1 = vpop.eup %11845  ;;  %v4488_v12 = vmul.f32 %v11844_v50, %v11832_v35 }
0x23d4   :  { %v11848_v48 = vpop.eup %11847  ;;  %v4485_v18 = vmul.f32 %v11846_v1, %v14450_v52 }
0x23d5   :  { %v4487_v36 = vmul.f32 %v11848_v48, %v14446_v54 }
0x23d6   :  { %v11850_v8 = vpop.eup %11849 }
0x23d7   :  { %v4486_v41 = vmul.f32 %v11850_v8, %v11834_v59  ;;  %v4494_v55 = vpack.c.bf16 %v4488_v12, %v4487_v36 }
0x23d9   :  { %v4493_v45 = vpack.c.bf16 %v4486_v41, %v4485_v18 }
0x23db   :  { %10830 = vmatprep.mubr.msk.bf16.mxu0 %vm422_vm2, %v4493_v45 }
0x23dc   :  { %10831 = vmatmul.mubr.msk.bf16.vlgmr.msra.gmra.mxu0 %vm422_vm2, %v4494_v55 }
0x23dd   :  { %10839 = vmatpush3.bf16.xpose.msra.mxu0 %v4628_v2 }
0x23de   :  { %11379 = vmatprep.subr.msk.bf16.mxu0 %vm332_vm1, %v4603_v5 }
0x23e5   :  { %10841 = vmatpush3.bf16.xpose.msra.mxu0 %v4625_v11 }
0x23fd   :  { %v4467_v35 = vpop.xlane.xlu1 %4466  ;;  %v4473_v52 = vpop.xlane.xlu0 %4472 }
0x23fe   :  { %11851 = vrcp.f32 %v4473_v52 }
0x23ff   :  { %11853 = vrcp.f32 %v4467_v35 }
0x2401   :  { %v4476_v54 = vpop.xlane.xlu1 %4475  ;;  %v4470_v59 = vpop.xlane.xlu0 %4469 }
0x2402   :  { %11855 = vrcp.f32 %v4476_v54 }
0x2403   :  { %11857 = vrcp.f32 %v4470_v59 }
0x2405   :  { %v4601_v15 = vpop.permute.xlu1 %4600  ;;  %v4599_v3 = vpop.permute.xlu0 %4598 }
0x2406   :  { %11380 = vmatprep.subr.msk.bf16.mxu0 %vm332_vm1, %v4601_v15  ;;  %v4622_v33 = vsel %vm332_vm1, %v4601_v15, 0  ;;  %v4619_v9 = vsel %vm332_vm1, %v4599_v3, 0 }
0x2407   :  { %10843 = vmatpush3.bf16.xpose.msra.mxu0 %v4622_v33 }
0x2408   :  { %11381 = vmatprep.subr.msk.bf16.mxu0 %vm332_vm1, %v4599_v3 }
0x2409   :  { %v4591_v48 = vpop.permute.xlu1 %4590  ;;  %v4593_v8 = vpop.permute.xlu0 %4592 }
0x240b   :  { %v11852_v39 = vpop.eup %11851 }
0x240c   :  { %v11854_v30 = vpop.eup %11853  ;;  %v4491_v46 = vmul.f32 %v11852_v39, %v14464_v21 }
0x240d   :  { %v4489_v27 = vmul.f32 %v11854_v30, %v14462_v61  ;;  %v4595_v12 = vpop.permute.xlu1 %4594  ;;  %v4597_v21 = vpop.permute.xlu0 %4596 }
0x240f   :  { %v11856_v13 = vpop.eup %11855  ;;  %10845 = vmatpush3.bf16.xpose.msra.mxu0 %v4619_v9 }
0x2410   :  { %v11858_v38 = vpop.eup %11857  ;;  %v4492_v0 = vmul.f32 %v11856_v13, %v14468_v19 }
0x2411   :  { %v4490_v6 = vmul.f32 %v11858_v38, %v14472_v20 }
0x2412   :  { %v4496_v50 = vpack.c.bf16 %v4492_v0, %v4491_v46 }
0x2413   :  { %v4495_v1 = vpack.c.bf16 %v4490_v6, %v4489_v27 }
0x2415   :  { %10834 = vmatprep.mubr.msk.bf16.mxu0 %vm422_vm2, %v4495_v1 }
0x2416   :  { %10835 = vmatmul.mubr.msk.bf16.gmra.mxu0 %vm422_vm2, %v4496_v50 }
0x2417   :  { %10846 = vmatprep.mubr.msk.bf16.mxu0 %vm332_vm1, %v4591_v48 }
0x241e   :  { %10847 = vmatmul.mubr.msk.bf16.vlgmr.msra.gmra.mxu0 %vm332_vm1, %v4593_v8 }
0x241f   :  { %10850 = vmatprep.mubr.msk.bf16.mxu0 %vm332_vm1, %v4595_v12 }
0x2426   :  { %10851 = vmatmul.mubr.msk.bf16.gmra.mxu0 %vm332_vm1, %v4597_v21 }
0x249c   :  { %v14512_v61 = vpop.f32.mrf.mxu0 }
0x249e   :  { %v14514_v19 = vpop.f32.mrf.mxu0 }
0x24a0   :  { %v14516_v20 = vpop.f32.mrf.mxu0 }
0x24a2   :  { %v14520_v41 = vpop.f32.mrf.mxu0 }
0x24d6   :  { %v14522_v36 = vpop.f32.mrf.mxu0 }
0x24d8   :  { %v14524_v45 = vpop.f32.mrf.mxu0 }
0x24da   :  { %v14526_v55 = vpop.f32.mrf.mxu0 }
0x24dc   :  { %v14530_v5 = vpop.f32.mrf.mxu0 }
0x24de   :  { %v10848_v11 = vpop.f32.mrf.mxu0 }
0x24df   :  { %v4701_v35 = vsel %vm422_vm2, %v10848_v11, -inf }
0x24e0   :  { %4702 = vmax.xlane.f32.xlu0 %v4701_v35  ;;  %v4664_v52 = vpop.f32.mrf.mxu0 }
0x24e1   :  { %v4695_v54 = vsel %vm422_vm2, %v4664_v52, -inf }
0x24e2   :  { %4696 = vmax.xlane.f32.xlu1 %v4695_v54  ;;  %v10849_v59 = vpop.f32.mrf.mxu0 }
0x24e3   :  { %v4704_v30 = vsel %vm422_vm2, %v10849_v59, -inf }
0x24e4   :  { %v4667_v15 = vpop.f32.mrf.mxu0 }
0x24e5   :  { %v4698_v33 = vsel %vm422_vm2, %v4667_v15, -inf }
0x24e6   :  { %4699 = vmax.xlane.f32.xlu0 %v4698_v33  ;;  %v10852_v3 = vpop.f32.mrf.mxu0 }
0x24e7   :  { %v4713_v46 = vsel %vm422_vm2, %v10852_v3, -inf }
0x24e8   :  { %v4680_v39 = vpop.f32.mrf.mxu0 }
0x24e9   :  { %v4707_v9 = vsel %vm422_vm2, %v4680_v39, -inf }
0x24ea   :  { %4705 = vmax.xlane.f32.xlu0 %v4704_v30  ;;  %4708 = vmax.xlane.f32.xlu1 %v4707_v9  ;;  %v10853_v13 = vpop.f32.mrf.mxu0 }
0x24eb   :  { %v4716_v27 = vsel %vm422_vm2, %v10853_v13, -inf }
0x24ec   :  { %v4683_v38 = vpop.f32.mrf.mxu0 }
0x24ed   :  { %v4710_v0 = vsel %vm422_vm2, %v4683_v38, -inf }
0x24ee   :  { %4714 = vmax.xlane.f32.xlu1 %v4713_v46  ;;  %4711 = vmax.xlane.f32.xlu0 %v4710_v0 }
0x24f2   :  { %4717 = vmax.xlane.f32.xlu0 %v4716_v27 }
0x24ff   :  { %4793 = vrot.lane.b32.xlu1 %v14158_v10, %s12383_s20 }
0x2569   :  { %v4703_v6 = vpop.xlane.xlu0 %4702 }
0x256a   :  { %v4721_v50 = vsub.f32 %v10848_v11, %v4703_v6 }
0x256b   :  { %v4697_v1 = vpop.xlane.xlu1 %4696 }
0x256c   :  { %v4731_v48 = vmul.f32 1.442695, %v4721_v50  ;;  %v4719_v8 = vsub.f32 %v4664_v52, %v4697_v1 }
0x256e   :  { %11859 = vpow2.f32 %v4731_v48  ;;  %v4727_v12 = vmul.f32 1.442695, %v4719_v8 }
0x256f   :  { %v4700_v21 = vpop.xlane.xlu0 %4699 }
0x2570   :  { %11861 = vpow2.f32 %v4727_v12  ;;  %v4720_v35 = vsub.f32 %v4667_v15, %v4700_v21 }
0x2572   :  { %v4729_v0 = vmul.f32 1.442695, %v4720_v35 }
0x2573   :  { %v4709_v54 = vpop.xlane.xlu1 %4708  ;;  %v4706_v33 = vpop.xlane.xlu0 %4705 }
0x2574   :  { %v4722_v30 = vsub.f32 %v10849_v59, %v4706_v33  ;;  %v4723_v9 = vsub.f32 %v4680_v39, %v4709_v54 }
0x2576   :  { %v4733_v46 = vmul.f32 1.442695, %v4722_v30  ;;  %v4735_v10 = vmul.f32 1.442695, %v4723_v9 }
0x2577   :  { %v4715_v27 = vpop.xlane.xlu1 %4714  ;;  %v4712_v2 = vpop.xlane.xlu0 %4711 }
0x2578   :  { %v4725_v18 = vsub.f32 %v10852_v3, %v4715_v27  ;;  %11863 = vpow2.f32 %v4733_v46  ;;  %v4724_v52 = vsub.f32 %v4683_v38, %v4712_v2  ;;  %v4586_v27 = vpack.c.bf16 %v14520_v41, %v14514_v19 }
0x2579   :  { %11865 = vpow2.f32 %v4729_v0  ;;  %v4296_v0 = vpack.c.bf16 %v14422_v42, %v14416_v25 }
0x257a   :  { %v4739_v11 = vmul.f32 1.442695, %v4725_v18  ;;  %v4737_v48 = vmul.f32 1.442695, %v4724_v52 }
0x257b   :  { %v14542_v6 = vpop.eup %11859  ;;  %v4794_v50 = vpop.permute.xlu1 %4793 }
0x257c   :  { %v4718_v1 = vpop.xlane.xlu0 %4717  ;;  %11867 = vpow2.f32 %v4739_v11  ;;  %10854 = vmatprep.subr.bf16.mxu1 %v4794_v50  ;;  %v4749_v59 = vsel %vm422_vm2, %v14542_v6, 0.0 }
0x257d   :  { %v4726_v15 = vsub.f32 %v10853_v13, %v4718_v1  ;;  %v14546_v39 = vpop.eup %11861  ;;  %10855 = vmatpush3.bf16.msra.mxu1 %v4794_v50  ;;  %4750 = vadd.xlane.f32.xlu1 %v4749_v59  ;;  %11869 = vpow2.f32 %v4735_v10  ;;  %v4298_v10 = vpack.c.bf16 %v14432_v23, %v14426_v53 }
0x257e   :  { %v4743_v18 = vsel %vm422_vm2, %v14546_v39, 0.0 }
0x257f   :  { %v4741_v3 = vmul.f32 1.442695, %v4726_v15 }
0x2581   :  { %11871 = vpow2.f32 %v4741_v3  ;;  %4744 = vadd.xlane.f32.xlu1 %v4743_v18 }
0x2582   :  { %11873 = vpow2.f32 %v4737_v48 }
0x2585   :  { %v11864_v2 = vpop.eup %11863 }
0x2586   :  { %v4752_v13 = vsel %vm422_vm2, %v11864_v2, 0.0  ;;  %v11866_v38 = vpop.eup %11865 }
0x2587   :  { %4753 = vadd.xlane.f32.xlu0 %v4752_v13  ;;  %v4746_v35 = vsel %vm422_vm2, %v11866_v38, 0.0 }
0x2589   :  { %v14551_v8 = vpop.eup %11867 }
0x258a   :  { %v4761_v12 = vsel %vm422_vm2, %v14551_v8, 0.0  ;;  %v14555_v21 = vpop.eup %11869 }
0x258b   :  { %4762 = vadd.xlane.f32.xlu1 %v4761_v12  ;;  %4747 = vadd.xlane.f32.xlu0 %v4746_v35  ;;  %v4755_v33 = vsel %vm422_vm2, %v14555_v21, 0.0 }
0x258e   :  { %v14558_v54 = vpop.eup %11871 }
0x258f   :  { %v4764_v30 = vsel %vm422_vm2, %v14558_v54, 0.0  ;;  %4756 = vadd.xlane.f32.xlu1 %v4755_v33  ;;  %v11874_v9 = vpop.eup %11873 }
0x2590   :  { %4765 = vadd.xlane.f32.xlu0 %v4764_v30  ;;  %v4758_v46 = vsel %vm422_vm2, %v11874_v9, 0.0 }
0x2594   :  { %4759 = vadd.xlane.f32.xlu0 %v4758_v46 }
0x25a0   :  { %4789 = vrot.lane.b32.xlu1 %v14144_v29, %s12383_s20  ;;  %v16691_v29 = vpack.c.bf16 %v14418_v4, %v14414_v51 }
0x25a4   :  { %4787 = vrot.lane.b32.xlu1 %v14251_v40, %s12383_s20  ;;  %v16692_v40 = vpack.c.bf16 %v14516_v20, %v14512_v61 }
0x25a8   :  { %4884 = vrot.lane.b32.xlu1 %v4296_v0, %s12387_s28 }
0x25aa   :  { %4791 = vrot.lane.b32.xlu0 %v14226_v44, %s12383_s20  ;;  %v16693_v44 = vpack.c.bf16 %v14428_v37, %v14424_v57 }
0x25ac   :  { %4896 = vrot.lane.b32.xlu1 %v4586_v27, %s12386_s27 }
0x25ae   :  { %4886 = vrot.lane.b32.xlu0 %v16691_v29, %s12387_s28 }
0x25b0   :  { %4888 = vrot.lane.b32.xlu1 %v4298_v10, %s12387_s28 }
0x25b2   :  { %4898 = vrot.lane.b32.xlu0 %v16692_v40, %s12386_s27 }
0x25b6   :  { %4890 = vrot.lane.b32.xlu0 %v16693_v44, %s12387_s28 }
0x2606   :  { %v4751_v25 = vpop.xlane.xlu1 %4750 }
0x260a   :  { %v4745_v42 = vpop.xlane.xlu1 %4744 }
0x260b   :  { %11875 = vrcp.f32 %v4745_v42 }
0x2610   :  { %v4754_v53 = vpop.xlane.xlu0 %4753 }
0x2614   :  { %v4763_v23 = vpop.xlane.xlu1 %4762  ;;  %v4748_v19 = vpop.xlane.xlu0 %4747 }
0x2615   :  { %11877 = vrcp.f32 %v4748_v19 }
0x2616   :  { %11879 = vrcp.f32 %v4754_v53 }
0x2617   :  { %11881 = vrcp.f32 %v4751_v25 }
0x2618   :  { %v4757_v51 = vpop.xlane.xlu1 %4756  ;;  %v11876_v61 = vpop.eup %11875 }
0x2619   :  { %v4766_v4 = vpop.xlane.xlu0 %4765  ;;  %11883 = vrcp.f32 %v4757_v51  ;;  %v4775_v37 = vmul.f32 %v11876_v61, %v14546_v39 }
0x261c   :  { %v4790_v20 = vpop.permute.xlu1 %4789 }
0x261d   :  { %v4760_v41 = vpop.xlane.xlu0 %4759 }
0x261e   :  { %11885 = vrcp.f32 %v4760_v41  ;;  %v16695_v41 = vpack.c.bf16 %v14314_v58, %v14310_v16  ;;  %v4000_v16 = vpack.c.bf16 %v14328_v56, %v14322_v62 }
0x261f   :  { %11887 = vrcp.f32 %v4766_v4 }
0x2620   :  { %11889 = vrcp.f32 %v4763_v23  ;;  %v4788_v59 = vpop.permute.xlu1 %4787 }
0x2621   :  { %v4792_v11 = vpop.permute.xlu0 %4791 }
0x2622   :  { %10856 = vmatprep.subr.bf16.mxu1 %v4792_v11  ;;  %v11878_v57 = vpop.eup %11877 }
0x2623   :  { %10857 = vmatpush3.bf16.msra.mxu1 %v4792_v11  ;;  %v4776_v52 = vmul.f32 %v11878_v57, %v11866_v38  ;;  %v11880_v50 = vpop.eup %11879 }
0x2624   :  { %10858 = vmatprep.subr.bf16.mxu1 %v4790_v20  ;;  %v11882_v15 = vpop.eup %11881  ;;  %v4778_v3 = vmul.f32 %v11880_v50, %v11864_v2  ;;  %v4885_v23 = vpop.permute.xlu1 %4884 }
0x2625   :  { %v4783_v1 = vpack.c.bf16 %v4776_v52, %v4775_v37  ;;  %v4777_v18 = vmul.f32 %v11882_v15, %v14542_v6  ;;  %v4887_v53 = vpop.permute.xlu0 %4886 }
0x2626   :  { %v11884_v48 = vpop.eup %11883  ;;  %v4921_v61 = vsel %vm332_vm1, %v16695_v41, %v4887_v53 }
0x2627   :  { %10859 = vmatpush3.bf16.msra.mxu1 %v4790_v20  ;;  %10862 = vmatprep.mubr.msk.bf16.mxu1 %vm422_vm2, %v4783_v1  ;;  %v4784_v12 = vpack.c.bf16 %v4778_v3, %v4777_v18  ;;  %v4779_v39 = vmul.f32 %v11884_v48, %v14555_v21  ;;  %v16696_v1 = vpack.c.bf16 %v14324_v32, %v14320_v28  ;;  %v16697_v28 = vld [vmem:[#allocation11_spill] sm:$0xff] }
0x2628   :  { %10860 = vmatprep.subr.bf16.mxu1 %v4788_v59  ;;  %v4897_v51 = vpop.permute.xlu1 %4896 }
0x2629   :  { %v4899_v19 = vpop.permute.xlu0 %4898 }
0x262a   :  { %v4931_v57 = vsel %vm1534_vm3, %v4921_v61, %v4899_v19 }
0x262b   :  { %v11886_v13 = vpop.eup %11885  ;;  %10861 = vmatpush3.bf16.msra.mxu1 %v4788_v59 }
0x262c   :  { %10870 = vmatprep.subr.bf16.mxu1 %v13894_v63  ;;  %v4780_v38 = vmul.f32 %v11886_v13, %v11874_v9  ;;  %v11888_v35 = vpop.eup %11887 }
0x262d   :  { %v11890_v30 = vpop.eup %11889  ;;  %v4782_v6 = vmul.f32 %v11888_v35, %v14558_v54  ;;  %v16698_v35 = vld [vmem:[#allocation10_spill] sm:$0xff] }
0x262e   :  { %10863 = vmatmul.mubr.msk.bf16.vlgmr.msra.gmra.mxu1 %vm422_vm2, %v4784_v12  ;;  %v4785_v33 = vpack.c.bf16 %v4780_v38, %v4779_v39  ;;  %v4781_v2 = vmul.f32 %v11890_v30, %v14551_v8  ;;  %v4588_v8 = vpack.c.bf16 %v14530_v5, %v14524_v45  ;;  %v4891_v45 = vpop.permute.xlu0 %4890  ;;  %v4889_v5 = vpop.permute.xlu1 %4888 }
0x262f   :  { %10871 = vmatpush3.bf16.msra.mxu1 %v13894_v63  ;;  %v4924_v58 = vsel %vm332_vm1, %v4000_v16, %v4889_v5  ;;  %v4927_v15 = vsel %vm332_vm1, %v16696_v1, %v4891_v45 }
0x2630   :  { %10866 = vmatprep.mubr.msk.bf16.mxu1 %vm422_vm2, %v4785_v33  ;;  %10872 = vmatprep.subr.bf16.mxu1 %v13900_v24  ;;  %v4786_v46 = vpack.c.bf16 %v4782_v6, %v4781_v2 }
0x2633   :  { %10873 = vmatpush3.bf16.msra.mxu1 %v13900_v24  ;;  %v16694_v24 = vpack.c.bf16 %v14526_v55, %v14522_v36  ;;  %v3998_v36 = vpack.c.bf16 %v14318_v43, %v14312_v17 }
0x2635   :  { %v4918_v4 = vsel %vm332_vm1, %v3998_v36, %v4885_v23  ;;  %v16702_v23 = vld [vmem:[#allocation15_spill] sm:$0xff]  ;;  %v16703_v36 = vld [vmem:[#allocation16_spill] sm:$0xff] }
0x2636   :  { %10867 = vmatmul.mubr.msk.bf16.gmra.mxu1 %vm422_vm2, %v4786_v46  ;;  %v4929_v20 = vsel %vm1534_vm3, %v4918_v4, %v4897_v51  ;;  %v16704_v4 = vld [vmem:[#allocation17_spill] sm:$0xff] }
0x26ee   :  { %v10864_v21 = vpop.f32.mrf.mxu1 }
0x26f0   :  { %v4845_v9 = vpop.f32.mrf.mxu1 }
0x26f2   :  { %v10865_v0 = vpop.f32.mrf.mxu1 }
0x26f3   :  { %v4877_v27 = vpack.c.bf16 %v10865_v0, %v10864_v21  ;;  %v16699_v0 = vld [vmem:[#allocation12_spill] sm:$0xff] }
0x26f4   :  { %v4848_v10 = vpop.f32.mrf.mxu1 }
0x26f5   :  { %v4876_v29 = vpack.c.bf16 %v4848_v10, %v4845_v9  ;;  %4910 = vrot.lane.b32.xlu0 %v4877_v27, %s12388_s29  ;;  %v16700_v10 = vld [vmem:[#allocation13_spill] sm:$0xff] }
0x26f6   :  { %v10868_v63 = vpop.f32.mrf.mxu1 }
0x26f7   :  { %4908 = vrot.lane.b32.xlu1 %v4876_v29, %s12388_s29 }
0x26f8   :  { %v4861_v40 = vpop.f32.mrf.mxu1 }
0x26f9   :  { %4902 = vrot.lane.b32.xlu0 %v16694_v24, %s12386_s27 }
0x26fa   :  { %v10869_v54 = vpop.f32.mrf.mxu1 }
0x26fb   :  { %v4879_v44 = vpack.c.bf16 %v10869_v54, %v10868_v63  ;;  %4900 = vrot.lane.b32.xlu1 %v4588_v8, %s12386_s27 }
0x26fc   :  { %v4864_v25 = vpop.f32.mrf.mxu1 }
0x26fd   :  { %v4878_v42 = vpack.c.bf16 %v4864_v25, %v4861_v40  ;;  %4914 = vrot.lane.b32.xlu0 %v4879_v44, %s12388_s29  ;;  %v16701_v44 = vld [vmem:[#allocation14_spill] sm:$0xff] }
0x26ff   :  { %4912 = vrot.lane.b32.xlu1 %v4878_v42, %s12388_s29 }
0x2767   :  { %v4911_v55 = vpop.permute.xlu0 %4910 }
0x2768   :  { %v4939_v52 = vsel %vm1543_vm4, %v4931_v57, %v4911_v55 }
0x2769   :  { %v4909_v11 = vpop.permute.xlu1 %4908 }
0x276a   :  { %v4937_v37 = vsel %vm1543_vm4, %v4929_v20, %v4909_v11 }
0x276b   :  { %10874 = vmatprep.mubr.msk.bf16.mxu1 %vm41_vm0, %v4937_v37  ;;  %v4903_v17 = vpop.permute.xlu0 %4902 }
0x276c   :  { %10875 = vmatmul.mubr.msk.bf16.vlgmr.msra.gmra.mxu1 %vm41_vm0, %v4939_v52  ;;  %v4935_v48 = vsel %vm1534_vm3, %v4927_v15, %v4903_v17 }
0x276d   :  { %v4901_v43 = vpop.permute.xlu1 %4900 }
0x276e   :  { %v4933_v59 = vsel %vm1534_vm3, %v4924_v58, %v4901_v43 }
0x276f   :  { %v4915_v50 = vpop.permute.xlu0 %4914 }
0x2770   :  { %v4943_v13 = vsel %vm1543_vm4, %v4935_v48, %v4915_v50 }
0x2771   :  { %v4913_v3 = vpop.permute.xlu1 %4912 }
0x2772   :  { %v4941_v18 = vsel %vm1543_vm4, %v4933_v59, %v4913_v3 }
0x2773   :  { %10878 = vmatprep.mubr.msk.bf16.mxu1 %vm41_vm0, %v4941_v18 }
0x2774   :  { %10879 = vmatmul.mubr.msk.bf16.gmra.mxu1 %vm41_vm0, %v4943_v13 }
0x282c   :  { %v10876_v62 = vpop.f32.mrf.mxu1 }
0x282d   :  { %v4995_v56 = vadd.f32 %v10876_v62, %v13957_v7 }
0x282e   :  { %v4986_v12 = vpop.f32.mrf.mxu1 }
0x282f   :  { %v14644_v32 = vadd.f32 %v4995_v56, %v16697_v28  ;;  %v4987_v39 = vadd.f32 %v4986_v12, %v13957_v7 }
0x2830   :  { %v10877_v38 = vpop.f32.mrf.mxu1 }
0x2831   :  { %v14648_v33 = vadd.f32 %v4987_v39, %v16698_v35  ;;  %v5037_v30 = vsel %vm41_vm0, %v14644_v32, 0.0  ;;  %v4998_v6 = vadd.f32 %v10877_v38, %v13957_v7 }
0x2832   :  { %5038 = vadd.xlane.f32.xlu0 %v5037_v30  ;;  %v4989_v2 = vpop.f32.mrf.mxu1 }
0x2833   :  { %v4990_v46 = vadd.f32 %v4989_v2, %v13957_v7  ;;  %v5031_v21 = vsel %vm41_vm0, %v14648_v33, 0.0  ;;  %v14660_v29 = vadd.f32 %v4998_v6, %v16700_v10 }
0x2834   :  { %5032 = vadd.xlane.f32.xlu1 %v5031_v21  ;;  %v10880_v9 = vpop.f32.mrf.mxu1 }
0x2835   :  { %v14657_v27 = vadd.f32 %v4990_v46, %v16699_v0  ;;  %v5011_v40 = vadd.f32 %v10880_v9, %v13957_v7  ;;  %v5040_v53 = vsel %vm41_vm0, %v14660_v29, 0.0 }
0x2836   :  { %v5002_v63 = vpop.f32.mrf.mxu1 }
0x2837   :  { %v5003_v8 = vadd.f32 %v5002_v63, %v13957_v7  ;;  %v5034_v24 = vsel %vm41_vm0, %v14657_v27, 0.0  ;;  %v14672_v19 = vadd.f32 %v5011_v40, %v16702_v23 }
0x2838   :  { %5035 = vadd.xlane.f32.xlu0 %v5034_v24  ;;  %v10881_v54 = vpop.f32.mrf.mxu1 }
0x2839   :  { %v14667_v25 = vadd.f32 %v5003_v8, %v16701_v44  ;;  %v5014_v51 = vadd.f32 %v10881_v54, %v13957_v7  ;;  %v5049_v20 = vsel %vm41_vm0, %v14672_v19, 0.0 }
0x283a   :  { %v5005_v42 = vpop.f32.mrf.mxu1 }
0x283b   :  { %v5006_v45 = vadd.f32 %v5005_v42, %v13957_v7  ;;  %v5043_v5 = vsel %vm41_vm0, %v14667_v25, 0.0  ;;  %v14682_v41 = vadd.f32 %v5014_v51, %v16704_v4  ;;  %v11437_v51 = vld [vmem:[%s16608_s2 + $0x30] ss:$8 sps:$4 sm:$0xff]  }
0x283c   :  { %5041 = vadd.xlane.f32.xlu0 %v5040_v53  ;;  %5044 = vadd.xlane.f32.xlu1 %v5043_v5  ;;  %v14747_v5 = vld [vmem:[%s16609_s3 + $0x10] sm:$0xff] }
0x283d   :  { %v14679_v55 = vadd.f32 %v5006_v45, %v16703_v36  ;;  %v5052_v7 = vsel %vm41_vm0, %v14682_v41, 0.0  ;;  %10882 = vmatprep.subr.bf16.mxu0 %v11437_v51  ;;  %v11440_v45 = vld [vmem:[%s16608_s2 + $0x20] ss:$8 sps:$4 sm:$0xff]  }
0x283e   :  { %10883 = vmatpush3.bf16.msra.mxu0 %v11437_v51  ;;  %v16705_v36 = vld [vmem:[#allocation5_spill] sm:$0xff] }
0x283f   :  { %v5046_v61 = vsel %vm41_vm0, %v14679_v55, 0.0  ;;  %10884 = vmatprep.subr.bf16.mxu0 %v11440_v45  ;;  %v5267_v4 = vrot.slane %v14747_v5, %v16705_v36 }
0x2840   :  { %5047 = vadd.xlane.f32.xlu0 %v5046_v61  ;;  %5050 = vadd.xlane.f32.xlu1 %v5049_v20 }
0x2842   :  { %10885 = vmatpush3.bf16.msra.mxu0 %v11440_v45 }
0x2844   :  { %5053 = vadd.xlane.f32.xlu0 %v5052_v7 }
0x28bb   :  { %v5039_v11 = vpop.xlane.xlu0 %5038 }
0x28bc   :  { %v5057_v57 = vmul.f32 0.03125, %v5039_v11 }
0x28bd   :  { %v5033_v37 = vpop.xlane.xlu1 %5032 }
0x28be   :  { %v5055_v52 = vmul.f32 0.03125, %v5033_v37  ;;  %v14691_v17 = vsub.f32 %v14644_v32, %v5057_v57 }
0x28c0   :  { %v14694_v43 = vsub.f32 %v14648_v33, %v5055_v52  ;;  %v5073_v59 = vmul.f32 %v14691_v17, %v14691_v17 }
0x28c1   :  { %v5036_v16 = vpop.xlane.xlu0 %5035 }
0x28c2   :  { %v5056_v58 = vmul.f32 0.03125, %v5036_v16  ;;  %v5071_v50 = vmul.f32 %v14694_v43, %v14694_v43  ;;  %v5085_v28 = vsel %vm41_vm0, %v5073_v59, 0.0 }
0x28c4   :  { %v14699_v1 = vsub.f32 %v14657_v27, %v5056_v58  ;;  %v5079_v15 = vsel %vm41_vm0, %v5071_v50, 0.0 }
0x28c5   :  { %5080 = vadd.xlane.f32.xlu1 %v5079_v15  ;;  %v5045_v3 = vpop.xlane.xlu1 %5044  ;;  %v5042_v48 = vpop.xlane.xlu0 %5041 }
0x28c6   :  { %v5059_v18 = vmul.f32 0.03125, %v5045_v3  ;;  %v5058_v13 = vmul.f32 0.03125, %v5042_v48  ;;  %v5072_v62 = vmul.f32 %v14699_v1, %v14699_v1 }
0x28c8   :  { %v14707_v56 = vsub.f32 %v14667_v25, %v5059_v18  ;;  %v14710_v12 = vsub.f32 %v14660_v29, %v5058_v13  ;;  %v5082_v39 = vsel %vm41_vm0, %v5072_v62, 0.0 }
0x28c9   :  { %v5051_v38 = vpop.xlane.xlu1 %5050  ;;  %5086 = vadd.xlane.f32.xlu1 %v5085_v28  ;;  %5083 = vadd.xlane.f32.xlu0 %v5082_v39  ;;  %v5048_v35 = vpop.xlane.xlu0 %5047 }
0x28ca   :  { %v5061_v30 = vmul.f32 0.03125, %v5051_v38  ;;  %v5060_v6 = vmul.f32 0.03125, %v5048_v35  ;;  %v5075_v2 = vmul.f32 %v14707_v56, %v14707_v56  ;;  %v5074_v46 = vmul.f32 %v14710_v12, %v14710_v12 }
0x28cc   :  { %v14719_v21 = vsub.f32 %v14672_v19, %v5061_v30  ;;  %v14722_v9 = vsub.f32 %v14679_v55, %v5060_v6  ;;  %v5091_v0 = vsel %vm41_vm0, %v5075_v2, 0.0  ;;  %v5088_v10 = vsel %vm41_vm0, %v5074_v46, 0.0 }
0x28cd   :  { %5092 = vadd.xlane.f32.xlu1 %v5091_v0  ;;  %5089 = vadd.xlane.f32.xlu0 %v5088_v10  ;;  %v5054_v63 = vpop.xlane.xlu0 %5053  ;;  %v5138_v46 = vrot.slane %v14747_v5, %v12508_v22 }
0x28ce   :  { %v5062_v40 = vmul.f32 0.03125, %v5054_v63  ;;  %v5077_v8 = vmul.f32 %v14719_v21, %v14719_v21  ;;  %v5076_v24 = vmul.f32 %v14722_v9, %v14722_v9 }
0x28d0   :  { %v14731_v54 = vsub.f32 %v14682_v41, %v5062_v40  ;;  %v5097_v44 = vsel %vm41_vm0, %v5077_v8, 0.0  ;;  %v5094_v42 = vsel %vm41_vm0, %v5076_v24, 0.0  ;;  %v5150_v8 = vrot.slane %v14747_v5, %v12514_v31 }
0x28d1   :  { %5098 = vadd.xlane.f32.xlu1 %v5097_v44  ;;  %5095 = vadd.xlane.f32.xlu0 %v5094_v42 }
0x28d2   :  { %v5078_v53 = vmul.f32 %v14731_v54, %v14731_v54 }
0x28d4   :  { %v5100_v23 = vsel %vm41_vm0, %v5078_v53, 0.0 }
0x28d5   :  { %5101 = vadd.xlane.f32.xlu0 %v5100_v23 }
0x28e2   :  { %5269 = vrot.lane.b32.xlu1 %v5267_v4, %s12374_s11 }
0x294e   :  { %v5081_v61 = vpop.xlane.xlu1 %5080 }
0x294f   :  { %v5103_v20 = vmul.f32 0.03125, %v5081_v61 }
0x2951   :  { %v5111_v7 = vadd.f32 1e-05, %v5103_v20 }
0x2952   :  { %v5087_v11 = vpop.xlane.xlu1 %5086  ;;  %v5084_v57 = vpop.xlane.xlu0 %5083 }
0x2953   :  { %11891 = vrsqrt.f32 %v5111_v7  ;;  %v5105_v37 = vmul.f32 0.03125, %v5087_v11  ;;  %v5104_v52 = vmul.f32 0.03125, %v5084_v57 }
0x2955   :  { %v5113_v16 = vadd.f32 1e-05, %v5105_v37  ;;  %v5112_v58 = vadd.f32 1e-05, %v5104_v52 }
0x2956   :  { %v5093_v50 = vpop.xlane.xlu1 %5092  ;;  %v5090_v15 = vpop.xlane.xlu0 %5089 }
0x2957   :  { %11893 = vrsqrt.f32 %v5113_v16  ;;  %v5107_v59 = vmul.f32 0.03125, %v5093_v50  ;;  %v5106_v3 = vmul.f32 0.03125, %v5090_v15 }
0x2958   :  { %11895 = vrsqrt.f32 %v5112_v58 }
0x2959   :  { %v5115_v48 = vadd.f32 1e-05, %v5107_v59  ;;  %v5114_v18 = vadd.f32 1e-05, %v5106_v3 }
0x295a   :  { %v5099_v13 = vpop.xlane.xlu1 %5098  ;;  %v5096_v62 = vpop.xlane.xlu0 %5095 }
0x295b   :  { %11897 = vrsqrt.f32 %v5115_v48  ;;  %v5109_v28 = vmul.f32 0.03125, %v5099_v13  ;;  %v5108_v39 = vmul.f32 0.03125, %v5096_v62 }
0x295c   :  { %11899 = vrsqrt.f32 %v5114_v18 }
0x295d   :  { %v5117_v38 = vadd.f32 1e-05, %v5109_v28  ;;  %v5116_v35 = vadd.f32 1e-05, %v5108_v39 }
0x295e   :  { %v5102_v30 = vpop.xlane.xlu0 %5101 }
0x295f   :  { %11901 = vrsqrt.f32 %v5117_v38  ;;  %v5110_v6 = vmul.f32 0.03125, %v5102_v30 }
0x2960   :  { %v11892_v2 = vpop.eup %11891  ;;  %11903 = vrsqrt.f32 %v5116_v35 }
0x2961   :  { %v5118_v0 = vadd.f32 1e-05, %v5110_v6  ;;  %v5127_v10 = vmul.f32 %v11892_v2, %v14694_v43 }
0x2963   :  { %11905 = vrsqrt.f32 %v5118_v0  ;;  %v5139_v24 = vmul.f32 %v5138_v46, %v5127_v10 }
0x2964   :  { %v11894_v63 = vpop.eup %11893 }
0x2965   :  { %v11896_v40 = vpop.eup %11895  ;;  %v5129_v44 = vmul.f32 %v11894_v63, %v14691_v17  ;;  %v5151_v45 = vadd.f32 %v5150_v8, %v5139_v24  ;;  %v5270_v63 = vpop.permute.xlu1 %5269 }
0x2966   :  { %v5128_v42 = vmul.f32 %v11896_v40, %v14699_v1 }
0x2967   :  { %v5141_v4 = vmul.f32 %v5138_v46, %v5129_v44 }
0x2968   :  { %v11898_v53 = vpop.eup %11897  ;;  %v5140_v23 = vmul.f32 %v5138_v46, %v5128_v42 }
0x2969   :  { %v11900_v51 = vpop.eup %11899  ;;  %v5131_v43 = vmul.f32 %v11898_v53, %v14707_v56  ;;  %v5153_v16 = vadd.f32 %v5150_v8, %v5141_v4 }
0x296a   :  { %v5130_v61 = vmul.f32 %v11900_v51, %v14710_v12  ;;  %v5152_v20 = vadd.f32 %v5150_v8, %v5140_v23 }
0x296b   :  { %v5143_v58 = vmul.f32 %v5138_v46, %v5131_v43 }
0x296c   :  { %v11902_v7 = vpop.eup %11901  ;;  %v5142_v11 = vmul.f32 %v5138_v46, %v5130_v61  ;;  %v5159_v57 = vpack.c.bf16 %v5152_v20, %v5151_v45 }
0x296d   :  { %v11904_v37 = vpop.eup %11903  ;;  %v5133_v52 = vmul.f32 %v11902_v7, %v14719_v21  ;;  %v5155_v56 = vadd.f32 %v5150_v8, %v5143_v58 }
0x296e   :  { %v5154_v17 = vadd.f32 %v5150_v8, %v5142_v11  ;;  %10886 = vmatprep.mubr.msk.bf16.mxu0 %vm41_vm0, %v5159_v57  ;;  %v5132_v1 = vmul.f32 %v11904_v37, %v14722_v9 }
0x296f   :  { %v5145_v3 = vmul.f32 %v5138_v46, %v5133_v52 }
0x2970   :  { %v11906_v50 = vpop.eup %11905  ;;  %v5160_v15 = vpack.c.bf16 %v5154_v17, %v5153_v16  ;;  %v5144_v59 = vmul.f32 %v5138_v46, %v5132_v1 }
0x2971   :  { %v5134_v12 = vmul.f32 %v11906_v50, %v14731_v54  ;;  %v5157_v21 = vadd.f32 %v5150_v8, %v5145_v3  ;;  %v16706_v54 = vld [vmem:[#allocation8_spill] sm:$0xff] }
0x2972   :  { %10887 = vmatmul.mubr.msk.bf16.vlgmr.msra.gmra.mxu0 %vm41_vm0, %v5160_v15  ;;  %v5156_v48 = vadd.f32 %v5150_v8, %v5144_v59  ;;  %v5255_v35 = vrot.slane %v14747_v5, %v16706_v54 }
0x2973   :  { %v5146_v18 = vmul.f32 %v5138_v46, %v5134_v12 }
0x2974   :  { %v5161_v13 = vpack.c.bf16 %v5156_v48, %v5155_v56 }
0x2975   :  { %v5158_v62 = vadd.f32 %v5150_v8, %v5146_v18 }
0x2976   :  { %10890 = vmatprep.mubr.msk.bf16.mxu0 %vm41_vm0, %v5161_v13 }
0x2977   :  { %v5162_v28 = vpack.c.bf16 %v5158_v62, %v5157_v21 }
0x297a   :  { %10891 = vmatmul.mubr.msk.bf16.gmra.mxu0 %vm41_vm0, %v5162_v28 }
0x2a32   :  { %v14768_v9 = vpop.f32.mrf.mxu0 }
0x2a33   :  { %v5274_v4 = vadd.f32 %v14768_v9, %v5270_v63  ;;  %v5258_v59 = vadd.f32 %v14768_v9, %v5255_v35 }
0x2a34   :  { %v14770_v39 = vpop.f32.mrf.mxu0 }
0x2a35   :  { %v5256_v6 = vadd.f32 %v5255_v35, %v14770_v39  ;;  %v5272_v43 = vadd.f32 %v5270_v63, %v14770_v39 }
0x2a36   :  { %v14772_v38 = vpop.f32.mrf.mxu0 }
0x2a37   :  { %v5275_v51 = vadd.f32 %v14772_v38, %v5270_v63  ;;  %v5259_v50 = vadd.f32 %v14772_v38, %v5255_v35 }
0x2a38   :  { %v14776_v30 = vpop.f32.mrf.mxu0 }
0x2a39   :  { %v5257_v2 = vadd.f32 %v5255_v35, %v14776_v30  ;;  %v14806_v61 = vpack.c.bf16 %v5275_v51, %v5274_v4  ;;  %v5273_v20 = vadd.f32 %v5270_v63, %v14776_v30  ;;  %v14828_v3 = vpack.c.bf16 %v5259_v50, %v5258_v59  ;;  %v16707_v4 = vld [vmem:[#allocation9_spill] sm:$0xff] }
0x2a3a   :  { %v14780_v46 = vpop.f32.mrf.mxu0 }
0x2a3b   :  { %v14782_v0 = vpack.c.bf16 %v5257_v2, %v5256_v6  ;;  %v5278_v8 = vadd.f32 %v14780_v46, %v5270_v63  ;;  %v14812_v7 = vpack.c.bf16 %v5273_v20, %v5272_v43  ;;  %v5262_v18 = vadd.f32 %v14780_v46, %v5255_v35 }
0x2a3c   :  { %v14784_v10 = vpop.f32.mrf.mxu0  ;;  %v5283_v20 = vrot.slane %v14747_v5, %v16707_v4 }
0x2a3d   :  { %10902 = vmatprep.mubr.msk.bf16.mxu1 %vm332_vm1, %v14782_v0  ;;  %v5276_v42 = vadd.f32 %v5270_v63, %v14784_v10  ;;  %v5260_v12 = vadd.f32 %v5255_v35, %v14784_v10 }
0x2a3e   :  { %v14788_v40 = vpop.f32.mrf.mxu0 }
0x2a3f   :  { %v5279_v24 = vadd.f32 %v14788_v40, %v5270_v63  ;;  %v5263_v48 = vadd.f32 %v14788_v40, %v5255_v35 }
0x2a40   :  { %v14792_v44 = vpop.f32.mrf.mxu0 }
0x2a41   :  { %v14795_v53 = vpack.c.bf16 %v5279_v24, %v5278_v8  ;;  %v5277_v23 = vadd.f32 %v5270_v63, %v14792_v44  ;;  %v5261_v15 = vadd.f32 %v5255_v35, %v14792_v44  ;;  %v14838_v13 = vpack.c.bf16 %v5263_v48, %v5262_v18 }
0x2a43   :  { %v14799_v45 = vpack.c.bf16 %v5277_v23, %v5276_v42  ;;  %5318 = vrot.lane.b32.xlu0 %v14795_v53, %s12375_s12  ;;  %v14830_v56 = vpack.c.bf16 %v5261_v15, %v5260_v12 }
0x2a45   :  { %5316 = vrot.lane.b32.xlu1 %v14799_v45, %s12375_s12 }
0x2a49   :  { %5314 = vrot.lane.b32.xlu1 %v14806_v61, %s12375_s12 }
0x2a4d   :  { %5312 = vrot.lane.b32.xlu1 %v14812_v7, %s12375_s12 }
0x2ab5   :  { %v5319_v11 = vpop.permute.xlu0 %5318 }
0x2ab6   :  { %11382 = vmatprep.subr.msk.bf16.mxu1 %vm332_vm1, %v5319_v11  ;;  %v5342_v57 = vsel %vm332_vm1, %v5319_v11, 0 }
0x2ab7   :  { %10895 = vmatpush3.bf16.xpose.msra.mxu1 %v5342_v57  ;;  %v5317_v37 = vpop.permute.xlu1 %5316 }
0x2ab8   :  { %11383 = vmatprep.subr.msk.bf16.mxu1 %vm332_vm1, %v5317_v37  ;;  %v5339_v52 = vsel %vm332_vm1, %v5317_v37, 0 }
0x2abb   :  { %v5315_v16 = vpop.permute.xlu1 %5314 }
0x2abc   :  { %v5336_v17 = vsel %vm332_vm1, %v5315_v16, 0 }
0x2abf   :  { %10897 = vmatpush3.bf16.xpose.msra.mxu1 %v5339_v52  ;;  %v5313_v1 = vpop.permute.xlu1 %5312 }
0x2ac0   :  { %11384 = vmatprep.subr.msk.bf16.mxu1 %vm332_vm1, %v5315_v16  ;;  %v5333_v58 = vsel %vm332_vm1, %v5313_v1, 0 }
0x2ac7   :  { %10899 = vmatpush3.bf16.xpose.msra.mxu1 %v5336_v17 }
0x2ac8   :  { %11385 = vmatprep.subr.msk.bf16.mxu1 %vm332_vm1, %v5313_v1 }
0x2acf   :  { %10901 = vmatpush3.bf16.xpose.msra.mxu1 %v5333_v58 }
0x2ad6   :  { %10903 = vmatmul.mubr.msk.bf16.vlgmr.msra.gmra.mxu1 %vm332_vm1, %v14828_v3 }
0x2ad7   :  { %10906 = vmatprep.mubr.msk.bf16.mxu1 %vm332_vm1, %v14830_v56 }
0x2ade   :  { %10907 = vmatmul.mubr.msk.bf16.gmra.mxu1 %vm332_vm1, %v14838_v13 }
0x2b96   :  { %v10904_v21 = vpop.f32.mrf.mxu1 }
0x2b97   :  { %v5415_v62 = vsel %vm422_vm2, %v10904_v21, -inf }
0x2b98   :  { %5416 = vmax.xlane.f32.xlu0 %v5415_v62  ;;  %v5378_v28 = vpop.f32.mrf.mxu1 }
0x2b99   :  { %v5409_v2 = vsel %vm422_vm2, %v5378_v28, -inf }
0x2b9a   :  { %v14843_v6 = vpop.f32.mrf.mxu1 }
0x2b9b   :  { %v5418_v8 = vsel %vm422_vm2, %v14843_v6, -inf }
0x2b9c   :  { %5410 = vmax.xlane.f32.xlu0 %v5409_v2  ;;  %v14846_v63 = vpop.f32.mrf.mxu1 }
0x2b9d   :  { %v5412_v35 = vsel %vm422_vm2, %v14846_v63, -inf }
0x2b9e   :  { %5413 = vmax.xlane.f32.xlu1 %v5412_v35  ;;  %v10908_v24 = vpop.f32.mrf.mxu1 }
0x2b9f   :  { %v5427_v42 = vsel %vm422_vm2, %v10908_v24, -inf }
0x2ba0   :  { %5419 = vmax.xlane.f32.xlu0 %v5418_v8  ;;  %v5394_v23 = vpop.f32.mrf.mxu1 }
0x2ba1   :  { %v5421_v51 = vsel %vm422_vm2, %v5394_v23, -inf }
0x2ba2   :  { %v10909_v62 = vpop.f32.mrf.mxu1 }
0x2ba3   :  { %v5430_v2 = vsel %vm422_vm2, %v10909_v62, -inf }
0x2ba4   :  { %5428 = vmax.xlane.f32.xlu0 %v5427_v42 }
0x2ba8   :  { %5422 = vmax.xlane.f32.xlu0 %v5421_v51 }
0x2bbe   :  { %5285 = vrot.lane.b32.xlu0 %v5283_v20, %s12376_s13 }
0x2c21   :  { %v5417_v43 = vpop.xlane.xlu0 %5416 }
0x2c25   :  { %v5411_v11 = vpop.xlane.xlu0 %5410 }
0x2c26   :  { %v5433_v20 = vsub.f32 %v5378_v28, %v5411_v11 }
0x2c29   :  { %v5420_v57 = vpop.xlane.xlu0 %5419 }
0x2c2d   :  { %v5429_v37 = vpop.xlane.xlu0 %5428 }
0x2c31   :  { %v5423_v52 = vpop.xlane.xlu0 %5422 }
0x2c32   :  { %v5437_v48 = vsub.f32 %v5394_v23, %v5423_v52  ;;  %v5435_v23 = vsub.f32 %v10904_v21, %v5417_v43  ;;  %v5436_v52 = vsub.f32 %v14843_v6, %v5420_v57 }
0x2c34   :  { %v5449_v18 = vmul.f32 1.442695, %v5437_v48  ;;  %v5445_v51 = vmul.f32 1.442695, %v5435_v23 }
0x2c35   :  { %v5286_v16 = vpop.permute.xlu0 %5285 }
0x2c36   :  { %v5294_v17 = vadd.f32 %v14780_v46, %v5286_v16  ;;  %v5295_v1 = vadd.f32 %v14788_v40, %v5286_v16  ;;  %v5292_v58 = vadd.f32 %v5286_v16, %v14784_v10  ;;  %v5293_v50 = vadd.f32 %v5286_v16, %v14792_v44 }
0x2c37   :  { %v5290_v5 = vadd.f32 %v14768_v9, %v5286_v16  ;;  %v5291_v12 = vadd.f32 %v14772_v38, %v5286_v16  ;;  %v5288_v10 = vadd.f32 %v5286_v16, %v14770_v39  ;;  %v5289_v40 = vadd.f32 %v5286_v16, %v14776_v30  ;;  %v5397_v30 = vpop.f32.mrf.mxu1  ;;  %v5414_v16 = vpop.xlane.xlu1 %5413 }
0x2c38   :  { %v14861_v15 = vpack.c.bf16 %v5295_v1, %v5294_v17  ;;  %v14863_v59 = vpack.c.bf16 %v5293_v50, %v5292_v58  ;;  %v5439_v9 = vsub.f32 %v10908_v24, %v5429_v37  ;;  %v5424_v8 = vsel %vm422_vm2, %v5397_v30, -inf }
0x2c39   :  { %v14871_v46 = vpack.c.bf16 %v5291_v12, %v5290_v5  ;;  %v14877_v44 = vpack.c.bf16 %v5289_v40, %v5288_v10  ;;  %v5441_v37 = vmul.f32 1.442695, %v5433_v20  ;;  %v5434_v17 = vsub.f32 %v14846_v63, %v5414_v16 }
0x2c3a   :  { %5511 = vrot.lane.b32.xlu1 %v14861_v15, %s12376_s13  ;;  %5509 = vrot.lane.b32.xlu0 %v14863_v59, %s12376_s13  ;;  %v5453_v38 = vmul.f32 1.442695, %v5439_v9  ;;  %v5447_v1 = vmul.f32 1.442695, %v5436_v52 }
0x2c3b   :  { %v5443_v58 = vmul.f32 1.442695, %v5434_v17 }
0x2c3c   :  { %11907 = vpow2.f32 %v5453_v38 }
0x2c3d   :  { %11909 = vpow2.f32 %v5449_v18 }
0x2c3e   :  { %5507 = vrot.lane.b32.xlu0 %v14871_v46, %s12376_s13  ;;  %11911 = vpow2.f32 %v5445_v51 }
0x2c3f   :  { %11913 = vpow2.f32 %v5441_v37 }
0x2c40   :  { %11915 = vpow2.f32 %v5447_v1 }
0x2c41   :  { %11917 = vpow2.f32 %v5443_v58 }
0x2c42   :  { %5505 = vrot.lane.b32.xlu0 %v14877_v44, %s12376_s13 }
0x2c49   :  { %v14882_v39 = vpop.eup %11907 }
0x2c4a   :  { %v5475_v35 = vsel %vm422_vm2, %v14882_v39, 0.0  ;;  %v14887_v42 = vpop.eup %11909 }
0x2c4b   :  { %v5469_v24 = vsel %vm422_vm2, %v14887_v42, 0.0  ;;  %v14895_v50 = vpop.eup %11911 }
0x2c4c   :  { %v5463_v5 = vsel %vm422_vm2, %v14895_v50, 0.0  ;;  %v11914_v21 = vpop.eup %11913 }
0x2c4d   :  { %v5457_v28 = vsel %vm422_vm2, %v11914_v21, 0.0  ;;  %v11916_v43 = vpop.eup %11915 }
0x2c4e   :  { %v5466_v6 = vsel %vm422_vm2, %v11916_v43, 0.0  ;;  %v11918_v11 = vpop.eup %11917 }
0x2c4f   :  { %v5460_v63 = vsel %vm422_vm2, %v11918_v11, 0.0 }
0x2c5e   :  { %5431 = vmax.xlane.f32.xlu1 %v5430_v2 }
0x2c61   :  { %5476 = vadd.xlane.f32.xlu0 %v5475_v35 }
0x2c62   :  { %5425 = vmax.xlane.f32.xlu1 %v5424_v8 }
0x2c65   :  { %5470 = vadd.xlane.f32.xlu0 %v5469_v24 }
0x2c73   :  { %5616 = vrot.lane.b32.xlu1 %v14795_v53, %s12377_s14 }
0x2c97   :  { %5464 = vadd.xlane.f32.xlu1 %v5463_v5 }
0x2c9b   :  { %5458 = vadd.xlane.f32.xlu1 %v5457_v28 }
0x2c9f   :  { %5467 = vadd.xlane.f32.xlu1 %v5466_v6 }
0x2ca3   :  { %5461 = vadd.xlane.f32.xlu1 %v5460_v63 }
0x2cac   :  { %v5512_v57 = vpop.permute.xlu1 %5511  ;;  %v5510_v12 = vpop.permute.xlu0 %5509 }
0x2cad   :  { %10910 = vmatprep.subr.bf16.mxu0 %v5512_v57 }
0x2cae   :  { %10911 = vmatpush3.bf16.msra.mxu0 %v5512_v57 }
0x2caf   :  { %10912 = vmatprep.subr.bf16.mxu0 %v5510_v12 }
0x2cb0   :  { %v5508_v10 = vpop.permute.xlu0 %5507 }
0x2cb2   :  { %10913 = vmatpush3.bf16.msra.mxu0 %v5510_v12 }
0x2cb3   :  { %10914 = vmatprep.subr.bf16.mxu0 %v5508_v10 }
0x2cb4   :  { %5614 = vrot.lane.b32.xlu1 %v14799_v45, %s12377_s14  ;;  %v5506_v40 = vpop.permute.xlu0 %5505 }
0x2cb6   :  { %10915 = vmatpush3.bf16.msra.mxu0 %v5508_v10 }
0x2cb7   :  { %10916 = vmatprep.subr.bf16.mxu0 %v5506_v40 }
0x2cba   :  { %10917 = vmatpush3.bf16.msra.mxu0 %v5506_v40 }
0x2ce7   :  { %v5432_v9 = vpop.xlane.xlu1 %5431 }
0x2ce8   :  { %v5440_v38 = vsub.f32 %v10909_v62, %v5432_v9 }
0x2cea   :  { %v5455_v48 = vmul.f32 1.442695, %v5440_v38 }
0x2ceb   :  { %v5426_v18 = vpop.xlane.xlu1 %5425 }
0x2cec   :  { %11919 = vpow2.f32 %v5455_v48  ;;  %v5438_v2 = vsub.f32 %v5397_v30, %v5426_v18 }
0x2cee   :  { %v5451_v35 = vmul.f32 1.442695, %v5438_v2 }
0x2cef   :  { %v5617_v8 = vpop.permute.xlu1 %5616 }
0x2cf0   :  { %11921 = vpow2.f32 %v5451_v35  ;;  %11386 = vmatprep.subr.msk.bf16.mxu0 %vm332_vm1, %v5617_v8  ;;  %v5640_v10 = vsel %vm332_vm1, %v5617_v8, 0 }
0x2cf9   :  { %v11920_v24 = vpop.eup %11919 }
0x2cfa   :  { %v5478_v23 = vsel %vm422_vm2, %v11920_v24, 0.0 }
0x2cfb   :  { %5479 = vadd.xlane.f32.xlu0 %v5478_v23 }
0x2cfd   :  { %v11922_v51 = vpop.eup %11921 }
0x2cfe   :  { %v5472_v20 = vsel %vm422_vm2, %v11922_v51, 0.0 }
0x2cff   :  { %5473 = vadd.xlane.f32.xlu1 %v5472_v20 }
0x2d10   :  { %5612 = vrot.lane.b32.xlu1 %v14806_v61, %s12377_s14 }
0x2d11   :  { %5610 = vrot.lane.b32.xlu0 %v14812_v7, %s12377_s14 }
0x2d14   :  { %5602 = vrot.lane.b32.xlu1 %v14782_v0, %s12378_s15 }
0x2d15   :  { %5604 = vrot.lane.b32.xlu0 %v14828_v3, %s12378_s15 }
0x2d18   :  { %5606 = vrot.lane.b32.xlu1 %v14830_v56, %s12378_s15 }
0x2d19   :  { %5608 = vrot.lane.b32.xlu0 %v14838_v13, %s12378_s15 }
0x2d1c   :  { %5805 = vrot.lane.b32.xlu1 %v14861_v15, %s12379_s16 }
0x2d20   :  { %v5465_v62 = vpop.xlane.xlu1 %5464 }
0x2d24   :  { %v5459_v30 = vpop.xlane.xlu1 %5458 }
0x2d28   :  { %v5468_v37 = vpop.xlane.xlu1 %5467 }
0x2d29   :  { %11923 = vrcp.f32 %v5468_v37 }
0x2d2a   :  { %11925 = vrcp.f32 %v5459_v30 }
0x2d2b   :  { %11927 = vrcp.f32 %v5465_v62 }
0x2d2c   :  { %v5462_v52 = vpop.xlane.xlu1 %5461 }
0x2d2d   :  { %11929 = vrcp.f32 %v5462_v52 }
0x2d30   :  { %v5615_v40 = vpop.permute.xlu1 %5614 }
0x2d31   :  { %v5637_v9 = vsel %vm332_vm1, %v5615_v40, 0 }
0x2d36   :  { %v11924_v16 = vpop.eup %11923 }
0x2d37   :  { %v11926_v17 = vpop.eup %11925  ;;  %v5492_v5 = vmul.f32 %v11924_v16, %v11916_v43  ;;  %v5477_v43 = vpop.xlane.xlu0 %5476 }
0x2d38   :  { %v11928_v1 = vpop.eup %11927  ;;  %v5489_v28 = vmul.f32 %v11926_v17, %v11914_v21 }
0x2d39   :  { %v5491_v63 = vmul.f32 %v11928_v1, %v14895_v50 }
0x2d3a   :  { %v11930_v58 = vpop.eup %11929 }
0x2d3b   :  { %v5490_v6 = vmul.f32 %v11930_v58, %v11918_v11  ;;  %v5498_v12 = vpack.c.bf16 %v5492_v5, %v5491_v63  ;;  %v5471_v21 = vpop.xlane.xlu0 %5470 }
0x2d3d   :  { %v5497_v57 = vpack.c.bf16 %v5490_v6, %v5489_v28 }
0x2d3f   :  { %10918 = vmatprep.mubr.msk.bf16.mxu0 %vm422_vm2, %v5497_v57 }
0x2d40   :  { %10919 = vmatmul.mubr.msk.bf16.vlgmr.msra.gmra.mxu0 %vm422_vm2, %v5498_v12 }
0x2d41   :  { %10927 = vmatpush3.bf16.xpose.msra.mxu0 %v5640_v10 }
0x2d42   :  { %11387 = vmatprep.subr.msk.bf16.mxu0 %vm332_vm1, %v5615_v40 }
0x2d49   :  { %10929 = vmatpush3.bf16.xpose.msra.mxu0 %v5637_v9 }
0x2d84   :  { %v5480_v11 = vpop.xlane.xlu0 %5479 }
0x2d85   :  { %11931 = vrcp.f32 %v5480_v11 }
0x2d86   :  { %11933 = vrcp.f32 %v5471_v21 }
0x2d87   :  { %11935 = vrcp.f32 %v5477_v43 }
0x2d88   :  { %v5474_v50 = vpop.xlane.xlu1 %5473  ;;  %v5611_v18 = vpop.permute.xlu0 %5610 }
0x2d89   :  { %11937 = vrcp.f32 %v5474_v50  ;;  %v5631_v62 = vsel %vm332_vm1, %v5611_v18, 0 }
0x2d8c   :  { %v5613_v38 = vpop.permute.xlu1 %5612  ;;  %v5605_v28 = vpop.permute.xlu0 %5604 }
0x2d8d   :  { %11388 = vmatprep.subr.msk.bf16.mxu0 %vm332_vm1, %v5613_v38  ;;  %v5634_v48 = vsel %vm332_vm1, %v5613_v38, 0 }
0x2d8e   :  { %10931 = vmatpush3.bf16.xpose.msra.mxu0 %v5634_v48 }
0x2d8f   :  { %11389 = vmatprep.subr.msk.bf16.mxu0 %vm332_vm1, %v5611_v18 }
0x2d90   :  { %v5603_v2 = vpop.permute.xlu1 %5602 }
0x2d92   :  { %v11932_v35 = vpop.eup %11931 }
0x2d93   :  { %v11934_v8 = vpop.eup %11933  ;;  %v5496_v37 = vmul.f32 %v11932_v35, %v11920_v24 }
0x2d94   :  { %v5607_v23 = vpop.permute.xlu1 %5606  ;;  %v11936_v20 = vpop.eup %11935  ;;  %v5493_v52 = vmul.f32 %v11934_v8, %v14887_v42 }
0x2d95   :  { %v5495_v1 = vmul.f32 %v11936_v20, %v14882_v39  ;;  %v5609_v42 = vpop.permute.xlu0 %5608 }
0x2d96   :  { %v11938_v30 = vpop.eup %11937  ;;  %10933 = vmatpush3.bf16.xpose.msra.mxu0 %v5631_v62 }
0x2d97   :  { %v5494_v16 = vmul.f32 %v11938_v30, %v11922_v51  ;;  %v5500_v5 = vpack.c.bf16 %v5496_v37, %v5495_v1 }
0x2d98   :  { %v5806_v17 = vpop.permute.xlu1 %5805 }
0x2d99   :  { %10942 = vmatprep.subr.bf16.mxu1 %v5806_v17  ;;  %v5499_v58 = vpack.c.bf16 %v5494_v16, %v5493_v52 }
0x2d9a   :  { %10943 = vmatpush3.bf16.msra.mxu1 %v5806_v17 }
0x2d9b   :  { %10922 = vmatprep.mubr.msk.bf16.mxu0 %vm422_vm2, %v5499_v58 }
0x2d9c   :  { %10923 = vmatmul.mubr.msk.bf16.gmra.mxu0 %vm422_vm2, %v5500_v5 }
0x2d9d   :  { %10934 = vmatprep.mubr.msk.bf16.mxu0 %vm332_vm1, %v5603_v2 }
0x2da4   :  { %10935 = vmatmul.mubr.msk.bf16.vlgmr.msra.gmra.mxu0 %vm332_vm1, %v5605_v28 }
0x2da5   :  { %10938 = vmatprep.mubr.msk.bf16.mxu0 %vm332_vm1, %v5607_v23 }
0x2dac   :  { %10939 = vmatmul.mubr.msk.bf16.gmra.mxu0 %vm332_vm1, %v5609_v42 }
0x2e00   :  { %v14939_v24 = vpop.f32.mrf.mxu0 }
0x2e02   :  { %v14941_v39 = vpop.f32.mrf.mxu0 }
0x2e04   :  { %v14943_v51 = vpop.f32.mrf.mxu0 }
0x2e06   :  { %v14947_v63 = vpop.f32.mrf.mxu0 }
0x2e5c   :  { %v14949_v57 = vpop.f32.mrf.mxu0 }
0x2e5e   :  { %v14951_v12 = vpop.f32.mrf.mxu0 }
0x2e60   :  { %v14953_v10 = vpop.f32.mrf.mxu0 }
0x2e62   :  { %v14957_v9 = vpop.f32.mrf.mxu0 }
0x2e64   :  { %v10936_v21 = vpop.f32.mrf.mxu0 }
0x2e65   :  { %v5713_v11 = vsel %vm422_vm2, %v10936_v21, -inf }
0x2e66   :  { %5714 = vmax.xlane.f32.xlu0 %v5713_v11  ;;  %v5676_v50 = vpop.f32.mrf.mxu0 }
0x2e67   :  { %v5707_v38 = vsel %vm422_vm2, %v5676_v50, -inf }
0x2e68   :  { %5708 = vmax.xlane.f32.xlu1 %v5707_v38  ;;  %v10937_v48 = vpop.f32.mrf.mxu0 }
0x2e69   :  { %v5716_v18 = vsel %vm422_vm2, %v10937_v48, -inf }
0x2e6a   :  { %5717 = vmax.xlane.f32.xlu0 %v5716_v18  ;;  %v5679_v2 = vpop.f32.mrf.mxu0 }
0x2e6b   :  { %v5710_v8 = vsel %vm422_vm2, %v5679_v2, -inf }
0x2e6c   :  { %v10940_v35 = vpop.f32.mrf.mxu0 }
0x2e6d   :  { %v5725_v23 = vsel %vm422_vm2, %v10940_v35, -inf }
0x2e6e   :  { %5711 = vmax.xlane.f32.xlu0 %v5710_v8  ;;  %5726 = vmax.xlane.f32.xlu1 %v5725_v23  ;;  %v5692_v20 = vpop.f32.mrf.mxu0 }
0x2e6f   :  { %v5719_v30 = vsel %vm422_vm2, %v5692_v20, -inf }
0x2e70   :  { %v10941_v62 = vpop.f32.mrf.mxu0 }
0x2e71   :  { %v5728_v37 = vsel %vm422_vm2, %v10941_v62, -inf }
0x2e72   :  { %5720 = vmax.xlane.f32.xlu1 %v5719_v30  ;;  %5729 = vmax.xlane.f32.xlu0 %v5728_v37  ;;  %v5695_v52 = vpop.f32.mrf.mxu0 }
0x2e73   :  { %v5722_v16 = vsel %vm422_vm2, %v5695_v52, -inf }
0x2e76   :  { %5723 = vmax.xlane.f32.xlu0 %v5722_v16 }
0x2e83   :  { %5801 = vrot.lane.b32.xlu1 %v14871_v46, %s12379_s16 }
0x2e8c   :  { %5803 = vrot.lane.b32.xlu0 %v14863_v59, %s12379_s16 }
0x2eef   :  { %v5715_v17 = vpop.xlane.xlu0 %5714 }
0x2ef0   :  { %v5733_v1 = vsub.f32 %v10936_v21, %v5715_v17 }
0x2ef1   :  { %v5709_v58 = vpop.xlane.xlu1 %5708 }
0x2ef2   :  { %v5743_v5 = vmul.f32 1.442695, %v5733_v1  ;;  %v5731_v28 = vsub.f32 %v5676_v50, %v5709_v58 }
0x2ef3   :  { %v5718_v42 = vpop.xlane.xlu0 %5717 }
0x2ef4   :  { %11939 = vpow2.f32 %v5743_v5  ;;  %v5739_v11 = vmul.f32 1.442695, %v5731_v28  ;;  %v5734_v38 = vsub.f32 %v10937_v48, %v5718_v42 }
0x2ef6   :  { %11941 = vpow2.f32 %v5739_v11  ;;  %v5745_v18 = vmul.f32 1.442695, %v5734_v38 }
0x2ef7   :  { %v5712_v8 = vpop.xlane.xlu0 %5711  ;;  %v5727_v30 = vpop.xlane.xlu1 %5726 }
0x2ef8   :  { %11943 = vpow2.f32 %v5745_v18  ;;  %v5732_v23 = vsub.f32 %v5679_v2, %v5712_v8  ;;  %v5737_v42 = vsub.f32 %v10940_v35, %v5727_v30 }
0x2efa   :  { %v5741_v37 = vmul.f32 1.442695, %v5732_v23  ;;  %v5751_v38 = vmul.f32 1.442695, %v5737_v42 }
0x2efb   :  { %v5730_v16 = vpop.xlane.xlu0 %5729  ;;  %v5721_v40 = vpop.xlane.xlu1 %5720 }
0x2efc   :  { %11945 = vpow2.f32 %v5741_v37  ;;  %v5735_v11 = vsub.f32 %v5692_v20, %v5721_v40  ;;  %v5738_v18 = vsub.f32 %v10941_v62, %v5730_v16 }
0x2efd   :  { %11947 = vpow2.f32 %v5751_v38 }
0x2efe   :  { %v5747_v8 = vmul.f32 1.442695, %v5735_v11  ;;  %v5753_v37 = vmul.f32 1.442695, %v5738_v18 }
0x2eff   :  { %v5724_v43 = vpop.xlane.xlu0 %5723  ;;  %v5802_v1 = vpop.permute.xlu1 %5801 }
0x2f00   :  { %v5736_v23 = vsub.f32 %v5695_v52, %v5724_v43  ;;  %11949 = vpow2.f32 %v5747_v8 }
0x2f01   :  { %v14973_v6 = vpop.eup %11939  ;;  %11951 = vpow2.f32 %v5753_v37 }
0x2f02   :  { %v5761_v21 = vsel %vm422_vm2, %v14973_v6, 0.0 }
0x2f03   :  { %v14977_v50 = vpop.eup %11941  ;;  %5762 = vadd.xlane.f32.xlu1 %v5761_v21  ;;  %v5804_v48 = vpop.permute.xlu0 %5803  ;;  %v5749_v21 = vmul.f32 1.442695, %v5736_v23 }
0x2f04   :  { %10944 = vmatprep.subr.bf16.mxu1 %v5804_v48  ;;  %v5755_v58 = vsel %vm422_vm2, %v14977_v50, 0.0 }
0x2f05   :  { %v14979_v17 = vpop.eup %11943  ;;  %10945 = vmatpush3.bf16.msra.mxu1 %v5804_v48  ;;  %11953 = vpow2.f32 %v5749_v21 }
0x2f06   :  { %10946 = vmatprep.subr.bf16.mxu1 %v5802_v1  ;;  %v5764_v2 = vsel %vm422_vm2, %v14979_v17, 0.0 }
0x2f07   :  { %5765 = vadd.xlane.f32.xlu0 %v5764_v2  ;;  %5756 = vadd.xlane.f32.xlu1 %v5755_v58 }
0x2f09   :  { %v11946_v5 = vpop.eup %11945  ;;  %10947 = vmatpush3.bf16.msra.mxu1 %v5802_v1 }
0x2f0a   :  { %v5758_v28 = vsel %vm422_vm2, %v11946_v5, 0.0  ;;  %v14992_v48 = vpop.eup %11947 }
0x2f0b   :  { %5759 = vadd.xlane.f32.xlu0 %v5758_v28  ;;  %v5773_v35 = vsel %vm422_vm2, %v14992_v48, 0.0 }
0x2f0d   :  { %v14994_v1 = vpop.eup %11949 }
0x2f0e   :  { %v14996_v2 = vpop.eup %11951  ;;  %v5767_v40 = vsel %vm422_vm2, %v14994_v1, 0.0 }
0x2f0f   :  { %v5776_v62 = vsel %vm422_vm2, %v14996_v2, 0.0 }
0x2f12   :  { %v15002_v20 = vpop.eup %11953 }
0x2f13   :  { %v5770_v43 = vsel %vm422_vm2, %v15002_v20, 0.0 }
0x2f18   :  { %5906 = vrot.lane.b32.xlu1 %v14795_v53, %s12380_s17 }
0x2f1c   :  { %5904 = vrot.lane.b32.xlu1 %v14799_v45, %s12380_s17 }
0x2f21   :  { %5799 = vrot.lane.b32.xlu0 %v14877_v44, %s12379_s16 }
0x2f40   :  { %5774 = vadd.xlane.f32.xlu0 %v5773_v35  ;;  %5768 = vadd.xlane.f32.xlu1 %v5767_v40 }
0x2f44   :  { %5771 = vadd.xlane.f32.xlu0 %v5770_v43  ;;  %5777 = vadd.xlane.f32.xlu1 %v5776_v62 }
0x2f55   :  { %5902 = vrot.lane.b32.xlu1 %v14806_v61, %s12380_s17 }
0x2f59   :  { %5892 = vrot.lane.b32.xlu1 %v14782_v0, %s12381_s18 }
0x2f5a   :  { %5900 = vrot.lane.b32.xlu0 %v14812_v7, %s12380_s17 }
0x2f5d   :  { %5896 = vrot.lane.b32.xlu1 %v14830_v56, %s12381_s18 }
0x2f5e   :  { %5894 = vrot.lane.b32.xlu0 %v14828_v3, %s12381_s18 }
0x2f61   :  { %6095 = vrot.lane.b32.xlu1 %v14861_v15, %s12382_s19 }
0x2f62   :  { %5898 = vrot.lane.b32.xlu0 %v14838_v13, %s12381_s18 }
0x2f8c   :  { %v5763_v52 = vpop.xlane.xlu1 %5762 }
0x2f90   :  { %v5766_v30 = vpop.xlane.xlu0 %5765  ;;  %v5757_v16 = vpop.xlane.xlu1 %5756 }
0x2f91   :  { %11955 = vrcp.f32 %v5766_v30 }
0x2f92   :  { %11957 = vrcp.f32 %v5757_v16 }
0x2f93   :  { %11959 = vrcp.f32 %v5763_v52 }
0x2f94   :  { %v5760_v58 = vpop.xlane.xlu0 %5759  ;;  %v5907_v42 = vpop.permute.xlu1 %5906 }
0x2f95   :  { %11961 = vrcp.f32 %v5760_v58  ;;  %v5930_v62 = vsel %vm332_vm1, %v5907_v42, 0 }
0x2f98   :  { %v5800_v28 = vpop.permute.xlu0 %5799  ;;  %v5905_v52 = vpop.permute.xlu1 %5904 }
0x2f99   :  { %10948 = vmatprep.subr.bf16.mxu1 %v5800_v28  ;;  %v5927_v30 = vsel %vm332_vm1, %v5905_v52, 0 }
0x2f9a   :  { %10949 = vmatpush3.bf16.msra.mxu1 %v5800_v28 }
0x2f9b   :  { %11390 = vmatprep.subr.msk.bf16.mxu1 %vm332_vm1, %v5907_v42 }
0x2f9e   :  { %v11956_v11 = vpop.eup %11955 }
0x2f9f   :  { %v11958_v38 = vpop.eup %11957  ;;  %v5790_v23 = vmul.f32 %v11956_v11, %v14979_v17 }
0x2fa0   :  { %v11960_v18 = vpop.eup %11959  ;;  %v5787_v37 = vmul.f32 %v11958_v38, %v14977_v50 }
0x2fa1   :  { %v5789_v35 = vmul.f32 %v11960_v18, %v14973_v6 }
0x2fa2   :  { %v11962_v8 = vpop.eup %11961 }
0x2fa3   :  { %v5788_v21 = vmul.f32 %v11962_v8, %v11946_v5  ;;  %v5796_v43 = vpack.c.bf16 %v5790_v23, %v5789_v35 }
0x2fa5   :  { %v5795_v40 = vpack.c.bf16 %v5788_v21, %v5787_v37 }
0x2fa7   :  { %10950 = vmatprep.mubr.msk.bf16.mxu1 %vm422_vm2, %v5795_v40 }
0x2fa8   :  { %10951 = vmatmul.mubr.msk.bf16.vlgmr.msra.gmra.mxu1 %vm422_vm2, %v5796_v43 }
0x2fa9   :  { %10959 = vmatpush3.bf16.xpose.msra.mxu1 %v5930_v62 }
0x2faa   :  { %11391 = vmatprep.subr.msk.bf16.mxu1 %vm332_vm1, %v5905_v52 }
0x2fb1   :  { %10961 = vmatpush3.bf16.xpose.msra.mxu1 %v5927_v30 }
0x2fc9   :  { %v5775_v17 = vpop.xlane.xlu0 %5774  ;;  %v5769_v50 = vpop.xlane.xlu1 %5768 }
0x2fca   :  { %11963 = vrcp.f32 %v5769_v50 }
0x2fcb   :  { %11965 = vrcp.f32 %v5775_v17 }
0x2fcd   :  { %v5772_v6 = vpop.xlane.xlu0 %5771  ;;  %v5778_v5 = vpop.xlane.xlu1 %5777 }
0x2fce   :  { %11967 = vrcp.f32 %v5772_v6 }
0x2fcf   :  { %11969 = vrcp.f32 %v5778_v5 }
0x2fd1   :  { %v5903_v16 = vpop.permute.xlu1 %5902  ;;  %v5901_v28 = vpop.permute.xlu0 %5900 }
0x2fd2   :  { %11392 = vmatprep.subr.msk.bf16.mxu1 %vm332_vm1, %v5903_v16  ;;  %v5924_v58 = vsel %vm332_vm1, %v5903_v16, 0  ;;  %v5921_v8 = vsel %vm332_vm1, %v5901_v28, 0 }
0x2fd3   :  { %10963 = vmatpush3.bf16.xpose.msra.mxu1 %v5924_v58 }
0x2fd4   :  { %11393 = vmatprep.subr.msk.bf16.mxu1 %vm332_vm1, %v5901_v28 }
0x2fd5   :  { %v5893_v42 = vpop.permute.xlu1 %5892  ;;  %v5895_v17 = vpop.permute.xlu0 %5894 }
0x2fd7   :  { %v11964_v11 = vpop.eup %11963 }
0x2fd8   :  { %v11966_v18 = vpop.eup %11965  ;;  %v5791_v21 = vmul.f32 %v11964_v11, %v14994_v1 }
0x2fd9   :  { %v5897_v38 = vpop.permute.xlu1 %5896  ;;  %v5793_v43 = vmul.f32 %v11966_v18, %v14992_v48  ;;  %v5899_v1 = vpop.permute.xlu0 %5898 }
0x2fdb   :  { %v11968_v23 = vpop.eup %11967  ;;  %10965 = vmatpush3.bf16.xpose.msra.mxu1 %v5921_v8 }
0x2fdc   :  { %v11970_v37 = vpop.eup %11969  ;;  %v5792_v35 = vmul.f32 %v11968_v23, %v15002_v20 }
0x2fdd   :  { %v6096_v40 = vpop.permute.xlu1 %6095  ;;  %v5794_v62 = vmul.f32 %v11970_v37, %v14996_v2 }
0x2fde   :  { %10974 = vmatprep.subr.bf16.mxu0 %v6096_v40  ;;  %v5797_v52 = vpack.c.bf16 %v5792_v35, %v5791_v21 }
0x2fdf   :  { %10975 = vmatpush3.bf16.msra.mxu0 %v6096_v40  ;;  %v5798_v30 = vpack.c.bf16 %v5794_v62, %v5793_v43 }
0x2fe0   :  { %10954 = vmatprep.mubr.msk.bf16.mxu1 %vm422_vm2, %v5797_v52 }
0x2fe1   :  { %10955 = vmatmul.mubr.msk.bf16.gmra.mxu1 %vm422_vm2, %v5798_v30 }
0x2fe2   :  { %10966 = vmatprep.mubr.msk.bf16.mxu1 %vm332_vm1, %v5893_v42 }
0x2fe9   :  { %10967 = vmatmul.mubr.msk.bf16.vlgmr.msra.gmra.mxu1 %vm332_vm1, %v5895_v17 }
0x2fea   :  { %10970 = vmatprep.mubr.msk.bf16.mxu1 %vm332_vm1, %v5897_v38 }
0x2ff1   :  { %10971 = vmatmul.mubr.msk.bf16.gmra.mxu1 %vm332_vm1, %v5899_v1 }
0x3068   :  { %v15045_v48 = vpop.f32.mrf.mxu1 }
0x306a   :  { %v15047_v2 = vpop.f32.mrf.mxu1 }
0x306c   :  { %v15049_v20 = vpop.f32.mrf.mxu1 }
0x306e   :  { %v15053_v6 = vpop.f32.mrf.mxu1 }
0x30a1   :  { %v15057_v16 = vpop.f32.mrf.mxu1 }
0x30a3   :  { %v15059_v58 = vpop.f32.mrf.mxu1 }
0x30a5   :  { %v15061_v28 = vpop.f32.mrf.mxu1 }
0x30a7   :  { %v15065_v11 = vpop.f32.mrf.mxu1 }
0x30a9   :  { %v10968_v18 = vpop.f32.mrf.mxu1 }
0x30aa   :  { %v6003_v8 = vsel %vm422_vm2, %v10968_v18, -inf }
0x30ab   :  { %6004 = vmax.xlane.f32.xlu0 %v6003_v8  ;;  %v5966_v23 = vpop.f32.mrf.mxu1 }
0x30ac   :  { %v5997_v37 = vsel %vm422_vm2, %v5966_v23, -inf }
0x30ad   :  { %5998 = vmax.xlane.f32.xlu1 %v5997_v37  ;;  %v10969_v21 = vpop.f32.mrf.mxu1 }
0x30ae   :  { %v6006_v35 = vsel %vm422_vm2, %v10969_v21, -inf }
0x30af   :  { %6007 = vmax.xlane.f32.xlu0 %v6006_v35  ;;  %v5969_v40 = vpop.f32.mrf.mxu1 }
0x30b0   :  { %v6000_v62 = vsel %vm422_vm2, %v5969_v40, -inf }
0x30b1   :  { %v10972_v43 = vpop.f32.mrf.mxu1 }
0x30b2   :  { %v6015_v52 = vsel %vm422_vm2, %v10972_v43, -inf }
0x30b3   :  { %6001 = vmax.xlane.f32.xlu0 %v6000_v62  ;;  %6016 = vmax.xlane.f32.xlu1 %v6015_v52  ;;  %v5982_v30 = vpop.f32.mrf.mxu1 }
0x30b4   :  { %v6009_v1 = vsel %vm422_vm2, %v5982_v30, -inf }
0x30b5   :  { %v10973_v17 = vpop.f32.mrf.mxu1 }
0x30b6   :  { %v6018_v8 = vsel %vm422_vm2, %v10973_v17, -inf }
0x30b7   :  { %6010 = vmax.xlane.f32.xlu1 %v6009_v1  ;;  %6019 = vmax.xlane.f32.xlu0 %v6018_v8  ;;  %v5985_v37 = vpop.f32.mrf.mxu1 }
0x30b8   :  { %v6012_v42 = vsel %vm422_vm2, %v5985_v37, -inf }
0x30bb   :  { %6013 = vmax.xlane.f32.xlu0 %v6012_v42 }
0x30c8   :  { %6091 = vrot.lane.b32.xlu1 %v14871_v46, %s12382_s19 }
0x30d1   :  { %6093 = vrot.lane.b32.xlu0 %v14863_v59, %s12382_s19 }
0x3134   :  { %v6005_v35 = vpop.xlane.xlu0 %6004 }
0x3135   :  { %v6023_v62 = vsub.f32 %v10968_v18, %v6005_v35 }
0x3136   :  { %v5999_v52 = vpop.xlane.xlu1 %5998 }
0x3137   :  { %v6033_v38 = vmul.f32 1.442695, %v6023_v62  ;;  %v6021_v50 = vsub.f32 %v5966_v23, %v5999_v52 }
0x3138   :  { %v6008_v5 = vpop.xlane.xlu0 %6007 }
0x3139   :  { %11971 = vpow2.f32 %v6033_v38  ;;  %v6029_v31 = vmul.f32 1.442695, %v6021_v50  ;;  %v6024_v1 = vsub.f32 %v10969_v21, %v6008_v5 }
0x313b   :  { %11973 = vpow2.f32 %v6029_v31  ;;  %v6035_v8 = vmul.f32 1.442695, %v6024_v1 }
0x313c   :  { %v6002_v22 = vpop.xlane.xlu0 %6001  ;;  %v6017_v4 = vpop.xlane.xlu1 %6016 }
0x313d   :  { %11975 = vpow2.f32 %v6035_v8  ;;  %v6022_v42 = vsub.f32 %v5969_v40, %v6002_v22  ;;  %v6027_v40 = vsub.f32 %v10972_v43, %v6017_v4 }
0x313f   :  { %v6031_v36 = vmul.f32 1.442695, %v6022_v42  ;;  %v6041_v62 = vmul.f32 1.442695, %v6027_v40 }
0x3140   :  { %v6020_v54 = vpop.xlane.xlu0 %6019  ;;  %v6011_v49 = vpop.xlane.xlu1 %6010 }
0x3141   :  { %11977 = vpow2.f32 %v6031_v36  ;;  %v6025_v35 = vsub.f32 %v5982_v30, %v6011_v49  ;;  %v6028_v52 = vsub.f32 %v10973_v17, %v6020_v54 }
0x3142   :  { %11979 = vpow2.f32 %v6041_v62 }
0x3143   :  { %v6037_v1 = vmul.f32 1.442695, %v6025_v35  ;;  %v6043_v42 = vmul.f32 1.442695, %v6028_v52 }
0x3144   :  { %v6014_v34 = vpop.xlane.xlu0 %6013  ;;  %v6092_v5 = vpop.permute.xlu1 %6091 }
0x3145   :  { %v6026_v8 = vsub.f32 %v5985_v37, %v6014_v34  ;;  %11981 = vpow2.f32 %v6037_v1 }
0x3146   :  { %v15081_v60 = vpop.eup %11971  ;;  %11983 = vpow2.f32 %v6043_v42 }
0x3147   :  { %v6051_v18 = vsel %vm422_vm2, %v15081_v60, 0.0 }
0x3148   :  { %v15085_v23 = vpop.eup %11973  ;;  %6052 = vadd.xlane.f32.xlu1 %v6051_v18  ;;  %v6094_v50 = vpop.permute.xlu0 %6093  ;;  %v6039_v18 = vmul.f32 1.442695, %v6026_v8 }
0x3149   :  { %10976 = vmatprep.subr.bf16.mxu0 %v6094_v50  ;;  %v6045_v36 = vsel %vm422_vm2, %v15085_v23, 0.0 }
0x314a   :  { %v11976_v31 = vpop.eup %11975  ;;  %10977 = vmatpush3.bf16.msra.mxu0 %v6094_v50  ;;  %11985 = vpow2.f32 %v6039_v18 }
0x314b   :  { %10978 = vmatprep.subr.bf16.mxu0 %v6092_v5  ;;  %v6054_v22 = vsel %vm422_vm2, %v11976_v31, 0.0 }
0x314c   :  { %6055 = vadd.xlane.f32.xlu0 %v6054_v22  ;;  %6046 = vadd.xlane.f32.xlu1 %v6045_v36 }
0x314e   :  { %v11978_v38 = vpop.eup %11977  ;;  %10979 = vmatpush3.bf16.msra.mxu0 %v6092_v5 }
0x314f   :  { %v6048_v21 = vsel %vm422_vm2, %v11978_v38, 0.0  ;;  %v15097_v50 = vpop.eup %11979 }
0x3150   :  { %6049 = vadd.xlane.f32.xlu0 %v6048_v21  ;;  %v6063_v4 = vsel %vm422_vm2, %v15097_v50, 0.0 }
0x315d   :  { %6196 = vrot.lane.b32.xlu1 %v14795_v53, %s12383_s20  ;;  %v15099_v53 = vpop.eup %11981 }
0x315e   :  { %v6057_v49 = vsel %vm422_vm2, %v15099_v53, 0.0 }
0x3161   :  { %6194 = vrot.lane.b32.xlu1 %v14799_v45, %s12383_s20  ;;  %v15101_v45 = vpop.eup %11983 }
0x3162   :  { %v15107_v54 = vpop.eup %11985  ;;  %v6066_v43 = vsel %vm422_vm2, %v15101_v45, 0.0 }
0x3163   :  { %v6060_v34 = vsel %vm422_vm2, %v15107_v54, 0.0 }
0x3166   :  { %6089 = vrot.lane.b32.xlu0 %v14877_v44, %s12382_s19 }
0x3185   :  { %6064 = vadd.xlane.f32.xlu0 %v6063_v4  ;;  %6058 = vadd.xlane.f32.xlu1 %v6057_v49 }
0x3189   :  { %6061 = vadd.xlane.f32.xlu0 %v6060_v34  ;;  %6067 = vadd.xlane.f32.xlu1 %v6066_v43 }
0x319a   :  { %6192 = vrot.lane.b32.xlu1 %v14806_v61, %s12383_s20 }
0x319e   :  { %6182 = vrot.lane.b32.xlu1 %v14782_v0, %s12384_s21 }
0x319f   :  { %6190 = vrot.lane.b32.xlu0 %v14812_v7, %s12383_s20 }
0x31a2   :  { %6186 = vrot.lane.b32.xlu1 %v14830_v56, %s12384_s21 }
0x31a3   :  { %6184 = vrot.lane.b32.xlu0 %v14828_v3, %s12384_s21 }
0x31a7   :  { %6188 = vrot.lane.b32.xlu0 %v14838_v13, %s12384_s21 }
0x31d1   :  { %v6053_v30 = vpop.xlane.xlu1 %6052 }
0x31d5   :  { %v6056_v17 = vpop.xlane.xlu0 %6055  ;;  %v6047_v37 = vpop.xlane.xlu1 %6046 }
0x31d6   :  { %11987 = vrcp.f32 %v6056_v17 }
0x31d7   :  { %11989 = vrcp.f32 %v6047_v37 }
0x31d8   :  { %11991 = vrcp.f32 %v6053_v30 }
0x31d9   :  { %v6050_v61 = vpop.xlane.xlu0 %6049  ;;  %v6197_v7 = vpop.permute.xlu1 %6196 }
0x31da   :  { %11993 = vrcp.f32 %v6050_v61  ;;  %v6220_v52 = vsel %vm332_vm1, %v6197_v7, 0 }
0x31dd   :  { %v6090_v0 = vpop.permute.xlu0 %6089  ;;  %v6195_v1 = vpop.permute.xlu1 %6194 }
0x31de   :  { %10980 = vmatprep.subr.bf16.mxu0 %v6090_v0  ;;  %v6217_v8 = vsel %vm332_vm1, %v6195_v1, 0 }
0x31df   :  { %10981 = vmatpush3.bf16.msra.mxu0 %v6090_v0 }
0x31e0   :  { %11394 = vmatprep.subr.msk.bf16.mxu0 %vm332_vm1, %v6197_v7 }
0x31e3   :  { %v11988_v56 = vpop.eup %11987 }
0x31e4   :  { %v11990_v5 = vpop.eup %11989  ;;  %v6080_v36 = vmul.f32 %v11988_v56, %v11976_v31 }
0x31e5   :  { %v11992_v3 = vpop.eup %11991  ;;  %v6077_v13 = vmul.f32 %v11990_v5, %v15085_v23 }
0x31e6   :  { %v6079_v40 = vmul.f32 %v11992_v3, %v15081_v60 }
0x31e7   :  { %v11994_v22 = vpop.eup %11993 }
0x31e8   :  { %v6078_v21 = vmul.f32 %v11994_v22, %v11978_v38  ;;  %v6086_v62 = vpack.c.bf16 %v6080_v36, %v6079_v40 }
0x31ea   :  { %v6085_v35 = vpack.c.bf16 %v6078_v21, %v6077_v13 }
0x31ec   :  { %10982 = vmatprep.mubr.msk.bf16.mxu0 %vm422_vm2, %v6085_v35 }
0x31ed   :  { %10983 = vmatmul.mubr.msk.bf16.vlgmr.msra.gmra.mxu0 %vm422_vm2, %v6086_v62 }
0x31ee   :  { %10991 = vmatpush3.bf16.xpose.msra.mxu0 %v6220_v52 }
0x31ef   :  { %11395 = vmatprep.subr.msk.bf16.mxu0 %vm332_vm1, %v6195_v1 }
0x31f6   :  { %10993 = vmatpush3.bf16.xpose.msra.mxu0 %v6217_v8 }
0x320e   :  { %v6065_v31 = vpop.xlane.xlu0 %6064  ;;  %v6059_v23 = vpop.xlane.xlu1 %6058 }
0x320f   :  { %11995 = vrcp.f32 %v6059_v23 }
0x3210   :  { %11997 = vrcp.f32 %v6065_v31 }
0x3212   :  { %v6062_v60 = vpop.xlane.xlu0 %6061  ;;  %v6068_v38 = vpop.xlane.xlu1 %6067 }
0x3213   :  { %11999 = vrcp.f32 %v6062_v60 }
0x3214   :  { %12001 = vrcp.f32 %v6068_v38 }
0x3216   :  { %v6193_v42 = vpop.permute.xlu1 %6192  ;;  %v6191_v4 = vpop.permute.xlu0 %6190 }
0x3217   :  { %11396 = vmatprep.subr.msk.bf16.mxu0 %vm332_vm1, %v6193_v42  ;;  %v6214_v18 = vsel %vm332_vm1, %v6193_v42, 0  ;;  %v6211_v43 = vsel %vm332_vm1, %v6191_v4, 0 }
0x3218   :  { %10995 = vmatpush3.bf16.xpose.msra.mxu0 %v6214_v18 }
0x3219   :  { %11397 = vmatprep.subr.msk.bf16.mxu0 %vm332_vm1, %v6191_v4 }
0x321a   :  { %v6183_v3 = vpop.permute.xlu1 %6182  ;;  %v6185_v22 = vpop.permute.xlu0 %6184 }
0x321c   :  { %v11996_v49 = vpop.eup %11995 }
0x321d   :  { %v11998_v34 = vpop.eup %11997  ;;  %v6081_v37 = vmul.f32 %v11996_v49, %v15099_v53 }
0x321e   :  { %v6083_v0 = vmul.f32 %v11998_v34, %v15097_v50  ;;  %v6187_v36 = vpop.permute.xlu1 %6186  ;;  %v6189_v53 = vpop.permute.xlu0 %6188  ;;  %v16708_v50 = vpack.c.bf16 %v14097_v47, %v14093_v14 }
0x3220   :  { %v12000_v30 = vpop.eup %11999  ;;  %10997 = vmatpush3.bf16.xpose.msra.mxu0 %v6211_v43 }
0x3221   :  { %v12002_v17 = vpop.eup %12001  ;;  %v6082_v61 = vmul.f32 %v12000_v30, %v15107_v54 }
0x3222   :  { %v6084_v7 = vmul.f32 %v12002_v17, %v15101_v45 }
0x3223   :  { %v6087_v56 = vpack.c.bf16 %v6082_v61, %v6081_v37 }
0x3224   :  { %v6088_v5 = vpack.c.bf16 %v6084_v7, %v6083_v0 }
0x3225   :  { %10986 = vmatprep.mubr.msk.bf16.mxu0 %vm422_vm2, %v6087_v56 }
0x3226   :  { %10987 = vmatmul.mubr.msk.bf16.gmra.mxu0 %vm422_vm2, %v6088_v5 }
0x3227   :  { %10998 = vmatprep.mubr.msk.bf16.mxu0 %vm332_vm1, %v6183_v3 }
0x322e   :  { %10999 = vmatmul.mubr.msk.bf16.vlgmr.msra.gmra.mxu0 %vm332_vm1, %v6185_v22 }
0x322f   :  { %11002 = vmatprep.mubr.msk.bf16.mxu0 %vm332_vm1, %v6187_v36 }
0x3236   :  { %11003 = vmatmul.mubr.msk.bf16.gmra.mxu0 %vm332_vm1, %v6189_v53 }
0x3237   :  { %11038 = vmatprep.mubr.msk.bf16.mxu0 %vm41_vm0, %v16708_v50 }
0x32ad   :  { %v15151_v45 = vpop.f32.mrf.mxu0 }
0x32af   :  { %v15153_v54 = vpop.f32.mrf.mxu0 }
0x32b1   :  { %v15155_v13 = vpop.f32.mrf.mxu0 }
0x32b2   :  { %v6179_v21 = vpack.c.bf16 %v15155_v13, %v15151_v45 }
0x32b3   :  { %v15159_v40 = vpop.f32.mrf.mxu0 }
0x32b4   :  { %v6178_v35 = vpack.c.bf16 %v15159_v40, %v15153_v54 }
0x32e6   :  { %v15163_v62 = vpop.f32.mrf.mxu0 }
0x32e8   :  { %v15165_v52 = vpop.f32.mrf.mxu0 }
0x32ea   :  { %v15167_v14 = vpop.f32.mrf.mxu0 }
0x32eb   :  { %v6181_v47 = vpack.c.bf16 %v15167_v14, %v15163_v62  ;;  %v5594_v14 = vpack.c.bf16 %v14947_v63, %v14941_v39 }
0x32ec   :  { %v15171_v1 = vpop.f32.mrf.mxu0 }
0x32ee   :  { %v11000_v31 = vpop.f32.mrf.mxu0 }
0x32ef   :  { %v6293_v23 = vsel %vm422_vm2, %v11000_v31, -inf }
0x32f0   :  { %6294 = vmax.xlane.f32.xlu0 %v6293_v23  ;;  %v6256_v60 = vpop.f32.mrf.mxu0 }
0x32f1   :  { %v6287_v38 = vsel %vm422_vm2, %v6256_v60, -inf }
0x32f2   :  { %6288 = vmax.xlane.f32.xlu1 %v6287_v38  ;;  %v11001_v42 = vpop.f32.mrf.mxu0 }
0x32f3   :  { %v6296_v43 = vsel %vm422_vm2, %v11001_v42, -inf }
0x32f4   :  { %v6259_v18 = vpop.f32.mrf.mxu0 }
0x32f5   :  { %v6290_v4 = vsel %vm422_vm2, %v6259_v18, -inf }
0x32f6   :  { %6291 = vmax.xlane.f32.xlu0 %v6290_v4  ;;  %v11004_v49 = vpop.f32.mrf.mxu0 }
0x32f7   :  { %v6305_v61 = vsel %vm422_vm2, %v11004_v49, -inf }
0x32f8   :  { %v6272_v34 = vpop.f32.mrf.mxu0 }
0x32f9   :  { %v6299_v30 = vsel %vm422_vm2, %v6272_v34, -inf }
0x32fa   :  { %6297 = vmax.xlane.f32.xlu0 %v6296_v43  ;;  %6300 = vmax.xlane.f32.xlu1 %v6299_v30  ;;  %v11005_v17 = vpop.f32.mrf.mxu0 }
0x32fb   :  { %v6308_v7 = vsel %vm422_vm2, %v11005_v17, -inf }
0x32fc   :  { %v6275_v37 = vpop.f32.mrf.mxu0 }
0x32fd   :  { %v6302_v0 = vsel %vm422_vm2, %v6275_v37, -inf }
0x32fe   :  { %6306 = vmax.xlane.f32.xlu1 %v6305_v61  ;;  %6303 = vmax.xlane.f32.xlu0 %v6302_v0 }
0x3302   :  { %6309 = vmax.xlane.f32.xlu0 %v6308_v7 }
0x330f   :  { %6385 = vrot.lane.b32.xlu1 %v14861_v15, %s12385_s22 }
0x3379   :  { %v6295_v56 = vpop.xlane.xlu0 %6294 }
0x337a   :  { %v6313_v5 = vsub.f32 %v11000_v31, %v6295_v56 }
0x337b   :  { %v6289_v3 = vpop.xlane.xlu1 %6288 }
0x337c   :  { %v6323_v22 = vmul.f32 1.442695, %v6313_v5  ;;  %v6311_v36 = vsub.f32 %v6256_v60, %v6289_v3 }
0x337e   :  { %12003 = vpow2.f32 %v6323_v22  ;;  %v6319_v53 = vmul.f32 1.442695, %v6311_v36 }
0x337f   :  { %v6292_v50 = vpop.xlane.xlu0 %6291 }
0x3380   :  { %12005 = vpow2.f32 %v6319_v53  ;;  %v6312_v23 = vsub.f32 %v6259_v18, %v6292_v50 }
0x3382   :  { %v6321_v30 = vmul.f32 1.442695, %v6312_v23 }
0x3383   :  { %v6298_v38 = vpop.xlane.xlu0 %6297  ;;  %v6301_v4 = vpop.xlane.xlu1 %6300 }
0x3384   :  { %v6314_v43 = vsub.f32 %v11001_v42, %v6298_v38  ;;  %v6315_v0 = vsub.f32 %v6272_v34, %v6301_v4 }
0x3386   :  { %v6325_v61 = vmul.f32 1.442695, %v6314_v43  ;;  %v6327_v60 = vmul.f32 1.442695, %v6315_v0 }
0x3387   :  { %v6304_v7 = vpop.xlane.xlu0 %6303  ;;  %v6307_v8 = vpop.xlane.xlu1 %6306 }
0x3388   :  { %12007 = vpow2.f32 %v6325_v61  ;;  %v6317_v15 = vsub.f32 %v11004_v49, %v6307_v8  ;;  %v6316_v31 = vsub.f32 %v6275_v37, %v6304_v7 }
0x3389   :  { %12009 = vpow2.f32 %v6321_v30 }
0x338a   :  { %v6331_v56 = vmul.f32 1.442695, %v6317_v15  ;;  %v6329_v34 = vmul.f32 1.442695, %v6316_v31  ;;  %v15210_v15 = vld [vmem:[%s16608_s2 + $0x34] ss:$8 sps:$4 sm:$0xff]  }
0x338b   :  { %v15185_v5 = vpop.eup %12003  ;;  %v6310_v3 = vpop.xlane.xlu0 %6309  ;;  %v15217_v31 = vld [vmem:[%s16608_s2 + $0x24] ss:$8 sps:$4 sm:$0xff]  }
0x338c   :  { %v6386_v22 = vpop.permute.xlu1 %6385  ;;  %v6318_v36 = vsub.f32 %v11005_v17, %v6310_v3  ;;  %v6341_v42 = vsel %vm422_vm2, %v15185_v5, 0.0  ;;  %12011 = vpow2.f32 %v6331_v56 }
0x338d   :  { %11006 = vmatprep.subr.bf16.mxu1 %v6386_v22  ;;  %v15189_v18 = vpop.eup %12005  ;;  %6342 = vadd.xlane.f32.xlu1 %v6341_v42  ;;  %12013 = vpow2.f32 %v6327_v60 }
0x338e   :  { %11007 = vmatpush3.bf16.msra.mxu1 %v6386_v22  ;;  %v6333_v8 = vmul.f32 1.442695, %v6318_v36  ;;  %v6335_v49 = vsel %vm422_vm2, %v15189_v18, 0.0 }
0x3390   :  { %12015 = vpow2.f32 %v6333_v8 }
0x3391   :  { %6336 = vadd.xlane.f32.xlu1 %v6335_v49  ;;  %12017 = vpow2.f32 %v6329_v34 }
0x3395   :  { %v12008_v37 = vpop.eup %12007 }
0x3396   :  { %v6344_v17 = vsel %vm422_vm2, %v12008_v37, 0.0  ;;  %v12010_v53 = vpop.eup %12009 }
0x3397   :  { %6345 = vadd.xlane.f32.xlu0 %v6344_v17  ;;  %v6338_v23 = vsel %vm422_vm2, %v12010_v53, 0.0 }
0x3399   :  { %v15194_v50 = vpop.eup %12011 }
0x339a   :  { %v6353_v38 = vsel %vm422_vm2, %v15194_v50, 0.0  ;;  %v12014_v4 = vpop.eup %12013 }
0x339b   :  { %6339 = vadd.xlane.f32.xlu0 %v6338_v23  ;;  %6354 = vadd.xlane.f32.xlu1 %v6353_v38  ;;  %v6347_v0 = vsel %vm422_vm2, %v12014_v4, 0.0 }
0x339d   :  { %v15199_v43 = vpop.eup %12015 }
0x339e   :  { %v6356_v30 = vsel %vm422_vm2, %v15199_v43, 0.0  ;;  %v12018_v61 = vpop.eup %12017 }
0x339f   :  { %6357 = vadd.xlane.f32.xlu0 %v6356_v30  ;;  %6348 = vadd.xlane.f32.xlu1 %v6347_v0  ;;  %v6350_v7 = vsel %vm422_vm2, %v12018_v61, 0.0 }
0x33a3   :  { %6351 = vadd.xlane.f32.xlu0 %v6350_v7 }
0x33b0   :  { %6381 = vrot.lane.b32.xlu1 %v14871_v46, %s12385_s22  ;;  %v16709_v46 = vpack.c.bf16 %v15053_v6, %v15047_v2  ;;  %v16712_v2 = vpack.c.bf16 %v15061_v28, %v15057_v16 }
0x33b4   :  { %6379 = vrot.lane.b32.xlu1 %v14877_v44, %s12385_s22  ;;  %v16710_v44 = vpack.c.bf16 %v15049_v20, %v15045_v48 }
0x33b8   :  { %6548 = vrot.lane.b32.xlu1 %v15210_v15, %s12376_s13 }
0x33b9   :  { %6383 = vrot.lane.b32.xlu0 %v14863_v59, %s12385_s22  ;;  %v16711_v59 = vpack.c.bf16 %v15065_v11, %v15059_v58 }
0x33bc   :  { %6546 = vrot.lane.b32.xlu1 %v15217_v31, %s12376_s13 }
0x33bd   :  { %6476 = vrot.lane.b32.xlu0 %v16709_v46, %s12387_s28 }
0x33c0   :  { %6488 = vrot.lane.b32.xlu1 %v6178_v35, %s12386_s27 }
0x33c1   :  { %6478 = vrot.lane.b32.xlu0 %v16710_v44, %s12387_s28 }
0x33c4   :  { %6480 = vrot.lane.b32.xlu1 %v16711_v59, %s12387_s28 }
0x33c5   :  { %6490 = vrot.lane.b32.xlu0 %v6179_v21, %s12386_s27 }
0x33c9   :  { %6482 = vrot.lane.b32.xlu0 %v16712_v2, %s12387_s28 }
0x3416   :  { %v6343_v6 = vpop.xlane.xlu1 %6342 }
0x341a   :  { %v6337_v54 = vpop.xlane.xlu1 %6336 }
0x341b   :  { %12019 = vrcp.f32 %v6337_v54 }
0x3420   :  { %v6346_v40 = vpop.xlane.xlu0 %6345 }
0x3424   :  { %v6340_v48 = vpop.xlane.xlu0 %6339  ;;  %v6355_v20 = vpop.xlane.xlu1 %6354 }
0x3425   :  { %12021 = vrcp.f32 %v6340_v48  ;;  %v16713_v48 = vpack.c.bf16 %v15171_v1, %v15165_v52  ;;  %v16714_v52 = vpack.c.bf16 %v14943_v51, %v14939_v24  ;;  %v16715_v24 = vpack.c.bf16 %v14957_v9, %v14951_v12 }
0x3426   :  { %12023 = vrcp.f32 %v6346_v40 }
0x3427   :  { %12025 = vrcp.f32 %v6343_v6 }
0x3428   :  { %v6358_v58 = vpop.xlane.xlu0 %6357  ;;  %v6349_v11 = vpop.xlane.xlu1 %6348 }
0x3429   :  { %12027 = vrcp.f32 %v6349_v11  ;;  %v12020_v13 = vpop.eup %12019 }
0x342a   :  { %v6367_v56 = vmul.f32 %v12020_v13, %v15189_v18 }
0x342c   :  { %v6352_v35 = vpop.xlane.xlu0 %6351  ;;  %v6382_v45 = vpop.permute.xlu1 %6381 }
0x342d   :  { %12029 = vrcp.f32 %v6352_v35 }
0x342e   :  { %12031 = vrcp.f32 %v6358_v58 }
0x342f   :  { %12033 = vrcp.f32 %v6355_v20 }
0x3430   :  { %v6384_v21 = vpop.permute.xlu0 %6383  ;;  %v6380_v28 = vpop.permute.xlu1 %6379 }
0x3431   :  { %11008 = vmatprep.subr.bf16.mxu1 %v6384_v21 }
0x3432   :  { %v12022_v16 = vpop.eup %12021  ;;  %11009 = vmatpush3.bf16.msra.mxu1 %v6384_v21 }
0x3433   :  { %11010 = vmatprep.subr.bf16.mxu1 %v6382_v45  ;;  %v6368_v60 = vmul.f32 %v12022_v16, %v12010_v53  ;;  %v12024_v3 = vpop.eup %12023 }
0x3434   :  { %v12026_v36 = vpop.eup %12025  ;;  %v6370_v42 = vmul.f32 %v12024_v3, %v12008_v37  ;;  %v6549_v8 = vpop.permute.xlu1 %6548 }
0x3435   :  { %v6375_v22 = vpack.c.bf16 %v6368_v60, %v6367_v56  ;;  %v6369_v49 = vmul.f32 %v12026_v36, %v15185_v5  ;;  %v6477_v11 = vpop.permute.xlu0 %6476 }
0x3436   :  { %11011 = vmatpush3.bf16.msra.mxu1 %v6382_v45  ;;  %v12028_v34 = vpop.eup %12027  ;;  %v6510_v16 = vsel %vm332_vm1, %v5594_v14, %v6477_v11 }
0x3437   :  { %11012 = vmatprep.subr.bf16.mxu1 %v6380_v28  ;;  %11014 = vmatprep.mubr.msk.bf16.mxu1 %vm422_vm2, %v6375_v22  ;;  %v6376_v23 = vpack.c.bf16 %v6370_v42, %v6369_v49  ;;  %v6371_v38 = vmul.f32 %v12028_v34, %v12014_v4  ;;  %v16716_v42 = vpack.c.bf16 %v14953_v10, %v14949_v57  ;;  %v12346_v57 = vld [vmem:[%s16609_s3 + $0x10] sm:$0xff] }
0x3438   :  { %v6547_v7 = vpop.permute.xlu1 %6546  ;;  %v6539_v12 = vrot.slane %v12346_v57, %v13049_v26 }
0x3439   :  { %v6479_v35 = vpop.permute.xlu0 %6478 }
0x343a   :  { %v12030_v17 = vpop.eup %12029  ;;  %11013 = vmatpush3.bf16.msra.mxu1 %v6380_v28  ;;  %v6513_v1 = vsel %vm332_vm1, %v16714_v52, %v6479_v35 }
0x343b   :  { %v6372_v30 = vmul.f32 %v12030_v17, %v12018_v61  ;;  %11022 = vmatprep.subr.bf16.mxu1 %v6549_v8  ;;  %v12032_v18 = vpop.eup %12031 }
0x343c   :  { %v12034_v0 = vpop.eup %12033  ;;  %v6374_v37 = vmul.f32 %v12032_v18, %v15199_v43  ;;  %v6489_v13 = vpop.permute.xlu1 %6488 }
0x343d   :  { %11015 = vmatmul.mubr.msk.bf16.vlgmr.msra.gmra.mxu1 %vm422_vm2, %v6376_v23  ;;  %v6377_v53 = vpack.c.bf16 %v6372_v30, %v6371_v38  ;;  %v6373_v5 = vmul.f32 %v12034_v0, %v15194_v50  ;;  %v6491_v45 = vpop.permute.xlu0 %6490  ;;  %v6521_v28 = vsel %vm1534_vm3, %v6510_v16, %v6489_v13 }
0x343e   :  { %11023 = vmatpush3.bf16.msra.mxu1 %v6549_v8  ;;  %v6523_v60 = vsel %vm1534_vm3, %v6513_v1, %v6491_v45 }
0x343f   :  { %11018 = vmatprep.mubr.msk.bf16.mxu1 %vm422_vm2, %v6377_v53  ;;  %11024 = vmatprep.subr.bf16.mxu1 %v6547_v7  ;;  %v6378_v46 = vpack.c.bf16 %v6374_v37, %v6373_v5 }
0x3440   :  { %v6481_v62 = vpop.permute.xlu1 %6480 }
0x3441   :  { %v6483_v21 = vpop.permute.xlu0 %6482  ;;  %v6516_v51 = vsel %vm332_vm1, %v16715_v24, %v6481_v62 }
0x3442   :  { %11025 = vmatpush3.bf16.msra.mxu1 %v6547_v7  ;;  %v6519_v34 = vsel %vm332_vm1, %v16716_v42, %v6483_v21 }
0x3443   :  { %11046 = vmatprep.subr.bf16.mxu1 %v15210_v15 }
0x3445   :  { %11019 = vmatmul.mubr.msk.bf16.gmra.mxu1 %vm422_vm2, %v6378_v46 }
0x34fd   :  { %v11016_v4 = vpop.f32.mrf.mxu1 }
0x34ff   :  { %v6437_v61 = vpop.f32.mrf.mxu1 }
0x3501   :  { %v11017_v44 = vpop.f32.mrf.mxu1 }
0x3502   :  { %v6469_v59 = vpack.c.bf16 %v11017_v44, %v11016_v4 }
0x3503   :  { %v6440_v2 = vpop.f32.mrf.mxu1 }
0x3504   :  { %v6468_v6 = vpack.c.bf16 %v6440_v2, %v6437_v61  ;;  %6502 = vrot.lane.b32.xlu0 %v6469_v59, %s12388_s29 }
0x3505   :  { %v11020_v54 = vpop.f32.mrf.mxu1 }
0x3506   :  { %6500 = vrot.lane.b32.xlu1 %v6468_v6, %s12388_s29 }
0x3507   :  { %v6453_v43 = vpop.f32.mrf.mxu1 }
0x3508   :  { %6494 = vrot.lane.b32.xlu0 %v6181_v47, %s12386_s27 }
0x3509   :  { %v11021_v50 = vpop.f32.mrf.mxu1 }
0x350a   :  { %v6471_v40 = vpack.c.bf16 %v11021_v50, %v11020_v54  ;;  %6492 = vrot.lane.b32.xlu1 %v16713_v48, %s12386_s27 }
0x350b   :  { %v6456_v20 = vpop.f32.mrf.mxu1 }
0x350c   :  { %v6470_v58 = vpack.c.bf16 %v6456_v20, %v6453_v43  ;;  %6506 = vrot.lane.b32.xlu0 %v6471_v40, %s12388_s29 }
0x350e   :  { %6504 = vrot.lane.b32.xlu1 %v6470_v58, %s12388_s29 }
0x3576   :  { %v6503_v47 = vpop.permute.xlu0 %6502 }
0x3577   :  { %v6531_v22 = vsel %vm1543_vm4, %v6523_v60, %v6503_v47 }
0x3578   :  { %v6501_v56 = vpop.permute.xlu1 %6500 }
0x3579   :  { %v6529_v3 = vsel %vm1543_vm4, %v6521_v28, %v6501_v56 }
0x357a   :  { %v6495_v36 = vpop.permute.xlu0 %6494  ;;  %11026 = vmatprep.mubr.msk.bf16.mxu1 %vm41_vm0, %v6529_v3 }
0x357b   :  { %11027 = vmatmul.mubr.msk.bf16.vlgmr.msra.gmra.mxu1 %vm41_vm0, %v6531_v22 }
0x357c   :  { %v6493_v39 = vpop.permute.xlu1 %6492  ;;  %11047 = vmatpush3.bf16.msra.mxu1 %v15210_v15  ;;  %v6527_v15 = vsel %vm1534_vm3, %v6519_v34, %v6495_v36 }
0x357d   :  { %11048 = vmatprep.subr.bf16.mxu1 %v15217_v31  ;;  %v6525_v8 = vsel %vm1534_vm3, %v6516_v51, %v6493_v39 }
0x357e   :  { %v6507_v63 = vpop.permute.xlu0 %6506 }
0x357f   :  { %v6535_v23 = vsel %vm1543_vm4, %v6527_v15, %v6507_v63 }
0x3580   :  { %v6505_v49 = vpop.permute.xlu1 %6504  ;;  %11049 = vmatpush3.bf16.msra.mxu1 %v15217_v31 }
0x3581   :  { %v6533_v17 = vsel %vm1543_vm4, %v6525_v8, %v6505_v49 }
0x3582   :  { %11030 = vmatprep.mubr.msk.bf16.mxu1 %vm41_vm0, %v6533_v17 }
0x3583   :  { %11031 = vmatmul.mubr.msk.bf16.gmra.mxu1 %vm41_vm0, %v6535_v23 }
0x363b   :  { %v11028_v10 = vpop.f32.mrf.mxu1 }
0x363c   :  { %v6603_v9 = vadd.f32 %v11028_v10, %v6539_v12 }
0x363d   :  { %v6594_v38 = vpop.f32.mrf.mxu1 }
0x363e   :  { %v6627_v31 = vadd.f32 %v6603_v9, %v14644_v32  ;;  %v6595_v30 = vadd.f32 %v6594_v38, %v6539_v12 }
0x363f   :  { %v11029_v18 = vpop.f32.mrf.mxu1 }
0x3640   :  { %v6625_v53 = vadd.f32 %v6595_v30, %v14648_v33  ;;  %v6639_v0 = vsel %vm41_vm0, %v6627_v31, 0.0  ;;  %v6606_v7 = vadd.f32 %v11029_v18, %v6539_v12 }
0x3641   :  { %6640 = vadd.xlane.f32.xlu0 %v6639_v0  ;;  %v6597_v37 = vpop.f32.mrf.mxu1 }
0x3642   :  { %v6598_v5 = vadd.f32 %v6597_v37, %v6539_v12  ;;  %v6633_v46 = vsel %vm41_vm0, %v6625_v53, 0.0  ;;  %v6628_v44 = vadd.f32 %v6606_v7, %v14660_v29  ;;  %v12347_v37 = vld [vmem:[%s16608_s2 + $0x30] ss:$8 sps:$4 sm:$0xff]  }
0x3643   :  { %6634 = vadd.xlane.f32.xlu1 %v6633_v46  ;;  %v11032_v4 = vpop.f32.mrf.mxu1 }
0x3644   :  { %v6626_v61 = vadd.f32 %v6598_v5, %v14657_v27  ;;  %v6619_v32 = vadd.f32 %v11032_v4, %v6539_v12  ;;  %v6642_v50 = vsel %vm41_vm0, %v6628_v44, 0.0  ;;  %v12348_v5 = vld [vmem:[%s16608_s2 + $0x20] ss:$8 sps:$4 sm:$0xff]  }
0x3645   :  { %v6610_v59 = vpop.f32.mrf.mxu1 }
0x3646   :  { %v6611_v2 = vadd.f32 %v6610_v59, %v6539_v12  ;;  %v6636_v6 = vsel %vm41_vm0, %v6626_v61, 0.0  ;;  %v6631_v40 = vadd.f32 %v6619_v32, %v14672_v19 }
0x3647   :  { %6637 = vadd.xlane.f32.xlu0 %v6636_v6  ;;  %v11033_v33 = vpop.f32.mrf.mxu1 }
0x3648   :  { %v6629_v54 = vadd.f32 %v6611_v2, %v14667_v25  ;;  %v6622_v48 = vadd.f32 %v11033_v33, %v6539_v12  ;;  %v6651_v35 = vsel %vm41_vm0, %v6631_v40, 0.0 }
0x3649   :  { %v6613_v43 = vpop.f32.mrf.mxu1 }
0x364a   :  { %v6614_v20 = vadd.f32 %v6613_v43, %v6539_v12  ;;  %v6645_v27 = vsel %vm41_vm0, %v6629_v54, 0.0  ;;  %v6632_v58 = vadd.f32 %v6622_v48, %v14682_v41 }
0x364b   :  { %6643 = vadd.xlane.f32.xlu0 %v6642_v50  ;;  %6646 = vadd.xlane.f32.xlu1 %v6645_v27 }
0x364c   :  { %v6630_v29 = vadd.f32 %v6614_v20, %v14679_v55  ;;  %v6654_v25 = vsel %vm41_vm0, %v6632_v58, 0.0 }
0x364e   :  { %v6648_v11 = vsel %vm41_vm0, %v6630_v29, 0.0 }
0x364f   :  { %6649 = vadd.xlane.f32.xlu0 %v6648_v11  ;;  %6652 = vadd.xlane.f32.xlu1 %v6651_v35 }
0x3653   :  { %6655 = vadd.xlane.f32.xlu0 %v6654_v25 }
0x36ca   :  { %v6641_v19 = vpop.xlane.xlu0 %6640 }
0x36cb   :  { %v6659_v45 = vmul.f32 0.03125, %v6641_v19 }
0x36cc   :  { %v6635_v13 = vpop.xlane.xlu1 %6634 }
0x36cd   :  { %v6657_v21 = vmul.f32 0.03125, %v6635_v13  ;;  %v15320_v62 = vsub.f32 %v6627_v31, %v6659_v45 }
0x36cf   :  { %v15322_v14 = vsub.f32 %v6625_v53, %v6657_v21  ;;  %v6675_v1 = vmul.f32 %v15320_v62, %v15320_v62 }
0x36d0   :  { %v6638_v55 = vpop.xlane.xlu0 %6637 }
0x36d1   :  { %v6658_v47 = vmul.f32 0.03125, %v6638_v55  ;;  %v6673_v41 = vmul.f32 %v15322_v14, %v15322_v14  ;;  %v6687_v51 = vsel %vm41_vm0, %v6675_v1, 0.0 }
0x36d3   :  { %v15326_v16 = vsub.f32 %v6626_v61, %v6658_v47  ;;  %v6681_v52 = vsel %vm41_vm0, %v6673_v41, 0.0 }
0x36d4   :  { %v6644_v28 = vpop.xlane.xlu0 %6643  ;;  %6682 = vadd.xlane.f32.xlu1 %v6681_v52  ;;  %v6647_v56 = vpop.xlane.xlu1 %6646 }
0x36d5   :  { %v6660_v60 = vmul.f32 0.03125, %v6644_v28  ;;  %v6661_v3 = vmul.f32 0.03125, %v6647_v56  ;;  %v6674_v22 = vmul.f32 %v15326_v16, %v15326_v16  ;;  %v16717_v56 = vld [vmem:[#allocation28_spill] sm:$0xff] }
0x36d7   :  { %v15333_v36 = vsub.f32 %v6628_v44, %v6660_v60  ;;  %v15335_v39 = vsub.f32 %v6629_v54, %v6661_v3  ;;  %v6684_v24 = vsel %vm41_vm0, %v6674_v22, 0.0  ;;  %v16718_v22 = vld [vmem:[#allocation31_spill] sm:$0xff] }
0x36d8   :  { %6685 = vadd.xlane.f32.xlu0 %v6684_v24  ;;  %v6650_v63 = vpop.xlane.xlu0 %6649  ;;  %6688 = vadd.xlane.f32.xlu1 %v6687_v51  ;;  %v6653_v42 = vpop.xlane.xlu1 %6652  ;;  %v16719_v24 = vld [vmem:[#allocation30_spill] sm:$0xff] }
0x36d9   :  { %v6662_v34 = vmul.f32 0.03125, %v6650_v63  ;;  %v6663_v8 = vmul.f32 0.03125, %v6653_v42  ;;  %v6676_v49 = vmul.f32 %v15333_v36, %v15333_v36  ;;  %v6677_v15 = vmul.f32 %v15335_v39, %v15335_v39  ;;  %v16721_v42 = vld [vmem:[#allocation33_spill] sm:$0xff] }
0x36da   :  { %v16720_v51 = vpack.c.bf16 %v16718_v22, %v16719_v24 }
0x36db   :  { %v15343_v17 = vsub.f32 %v6630_v29, %v6662_v34  ;;  %v15345_v23 = vsub.f32 %v6631_v40, %v6663_v8  ;;  %v6690_v57 = vsel %vm41_vm0, %v6676_v49, 0.0  ;;  %v6693_v12 = vsel %vm41_vm0, %v6677_v15, 0.0  ;;  %v16722_v34 = vld [vmem:[#allocation32_spill] sm:$0xff] }
0x36dc   :  { %6691 = vadd.xlane.f32.xlu0 %v6690_v57  ;;  %v6656_v10 = vpop.xlane.xlu0 %6655  ;;  %6694 = vadd.xlane.f32.xlu1 %v6693_v12  ;;  %v16723_v8 = vpack.c.bf16 %v16721_v42, %v16722_v34  ;;  %v16724_v57 = vld [vmem:[#allocation29_spill] sm:$0xff] }
0x36dd   :  { %v6664_v9 = vmul.f32 0.03125, %v6656_v10  ;;  %v6678_v38 = vmul.f32 %v15343_v17, %v15343_v17  ;;  %v6679_v31 = vmul.f32 %v15345_v23, %v15345_v23 }
0x36df   :  { %v15353_v30 = vsub.f32 %v6632_v58, %v6664_v9  ;;  %v6696_v18 = vsel %vm41_vm0, %v6678_v38, 0.0  ;;  %v6699_v53 = vsel %vm41_vm0, %v6679_v31, 0.0 }
0x36e0   :  { %6697 = vadd.xlane.f32.xlu0 %v6696_v18  ;;  %6700 = vadd.xlane.f32.xlu1 %v6699_v53 }
0x36e1   :  { %v6680_v0 = vmul.f32 %v15353_v30, %v15353_v30 }
0x36e3   :  { %v6702_v7 = vsel %vm41_vm0, %v6680_v0, 0.0 }
0x36e4   :  { %6703 = vadd.xlane.f32.xlu0 %v6702_v7 }
0x36f1   :  { %6787 = vrot.lane.b32.xlu1 %v12347_v37, %s12374_s11 }
0x36fa   :  { %6785 = vrot.lane.b32.xlu0 %v12348_v5, %s12374_s11  ;;  %v16725_v5 = vld [vmem:[#allocation35_spill] sm:$0xff] }
0x375d   :  { %v6683_v46 = vpop.xlane.xlu1 %6682 }
0x375e   :  { %v6705_v4 = vmul.f32 0.03125, %v6683_v46  ;;  %v16726_v46 = vld [vmem:[#allocation34_spill] sm:$0xff] }
0x3760   :  { %v6713_v61 = vadd.f32 1e-05, %v6705_v4  ;;  %v16727_v4 = vpack.c.bf16 %v16725_v5, %v16726_v46 }
0x3761   :  { %v6686_v44 = vpop.xlane.xlu0 %6685  ;;  %v6689_v59 = vpop.xlane.xlu1 %6688 }
0x3762   :  { %12035 = vrsqrt.f32 %v6713_v61  ;;  %v6706_v32 = vmul.f32 0.03125, %v6686_v44  ;;  %v6707_v2 = vmul.f32 0.03125, %v6689_v59 }
0x3764   :  { %v6714_v6 = vadd.f32 1e-05, %v6706_v32  ;;  %v6715_v33 = vadd.f32 1e-05, %v6707_v2 }
0x3765   :  { %v6692_v54 = vpop.xlane.xlu0 %6691  ;;  %v6695_v43 = vpop.xlane.xlu1 %6694 }
0x3766   :  { %12037 = vrsqrt.f32 %v6714_v6  ;;  %v6708_v50 = vmul.f32 0.03125, %v6692_v54  ;;  %v6709_v40 = vmul.f32 0.03125, %v6695_v43 }
0x3767   :  { %12039 = vrsqrt.f32 %v6715_v33 }
0x3768   :  { %v6716_v48 = vadd.f32 1e-05, %v6708_v50  ;;  %v6717_v20 = vadd.f32 1e-05, %v6709_v40  ;;  %v15431_v50 = vld [vmem:[%s16609_s3 + $0x18] sm:$0xff] }
0x3769   :  { %v6698_v27 = vpop.xlane.xlu0 %6697  ;;  %v6701_v29 = vpop.xlane.xlu1 %6700 }
0x376a   :  { %12041 = vrsqrt.f32 %v6716_v48  ;;  %v6710_v58 = vmul.f32 0.03125, %v6698_v27  ;;  %v6711_v11 = vmul.f32 0.03125, %v6701_v29 }
0x376b   :  { %12043 = vrsqrt.f32 %v6717_v20  ;;  %v16728_v20 = vld [vmem:[#allocation8_spill] sm:$0xff] }
0x376c   :  { %v6718_v35 = vadd.f32 1e-05, %v6710_v58  ;;  %v6719_v25 = vadd.f32 1e-05, %v6711_v11  ;;  %v15435_v27 = vrot.slane %v15431_v50, %v16728_v20 }
0x376d   :  { %v6704_v19 = vpop.xlane.xlu0 %6703  ;;  %v15368_v45 = vpop.permute.xlu1 %6787 }
0x376e   :  { %12045 = vrsqrt.f32 %v6718_v35  ;;  %v6712_v13 = vmul.f32 0.03125, %v6704_v19  ;;  %11034 = vmatprep.subr.bf16.mxu0 %v15368_v45 }
0x376f   :  { %v12036_v21 = vpop.eup %12035  ;;  %12047 = vrsqrt.f32 %v6719_v25  ;;  %11035 = vmatpush3.bf16.msra.mxu0 %v15368_v45 }
0x3770   :  { %v6720_v55 = vadd.f32 1e-05, %v6712_v13  ;;  %v6729_v47 = vmul.f32 %v12036_v21, %v15322_v14 }
0x3771   :  { %v15373_v41 = vpop.permute.xlu0 %6785 }
0x3772   :  { %12049 = vrsqrt.f32 %v6720_v55  ;;  %11036 = vmatprep.subr.bf16.mxu0 %v15373_v41  ;;  %v6741_v60 = vmul.f32 %v16717_v56, %v6729_v47 }
0x3773   :  { %v12038_v52 = vpop.eup %12037  ;;  %11037 = vmatpush3.bf16.msra.mxu0 %v15373_v41 }
0x3774   :  { %v12040_v1 = vpop.eup %12039  ;;  %v6730_v28 = vmul.f32 %v12038_v52, %v15326_v16  ;;  %v16729_v52 = vld [vmem:[#allocation5_spill] sm:$0xff] }
0x3775   :  { %v6731_v3 = vmul.f32 %v12040_v1, %v15320_v62  ;;  %v6753_v62 = vadd.f32 %v16724_v57, %v6741_v60  ;;  %v15457_v1 = vrot.slane %v15431_v50, %v16729_v52 }
0x3776   :  { %11039 = vmatmul.mubr.msk.bf16.vlgmr.msra.gmra.mxu0 %vm41_vm0, %v16720_v51  ;;  %v6742_v14 = vmul.f32 %v16717_v56, %v6730_v28 }
0x3777   :  { %v12042_v63 = vpop.eup %12041  ;;  %11042 = vmatprep.mubr.msk.bf16.mxu0 %vm41_vm0, %v16723_v8  ;;  %v6743_v16 = vmul.f32 %v16717_v56, %v6731_v3 }
0x3778   :  { %v12044_v49 = vpop.eup %12043  ;;  %v6732_v15 = vmul.f32 %v12042_v63, %v15333_v36  ;;  %v6754_v12 = vadd.f32 %v16724_v57, %v6742_v14 }
0x3779   :  { %v6733_v10 = vmul.f32 %v12044_v49, %v15335_v39  ;;  %v6755_v53 = vadd.f32 %v16724_v57, %v6743_v16 }
0x377a   :  { %v6744_v9 = vmul.f32 %v16717_v56, %v6732_v15  ;;  %v15395_v38 = vpack.c.bf16 %v6754_v12, %v6753_v62 }
0x377b   :  { %v12046_v31 = vpop.eup %12045  ;;  %v6745_v7 = vmul.f32 %v16717_v56, %v6733_v10 }
0x377c   :  { %v12048_v18 = vpop.eup %12047  ;;  %v6756_v0 = vadd.f32 %v16724_v57, %v6744_v9  ;;  %11050 = vmatprep.mubr.msk.bf16.mxu1 %vm41_vm0, %v15395_v38  ;;  %v6734_v36 = vmul.f32 %v12046_v31, %v15343_v17 }
0x377d   :  { %v6735_v37 = vmul.f32 %v12048_v18, %v15345_v23  ;;  %v6757_v17 = vadd.f32 %v16724_v57, %v6745_v7 }
0x377e   :  { %v15404_v39 = vpack.c.bf16 %v6756_v0, %v6755_v53  ;;  %11043 = vmatmul.mubr.msk.bf16.gmra.mxu0 %vm41_vm0, %v16727_v4  ;;  %v6746_v61 = vmul.f32 %v16717_v56, %v6734_v36 }
0x377f   :  { %v12050_v44 = vpop.eup %12049  ;;  %v6747_v23 = vmul.f32 %v16717_v56, %v6735_v37 }
0x3780   :  { %v6736_v59 = vmul.f32 %v12050_v44, %v15353_v30  ;;  %11051 = vmatmul.mubr.msk.bf16.vlgmr.msra.gmra.mxu1 %vm41_vm0, %v15404_v39  ;;  %v6758_v32 = vadd.f32 %v16724_v57, %v6746_v61 }
0x3781   :  { %v6759_v33 = vadd.f32 %v16724_v57, %v6747_v23 }
0x3782   :  { %v15417_v2 = vpack.c.bf16 %v6758_v32, %v6757_v17  ;;  %v6748_v6 = vmul.f32 %v16717_v56, %v6736_v59 }
0x3784   :  { %11054 = vmatprep.mubr.msk.bf16.mxu1 %vm41_vm0, %v15417_v2  ;;  %v6760_v30 = vadd.f32 %v16724_v57, %v6748_v6 }
0x3786   :  { %v15424_v54 = vpack.c.bf16 %v6760_v30, %v6759_v33 }
0x3788   :  { %11055 = vmatmul.mubr.msk.bf16.gmra.mxu1 %vm41_vm0, %v15424_v54 }
0x3836   :  { %v11040_v43 = vpop.f32.mrf.mxu0 }
0x3837   :  { %v6846_v36 = vadd.f32 %v11040_v43, %v15435_v27 }
0x3838   :  { %v6837_v40 = vpop.f32.mrf.mxu0 }
0x3839   :  { %v6838_v58 = vadd.f32 %v6837_v40, %v15435_v27 }
0x383a   :  { %v11041_v48 = vpop.f32.mrf.mxu0 }
0x383b   :  { %v6849_v53 = vadd.f32 %v11041_v48, %v15435_v27 }
0x383c   :  { %v6840_v29 = vpop.f32.mrf.mxu0 }
0x383d   :  { %v6841_v11 = vadd.f32 %v6840_v29, %v15435_v27  ;;  %v15507_v37 = vpack.c.bf16 %v6849_v53, %v6846_v36 }
0x383e   :  { %v11044_v16 = vpop.f32.mrf.mxu0 }
0x383f   :  { %v15439_v35 = vpack.c.bf16 %v6841_v11, %v6838_v58  ;;  %v6862_v4 = vadd.f32 %v11044_v16, %v15435_v27  ;;  %v16730_v11 = vld [vmem:[#allocation9_spill] sm:$0xff] }
0x3840   :  { %v15441_v25 = vpop.f32.mrf.mxu1  ;;  %v6853_v62 = vpop.f32.mrf.mxu0  ;;  %v6966_v52 = vrot.slane %v15431_v50, %v16730_v11 }
0x3841   :  { %11066 = vmatprep.mubr.msk.bf16.mxu0 %vm332_vm1, %v15439_v35  ;;  %v6957_v34 = vadd.f32 %v15441_v25, %v15457_v1  ;;  %v6854_v7 = vadd.f32 %v6853_v62, %v15435_v27 }
0x3842   :  { %v15445_v19 = vpop.f32.mrf.mxu1  ;;  %v11045_v9 = vpop.f32.mrf.mxu0 }
0x3843   :  { %v6955_v57 = vadd.f32 %v15457_v1, %v15445_v19  ;;  %v6865_v46 = vadd.f32 %v11045_v9, %v15435_v27 }
0x3844   :  { %v15447_v13 = vpop.f32.mrf.mxu1  ;;  %v6856_v31 = vpop.f32.mrf.mxu0 }
0x3845   :  { %v6958_v42 = vadd.f32 %v15447_v13, %v15457_v1  ;;  %v6857_v0 = vadd.f32 %v6856_v31, %v15435_v27  ;;  %v15517_v61 = vpack.c.bf16 %v6865_v46, %v6862_v4 }
0x3846   :  { %v15449_v21 = vpop.f32.mrf.mxu1 }
0x3847   :  { %v15485_v8 = vpack.c.bf16 %v6958_v42, %v6957_v34  ;;  %v6956_v15 = vadd.f32 %v15457_v1, %v15449_v21  ;;  %v15509_v5 = vpack.c.bf16 %v6857_v0, %v6854_v7 }
0x3848   :  { %v15451_v55 = vpop.f32.mrf.mxu1 }
0x3849   :  { %v6961_v56 = vadd.f32 %v15451_v55, %v15457_v1  ;;  %v15495_v12 = vpack.c.bf16 %v6956_v15, %v6955_v57  ;;  %v7007_v10 = vsel %vm332_vm1, %v15485_v8, 0 }
0x384a   :  { %v15453_v47 = vpop.f32.mrf.mxu1 }
0x384b   :  { %v6959_v22 = vadd.f32 %v15457_v1, %v15453_v47  ;;  %v7004_v18 = vsel %vm332_vm1, %v15495_v12, 0 }
0x384c   :  { %v15459_v28 = vpop.f32.mrf.mxu1 }
0x384d   :  { %v6962_v60 = vadd.f32 %v15459_v28, %v15457_v1 }
0x384e   :  { %v15465_v3 = vpop.f32.mrf.mxu1 }
0x384f   :  { %v15469_v24 = vpack.c.bf16 %v6962_v60, %v6961_v56  ;;  %v6960_v51 = vadd.f32 %v15457_v1, %v15465_v3 }
0x3851   :  { %v15473_v14 = vpack.c.bf16 %v6960_v51, %v6959_v22  ;;  %11398 = vmatprep.subr.msk.bf16.mxu0 %vm332_vm1, %v15469_v24  ;;  %v7013_v63 = vsel %vm332_vm1, %v15469_v24, 0 }
0x3852   :  { %11059 = vmatpush3.bf16.xpose.msra.mxu0 %v7013_v63 }
0x3853   :  { %11399 = vmatprep.subr.msk.bf16.mxu0 %vm332_vm1, %v15473_v14  ;;  %v7010_v49 = vsel %vm332_vm1, %v15473_v14, 0 }
0x385a   :  { %11061 = vmatpush3.bf16.xpose.msra.mxu0 %v7010_v49 }
0x385b   :  { %11400 = vmatprep.subr.msk.bf16.mxu0 %vm332_vm1, %v15485_v8 }
0x3862   :  { %11063 = vmatpush3.bf16.xpose.msra.mxu0 %v7007_v10 }
0x3863   :  { %11401 = vmatprep.subr.msk.bf16.mxu0 %vm332_vm1, %v15495_v12 }
0x386a   :  { %11065 = vmatpush3.bf16.xpose.msra.mxu0 %v7004_v18 }
0x3871   :  { %11067 = vmatmul.mubr.msk.bf16.vlgmr.msra.gmra.mxu0 %vm332_vm1, %v15507_v37 }
0x3872   :  { %11070 = vmatprep.mubr.msk.bf16.mxu0 %vm332_vm1, %v15509_v5 }
0x3879   :  { %11071 = vmatmul.mubr.msk.bf16.gmra.mxu0 %vm332_vm1, %v15517_v61 }
0x3931   :  { %v11068_v44 = vpop.f32.mrf.mxu0 }
0x3932   :  { %v7086_v59 = vsel %vm422_vm2, %v11068_v44, -inf }
0x3933   :  { %7087 = vmax.xlane.f32.xlu1 %v7086_v59  ;;  %v7049_v17 = vpop.f32.mrf.mxu0 }
0x3934   :  { %v7080_v23 = vsel %vm422_vm2, %v7049_v17, -inf }
0x3935   :  { %v11069_v32 = vpop.f32.mrf.mxu0 }
0x3936   :  { %v7089_v40 = vsel %vm422_vm2, %v11069_v32, -inf }
0x3937   :  { %7081 = vmax.xlane.f32.xlu1 %v7080_v23  ;;  %v7052_v6 = vpop.f32.mrf.mxu0 }
0x3938   :  { %v7083_v33 = vsel %vm422_vm2, %v7052_v6, -inf }
0x3939   :  { %7084 = vmax.xlane.f32.xlu0 %v7083_v33  ;;  %v15524_v30 = vpop.f32.mrf.mxu0 }
0x393a   :  { %v7098_v56 = vsel %vm422_vm2, %v15524_v30, -inf }
0x393b   :  { %v15526_v43 = vpop.f32.mrf.mxu0 }
0x393c   :  { %v7092_v60 = vsel %vm422_vm2, %v15526_v43, -inf }
0x393d   :  { %7090 = vmax.xlane.f32.xlu0 %v7089_v40  ;;  %v15529_v48 = vpop.f32.mrf.mxu0 }
0x393e   :  { %v7101_v20 = vsel %vm422_vm2, %v15529_v48, -inf }
0x393f   :  { %v7068_v29 = vpop.f32.mrf.mxu0 }
0x3940   :  { %v7095_v58 = vsel %vm422_vm2, %v7068_v29, -inf }
0x3941   :  { %7102 = vmax.xlane.f32.xlu0 %v7101_v20 }
0x3945   :  { %7096 = vmax.xlane.f32.xlu0 %v7095_v58 }
0x3948   :  { %6968 = vrot.lane.b32.xlu1 %v6966_v52, %s12374_s11 }
0x396c   :  { %7099 = vmax.xlane.f32.xlu1 %v7098_v56 }
0x3970   :  { %7093 = vmax.xlane.f32.xlu1 %v7092_v60 }
0x39bc   :  { %v7088_v22 = vpop.xlane.xlu1 %7087 }
0x39c0   :  { %v7082_v51 = vpop.xlane.xlu1 %7081 }
0x39c1   :  { %v7104_v31 = vsub.f32 %v7049_v17, %v7082_v51 }
0x39c3   :  { %v7112_v53 = vmul.f32 1.442695, %v7104_v31 }
0x39c4   :  { %v6969_v63 = vpop.permute.xlu1 %6968 }
0x39c5   :  { %v6977_v42 = vadd.f32 %v15451_v55, %v6969_v63  ;;  %v6978_v34 = vadd.f32 %v15459_v28, %v6969_v63  ;;  %v6975_v50 = vadd.f32 %v6969_v63, %v15453_v47  ;;  %v6976_v49 = vadd.f32 %v6969_v63, %v15465_v3  ;;  %v7085_v55 = vpop.xlane.xlu0 %7084 }
0x39c6   :  { %v6973_v15 = vadd.f32 %v15441_v25, %v6969_v63  ;;  %v6974_v57 = vadd.f32 %v15447_v13, %v6969_v63  ;;  %v6971_v47 = vadd.f32 %v6969_v63, %v15445_v19  ;;  %v6972_v3 = vadd.f32 %v6969_v63, %v15449_v21 }
0x39c7   :  { %v15545_v16 = vpack.c.bf16 %v6978_v34, %v6977_v42  ;;  %v15549_v62 = vpack.c.bf16 %v6976_v49, %v6975_v50  ;;  %v7106_v13 = vsub.f32 %v11068_v44, %v7088_v22  ;;  %v7105_v19 = vsub.f32 %v7052_v6, %v7085_v55 }
0x39c8   :  { %v15555_v28 = vpack.c.bf16 %v6974_v57, %v6973_v15  ;;  %v15561_v25 = vpack.c.bf16 %v6972_v3, %v6971_v47 }
0x39c9   :  { %7182 = vrot.lane.b32.xlu1 %v15545_v16, %s12375_s12  ;;  %7180 = vrot.lane.b32.xlu0 %v15549_v62, %s12375_s12  ;;  %v7091_v10 = vpop.xlane.xlu0 %7090  ;;  %v7116_v9 = vmul.f32 1.442695, %v7106_v13  ;;  %v7114_v7 = vmul.f32 1.442695, %v7105_v19 }
0x39ca   :  { %v7107_v0 = vsub.f32 %v11069_v32, %v7091_v10 }
0x39cb   :  { %12051 = vpow2.f32 %v7116_v9 }
0x39cc   :  { %12053 = vpow2.f32 %v7112_v53  ;;  %v7118_v36 = vmul.f32 1.442695, %v7107_v0 }
0x39cd   :  { %7178 = vrot.lane.b32.xlu1 %v15555_v28, %s12375_s12  ;;  %v7103_v18 = vpop.xlane.xlu0 %7102 }
0x39ce   :  { %12055 = vpow2.f32 %v7118_v36  ;;  %v7111_v11 = vsub.f32 %v15529_v48, %v7103_v18 }
0x39cf   :  { %12057 = vpow2.f32 %v7114_v7 }
0x39d0   :  { %v7126_v51 = vmul.f32 1.442695, %v7111_v11 }
0x39d1   :  { %7176 = vrot.lane.b32.xlu1 %v15561_v25, %s12375_s12  ;;  %v7097_v21 = vpop.xlane.xlu0 %7096 }
0x39d2   :  { %v7109_v46 = vsub.f32 %v7068_v29, %v7097_v21 }
0x39d4   :  { %v7122_v4 = vmul.f32 1.442695, %v7109_v46 }
0x39d6   :  { %12059 = vpow2.f32 %v7122_v4 }
0x39d8   :  { %v15565_v44 = vpop.eup %12051 }
0x39d9   :  { %v7134_v59 = vsel %vm422_vm2, %v15565_v44, 0.0  ;;  %v15569_v17 = vpop.eup %12053 }
0x39da   :  { %v7128_v32 = vsel %vm422_vm2, %v15569_v17, 0.0 }
0x39db   :  { %v15573_v23 = vpop.eup %12055 }
0x39dc   :  { %v7137_v6 = vsel %vm422_vm2, %v15573_v23, 0.0  ;;  %v15577_v33 = vpop.eup %12057 }
0x39dd   :  { %v7131_v40 = vsel %vm422_vm2, %v15577_v33, 0.0 }
0x39e3   :  { %v15581_v20 = vpop.eup %12059 }
0x39e4   :  { %v7143_v56 = vsel %vm422_vm2, %v15581_v20, 0.0 }
0x39e8   :  { %7135 = vadd.xlane.f32.xlu0 %v7134_v59 }
0x39ec   :  { %7129 = vadd.xlane.f32.xlu0 %v7128_v32 }
0x39f0   :  { %7138 = vadd.xlane.f32.xlu0 %v7137_v6 }
0x39f4   :  { %7132 = vadd.xlane.f32.xlu0 %v7131_v40 }
0x39f5   :  { %v7100_v29 = vpop.xlane.xlu1 %7099 }
0x39f6   :  { %v7110_v58 = vsub.f32 %v15524_v30, %v7100_v29 }
0x39f8   :  { %v7124_v52 = vmul.f32 1.442695, %v7110_v58  ;;  %7144 = vadd.xlane.f32.xlu0 %v7143_v56 }
0x39f9   :  { %v7094_v60 = vpop.xlane.xlu1 %7093 }
0x39fa   :  { %12061 = vpow2.f32 %v7124_v52  ;;  %v7108_v22 = vsub.f32 %v15526_v43, %v7094_v60 }
0x39fc   :  { %v7120_v63 = vmul.f32 1.442695, %v7108_v22 }
0x39fe   :  { %12063 = vpow2.f32 %v7120_v63 }
0x39ff   :  { %12065 = vpow2.f32 %v7126_v51 }
0x3a07   :  { %v15588_v42 = vpop.eup %12061 }
0x3a08   :  { %v7146_v30 = vsel %vm422_vm2, %v15588_v42, 0.0 }
0x3a09   :  { %7147 = vadd.xlane.f32.xlu1 %v7146_v30 }
0x3a0b   :  { %v15592_v48 = vpop.eup %12063 }
0x3a0c   :  { %v7140_v34 = vsel %vm422_vm2, %v15592_v48, 0.0  ;;  %v15596_v50 = vpop.eup %12065 }
0x3a0d   :  { %7141 = vadd.xlane.f32.xlu1 %v7140_v34  ;;  %v7149_v43 = vsel %vm422_vm2, %v15596_v50, 0.0 }
0x3a0e   :  { %7291 = vrot.lane.b32.xlu0 %v15469_v24, %s12378_s15 }
0x3a11   :  { %7150 = vadd.xlane.f32.xlu1 %v7149_v43 }
0x3a12   :  { %7273 = vrot.lane.b32.xlu0 %v15439_v35, %s12378_s15 }
0x3a16   :  { %7277 = vrot.lane.b32.xlu0 %v15509_v5, %s12378_s15 }
0x3a22   :  { %7289 = vrot.lane.b32.xlu1 %v15473_v14, %s12378_s15 }
0x3a26   :  { %7287 = vrot.lane.b32.xlu1 %v15485_v8, %s12378_s15 }
0x3a2a   :  { %7285 = vrot.lane.b32.xlu1 %v15495_v12, %s12378_s15 }
0x3a2e   :  { %7275 = vrot.lane.b32.xlu1 %v15507_v37, %s12378_s15 }
0x3a32   :  { %7279 = vrot.lane.b32.xlu1 %v15517_v61, %s12378_s15 }
0x3a3b   :  { %v7183_v49 = vpop.permute.xlu1 %7182  ;;  %v7181_v15 = vpop.permute.xlu0 %7180 }
0x3a3c   :  { %11074 = vmatprep.subr.bf16.mxu1 %v7183_v49 }
0x3a3d   :  { %11075 = vmatpush3.bf16.msra.mxu1 %v7183_v49 }
0x3a3e   :  { %11076 = vmatprep.subr.bf16.mxu1 %v7181_v15 }
0x3a3f   :  { %v7179_v57 = vpop.permute.xlu1 %7178 }
0x3a41   :  { %11077 = vmatpush3.bf16.msra.mxu1 %v7181_v15 }
0x3a42   :  { %11078 = vmatprep.subr.bf16.mxu1 %v7179_v57 }
0x3a43   :  { %v7177_v55 = vpop.permute.xlu1 %7176 }
0x3a45   :  { %11079 = vmatpush3.bf16.msra.mxu1 %v7179_v57 }
0x3a46   :  { %11080 = vmatprep.subr.bf16.mxu1 %v7177_v55 }
0x3a49   :  { %11081 = vmatpush3.bf16.msra.mxu1 %v7177_v55 }
0x3a71   :  { %v7136_v47 = vpop.xlane.xlu0 %7135 }
0x3a75   :  { %v7130_v3 = vpop.xlane.xlu0 %7129 }
0x3a79   :  { %v7139_v13 = vpop.xlane.xlu0 %7138 }
0x3a7a   :  { %12067 = vrcp.f32 %v7139_v13 }
0x3a7b   :  { %12069 = vrcp.f32 %v7130_v3 }
0x3a7c   :  { %12071 = vrcp.f32 %v7136_v47 }
0x3a7d   :  { %v7133_v10 = vpop.xlane.xlu0 %7132 }
0x3a7e   :  { %12073 = vrcp.f32 %v7133_v10 }
0x3a81   :  { %v7145_v9 = vpop.xlane.xlu0 %7144 }
0x3a82   :  { %12075 = vrcp.f32 %v7145_v9 }
0x3a85   :  { %v7292_v31 = vpop.permute.xlu0 %7291 }
0x3a86   :  { %11402 = vmatprep.subr.msk.bf16.mxu1 %vm332_vm1, %v7292_v31  ;;  %v7315_v32 = vsel %vm332_vm1, %v7292_v31, 0 }
0x3a87   :  { %v12068_v18 = vpop.eup %12067 }
0x3a88   :  { %v12070_v53 = vpop.eup %12069  ;;  %v7163_v36 = vmul.f32 %v12068_v18, %v15573_v23 }
0x3a89   :  { %v12072_v0 = vpop.eup %12071  ;;  %v7160_v21 = vmul.f32 %v12070_v53, %v15569_v17  ;;  %v7274_v49 = vpop.permute.xlu0 %7273 }
0x3a8a   :  { %v7162_v46 = vmul.f32 %v12072_v0, %v15565_v44 }
0x3a8b   :  { %v12074_v19 = vpop.eup %12073 }
0x3a8c   :  { %v7161_v7 = vmul.f32 %v12074_v19, %v15577_v33  ;;  %v7169_v59 = vpack.c.bf16 %v7163_v36, %v7162_v46 }
0x3a8d   :  { %v7278_v15 = vpop.permute.xlu0 %7277 }
0x3a8e   :  { %v7168_v4 = vpack.c.bf16 %v7161_v7, %v7160_v21 }
0x3a8f   :  { %v12076_v33 = vpop.eup %12075 }
0x3a90   :  { %11082 = vmatprep.mubr.msk.bf16.mxu1 %vm422_vm2, %v7168_v4  ;;  %v7165_v52 = vmul.f32 %v12076_v33, %v15581_v20 }
0x3a91   :  { %11083 = vmatmul.mubr.msk.bf16.vlgmr.msra.gmra.mxu1 %vm422_vm2, %v7169_v59 }
0x3a92   :  { %v7148_v6 = vpop.xlane.xlu1 %7147  ;;  %11091 = vmatpush3.bf16.xpose.msra.mxu1 %v7315_v32 }
0x3a96   :  { %v7142_v40 = vpop.xlane.xlu1 %7141 }
0x3a97   :  { %12077 = vrcp.f32 %v7142_v40 }
0x3a98   :  { %12079 = vrcp.f32 %v7148_v6 }
0x3a9a   :  { %v7151_v23 = vpop.xlane.xlu1 %7150 }
0x3a9b   :  { %12081 = vrcp.f32 %v7151_v23 }
0x3a9e   :  { %v7290_v17 = vpop.permute.xlu1 %7289 }
0x3a9f   :  { %11403 = vmatprep.subr.msk.bf16.mxu1 %vm332_vm1, %v7290_v17  ;;  %v7312_v44 = vsel %vm332_vm1, %v7290_v17, 0 }
0x3aa0   :  { %11093 = vmatpush3.bf16.xpose.msra.mxu1 %v7312_v44 }
0x3aa2   :  { %v7288_v29 = vpop.permute.xlu1 %7287 }
0x3aa3   :  { %11404 = vmatprep.subr.msk.bf16.mxu1 %vm332_vm1, %v7288_v29  ;;  %v7309_v60 = vsel %vm332_vm1, %v7288_v29, 0 }
0x3aa4   :  { %v12078_v58 = vpop.eup %12077 }
0x3aa5   :  { %v7164_v11 = vmul.f32 %v12078_v58, %v15592_v48  ;;  %v12080_v56 = vpop.eup %12079 }
0x3aa6   :  { %v7286_v63 = vpop.permute.xlu1 %7285  ;;  %v7166_v30 = vmul.f32 %v12080_v56, %v15588_v42 }
0x3aa7   :  { %v7170_v22 = vpack.c.bf16 %v7165_v52, %v7164_v11  ;;  %v7306_v20 = vsel %vm332_vm1, %v7286_v63, 0 }
0x3aa8   :  { %v12082_v51 = vpop.eup %12081  ;;  %11095 = vmatpush3.bf16.xpose.msra.mxu1 %v7309_v60 }
0x3aa9   :  { %11086 = vmatprep.mubr.msk.bf16.mxu1 %vm422_vm2, %v7170_v22  ;;  %11405 = vmatprep.subr.msk.bf16.mxu1 %vm332_vm1, %v7286_v63  ;;  %v7167_v34 = vmul.f32 %v12082_v51, %v15596_v50 }
0x3aaa   :  { %v7276_v48 = vpop.permute.xlu1 %7275 }
0x3aab   :  { %v7171_v43 = vpack.c.bf16 %v7167_v34, %v7166_v30 }
0x3aad   :  { %11087 = vmatmul.mubr.msk.bf16.gmra.mxu1 %vm422_vm2, %v7171_v43 }
0x3aae   :  { %11098 = vmatprep.mubr.msk.bf16.mxu1 %vm332_vm1, %v7274_v49  ;;  %v7280_v57 = vpop.permute.xlu1 %7279 }
0x3ab0   :  { %11097 = vmatpush3.bf16.xpose.msra.mxu1 %v7306_v20 }
0x3ab7   :  { %11099 = vmatmul.mubr.msk.bf16.vlgmr.msra.gmra.mxu1 %vm332_vm1, %v7276_v48 }
0x3ab8   :  { %11102 = vmatprep.mubr.msk.bf16.mxu1 %vm332_vm1, %v7278_v15 }
0x3abf   :  { %11103 = vmatmul.mubr.msk.bf16.gmra.mxu1 %vm332_vm1, %v7280_v57 }
0x3b51   :  { %v15640_v42 = vpop.f32.mrf.mxu1 }
0x3b53   :  { %v15642_v50 = vpop.f32.mrf.mxu1 }
0x3b55   :  { %v15644_v55 = vpop.f32.mrf.mxu1 }
0x3b57   :  { %v15648_v3 = vpop.f32.mrf.mxu1 }
0x3b6d   :  { %v15652_v10 = vpop.f32.mrf.mxu1 }
0x3b6f   :  { %v15654_v9 = vpop.f32.mrf.mxu1 }
0x3b71   :  { %v15656_v31 = vpop.f32.mrf.mxu1 }
0x3b73   :  { %v15660_v53 = vpop.f32.mrf.mxu1 }
0x3b77   :  { %v11100_v19 = vpop.f32.mrf.mxu1 }
0x3b78   :  { %v7388_v4 = vsel %vm422_vm2, %v11100_v19, -inf }
0x3b79   :  { %v7351_v36 = vpop.f32.mrf.mxu1 }
0x3b7a   :  { %v7382_v21 = vsel %vm422_vm2, %v7351_v36, -inf }
0x3b7b   :  { %7383 = vmax.xlane.f32.xlu0 %v7382_v21  ;;  %v11101_v7 = vpop.f32.mrf.mxu1 }
0x3b7c   :  { %v7391_v40 = vsel %vm422_vm2, %v11101_v7, -inf }
0x3b7d   :  { %v7354_v46 = vpop.f32.mrf.mxu1 }
0x3b7e   :  { %v7385_v59 = vsel %vm422_vm2, %v7354_v46, -inf }
0x3b7f   :  { %7389 = vmax.xlane.f32.xlu0 %v7388_v4  ;;  %7386 = vmax.xlane.f32.xlu1 %v7385_v59  ;;  %v11104_v32 = vpop.f32.mrf.mxu1 }
0x3b80   :  { %v7400_v33 = vsel %vm422_vm2, %v11104_v32, -inf }
0x3b81   :  { %v7367_v6 = vpop.f32.mrf.mxu1 }
0x3b82   :  { %v7394_v58 = vsel %vm422_vm2, %v7367_v6, -inf }
0x3b83   :  { %7392 = vmax.xlane.f32.xlu0 %v7391_v40  ;;  %v11105_v23 = vpop.f32.mrf.mxu1 }
0x3b84   :  { %v7403_v17 = vsel %vm422_vm2, %v11105_v23, -inf }
0x3b85   :  { %7404 = vmax.xlane.f32.xlu1 %v7403_v17  ;;  %v7370_v44 = vpop.f32.mrf.mxu1 }
0x3b86   :  { %v7397_v29 = vsel %vm422_vm2, %v7370_v44, -inf }
0x3b87   :  { %7401 = vmax.xlane.f32.xlu0 %v7400_v33 }
0x3b89   :  { %7398 = vmax.xlane.f32.xlu1 %v7397_v29 }
0x3b8b   :  { %7395 = vmax.xlane.f32.xlu0 %v7394_v58 }
0x3b9a   :  { %7478 = vrot.lane.b32.xlu1 %v15549_v62, %s12377_s14 }
0x3b9e   :  { %7476 = vrot.lane.b32.xlu1 %v15555_v28, %s12377_s14 }
0x3ba1   :  { %7480 = vrot.lane.b32.xlu0 %v15545_v16, %s12377_s14 }
0x3ba2   :  { %7474 = vrot.lane.b32.xlu1 %v15561_v25, %s12377_s14 }
0x3c04   :  { %v7384_v11 = vpop.xlane.xlu0 %7383 }
0x3c05   :  { %v7406_v52 = vsub.f32 %v7351_v36, %v7384_v11 }
0x3c07   :  { %v7414_v30 = vmul.f32 1.442695, %v7406_v52 }
0x3c08   :  { %v7387_v56 = vpop.xlane.xlu1 %7386  ;;  %v7390_v60 = vpop.xlane.xlu0 %7389 }
0x3c09   :  { %v7408_v22 = vsub.f32 %v11100_v19, %v7390_v60  ;;  %v7407_v51 = vsub.f32 %v7354_v46, %v7387_v56 }
0x3c0b   :  { %v7418_v63 = vmul.f32 1.442695, %v7408_v22  ;;  %v7416_v20 = vmul.f32 1.442695, %v7407_v51 }
0x3c0c   :  { %v7393_v34 = vpop.xlane.xlu0 %7392 }
0x3c0d   :  { %v7409_v43 = vsub.f32 %v11101_v7, %v7393_v34  ;;  %12083 = vpow2.f32 %v7418_v63 }
0x3c0e   :  { %v7405_v49 = vpop.xlane.xlu1 %7404  ;;  %12085 = vpow2.f32 %v7414_v30 }
0x3c0f   :  { %v7420_v48 = vmul.f32 1.442695, %v7409_v43  ;;  %v7413_v15 = vsub.f32 %v11105_v23, %v7405_v49 }
0x3c10   :  { %v7402_v57 = vpop.xlane.xlu0 %7401 }
0x3c11   :  { %12087 = vpow2.f32 %v7420_v48  ;;  %v7412_v21 = vsub.f32 %v11104_v32, %v7402_v57  ;;  %v7428_v59 = vmul.f32 1.442695, %v7413_v15 }
0x3c12   :  { %v7399_v4 = vpop.xlane.xlu1 %7398  ;;  %12089 = vpow2.f32 %v7416_v20 }
0x3c13   :  { %v7426_v36 = vmul.f32 1.442695, %v7412_v21  ;;  %v7411_v40 = vsub.f32 %v7370_v44, %v7399_v4 }
0x3c14   :  { %v7396_v19 = vpop.xlane.xlu0 %7395 }
0x3c15   :  { %12091 = vpow2.f32 %v7426_v36  ;;  %v7410_v46 = vsub.f32 %v7367_v6, %v7396_v19  ;;  %v7424_v7 = vmul.f32 1.442695, %v7411_v40 }
0x3c16   :  { %v7479_v17 = vpop.permute.xlu1 %7478  ;;  %12093 = vpow2.f32 %v7428_v59 }
0x3c17   :  { %v7422_v33 = vmul.f32 1.442695, %v7410_v46 }
0x3c18   :  { %v7481_v29 = vpop.permute.xlu0 %7480 }
0x3c19   :  { %12095 = vpow2.f32 %v7422_v33  ;;  %11106 = vmatprep.subr.bf16.mxu0 %v7481_v29 }
0x3c1a   :  { %11107 = vmatpush3.bf16.msra.mxu0 %v7481_v29  ;;  %v15680_v23 = vpop.eup %12083  ;;  %12097 = vpow2.f32 %v7424_v7  ;;  %v7477_v32 = vpop.permute.xlu1 %7476 }
0x3c1b   :  { %11108 = vmatprep.subr.bf16.mxu0 %v7479_v17  ;;  %v7436_v58 = vsel %vm422_vm2, %v15680_v23, 0.0  ;;  %v12086_v44 = vpop.eup %12085 }
0x3c1c   :  { %7437 = vadd.xlane.f32.xlu0 %v7436_v58  ;;  %v7430_v56 = vsel %vm422_vm2, %v12086_v44, 0.0 }
0x3c1e   :  { %v12088_v11 = vpop.eup %12087  ;;  %11109 = vmatpush3.bf16.msra.mxu0 %v7479_v17  ;;  %v7475_v22 = vpop.permute.xlu1 %7474 }
0x3c1f   :  { %11110 = vmatprep.subr.bf16.mxu0 %v7477_v32  ;;  %v7439_v6 = vsel %vm422_vm2, %v12088_v11, 0.0  ;;  %v12090_v52 = vpop.eup %12089 }
0x3c20   :  { %7440 = vadd.xlane.f32.xlu1 %v7439_v6  ;;  %7431 = vadd.xlane.f32.xlu0 %v7430_v56  ;;  %v7433_v51 = vsel %vm422_vm2, %v12090_v52, 0.0 }
0x3c22   :  { %v15686_v60 = vpop.eup %12091  ;;  %11111 = vmatpush3.bf16.msra.mxu0 %v7477_v32 }
0x3c23   :  { %11112 = vmatprep.subr.bf16.mxu0 %v7475_v22  ;;  %v7448_v63 = vsel %vm422_vm2, %v15686_v60, 0.0  ;;  %v12094_v30 = vpop.eup %12093 }
0x3c24   :  { %7434 = vadd.xlane.f32.xlu1 %v7433_v51  ;;  %7449 = vadd.xlane.f32.xlu0 %v7448_v63  ;;  %v7451_v49 = vsel %vm422_vm2, %v12094_v30, 0.0 }
0x3c26   :  { %v12096_v34 = vpop.eup %12095  ;;  %11113 = vmatpush3.bf16.msra.mxu0 %v7475_v22 }
0x3c27   :  { %v7442_v43 = vsel %vm422_vm2, %v12096_v34, 0.0  ;;  %v12098_v20 = vpop.eup %12097 }
0x3c28   :  { %7443 = vadd.xlane.f32.xlu1 %v7442_v43  ;;  %7452 = vadd.xlane.f32.xlu0 %v7451_v49  ;;  %v7445_v48 = vsel %vm422_vm2, %v12098_v20, 0.0 }
0x3c2c   :  { %7446 = vadd.xlane.f32.xlu0 %v7445_v48 }
0x3c39   :  { %7579 = vrot.lane.b32.xlu1 %v15473_v14, %s12381_s18 }
0x3c3d   :  { %7577 = vrot.lane.b32.xlu1 %v15485_v8, %s12381_s18 }
0x3c41   :  { %7575 = vrot.lane.b32.xlu1 %v15495_v12, %s12381_s18 }
0x3c42   :  { %7581 = vrot.lane.b32.xlu0 %v15469_v24, %s12381_s18 }
0x3c45   :  { %7569 = vrot.lane.b32.xlu1 %v15507_v37, %s12381_s18 }
0x3c46   :  { %7567 = vrot.lane.b32.xlu0 %v15439_v35, %s12381_s18 }
0x3c49   :  { %7573 = vrot.lane.b32.xlu1 %v15517_v61, %s12381_s18 }
0x3c4a   :  { %7571 = vrot.lane.b32.xlu0 %v15509_v5, %s12381_s18 }
0x3ca5   :  { %v7438_v15 = vpop.xlane.xlu0 %7437 }
0x3ca9   :  { %v7441_v57 = vpop.xlane.xlu1 %7440  ;;  %v7432_v21 = vpop.xlane.xlu0 %7431 }
0x3caa   :  { %12099 = vrcp.f32 %v7441_v57 }
0x3cab   :  { %12101 = vrcp.f32 %v7432_v21 }
0x3cac   :  { %12103 = vrcp.f32 %v7438_v15 }
0x3cad   :  { %v7435_v4 = vpop.xlane.xlu1 %7434  ;;  %v7450_v36 = vpop.xlane.xlu0 %7449 }
0x3cae   :  { %12105 = vrcp.f32 %v7435_v4 }
0x3cb1   :  { %v7444_v59 = vpop.xlane.xlu1 %7443  ;;  %v7453_v40 = vpop.xlane.xlu0 %7452 }
0x3cb2   :  { %12107 = vrcp.f32 %v7453_v40 }
0x3cb3   :  { %12109 = vrcp.f32 %v7444_v59 }
0x3cb4   :  { %12111 = vrcp.f32 %v7450_v36 }
0x3cb5   :  { %v7447_v19 = vpop.xlane.xlu0 %7446  ;;  %v7580_v48 = vpop.permute.xlu1 %7579 }
0x3cb6   :  { %12113 = vrcp.f32 %v7447_v19  ;;  %v7602_v59 = vsel %vm332_vm1, %v7580_v48, 0 }
0x3cb7   :  { %v12100_v46 = vpop.eup %12099 }
0x3cb8   :  { %v12102_v17 = vpop.eup %12101  ;;  %v7465_v32 = vmul.f32 %v12100_v46, %v12088_v11 }
0x3cb9   :  { %v12104_v33 = vpop.eup %12103  ;;  %v7582_v7 = vpop.permute.xlu0 %7581  ;;  %v7462_v58 = vmul.f32 %v12102_v17, %v12086_v44 }
0x3cba   :  { %11406 = vmatprep.subr.msk.bf16.mxu0 %vm332_vm1, %v7582_v7  ;;  %v7464_v56 = vmul.f32 %v12104_v33, %v15680_v23  ;;  %v7605_v43 = vsel %vm332_vm1, %v7582_v7, 0  ;;  %v7578_v40 = vpop.permute.xlu1 %7577 }
0x3cbb   :  { %v12106_v29 = vpop.eup %12105 }
0x3cbc   :  { %v7463_v6 = vmul.f32 %v12106_v29, %v12090_v52  ;;  %v7471_v51 = vpack.c.bf16 %v7465_v32, %v7464_v56 }
0x3cbd   :  { %v7568_v36 = vpop.permute.xlu0 %7567 }
0x3cbe   :  { %v7470_v22 = vpack.c.bf16 %v7463_v6, %v7462_v58 }
0x3cbf   :  { %v12108_v63 = vpop.eup %12107 }
0x3cc0   :  { %11114 = vmatprep.mubr.msk.bf16.mxu0 %vm422_vm2, %v7470_v22  ;;  %v12110_v49 = vpop.eup %12109  ;;  %v7469_v44 = vmul.f32 %v12108_v63, %v12094_v30  ;;  %v7599_v30 = vsel %vm332_vm1, %v7578_v40, 0 }
0x3cc1   :  { %11115 = vmatmul.mubr.msk.bf16.vlgmr.msra.gmra.mxu0 %vm422_vm2, %v7471_v51  ;;  %v12112_v15 = vpop.eup %12111  ;;  %v7466_v52 = vmul.f32 %v12110_v49, %v12096_v34  ;;  %v7576_v34 = vpop.permute.xlu1 %7575 }
0x3cc2   :  { %11123 = vmatpush3.bf16.xpose.msra.mxu0 %v7605_v43  ;;  %v7468_v23 = vmul.f32 %v12112_v15, %v15686_v60  ;;  %v7596_v60 = vsel %vm332_vm1, %v7576_v34, 0  ;;  %v7572_v19 = vpop.permute.xlu0 %7571 }
0x3cc3   :  { %11407 = vmatprep.subr.msk.bf16.mxu0 %vm332_vm1, %v7580_v48  ;;  %v12114_v11 = vpop.eup %12113 }
0x3cc4   :  { %v7467_v57 = vmul.f32 %v12114_v11, %v12098_v20  ;;  %v7473_v4 = vpack.c.bf16 %v7469_v44, %v7468_v23 }
0x3cc5   :  { %v7570_v20 = vpop.permute.xlu1 %7569 }
0x3cc6   :  { %v7472_v21 = vpack.c.bf16 %v7467_v57, %v7466_v52 }
0x3cc8   :  { %11118 = vmatprep.mubr.msk.bf16.mxu0 %vm422_vm2, %v7472_v21 }
0x3cc9   :  { %11119 = vmatmul.mubr.msk.bf16.gmra.mxu0 %vm422_vm2, %v7473_v4  ;;  %v7574_v46 = vpop.permute.xlu1 %7573 }
0x3cca   :  { %11125 = vmatpush3.bf16.xpose.msra.mxu0 %v7602_v59  ;;  %11130 = vmatprep.mubr.msk.bf16.mxu0 %vm332_vm1, %v7568_v36 }
0x3ccb   :  { %11408 = vmatprep.subr.msk.bf16.mxu0 %vm332_vm1, %v7578_v40 }
0x3cd2   :  { %11127 = vmatpush3.bf16.xpose.msra.mxu0 %v7599_v30 }
0x3cd3   :  { %11409 = vmatprep.subr.msk.bf16.mxu0 %vm332_vm1, %v7576_v34 }
0x3cda   :  { %11129 = vmatpush3.bf16.xpose.msra.mxu0 %v7596_v60 }
0x3ce1   :  { %11131 = vmatmul.mubr.msk.bf16.vlgmr.msra.gmra.mxu0 %vm332_vm1, %v7570_v20 }
0x3ce2   :  { %11134 = vmatprep.mubr.msk.bf16.mxu0 %vm332_vm1, %v7572_v19 }
0x3ce9   :  { %11135 = vmatmul.mubr.msk.bf16.gmra.mxu0 %vm332_vm1, %v7574_v46 }
0x3d81   :  { %v15728_v17 = vpop.f32.mrf.mxu0 }
0x3d83   :  { %v15730_v33 = vpop.f32.mrf.mxu0 }
0x3d85   :  { %v15732_v7 = vpop.f32.mrf.mxu0 }
0x3d87   :  { %v15736_v32 = vpop.f32.mrf.mxu0 }
0x3d89   :  { %v15740_v6 = vpop.f32.mrf.mxu0 }
0x3d8b   :  { %v15742_v56 = vpop.f32.mrf.mxu0 }
0x3d8d   :  { %v15744_v22 = vpop.f32.mrf.mxu0 }
0x3d8f   :  { %v15748_v63 = vpop.f32.mrf.mxu0 }
0x3d90   :  { %v7565_v43 = vpack.c.bf16 %v15748_v63, %v15742_v56  ;;  %v16732_v56 = vpack.c.bf16 %v15732_v7, %v15728_v17  ;;  %v16733_v63 = vpack.c.bf16 %v15744_v22, %v15740_v6 }
0x3da1   :  { %v11132_v49 = vpop.f32.mrf.mxu0 }
0x3da2   :  { %v7678_v52 = vsel %vm422_vm2, %v11132_v49, -inf }
0x3da3   :  { %v7641_v48 = vpop.f32.mrf.mxu0 }
0x3da4   :  { %v7672_v15 = vsel %vm422_vm2, %v7641_v48, -inf }
0x3da5   :  { %7673 = vmax.xlane.f32.xlu0 %v7672_v15  ;;  %v11133_v11 = vpop.f32.mrf.mxu0 }
0x3da6   :  { %v7681_v4 = vsel %vm422_vm2, %v11133_v11, -inf }
0x3da7   :  { %v7644_v44 = vpop.f32.mrf.mxu0 }
0x3da8   :  { %v7675_v57 = vsel %vm422_vm2, %v7644_v44, -inf }
0x3da9   :  { %7679 = vmax.xlane.f32.xlu0 %v7678_v52  ;;  %7676 = vmax.xlane.f32.xlu1 %v7675_v57  ;;  %v11136_v23 = vpop.f32.mrf.mxu0 }
0x3daa   :  { %v7690_v30 = vsel %vm422_vm2, %v11136_v23, -inf }
0x3dab   :  { %v7657_v21 = vpop.f32.mrf.mxu0 }
0x3dac   :  { %v7684_v60 = vsel %vm422_vm2, %v7657_v21, -inf }
0x3dad   :  { %7682 = vmax.xlane.f32.xlu0 %v7681_v4  ;;  %v11137_v36 = vpop.f32.mrf.mxu0 }
0x3dae   :  { %v7693_v59 = vsel %vm422_vm2, %v11137_v36, -inf }
0x3daf   :  { %7694 = vmax.xlane.f32.xlu1 %v7693_v59  ;;  %v7660_v40 = vpop.f32.mrf.mxu0 }
0x3db0   :  { %v7687_v34 = vsel %vm422_vm2, %v7660_v40, -inf }
0x3db1   :  { %7691 = vmax.xlane.f32.xlu0 %v7690_v30 }
0x3db3   :  { %7688 = vmax.xlane.f32.xlu1 %v7687_v34 }
0x3db5   :  { %7685 = vmax.xlane.f32.xlu0 %v7684_v60 }
0x3dc4   :  { %7768 = vrot.lane.b32.xlu1 %v15549_v62, %s12380_s17 }
0x3dc8   :  { %7766 = vrot.lane.b32.xlu1 %v15555_v28, %s12380_s17 }
0x3dcb   :  { %7770 = vrot.lane.b32.xlu0 %v15545_v16, %s12380_s17 }
0x3dcc   :  { %7764 = vrot.lane.b32.xlu1 %v15561_v25, %s12380_s17 }
0x3e2e   :  { %v7674_v20 = vpop.xlane.xlu0 %7673 }
0x3e2f   :  { %v7696_v19 = vsub.f32 %v7641_v48, %v7674_v20 }
0x3e31   :  { %v7704_v59 = vmul.f32 1.442695, %v7696_v19 }
0x3e32   :  { %v7677_v46 = vpop.xlane.xlu1 %7676  ;;  %v7680_v15 = vpop.xlane.xlu0 %7679 }
0x3e33   :  { %v7698_v52 = vsub.f32 %v11132_v49, %v7680_v15  ;;  %v7697_v57 = vsub.f32 %v7644_v44, %v7677_v46 }
0x3e35   :  { %v7708_v4 = vmul.f32 1.442695, %v7698_v52  ;;  %v7706_v18 = vmul.f32 1.442695, %v7697_v57 }
0x3e36   :  { %v7683_v30 = vpop.xlane.xlu0 %7682 }
0x3e37   :  { %v7699_v34 = vsub.f32 %v11133_v11, %v7683_v30  ;;  %12115 = vpow2.f32 %v7708_v4 }
0x3e38   :  { %v7695_v60 = vpop.xlane.xlu1 %7694  ;;  %12117 = vpow2.f32 %v7704_v59 }
0x3e39   :  { %v7710_v0 = vmul.f32 1.442695, %v7699_v34  ;;  %v7703_v47 = vsub.f32 %v11137_v36, %v7695_v60 }
0x3e3a   :  { %v7692_v13 = vpop.xlane.xlu0 %7691 }
0x3e3b   :  { %12119 = vpow2.f32 %v7710_v0  ;;  %v7702_v51 = vsub.f32 %v11136_v23, %v7692_v13  ;;  %v7718_v20 = vmul.f32 1.442695, %v7703_v47 }
0x3e3c   :  { %v7689_v29 = vpop.xlane.xlu1 %7688  ;;  %12121 = vpow2.f32 %v7706_v18 }
0x3e3d   :  { %v7716_v48 = vmul.f32 1.442695, %v7702_v51  ;;  %v7701_v58 = vsub.f32 %v7660_v40, %v7689_v29 }
0x3e3e   :  { %v7686_v49 = vpop.xlane.xlu0 %7685 }
0x3e3f   :  { %12123 = vpow2.f32 %v7716_v48  ;;  %v7700_v44 = vsub.f32 %v7657_v21, %v7686_v49  ;;  %v7714_v11 = vmul.f32 1.442695, %v7701_v58 }
0x3e40   :  { %v7769_v19 = vpop.permute.xlu1 %7768  ;;  %12125 = vpow2.f32 %v7718_v20 }
0x3e41   :  { %v7712_v46 = vmul.f32 1.442695, %v7700_v44 }
0x3e42   :  { %v7771_v15 = vpop.permute.xlu0 %7770 }
0x3e43   :  { %12127 = vpow2.f32 %v7712_v46  ;;  %11138 = vmatprep.subr.bf16.mxu1 %v7771_v15 }
0x3e44   :  { %11139 = vmatpush3.bf16.msra.mxu1 %v7771_v15  ;;  %v15768_v36 = vpop.eup %12115  ;;  %12129 = vpow2.f32 %v7714_v11  ;;  %v7767_v13 = vpop.permute.xlu1 %7766 }
0x3e45   :  { %11140 = vmatprep.subr.bf16.mxu1 %v7769_v19  ;;  %v7726_v47 = vsel %vm422_vm2, %v15768_v36, 0.0  ;;  %v12118_v18 = vpop.eup %12117 }
0x3e46   :  { %7727 = vadd.xlane.f32.xlu0 %v7726_v47  ;;  %v7720_v51 = vsel %vm422_vm2, %v12118_v18, 0.0 }
0x3e48   :  { %v12120_v0 = vpop.eup %12119  ;;  %11141 = vmatpush3.bf16.msra.mxu1 %v7769_v19  ;;  %v7765_v21 = vpop.permute.xlu1 %7764 }
0x3e49   :  { %11142 = vmatprep.subr.bf16.mxu1 %v7767_v13  ;;  %v7729_v29 = vsel %vm422_vm2, %v12120_v0, 0.0  ;;  %v12122_v58 = vpop.eup %12121 }
0x3e4a   :  { %7730 = vadd.xlane.f32.xlu1 %v7729_v29  ;;  %7721 = vadd.xlane.f32.xlu0 %v7720_v51  ;;  %v7723_v40 = vsel %vm422_vm2, %v12122_v58, 0.0 }
0x3e4c   :  { %v15774_v23 = vpop.eup %12123  ;;  %11143 = vmatpush3.bf16.msra.mxu1 %v7767_v13 }
0x3e4d   :  { %11144 = vmatprep.subr.bf16.mxu1 %v7765_v21  ;;  %v7738_v52 = vsel %vm422_vm2, %v15774_v23, 0.0  ;;  %v12126_v57 = vpop.eup %12125 }
0x3e4e   :  { %7724 = vadd.xlane.f32.xlu1 %v7723_v40  ;;  %7739 = vadd.xlane.f32.xlu0 %v7738_v52  ;;  %v7741_v30 = vsel %vm422_vm2, %v12126_v57, 0.0 }
0x3e50   :  { %v12128_v4 = vpop.eup %12127  ;;  %11145 = vmatpush3.bf16.msra.mxu1 %v7765_v21 }
0x3e51   :  { %v7732_v59 = vsel %vm422_vm2, %v12128_v4, 0.0  ;;  %v12130_v34 = vpop.eup %12129 }
0x3e52   :  { %7733 = vadd.xlane.f32.xlu1 %v7732_v59  ;;  %7742 = vadd.xlane.f32.xlu0 %v7741_v30  ;;  %v7735_v60 = vsel %vm422_vm2, %v12130_v34, 0.0 }
0x3e56   :  { %7736 = vadd.xlane.f32.xlu0 %v7735_v60 }
0x3e63   :  { %7869 = vrot.lane.b32.xlu1 %v15473_v14, %s12384_s21 }
0x3e67   :  { %7867 = vrot.lane.b32.xlu1 %v15485_v8, %s12384_s21 }
0x3e6b   :  { %7865 = vrot.lane.b32.xlu1 %v15495_v12, %s12384_s21 }
0x3e6c   :  { %7871 = vrot.lane.b32.xlu0 %v15469_v24, %s12384_s21 }
0x3e6f   :  { %7859 = vrot.lane.b32.xlu1 %v15507_v37, %s12384_s21 }
0x3e70   :  { %7857 = vrot.lane.b32.xlu0 %v15439_v35, %s12384_s21 }
0x3e73   :  { %7863 = vrot.lane.b32.xlu1 %v15517_v61, %s12384_s21 }
0x3e74   :  { %7861 = vrot.lane.b32.xlu0 %v15509_v5, %s12384_s21 }
0x3ecf   :  { %v7728_v14 = vpop.xlane.xlu0 %7727 }
0x3ed3   :  { %v7731_v8 = vpop.xlane.xlu1 %7730  ;;  %v7722_v48 = vpop.xlane.xlu0 %7721 }
0x3ed4   :  { %12131 = vrcp.f32 %v7731_v8 }
0x3ed5   :  { %12133 = vrcp.f32 %v7722_v48 }
0x3ed6   :  { %12135 = vrcp.f32 %v7728_v14 }
0x3ed7   :  { %v7725_v12 = vpop.xlane.xlu1 %7724  ;;  %v7740_v24 = vpop.xlane.xlu0 %7739 }
0x3ed8   :  { %12137 = vrcp.f32 %v7725_v12 }
0x3edb   :  { %v7734_v20 = vpop.xlane.xlu1 %7733  ;;  %v7743_v37 = vpop.xlane.xlu0 %7742 }
0x3edc   :  { %12139 = vrcp.f32 %v7743_v37 }
0x3edd   :  { %12141 = vrcp.f32 %v7734_v20 }
0x3ede   :  { %12143 = vrcp.f32 %v7740_v24 }
0x3edf   :  { %v7737_v35 = vpop.xlane.xlu0 %7736  ;;  %v7870_v52 = vpop.permute.xlu1 %7869 }
0x3ee0   :  { %12145 = vrcp.f32 %v7737_v35  ;;  %v7892_v48 = vsel %vm332_vm1, %v7870_v52, 0 }
0x3ee1   :  { %v12132_v61 = vpop.eup %12131 }
0x3ee2   :  { %v12134_v49 = vpop.eup %12133  ;;  %v7755_v46 = vmul.f32 %v12132_v61, %v12120_v0 }
0x3ee3   :  { %v12136_v44 = vpop.eup %12135  ;;  %v7872_v5 = vpop.permute.xlu0 %7871  ;;  %v7752_v11 = vmul.f32 %v12134_v49, %v12118_v18 }
0x3ee4   :  { %11410 = vmatprep.subr.msk.bf16.mxu1 %vm332_vm1, %v7872_v5  ;;  %v7754_v13 = vmul.f32 %v12136_v44, %v15768_v36  ;;  %v7895_v21 = vsel %vm332_vm1, %v7872_v5, 0  ;;  %v7868_v12 = vpop.permute.xlu1 %7867 }
0x3ee5   :  { %v12138_v19 = vpop.eup %12137 }
0x3ee6   :  { %v7753_v15 = vmul.f32 %v12138_v19, %v12122_v58  ;;  %v7761_v29 = vpack.c.bf16 %v7755_v46, %v7754_v13 }
0x3ee7   :  { %v7858_v8 = vpop.permute.xlu0 %7857 }
0x3ee8   :  { %v7760_v47 = vpack.c.bf16 %v7753_v15, %v7752_v11 }
0x3ee9   :  { %v12140_v51 = vpop.eup %12139 }
0x3eea   :  { %11146 = vmatprep.mubr.msk.bf16.mxu1 %vm422_vm2, %v7760_v47  ;;  %v12142_v40 = vpop.eup %12141  ;;  %v7759_v18 = vmul.f32 %v12140_v51, %v12126_v57  ;;  %v7889_v57 = vsel %vm332_vm1, %v7868_v12, 0 }
0x3eeb   :  { %11147 = vmatmul.mubr.msk.bf16.vlgmr.msra.gmra.mxu1 %vm422_vm2, %v7761_v29  ;;  %v12144_v59 = vpop.eup %12143  ;;  %v7756_v58 = vmul.f32 %v12142_v40, %v12128_v4  ;;  %v7866_v4 = vpop.permute.xlu1 %7865 }
0x3eec   :  { %11155 = vmatpush3.bf16.xpose.msra.mxu1 %v7895_v21  ;;  %v7758_v36 = vmul.f32 %v12144_v59, %v15774_v23  ;;  %v7886_v23 = vsel %vm332_vm1, %v7866_v4, 0  ;;  %v7862_v24 = vpop.permute.xlu0 %7861 }
0x3eed   :  { %11411 = vmatprep.subr.msk.bf16.mxu1 %vm332_vm1, %v7870_v52  ;;  %v12146_v0 = vpop.eup %12145 }
0x3eee   :  { %v7757_v30 = vmul.f32 %v12146_v0, %v12130_v34  ;;  %v7763_v14 = vpack.c.bf16 %v7759_v18, %v7758_v36 }
0x3eef   :  { %v7860_v34 = vpop.permute.xlu1 %7859 }
0x3ef0   :  { %v7762_v60 = vpack.c.bf16 %v7757_v30, %v7756_v58 }
0x3ef2   :  { %11150 = vmatprep.mubr.msk.bf16.mxu1 %vm422_vm2, %v7762_v60 }
0x3ef3   :  { %11151 = vmatmul.mubr.msk.bf16.gmra.mxu1 %vm422_vm2, %v7763_v14  ;;  %v7864_v20 = vpop.permute.xlu1 %7863 }
0x3ef4   :  { %11157 = vmatpush3.bf16.xpose.msra.mxu1 %v7892_v48  ;;  %11162 = vmatprep.mubr.msk.bf16.mxu1 %vm332_vm1, %v7858_v8 }
0x3ef5   :  { %11412 = vmatprep.subr.msk.bf16.mxu1 %vm332_vm1, %v7868_v12 }
0x3efc   :  { %11159 = vmatpush3.bf16.xpose.msra.mxu1 %v7889_v57 }
0x3efd   :  { %11413 = vmatprep.subr.msk.bf16.mxu1 %vm332_vm1, %v7866_v4 }
0x3f04   :  { %11161 = vmatpush3.bf16.xpose.msra.mxu1 %v7886_v23 }
0x3f05   :  { %11198 = vmatprep.subr.bf16.mxu1 %v15368_v45 }
0x3f0b   :  { %11163 = vmatmul.mubr.msk.bf16.vlgmr.msra.gmra.mxu1 %vm332_vm1, %v7860_v34 }
0x3f0c   :  { %11166 = vmatprep.mubr.msk.bf16.mxu1 %vm332_vm1, %v7862_v24  ;;  %11199 = vmatpush3.bf16.msra.mxu1 %v15368_v45 }
0x3f0d   :  { %11200 = vmatprep.subr.bf16.mxu1 %v15373_v41 }
0x3f10   :  { %11201 = vmatpush3.bf16.msra.mxu1 %v15373_v41 }
0x3f13   :  { %11167 = vmatmul.mubr.msk.bf16.gmra.mxu1 %vm332_vm1, %v7864_v20 }
0x3f14   :  { %11202 = vmatprep.mubr.msk.bf16.mxu1 %vm41_vm0, %v15395_v38 }
0x3f1b   :  { %11203 = vmatmul.mubr.msk.bf16.vlgmr.msra.gmra.mxu1 %vm41_vm0, %v15404_v39 }
0x3f1c   :  { %11206 = vmatprep.mubr.msk.bf16.mxu1 %vm41_vm0, %v15417_v2 }
0x3f23   :  { %11207 = vmatmul.mubr.msk.bf16.gmra.mxu1 %vm41_vm0, %v15424_v54 }
0x3fab   :  { %v15828_v45 = vpop.f32.mrf.mxu1 }
0x3fad   :  { %v15830_v37 = vpop.f32.mrf.mxu1 }
0x3faf   :  { %v15832_v41 = vpop.f32.mrf.mxu1 }
0x3fb0   :  { %v7854_v35 = vpack.c.bf16 %v15832_v41, %v15828_v45 }
0x3fb1   :  { %v15836_v61 = vpop.f32.mrf.mxu1 }
0x3fb2   :  { %v7853_v38 = vpack.c.bf16 %v15836_v61, %v15830_v37  ;;  %v16731_v37 = vpack.c.bf16 %v15736_v32, %v15730_v33 }
0x3fb3   :  { %v15840_v39 = vpop.f32.mrf.mxu1 }
0x3fb5   :  { %v15842_v2 = vpop.f32.mrf.mxu1 }
0x3fb7   :  { %v15844_v49 = vpop.f32.mrf.mxu1 }
0x3fb8   :  { %v7856_v54 = vpack.c.bf16 %v15844_v49, %v15840_v39 }
0x3fb9   :  { %v15848_v44 = vpop.f32.mrf.mxu1 }
0x3fba   :  { %v7855_v5 = vpack.c.bf16 %v15848_v44, %v15842_v2 }
0x3fcb   :  { %v11164_v19 = vpop.f32.mrf.mxu1 }
0x3fcc   :  { %v7968_v47 = vsel %vm422_vm2, %v11164_v19, -inf }
0x3fcd   :  { %v7931_v46 = vpop.f32.mrf.mxu1 }
0x3fce   :  { %v7962_v11 = vsel %vm422_vm2, %v7931_v46, -inf }
0x3fcf   :  { %7963 = vmax.xlane.f32.xlu0 %v7962_v11  ;;  %v11165_v15 = vpop.f32.mrf.mxu1 }
0x3fd0   :  { %v7971_v40 = vsel %vm422_vm2, %v11165_v15, -inf }
0x3fd1   :  { %v7934_v13 = vpop.f32.mrf.mxu1 }
0x3fd2   :  { %v7965_v29 = vsel %vm422_vm2, %v7934_v13, -inf }
0x3fd3   :  { %7969 = vmax.xlane.f32.xlu0 %v7968_v47  ;;  %7966 = vmax.xlane.f32.xlu1 %v7965_v29  ;;  %v11168_v51 = vpop.f32.mrf.mxu1 }
0x3fd4   :  { %v7980_v60 = vsel %vm422_vm2, %v11168_v51, -inf }
0x3fd5   :  { %v7947_v21 = vpop.f32.mrf.mxu1 }
0x3fd6   :  { %v7974_v0 = vsel %vm422_vm2, %v7947_v21, -inf }
0x3fd7   :  { %7972 = vmax.xlane.f32.xlu0 %v7971_v40  ;;  %v15856_v52 = vpop.f32.mrf.mxu1 }
0x3fd8   :  { %v7983_v14 = vsel %vm422_vm2, %v15856_v52, -inf }
0x3fd9   :  { %v15858_v59 = vpop.f32.mrf.mxu1 }
0x3fda   :  { %v7977_v18 = vsel %vm422_vm2, %v15858_v59, -inf }
0x3fdb   :  { %7975 = vmax.xlane.f32.xlu0 %v7974_v0  ;;  %v15863_v58 = vpop.f32.mrf.mxu1  ;;  %7978 = vmax.xlane.f32.xlu1 %v7977_v18 }
0x3fdd   :  { %v8464_v30 = vpop.f32.mrf.mxu1 }
0x3fde   :  { %v15866_v36 = vadd.f32 %v8464_v30, %v15435_v27 }
0x3fdf   :  { %7981 = vmax.xlane.f32.xlu0 %v7980_v60  ;;  %7984 = vmax.xlane.f32.xlu1 %v7983_v14 }
0x3fe0   :  { %11238 = vmatprep.mubr.msk.f32.mxu1 %vm332_vm1, %v15866_v36 }
0x4058   :  { %v7964_v8 = vpop.xlane.xlu0 %7963 }
0x4059   :  { %v7986_v48 = vsub.f32 %v7931_v46, %v7964_v8 }
0x405b   :  { %v7994_v24 = vmul.f32 1.442695, %v7986_v48 }
0x405c   :  { %v7967_v12 = vpop.xlane.xlu1 %7966  ;;  %v7970_v57 = vpop.xlane.xlu0 %7969 }
0x405d   :  { %v7988_v4 = vsub.f32 %v11164_v19, %v7970_v57  ;;  %v7987_v23 = vsub.f32 %v7934_v13, %v7967_v12 }
0x405f   :  { %v7998_v34 = vmul.f32 1.442695, %v7988_v4  ;;  %v7996_v47 = vmul.f32 1.442695, %v7987_v23 }
0x4060   :  { %v7973_v20 = vpop.xlane.xlu0 %7972 }
0x4061   :  { %v7989_v11 = vsub.f32 %v11165_v15, %v7973_v20  ;;  %12147 = vpow2.f32 %v7998_v34 }
0x4062   :  { %12149 = vpow2.f32 %v7994_v24 }
0x4063   :  { %v8000_v29 = vmul.f32 1.442695, %v7989_v11  ;;  %v15901_v11 = vld [vmem:[%s16608_s2 + $0x34] ss:$8 sps:$4 sm:$0xff]  }
0x4064   :  { %v7976_v40 = vpop.xlane.xlu0 %7975  ;;  %v7979_v34 = vpop.xlane.xlu1 %7978 }
0x4065   :  { %12151 = vpow2.f32 %v8000_v29  ;;  %v7990_v0 = vsub.f32 %v7947_v21, %v7976_v40 }
0x4066   :  { %12153 = vpow2.f32 %v7996_v47 }
0x4067   :  { %v8002_v46 = vmul.f32 1.442695, %v7990_v0 }
0x4068   :  { %v7982_v18 = vpop.xlane.xlu0 %7981  ;;  %v7985_v24 = vpop.xlane.xlu1 %7984 }
0x4069   :  { %v7992_v30 = vsub.f32 %v11168_v51, %v7982_v18  ;;  %v7993_v20 = vsub.f32 %v15856_v52, %v7985_v24 }
0x406b   :  { %v8006_v60 = vmul.f32 1.442695, %v7992_v30  ;;  %v8008_v47 = vmul.f32 1.442695, %v7993_v20 }
0x406d   :  { %12155 = vpow2.f32 %v8006_v60 }
0x406e   :  { %v15873_v14 = vpop.eup %12147  ;;  %12157 = vpow2.f32 %v8002_v46 }
0x406f   :  { %v8016_v19 = vsel %vm422_vm2, %v15873_v14, 0.0  ;;  %v12150_v15 = vpop.eup %12149  ;;  %12159 = vpow2.f32 %v8008_v47 }
0x4070   :  { %8017 = vadd.xlane.f32.xlu0 %v8016_v19  ;;  %v8010_v21 = vsel %vm422_vm2, %v12150_v15, 0.0 }
0x4072   :  { %v15877_v13 = vpop.eup %12151 }
0x4073   :  { %v8019_v8 = vsel %vm422_vm2, %v15877_v13, 0.0  ;;  %v12154_v48 = vpop.eup %12153 }
0x4074   :  { %8020 = vadd.xlane.f32.xlu1 %v8019_v8  ;;  %8011 = vadd.xlane.f32.xlu0 %v8010_v21  ;;  %v8013_v51 = vsel %vm422_vm2, %v12154_v48, 0.0 }
0x4078   :  { %8014 = vadd.xlane.f32.xlu1 %v8013_v51 }
0x407a   :  { %v15883_v12 = vpop.eup %12155 }
0x407b   :  { %v8028_v57 = vsel %vm422_vm2, %v15883_v12, 0.0  ;;  %v15887_v4 = vpop.eup %12157 }
0x407c   :  { %8029 = vadd.xlane.f32.xlu0 %v8028_v57  ;;  %v8022_v23 = vsel %vm422_vm2, %v15887_v4, 0.0  ;;  %v12160_v52 = vpop.eup %12159 }
0x4080   :  { %8023 = vadd.xlane.f32.xlu0 %v8022_v23 }
0x4089   :  { %8058 = vrot.lane.b32.xlu1 %v15549_v62, %s12383_s20  ;;  %v7991_v62 = vsub.f32 %v15858_v59, %v7979_v34  ;;  %v8031_v59 = vsel %vm422_vm2, %v12160_v52, 0.0 }
0x408d   :  { %8056 = vrot.lane.b32.xlu1 %v15555_v28, %s12383_s20  ;;  %v15909_v28 = vld [vmem:[%s16608_s2 + $0x24] ss:$8 sps:$4 sm:$0xff]  }
0x4096   :  { %8060 = vrot.lane.b32.xlu0 %v15545_v16, %s12383_s20  ;;  %v8004_v16 = vmul.f32 1.442695, %v7991_v62 }
0x4098   :  { %12161 = vpow2.f32 %v8004_v16 }
0x409a   :  { %8217 = vrot.lane.b32.xlu0 %v15901_v11, %s12374_s11 }
0x409e   :  { %8215 = vrot.lane.b32.xlu0 %v15909_v28, %s12374_s11 }
0x40a2   :  { %8163 = vrot.lane.b32.xlu0 %v7853_v38, %s12386_s27 }
0x40a5   :  { %v12162_v29 = vpop.eup %12161 }
0x40a6   :  { %8155 = vrot.lane.b32.xlu0 %v7565_v43, %s12387_s28  ;;  %v8025_v40 = vsel %vm422_vm2, %v12162_v29, 0.0 }
0x40b1   :  { %8032 = vadd.xlane.f32.xlu1 %v8031_v59 }
0x40b5   :  { %8026 = vadd.xlane.f32.xlu1 %v8025_v40 }
0x40c6   :  { %8054 = vrot.lane.b32.xlu1 %v15561_v25, %s12383_s20 }
0x40ca   :  { %8151 = vrot.lane.b32.xlu1 %v16731_v37, %s12387_s28 }
0x40ce   :  { %8153 = vrot.lane.b32.xlu1 %v16732_v56, %s12387_s28 }
0x40d2   :  { %8165 = vrot.lane.b32.xlu1 %v7854_v35, %s12386_s27 }
0x40d6   :  { %8157 = vrot.lane.b32.xlu1 %v16733_v63, %s12387_s28 }
0x40f9   :  { %v8018_v25 = vpop.xlane.xlu0 %8017 }
0x40fd   :  { %v8021_v43 = vpop.xlane.xlu1 %8020  ;;  %v8012_v61 = vpop.xlane.xlu0 %8011 }
0x40fe   :  { %12163 = vrcp.f32 %v8012_v61 }
0x4101   :  { %v8015_v33 = vpop.xlane.xlu1 %8014 }
0x4102   :  { %12165 = vrcp.f32 %v8015_v33 }
0x4103   :  { %12167 = vrcp.f32 %v8021_v43 }
0x4104   :  { %12169 = vrcp.f32 %v8018_v25 }
0x4105   :  { %v8030_v32 = vpop.xlane.xlu0 %8029  ;;  %v8059_v7 = vpop.permute.xlu1 %8058 }
0x4109   :  { %v8024_v38 = vpop.xlane.xlu0 %8023  ;;  %v8057_v6 = vpop.permute.xlu1 %8056 }
0x410b   :  { %v12164_v17 = vpop.eup %12163 }
0x410c   :  { %v8042_v45 = vmul.f32 %v12164_v17, %v12150_v15  ;;  %v16734_v17 = vpack.c.bf16 %v15648_v3, %v15642_v50 }
0x410d   :  { %v8061_v0 = vpop.permute.xlu0 %8060 }
0x410e   :  { %11170 = vmatprep.subr.bf16.mxu0 %v8061_v0 }
0x410f   :  { %v12166_v18 = vpop.eup %12165  ;;  %11171 = vmatpush3.bf16.msra.mxu0 %v8061_v0 }
0x4110   :  { %v8043_v41 = vmul.f32 %v12166_v18, %v12154_v48  ;;  %11172 = vmatprep.subr.bf16.mxu0 %v8059_v7  ;;  %v12168_v30 = vpop.eup %12167 }
0x4111   :  { %v12170_v46 = vpop.eup %12169  ;;  %v8045_v19 = vmul.f32 %v12168_v30, %v15877_v13  ;;  %v8218_v15 = vpop.permute.xlu0 %8217 }
0x4112   :  { %v8050_v35 = vpack.c.bf16 %v8043_v41, %v8042_v45  ;;  %v8044_v48 = vmul.f32 %v12170_v46, %v15873_v14 }
0x4113   :  { %11173 = vmatpush3.bf16.msra.mxu0 %v8059_v7 }
0x4114   :  { %11178 = vmatprep.mubr.msk.bf16.mxu0 %vm422_vm2, %v8050_v35  ;;  %11174 = vmatprep.subr.bf16.mxu0 %v8057_v6  ;;  %v8051_v21 = vpack.c.bf16 %v8045_v19, %v8044_v48 }
0x4115   :  { %v8216_v51 = vpop.permute.xlu0 %8215 }
0x4117   :  { %11175 = vmatpush3.bf16.msra.mxu0 %v8057_v6 }
0x4119   :  { %v8164_v39 = vpop.permute.xlu0 %8163 }
0x413a   :  { %v8033_v22 = vpop.xlane.xlu1 %8032 }
0x413b   :  { %12171 = vrcp.f32 %v8033_v22  ;;  %v16737_v22 = vpack.c.bf16 %v15656_v31, %v15652_v10 }
0x413c   :  { %12173 = vrcp.f32 %v8024_v38 }
0x413d   :  { %12175 = vrcp.f32 %v8030_v32 }
0x413e   :  { %v8027_v60 = vpop.xlane.xlu1 %8026 }
0x413f   :  { %12177 = vrcp.f32 %v8027_v60 }
0x4142   :  { %v8055_v8 = vpop.permute.xlu1 %8054 }
0x4143   :  { %11176 = vmatprep.subr.bf16.mxu0 %v8055_v8 }
0x4144   :  { %11177 = vmatpush3.bf16.msra.mxu0 %v8055_v8 }
0x4145   :  { %11186 = vmatprep.subr.bf16.mxu0 %v8218_v15 }
0x4146   :  { %v8152_v33 = vpop.permute.xlu1 %8151 }
0x4147   :  { %11179 = vmatmul.mubr.msk.bf16.vlgmr.msra.gmra.mxu0 %vm422_vm2, %v8051_v21  ;;  %v8185_v2 = vsel %vm332_vm1, %v16734_v17, %v8152_v33  ;;  %v16738_v21 = vld [vmem:[#allocation21_spill] sm:$0xff] }
0x4148   :  { %11187 = vmatpush3.bf16.msra.mxu0 %v8218_v15  ;;  %v12172_v57 = vpop.eup %12171  ;;  %v8196_v0 = vsel %vm1534_vm3, %v8185_v2, %v8164_v39  ;;  %v16744_v39 = vld [vmem:[#allocation26_spill] sm:$0xff] }
0x4149   :  { %11188 = vmatprep.subr.bf16.mxu0 %v8216_v51  ;;  %v12174_v23 = vpop.eup %12173  ;;  %v8049_v20 = vmul.f32 %v12172_v57, %v12160_v52 }
0x414a   :  { %v12176_v34 = vpop.eup %12175  ;;  %v8046_v13 = vmul.f32 %v12174_v23, %v15887_v4  ;;  %v8154_v32 = vpop.permute.xlu1 %8153  ;;  %v16739_v23 = vld [vmem:[#allocation20_spill] sm:$0xff] }
0x414b   :  { %v8048_v14 = vmul.f32 %v12176_v34, %v15883_v12 }
0x414c   :  { %v12178_v24 = vpop.eup %12177  ;;  %11189 = vmatpush3.bf16.msra.mxu0 %v8216_v51 }
0x414d   :  { %v8047_v62 = vmul.f32 %v12178_v24, %v12162_v29  ;;  %11210 = vmatprep.subr.bf16.mxu0 %v15901_v11  ;;  %v8053_v16 = vpack.c.bf16 %v8049_v20, %v8048_v14 }
0x414e   :  { %v8166_v38 = vpop.permute.xlu1 %8165 }
0x414f   :  { %v8052_v47 = vpack.c.bf16 %v8047_v62, %v8046_v13  ;;  %v16740_v62 = vld [vmem:[#allocation22_spill] sm:$0xff] }
0x4151   :  { %11182 = vmatprep.mubr.msk.bf16.mxu0 %vm422_vm2, %v8052_v47  ;;  %v16741_v47 = vld [vmem:[#allocation23_spill] sm:$0xff] }
0x4152   :  { %11183 = vmatmul.mubr.msk.bf16.gmra.mxu0 %vm422_vm2, %v8053_v16  ;;  %v8158_v49 = vpop.permute.xlu1 %8157 }
0x4153   :  { %v8194_v30 = vsel %vm332_vm1, %v16737_v22, %v8158_v49 }
0x4207   :  { %v11180_v59 = vpop.f32.mrf.mxu0 }
0x4209   :  { %v8112_v40 = vpop.f32.mrf.mxu0 }
0x420b   :  { %v11181_v37 = vpop.f32.mrf.mxu0 }
0x420c   :  { %v8144_v56 = vpack.c.bf16 %v11181_v37, %v11180_v59 }
0x420d   :  { %v8115_v63 = vpop.f32.mrf.mxu0 }
0x420e   :  { %v8143_v52 = vpack.c.bf16 %v8115_v63, %v8112_v40  ;;  %8177 = vrot.lane.b32.xlu1 %v8144_v56, %s12388_s29 }
0x4210   :  { %8175 = vrot.lane.b32.xlu0 %v8143_v52, %s12388_s29 }
0x4212   :  { %8169 = vrot.lane.b32.xlu1 %v7856_v54, %s12386_s27  ;;  %v11184_v12 = vpop.f32.mrf.mxu0  ;;  %v8156_v54 = vpop.permute.xlu0 %8155 }
0x4214   :  { %8167 = vrot.lane.b32.xlu0 %v7855_v5, %s12386_s27  ;;  %v8128_v4 = vpop.f32.mrf.mxu0  ;;  %v16735_v5 = vpack.c.bf16 %v15644_v55, %v15640_v42  ;;  %v16736_v55 = vpack.c.bf16 %v15660_v53, %v15654_v9  ;;  %v15996_v9 = vld [vmem:[%s16609_s3 + $0x18] sm:$0xff]  ;;  %s12389_s3 = smov [#allocation2]  }
0x4215   :  { %v8214_v10 = vrot.slane %v15996_v9, %v13049_v26 }
0x4216   :  { %v11185_v29 = vpop.f32.mrf.mxu0  ;;  %v8188_v7 = vsel %vm332_vm1, %v16735_v5, %v8154_v32  ;;  %v8191_v3 = vsel %vm332_vm1, %v16736_v55, %v8156_v54  ;;  %v16743_v32 = vld [vmem:[#allocation25_spill] sm:$0xff]  ;;  %v16745_v54 = vld [vmem:[#allocation27_spill] sm:$0xff] }
0x4217   :  { %v8146_v25 = vpack.c.bf16 %v11185_v29, %v11184_v12  ;;  %v8198_v45 = vsel %vm1534_vm3, %v8188_v7, %v8166_v38 }
0x4218   :  { %v8131_v43 = vpop.f32.mrf.mxu0 }
0x4219   :  { %v8145_v61 = vpack.c.bf16 %v8131_v43, %v8128_v4  ;;  %8181 = vrot.lane.b32.xlu1 %v8146_v25, %s12388_s29  ;;  %v16742_v4 = vld [vmem:[#allocation24_spill] sm:$0xff] }
0x421b   :  { %8179 = vrot.lane.b32.xlu0 %v8145_v61, %s12388_s29 }
0x4280   :  { %v8178_v44 = vpop.permute.xlu1 %8177 }
0x4281   :  { %v8206_v35 = vsel %vm1543_vm4, %v8198_v45, %v8178_v44 }
0x4282   :  { %v8176_v18 = vpop.permute.xlu0 %8175 }
0x4283   :  { %v8204_v41 = vsel %vm1543_vm4, %v8196_v0, %v8176_v18 }
0x4284   :  { %11190 = vmatprep.mubr.msk.bf16.mxu0 %vm41_vm0, %v8204_v41  ;;  %v8170_v42 = vpop.permute.xlu1 %8169 }
0x4285   :  { %11191 = vmatmul.mubr.msk.bf16.vlgmr.msra.gmra.mxu0 %vm41_vm0, %v8206_v35  ;;  %v8202_v46 = vsel %vm1534_vm3, %v8194_v30, %v8170_v42 }
0x4286   :  { %11211 = vmatpush3.bf16.msra.mxu0 %v15901_v11  ;;  %v8168_v50 = vpop.permute.xlu0 %8167 }
0x4287   :  { %11212 = vmatprep.subr.bf16.mxu0 %v15909_v28  ;;  %v8200_v60 = vsel %vm1534_vm3, %v8191_v3, %v8168_v50 }
0x428a   :  { %11213 = vmatpush3.bf16.msra.mxu0 %v15909_v28 }
0x428b   :  { %v8182_v6 = vpop.permute.xlu1 %8181 }
0x428c   :  { %v8210_v28 = vsel %vm1543_vm4, %v8202_v46, %v8182_v6 }
0x428d   :  { %v8180_v11 = vpop.permute.xlu0 %8179 }
0x428e   :  { %v8208_v19 = vsel %vm1543_vm4, %v8200_v60, %v8180_v11 }
0x428f   :  { %11194 = vmatprep.mubr.msk.bf16.mxu0 %vm41_vm0, %v8208_v19 }
0x4290   :  { %11195 = vmatmul.mubr.msk.bf16.gmra.mxu0 %vm41_vm0, %v8210_v28 }
0x4345   :  { %v11192_v31 = vpop.f32.mrf.mxu0 }
0x4346   :  { %v8272_v15 = vadd.f32 %v11192_v31, %v8214_v10 }
0x4347   :  { %v8263_v53 = vpop.f32.mrf.mxu0 }
0x4348   :  { %v8264_v8 = vadd.f32 %v8263_v53, %v8214_v10  ;;  %v8296_v34 = vadd.f32 %v8272_v15, %v16739_v23 }
0x4349   :  { %v11193_v48 = vpop.f32.mrf.mxu0 }
0x434a   :  { %v8294_v51 = vadd.f32 %v8264_v8, %v16738_v21  ;;  %v8275_v24 = vadd.f32 %v11193_v48, %v8214_v10  ;;  %v8308_v40 = vsel %vm41_vm0, %v8296_v34, 0.0 }
0x434b   :  { %v8266_v57 = vpop.f32.mrf.mxu0 }
0x434c   :  { %v8267_v20 = vadd.f32 %v8266_v57, %v8214_v10  ;;  %v8302_v13 = vsel %vm41_vm0, %v8294_v51, 0.0  ;;  %v8297_v16 = vadd.f32 %v8275_v24, %v16741_v47 }
0x434d   :  { %8303 = vadd.xlane.f32.xlu0 %v8302_v13 }
0x434e   :  { %v8295_v14 = vadd.f32 %v8267_v20, %v16740_v62  ;;  %v8311_v12 = vsel %vm41_vm0, %v8297_v16, 0.0 }
0x4350   :  { %v11196_v26 = vpop.f32.mrf.mxu0  ;;  %v8305_v59 = vsel %vm41_vm0, %v8295_v14, 0.0 }
0x4351   :  { %8306 = vadd.xlane.f32.xlu1 %v8305_v59  ;;  %8309 = vadd.xlane.f32.xlu0 %v8308_v40  ;;  %v8288_v63 = vadd.f32 %v11196_v26, %v8214_v10 }
0x4352   :  { %v8279_v37 = vpop.f32.mrf.mxu0 }
0x4353   :  { %v8280_v56 = vadd.f32 %v8279_v37, %v8214_v10  ;;  %v8300_v38 = vadd.f32 %v8288_v63, %v16743_v32 }
0x4354   :  { %v11197_v52 = vpop.f32.mrf.mxu0 }
0x4355   :  { %v8298_v29 = vadd.f32 %v8280_v56, %v16742_v4  ;;  %8312 = vadd.xlane.f32.xlu0 %v8311_v12  ;;  %v8291_v43 = vadd.f32 %v11197_v52, %v8214_v10  ;;  %v8320_v44 = vsel %vm41_vm0, %v8300_v38, 0.0  ;;  %v16056_v56 = vpop.f32.mrf.mxu1 }
0x4356   :  { %v8282_v25 = vpop.f32.mrf.mxu0 }
0x4357   :  { %v8283_v61 = vadd.f32 %v8282_v25, %v8214_v10  ;;  %v8314_v33 = vsel %vm41_vm0, %v8298_v29, 0.0  ;;  %v8301_v17 = vadd.f32 %v8291_v43, %v16745_v54  ;;  %v8467_v63 = vpop.f32.mrf.mxu1 }
0x4358   :  { %v16059_v52 = vadd.f32 %v8467_v63, %v15435_v27 }
0x4359   :  { %v8299_v49 = vadd.f32 %v8283_v61, %v16744_v39  ;;  %8315 = vadd.xlane.f32.xlu0 %v8314_v33  ;;  %v8323_v5 = vsel %vm41_vm0, %v8301_v17, 0.0 }
0x435b   :  { %v8317_v2 = vsel %vm41_vm0, %v8299_v49, 0.0 }
0x435c   :  { %8318 = vadd.xlane.f32.xlu1 %v8317_v2 }
0x435d   :  { %8321 = vadd.xlane.f32.xlu0 %v8320_v44 }
0x4360   :  { %8324 = vadd.xlane.f32.xlu1 %v8323_v5 }
0x43d6   :  { %v8304_v7 = vpop.xlane.xlu0 %8303 }
0x43d7   :  { %v8326_v0 = vmul.f32 0.03125, %v8304_v7 }
0x43d9   :  { %v16016_v18 = vsub.f32 %v8294_v51, %v8326_v0 }
0x43da   :  { %v8307_v45 = vpop.xlane.xlu1 %8306  ;;  %v8310_v41 = vpop.xlane.xlu0 %8309 }
0x43db   :  { %v8327_v35 = vmul.f32 0.03125, %v8307_v45  ;;  %v8328_v42 = vmul.f32 0.03125, %v8310_v41  ;;  %v8342_v50 = vmul.f32 %v16016_v18, %v16016_v18 }
0x43dd   :  { %v16020_v55 = vsub.f32 %v8295_v14, %v8327_v35  ;;  %v16022_v3 = vsub.f32 %v8296_v34, %v8328_v42  ;;  %v8350_v6 = vsel %vm41_vm0, %v8342_v50, 0.0  ;;  %v16746_v42 = vld [vmem:[#allocation6_spill] sm:$0xff] }
0x43de   :  { %8351 = vadd.xlane.f32.xlu0 %v8350_v6  ;;  %v8313_v22 = vpop.xlane.xlu0 %8312  ;;  %v8409_v50 = vrot.slane %v15996_v9, %v16746_v42 }
0x43df   :  { %v8329_v30 = vmul.f32 0.03125, %v8313_v22  ;;  %v8343_v60 = vmul.f32 %v16020_v55, %v16020_v55  ;;  %v8344_v11 = vmul.f32 %v16022_v3, %v16022_v3 }
0x43e1   :  { %v16029_v46 = vsub.f32 %v8297_v16, %v8329_v30  ;;  %v8353_v19 = vsel %vm41_vm0, %v8343_v60, 0.0  ;;  %v8356_v28 = vsel %vm41_vm0, %v8344_v11, 0.0 }
0x43e2   :  { %8354 = vadd.xlane.f32.xlu1 %v8353_v19  ;;  %8357 = vadd.xlane.f32.xlu0 %v8356_v28  ;;  %v8316_v10 = vpop.xlane.xlu0 %8315 }
0x43e3   :  { %v8330_v31 = vmul.f32 0.03125, %v8316_v10  ;;  %v8345_v53 = vmul.f32 %v16029_v46, %v16029_v46  ;;  %v16747_v10 = vld [vmem:[#allocation7_spill] sm:$0xff] }
0x43e5   :  { %v16035_v15 = vsub.f32 %v8298_v29, %v8330_v31  ;;  %v8319_v8 = vpop.xlane.xlu1 %8318  ;;  %v8359_v48 = vsel %vm41_vm0, %v8345_v53, 0.0  ;;  %v8421_v31 = vrot.slane %v15996_v9, %v16747_v10 }
0x43e6   :  { %v8331_v21 = vmul.f32 0.03125, %v8319_v8  ;;  %8360 = vadd.xlane.f32.xlu1 %v8359_v48  ;;  %v8322_v51 = vpop.xlane.xlu0 %8321 }
0x43e7   :  { %v8332_v57 = vmul.f32 0.03125, %v8322_v51  ;;  %v8346_v23 = vmul.f32 %v16035_v15, %v16035_v15 }
0x43e8   :  { %v16040_v34 = vsub.f32 %v8299_v49, %v8331_v21 }
0x43e9   :  { %v16042_v24 = vsub.f32 %v8300_v38, %v8332_v57  ;;  %v8325_v20 = vpop.xlane.xlu1 %8324  ;;  %v8362_v13 = vsel %vm41_vm0, %v8346_v23, 0.0 }
0x43ea   :  { %v8333_v62 = vmul.f32 0.03125, %v8325_v20  ;;  %8363 = vadd.xlane.f32.xlu0 %v8362_v13  ;;  %v8347_v14 = vmul.f32 %v16040_v34, %v16040_v34 }
0x43eb   :  { %v8348_v47 = vmul.f32 %v16042_v24, %v16042_v24 }
0x43ec   :  { %v16049_v16 = vsub.f32 %v8301_v17, %v8333_v62  ;;  %v8365_v26 = vsel %vm41_vm0, %v8347_v14, 0.0 }
0x43ed   :  { %8366 = vadd.xlane.f32.xlu1 %v8365_v26  ;;  %v8368_v59 = vsel %vm41_vm0, %v8348_v47, 0.0 }
0x43ee   :  { %8369 = vadd.xlane.f32.xlu0 %v8368_v59  ;;  %v8349_v40 = vmul.f32 %v16049_v16, %v16049_v16 }
0x43f0   :  { %v8371_v37 = vsel %vm41_vm0, %v8349_v40, 0.0 }
0x43f1   :  { %8372 = vadd.xlane.f32.xlu1 %v8371_v37 }
0x4402   :  { %8819 = vrot.lane.b32.xlu1 %v16059_v52, %s12378_s15 }
0x4404   :  { %8817 = vrot.lane.b32.xlu0 %v15866_v36, %s12378_s15 }
0x4467   :  { %v8352_v12 = vpop.xlane.xlu0 %8351 }
0x4468   :  { %v8374_v4 = vmul.f32 0.03125, %v8352_v12 }
0x446a   :  { %v8382_v29 = vadd.f32 1e-05, %v8374_v4 }
0x446b   :  { %v8355_v25 = vpop.xlane.xlu1 %8354  ;;  %v8358_v43 = vpop.xlane.xlu0 %8357 }
0x446c   :  { %12179 = vrsqrt.f32 %v8382_v29  ;;  %v8375_v61 = vmul.f32 0.03125, %v8355_v25  ;;  %v8376_v33 = vmul.f32 0.03125, %v8358_v43 }
0x446e   :  { %v8383_v32 = vadd.f32 1e-05, %v8375_v61  ;;  %v8384_v38 = vadd.f32 1e-05, %v8376_v33 }
0x446f   :  { %v8361_v39 = vpop.xlane.xlu1 %8360 }
0x4470   :  { %12181 = vrsqrt.f32 %v8383_v32  ;;  %v8377_v49 = vmul.f32 0.03125, %v8361_v39 }
0x4471   :  { %12183 = vrsqrt.f32 %v8384_v38 }
0x4472   :  { %v8385_v54 = vadd.f32 1e-05, %v8377_v49 }
0x4473   :  { %v8364_v17 = vpop.xlane.xlu0 %8363 }
0x4474   :  { %12185 = vrsqrt.f32 %v8385_v54  ;;  %v8378_v2 = vmul.f32 0.03125, %v8364_v17 }
0x4476   :  { %v8386_v44 = vadd.f32 1e-05, %v8378_v2  ;;  %v8367_v5 = vpop.xlane.xlu1 %8366 }
0x4477   :  { %v8379_v7 = vmul.f32 0.03125, %v8367_v5  ;;  %v8370_v0 = vpop.xlane.xlu0 %8369 }
0x4478   :  { %12187 = vrsqrt.f32 %v8386_v44  ;;  %v8380_v45 = vmul.f32 0.03125, %v8370_v0 }
0x4479   :  { %v12180_v41 = vpop.eup %12179  ;;  %v8387_v35 = vadd.f32 1e-05, %v8379_v7 }
0x447a   :  { %v8388_v6 = vadd.f32 1e-05, %v8380_v45  ;;  %v8373_v22 = vpop.xlane.xlu1 %8372  ;;  %v8398_v30 = vmul.f32 %v12180_v41, %v16016_v18 }
0x447b   :  { %12189 = vrsqrt.f32 %v8387_v35  ;;  %v8381_v60 = vmul.f32 0.03125, %v8373_v22 }
0x447c   :  { %12191 = vrsqrt.f32 %v8388_v6  ;;  %v8410_v8 = vmul.f32 %v8409_v50, %v8398_v30  ;;  %v8473_v6 = vadd.f32 %v15863_v58, %v15435_v27  ;;  %v8476_v30 = vadd.f32 %v16056_v56, %v15435_v27 }
0x447d   :  { %v12182_v11 = vpop.eup %12181  ;;  %v8389_v19 = vadd.f32 1e-05, %v8381_v60 }
0x447e   :  { %v12184_v28 = vpop.eup %12183  ;;  %v8399_v53 = vmul.f32 %v12182_v11, %v16020_v55  ;;  %v8422_v23 = vadd.f32 %v8421_v31, %v8410_v8 }
0x447f   :  { %v8400_v48 = vmul.f32 %v12184_v28, %v16022_v3  ;;  %12193 = vrsqrt.f32 %v8389_v19 }
0x4480   :  { %v8411_v21 = vmul.f32 %v8409_v50, %v8399_v53 }
0x4481   :  { %v12186_v51 = vpop.eup %12185  ;;  %v8412_v57 = vmul.f32 %v8409_v50, %v8400_v48 }
0x4482   :  { %v8401_v18 = vmul.f32 %v12186_v51, %v16029_v46  ;;  %v8423_v20 = vadd.f32 %v8421_v31, %v8411_v21 }
0x4483   :  { %v8424_v47 = vadd.f32 %v8421_v31, %v8412_v57 }
0x4484   :  { %v8413_v13 = vmul.f32 %v8409_v50, %v8401_v18  ;;  %v8495_v62 = vpack.c.bf16 %v8423_v20, %v8422_v23 }
0x4485   :  { %v12188_v14 = vpop.eup %12187 }
0x4486   :  { %v8425_v26 = vadd.f32 %v8421_v31, %v8413_v13  ;;  %11214 = vmatprep.mubr.msk.bf16.mxu0 %vm41_vm0, %v8495_v62  ;;  %v8402_v9 = vmul.f32 %v12188_v14, %v16035_v15 }
0x4488   :  { %v12190_v55 = vpop.eup %12189  ;;  %v8496_v59 = vpack.c.bf16 %v8425_v26, %v8424_v47  ;;  %v8414_v37 = vmul.f32 %v8409_v50, %v8402_v9 }
0x4489   :  { %v12192_v3 = vpop.eup %12191  ;;  %v8403_v40 = vmul.f32 %v12190_v55, %v16040_v34  ;;  %v8818_v34 = vpop.permute.xlu0 %8817 }
0x448a   :  { %v8404_v63 = vmul.f32 %v12192_v3, %v16042_v24  ;;  %11215 = vmatmul.mubr.msk.bf16.vlgmr.msra.gmra.mxu0 %vm41_vm0, %v8496_v59  ;;  %v8426_v29 = vadd.f32 %v8421_v31, %v8414_v37 }
0x448b   :  { %v8415_v46 = vmul.f32 %v8409_v50, %v8403_v40 }
0x448c   :  { %v12194_v12 = vpop.eup %12193  ;;  %v8416_v43 = vmul.f32 %v8409_v50, %v8404_v63 }
0x448d   :  { %v8405_v4 = vmul.f32 %v12194_v12, %v16049_v16  ;;  %v8427_v25 = vadd.f32 %v8421_v31, %v8415_v46 }
0x448e   :  { %v8428_v15 = vadd.f32 %v8421_v31, %v8416_v43 }
0x448f   :  { %v8497_v61 = vpack.c.bf16 %v8427_v25, %v8426_v29  ;;  %v8417_v33 = vmul.f32 %v8409_v50, %v8405_v4 }
0x4491   :  { %11218 = vmatprep.mubr.msk.bf16.mxu0 %vm41_vm0, %v8497_v61  ;;  %v8429_v32 = vadd.f32 %v8421_v31, %v8417_v33 }
0x4493   :  { %v8498_v38 = vpack.c.bf16 %v8429_v32, %v8428_v15 }
0x4495   :  { %11219 = vmatmul.mubr.msk.bf16.gmra.mxu0 %vm41_vm0, %v8498_v38 }
0x4496   :  { %11266 = vmatprep.mubr.msk.f32.mxu0 %vm332_vm1, %v8818_v34 }
0x454a   :  { %v11216_v24 = vpop.f32.mrf.mxu0 }
0x454b   :  { %v8554_v39 = vadd.f32 %v11216_v24, %v15457_v1 }
0x454c   :  { %v8545_v49 = vpop.f32.mrf.mxu0 }
0x454d   :  { %8837 = vrot.lane.b32.xlu1 %v8554_v39, %s12378_s15  ;;  %v16085_v54 = vadd.f32 %v8545_v49, %v15457_v1 }
0x454e   :  { %v11217_v16 = vpop.f32.mrf.mxu0 }
0x454f   :  { %v8557_v17 = vadd.f32 %v11217_v16, %v15457_v1 }
0x4550   :  { %v8548_v2 = vpop.f32.mrf.mxu0 }
0x4551   :  { %8839 = vrot.lane.b32.xlu0 %v8557_v17, %s12378_s15  ;;  %8833 = vrot.lane.b32.xlu1 %v16085_v54, %s12378_s15  ;;  %v8549_v44 = vadd.f32 %v8548_v2, %v15457_v1 }
0x4555   :  { %8835 = vrot.lane.b32.xlu0 %v8549_v44, %s12378_s15  ;;  %v11220_v5 = vpop.f32.mrf.mxu0 }
0x4556   :  { %v8570_v7 = vadd.f32 %v11220_v5, %v15457_v1 }
0x4557   :  { %v8561_v0 = vpop.f32.mrf.mxu0 }
0x4558   :  { %8845 = vrot.lane.b32.xlu1 %v8570_v7, %s12378_s15  ;;  %v8562_v35 = vadd.f32 %v8561_v0, %v15457_v1 }
0x4559   :  { %v11221_v45 = vpop.f32.mrf.mxu0 }
0x455a   :  { %v8573_v41 = vadd.f32 %v11221_v45, %v15457_v1 }
0x455b   :  { %v8564_v42 = vpop.f32.mrf.mxu0 }
0x455c   :  { %8847 = vrot.lane.b32.xlu0 %v8573_v41, %s12378_s15  ;;  %11222 = vmatprep.subr.msk.mxu1 %vm332_vm1, %v8573_v41  ;;  %v8565_v50 = vadd.f32 %v8564_v42, %v15457_v1  ;;  %v11208_v1 = vpop.f32.mrf.mxu1 }
0x455d   :  { %8841 = vrot.lane.b32.xlu1 %v8562_v35, %s12378_s15  ;;  %11223 = vmatpush3.xpose.msk.msra.mxu1 %vm332_vm1, %v8573_v41  ;;  %v8489_v19 = vadd.f32 %v11208_v1, %v15435_v27 }
0x455e   :  { %11224 = vmatprep.subr.msk.mxu1 %vm332_vm1, %v8570_v7  ;;  %v8480_v22 = vpop.f32.mrf.mxu1 }
0x455f   :  { %v8481_v58 = vadd.f32 %v8480_v22, %v15435_v27 }
0x4560   :  { %9102 = vrot.lane.b32.xlu0 %v8570_v7, %s12381_s18  ;;  %v11209_v60 = vpop.f32.mrf.mxu1 }
0x4561   :  { %9359 = vrot.lane.b32.xlu1 %v8570_v7, %s12384_s21  ;;  %11225 = vmatpush3.xpose.msk.msra.mxu1 %vm332_vm1, %v8570_v7  ;;  %v8492_v28 = vadd.f32 %v11209_v60, %v15435_v27 }
0x4562   :  { %11226 = vmatprep.subr.msk.mxu1 %vm332_vm1, %v8565_v50  ;;  %v8483_v11 = vpop.f32.mrf.mxu1 }
0x4563   :  { %v8484_v56 = vadd.f32 %v8483_v11, %v15435_v27  ;;  %v8820_v27 = vpop.permute.xlu1 %8819 }
0x4564   :  { %9098 = vrot.lane.b32.xlu0 %v8562_v35, %s12381_s18 }
0x4565   :  { %9104 = vrot.lane.b32.xlu1 %v8573_v41, %s12381_s18  ;;  %11227 = vmatpush3.xpose.msk.msra.mxu1 %vm332_vm1, %v8565_v50 }
0x4566   :  { %11228 = vmatprep.subr.msk.mxu1 %vm332_vm1, %v8562_v35 }
0x4568   :  { %9361 = vrot.lane.b32.xlu0 %v8573_v41, %s12384_s21 }
0x4569   :  { %8843 = vrot.lane.b32.xlu1 %v8565_v50, %s12378_s15  ;;  %11229 = vmatpush3.xpose.msk.msra.mxu1 %vm332_vm1, %v8562_v35 }
0x456a   :  { %11230 = vmatprep.subr.msk.mxu1 %vm332_vm1, %v8557_v17 }
0x456c   :  { %9096 = vrot.lane.b32.xlu0 %v8557_v17, %s12381_s18 }
0x456d   :  { %9355 = vrot.lane.b32.xlu1 %v8562_v35, %s12384_s21  ;;  %11231 = vmatpush3.xpose.msk.msra.mxu1 %vm332_vm1, %v8557_v17 }
0x456e   :  { %11232 = vmatprep.subr.msk.mxu1 %vm332_vm1, %v8554_v39 }
0x4570   :  { %8821 = vrot.lane.b32.xlu0 %v8473_v6, %s12378_s15 }
0x4571   :  { %9353 = vrot.lane.b32.xlu1 %v8557_v17, %s12384_s21  ;;  %11233 = vmatpush3.xpose.msk.msra.mxu1 %vm332_vm1, %v8554_v39 }
0x4572   :  { %11234 = vmatprep.subr.msk.mxu1 %vm332_vm1, %v8549_v44 }
0x4574   :  { %9094 = vrot.lane.b32.xlu0 %v8554_v39, %s12381_s18 }
0x4575   :  { %8823 = vrot.lane.b32.xlu1 %v8476_v30, %s12378_s15  ;;  %11235 = vmatpush3.xpose.msk.msra.mxu1 %vm332_vm1, %v8549_v44 }
0x4576   :  { %11236 = vmatprep.subr.msk.mxu1 %vm332_vm1, %v16085_v54 }
0x4578   :  { %8825 = vrot.lane.b32.xlu0 %v8481_v58, %s12378_s15 }
0x4579   :  { %9351 = vrot.lane.b32.xlu1 %v8554_v39, %s12384_s21  ;;  %11237 = vmatpush3.xpose.msk.msra.mxu1 %vm332_vm1, %v16085_v54 }
0x457c   :  { %9092 = vrot.lane.b32.xlu0 %v8549_v44, %s12381_s18  ;;  %11239 = vmatmul.mubr.msk.f32.vlgmr.msra.gmra.mxu1 %vm332_vm1, %v16059_v52 }
0x457d   :  { %8827 = vrot.lane.b32.xlu1 %v8484_v56, %s12378_s15  ;;  %11241 = vmatprep.mubr.msk.f32.mxu1 %vm332_vm1, %v8473_v6 }
0x4580   :  { %8829 = vrot.lane.b32.xlu0 %v8489_v19, %s12378_s15  ;;  %11242 = vmatmul.mubr.msk.f32.gmra.mxu1 %vm332_vm1, %v8476_v30 }
0x4581   :  { %9349 = vrot.lane.b32.xlu1 %v8549_v44, %s12384_s21  ;;  %11244 = vmatprep.mubr.msk.f32.mxu1 %vm332_vm1, %v8481_v58 }
0x4584   :  { %9100 = vrot.lane.b32.xlu0 %v8565_v50, %s12381_s18  ;;  %11245 = vmatmul.mubr.msk.f32.gmra.mxu1 %vm332_vm1, %v8484_v56 }
0x4585   :  { %8831 = vrot.lane.b32.xlu1 %v8492_v28, %s12378_s15  ;;  %11247 = vmatprep.mubr.msk.f32.mxu1 %vm332_vm1, %v8489_v19  ;;  %s9625_s15 = sshll.u32 %s12389_s3, 4  ;;  %s9626_s15 = int_to_ptr.vmem [resolvable:$true] %s9625_s15 }
0x4586   :  { %p12357_p1 = scmp.lt.s32.totalorder %s9626_s15, %s9626_s15 }
0x4588   :  { %9090 = vrot.lane.b32.xlu0 %v16085_v54, %s12381_s18  ;;  %11248 = vmatmul.mubr.msk.f32.gmra.mxu1 %vm332_vm1, %v8492_v28 }
0x4589   :  { %9357 = vrot.lane.b32.xlu1 %v8565_v50, %s12384_s21 }
0x458c   :  { %9074 = vrot.lane.b32.xlu0 %v15866_v36, %s12381_s18 }
0x458d   :  { %9347 = vrot.lane.b32.xlu1 %v16085_v54, %s12384_s21 }
0x4590   :  { %9076 = vrot.lane.b32.xlu0 %v16059_v52, %s12381_s18 }
0x4591   :  { %9331 = vrot.lane.b32.xlu1 %v15866_v36, %s12384_s21 }
0x4594   :  { %9078 = vrot.lane.b32.xlu0 %v8473_v6, %s12381_s18 }
0x4595   :  { %9333 = vrot.lane.b32.xlu1 %v16059_v52, %s12384_s21 }
0x4598   :  { %9080 = vrot.lane.b32.xlu0 %v8476_v30, %s12381_s18 }
0x4599   :  { %9335 = vrot.lane.b32.xlu1 %v8473_v6, %s12384_s21 }
0x459c   :  { %9082 = vrot.lane.b32.xlu0 %v8481_v58, %s12381_s18 }
0x459d   :  { %9337 = vrot.lane.b32.xlu1 %v8476_v30, %s12384_s21 }
0x45a0   :  { %9084 = vrot.lane.b32.xlu0 %v8484_v56, %s12381_s18 }
0x45a1   :  { %9339 = vrot.lane.b32.xlu1 %v8481_v58, %s12384_s21 }
0x45a4   :  { %9086 = vrot.lane.b32.xlu0 %v8489_v19, %s12381_s18 }
0x45a5   :  { %9341 = vrot.lane.b32.xlu1 %v8484_v56, %s12384_s21 }
0x45a8   :  { %9088 = vrot.lane.b32.xlu0 %v8492_v28, %s12381_s18  ;;  %s12352_s18 = scalar_lea.vmem %s9626_s15, 4096 }
0x45a9   :  { %9343 = vrot.lane.b32.xlu1 %v8489_v19, %s12384_s21  ;;  %p12353_p0 = scmp.ne.s32.totalorder %s9626_s15, %s12352_s18  ;;  %p12358_p2 = scmp.lt.s32.totalorder %s12352_s18, %s12352_s18 }
0x45ab   :  { %p12359_p3 = por %p12358_p2, %p12357_p1 }
0x45ad   :  { %9345 = vrot.lane.b32.xlu1 %v8492_v28, %s12384_s21  ;;  %p12360_p4 = pnand %p12359_p3, %p12353_p0 }
0x45bf   :  { %v8838_v36 = vpop.permute.xlu1 %8837 }
0x45c3   :  { %v8840_v52 = vpop.permute.xlu0 %8839  ;;  %v8834_v10 = vpop.permute.xlu1 %8833 }
0x45c7   :  { %v8836_v31 = vpop.permute.xlu0 %8835 }
0x45ca   :  { %v8846_v53 = vpop.permute.xlu1 %8845 }
0x45ce   :  { %v8848_v8 = vpop.permute.xlu0 %8847 }
0x45cf   :  { %v8842_v48 = vpop.permute.xlu1 %8841  ;;  %11250 = vmatprep.subr.msk.mxu0 %vm332_vm1, %v8848_v8 }
0x45d0   :  { %11251 = vmatpush3.xpose.msk.msra.mxu0 %vm332_vm1, %v8848_v8 }
0x45d1   :  { %11252 = vmatprep.subr.msk.mxu0 %vm332_vm1, %v8846_v53 }
0x45d2   :  { %v9103_v21 = vpop.permute.xlu0 %9102 }
0x45d3   :  { %v9360_v51 = vpop.permute.xlu1 %9359 }
0x45d4   :  { %11253 = vmatpush3.xpose.msk.msra.mxu0 %vm332_vm1, %v8846_v53 }
0x45d6   :  { %v9099_v57 = vpop.permute.xlu0 %9098 }
0x45d7   :  { %v9105_v18 = vpop.permute.xlu1 %9104 }
0x45d8   :  { %11278 = vmatprep.subr.msk.mxu1 %vm332_vm1, %v9105_v18 }
0x45d9   :  { %11279 = vmatpush3.xpose.msk.msra.mxu1 %vm332_vm1, %v9105_v18 }
0x45da   :  { %11280 = vmatprep.subr.msk.mxu1 %vm332_vm1, %v9103_v21  ;;  %v9362_v23 = vpop.permute.xlu0 %9361 }
0x45db   :  { %v8844_v20 = vpop.permute.xlu1 %8843 }
0x45dc   :  { %11254 = vmatprep.subr.msk.mxu0 %vm332_vm1, %v8844_v20 }
0x45dd   :  { %11255 = vmatpush3.xpose.msk.msra.mxu0 %vm332_vm1, %v8844_v20  ;;  %11281 = vmatpush3.xpose.msk.msra.mxu1 %vm332_vm1, %v9103_v21 }
0x45de   :  { %11256 = vmatprep.subr.msk.mxu0 %vm332_vm1, %v8842_v48  ;;  %v9097_v13 = vpop.permute.xlu0 %9096 }
0x45df   :  { %v9356_v62 = vpop.permute.xlu1 %9355 }
0x45e1   :  { %11257 = vmatpush3.xpose.msk.msra.mxu0 %vm332_vm1, %v8842_v48 }
0x45e2   :  { %11258 = vmatprep.subr.msk.mxu0 %vm332_vm1, %v8840_v52  ;;  %v8822_v14 = vpop.permute.xlu0 %8821 }
0x45e3   :  { %v9354_v47 = vpop.permute.xlu1 %9353 }
0x45e5   :  { %11259 = vmatpush3.xpose.msk.msra.mxu0 %vm332_vm1, %v8840_v52 }
0x45e6   :  { %11260 = vmatprep.subr.msk.mxu0 %vm332_vm1, %v8838_v36  ;;  %v9095_v26 = vpop.permute.xlu0 %9094 }
0x45e7   :  { %v8824_v9 = vpop.permute.xlu1 %8823 }
0x45e9   :  { %11261 = vmatpush3.xpose.msk.msra.mxu0 %vm332_vm1, %v8838_v36 }
0x45ea   :  { %11262 = vmatprep.subr.msk.mxu0 %vm332_vm1, %v8836_v31  ;;  %v8826_v55 = vpop.permute.xlu0 %8825 }
0x45eb   :  { %v9352_v59 = vpop.permute.xlu1 %9351 }
0x45ed   :  { %11263 = vmatpush3.xpose.msk.msra.mxu0 %vm332_vm1, %v8836_v31 }
0x45ee   :  { %11264 = vmatprep.subr.msk.mxu0 %vm332_vm1, %v8834_v10  ;;  %v9093_v3 = vpop.permute.xlu0 %9092 }
0x45ef   :  { %v8828_v40 = vpop.permute.xlu1 %8827 }
0x45f1   :  { %11265 = vmatpush3.xpose.msk.msra.mxu0 %vm332_vm1, %v8834_v10 }
0x45f2   :  { %11306 = vmatprep.subr.msk.mxu0 %vm332_vm1, %v9362_v23  ;;  %v8830_v37 = vpop.permute.xlu0 %8829 }
0x45f3   :  { %v9350_v63 = vpop.permute.xlu1 %9349 }
0x45f4   :  { %11267 = vmatmul.mubr.msk.f32.vlgmr.msra.gmra.mxu0 %vm332_vm1, %v8820_v27 }
0x45f5   :  { %11269 = vmatprep.mubr.msk.f32.mxu0 %vm332_vm1, %v8822_v14  ;;  %11307 = vmatpush3.xpose.msk.msra.mxu0 %vm332_vm1, %v9362_v23 }
0x45f6   :  { %11308 = vmatprep.subr.msk.mxu0 %vm332_vm1, %v9360_v51  ;;  %v9101_v46 = vpop.permute.xlu0 %9100 }
0x45f7   :  { %v8832_v12 = vpop.permute.xlu1 %8831  ;;  %11282 = vmatprep.subr.msk.mxu1 %vm332_vm1, %v9101_v46 }
0x45f8   :  { %11270 = vmatmul.mubr.msk.f32.gmra.mxu0 %vm332_vm1, %v8824_v9  ;;  %11283 = vmatpush3.xpose.msk.msra.mxu1 %vm332_vm1, %v9101_v46 }
0x45f9   :  { %11272 = vmatprep.mubr.msk.f32.mxu0 %vm332_vm1, %v8826_v55  ;;  %11309 = vmatpush3.xpose.msk.msra.mxu0 %vm332_vm1, %v9360_v51 }
0x45fa   :  { %11284 = vmatprep.subr.msk.mxu1 %vm332_vm1, %v9099_v57  ;;  %v9091_v4 = vpop.permute.xlu0 %9090 }
0x45fb   :  { %v9358_v29 = vpop.permute.xlu1 %9357 }
0x45fc   :  { %11273 = vmatmul.mubr.msk.f32.gmra.mxu0 %vm332_vm1, %v8828_v40  ;;  %11310 = vmatprep.subr.msk.mxu0 %vm332_vm1, %v9358_v29 }
0x45fd   :  { %11275 = vmatprep.mubr.msk.f32.mxu0 %vm332_vm1, %v8830_v37  ;;  %11285 = vmatpush3.xpose.msk.msra.mxu1 %vm332_vm1, %v9099_v57 }
0x45fe   :  { %11311 = vmatpush3.xpose.msk.msra.mxu0 %vm332_vm1, %v9358_v29  ;;  %11286 = vmatprep.subr.msk.mxu1 %vm332_vm1, %v9097_v13  ;;  %v9075_v25 = vpop.permute.xlu0 %9074 }
0x45ff   :  { %11312 = vmatprep.subr.msk.mxu0 %vm332_vm1, %v9356_v62  ;;  %v9348_v43 = vpop.permute.xlu1 %9347  ;;  %11294 = vmatprep.mubr.msk.f32.mxu1 %vm332_vm1, %v9075_v25 }
0x4600   :  { %11276 = vmatmul.mubr.msk.f32.gmra.mxu0 %vm332_vm1, %v8832_v12 }
0x4601   :  { %11287 = vmatpush3.xpose.msk.msra.mxu1 %vm332_vm1, %v9097_v13 }
0x4602   :  { %11313 = vmatpush3.xpose.msk.msra.mxu0 %vm332_vm1, %v9356_v62  ;;  %11288 = vmatprep.subr.msk.mxu1 %vm332_vm1, %v9095_v26  ;;  %v9077_v61 = vpop.permute.xlu0 %9076 }
0x4603   :  { %11314 = vmatprep.subr.msk.mxu0 %vm332_vm1, %v9354_v47  ;;  %v9332_v33 = vpop.permute.xlu1 %9331 }
0x4604   :  { %11322 = vmatprep.mubr.msk.f32.mxu0 %vm332_vm1, %v9332_v33 }
0x4605   :  { %11289 = vmatpush3.xpose.msk.msra.mxu1 %vm332_vm1, %v9095_v26 }
0x4606   :  { %11315 = vmatpush3.xpose.msk.msra.mxu0 %vm332_vm1, %v9354_v47  ;;  %11290 = vmatprep.subr.msk.mxu1 %vm332_vm1, %v9093_v3  ;;  %v9079_v15 = vpop.permute.xlu0 %9078 }
0x4607   :  { %11316 = vmatprep.subr.msk.mxu0 %vm332_vm1, %v9352_v59  ;;  %v9334_v32 = vpop.permute.xlu1 %9333 }
0x4609   :  { %11291 = vmatpush3.xpose.msk.msra.mxu1 %vm332_vm1, %v9093_v3 }
0x460a   :  { %11317 = vmatpush3.xpose.msk.msra.mxu0 %vm332_vm1, %v9352_v59  ;;  %11292 = vmatprep.subr.msk.mxu1 %vm332_vm1, %v9091_v4  ;;  %v9081_v38 = vpop.permute.xlu0 %9080 }
0x460b   :  { %11318 = vmatprep.subr.msk.mxu0 %vm332_vm1, %v9350_v63  ;;  %v9336_v34 = vpop.permute.xlu1 %9335 }
0x460d   :  { %11293 = vmatpush3.xpose.msk.msra.mxu1 %vm332_vm1, %v9091_v4 }
0x460e   :  { %11319 = vmatpush3.xpose.msk.msra.mxu0 %vm332_vm1, %v9350_v63  ;;  %v9083_v24 = vpop.permute.xlu0 %9082 }
0x460f   :  { %11320 = vmatprep.subr.msk.mxu0 %vm332_vm1, %v9348_v43  ;;  %v9338_v39 = vpop.permute.xlu1 %9337 }
0x4610   :  { %11295 = vmatmul.mubr.msk.f32.vlgmr.msra.gmra.mxu1 %vm332_vm1, %v9077_v61 }
0x4611   :  { %11297 = vmatprep.mubr.msk.f32.mxu1 %vm332_vm1, %v9079_v15 }
0x4612   :  { %11321 = vmatpush3.xpose.msk.msra.mxu0 %vm332_vm1, %v9348_v43  ;;  %v9085_v49 = vpop.permute.xlu0 %9084 }
0x4613   :  { %v9340_v16 = vpop.permute.xlu1 %9339 }
0x4614   :  { %11298 = vmatmul.mubr.msk.f32.gmra.mxu1 %vm332_vm1, %v9081_v38 }
0x4615   :  { %11323 = vmatmul.mubr.msk.f32.vlgmr.msra.gmra.mxu0 %vm332_vm1, %v9334_v32  ;;  %11300 = vmatprep.mubr.msk.f32.mxu1 %vm332_vm1, %v9083_v24 }
0x4616   :  { %11325 = vmatprep.mubr.msk.f32.mxu0 %vm332_vm1, %v9336_v34  ;;  %v9087_v54 = vpop.permute.xlu0 %9086 }
0x4617   :  { %v9342_v17 = vpop.permute.xlu1 %9341 }
0x4618   :  { %11301 = vmatmul.mubr.msk.f32.gmra.mxu1 %vm332_vm1, %v9085_v49 }
0x4619   :  { %11326 = vmatmul.mubr.msk.f32.gmra.mxu0 %vm332_vm1, %v9338_v39  ;;  %11303 = vmatprep.mubr.msk.f32.mxu1 %vm332_vm1, %v9087_v54 }
0x461a   :  { %11328 = vmatprep.mubr.msk.f32.mxu0 %vm332_vm1, %v9340_v16  ;;  %v9089_v2 = vpop.permute.xlu0 %9088 }
0x461b   :  { %v9344_v44 = vpop.permute.xlu1 %9343 }
0x461c   :  { %11304 = vmatmul.mubr.msk.f32.gmra.mxu1 %vm332_vm1, %v9089_v2 }
0x461d   :  { %11329 = vmatmul.mubr.msk.f32.gmra.mxu0 %vm332_vm1, %v9342_v17 }
0x461e   :  { %11331 = vmatprep.mubr.msk.f32.mxu0 %vm332_vm1, %v9344_v44 }
0x461f   :  { %v9346_v5 = vpop.permute.xlu1 %9345 }
0x4621   :  { %11332 = vmatmul.mubr.msk.f32.gmra.mxu0 %vm332_vm1, %v9346_v5 }
0x463c   :  { %v16250_v7 = vpop.f32.mrf.mxu1 }
0x463d   :  { %v8732_v0 = vsel %vm422_vm2, %v16250_v7, -inf }
0x463e   :  { %8733 = vmax.xlane.f32.xlu1 %v8732_v0  ;;  %v16254_v45 = vpop.f32.mrf.mxu1 }
0x463f   :  { %v8729_v41 = vsel %vm422_vm2, %v16254_v45, -inf }
0x4640   :  { %8730 = vmax.xlane.f32.xlu0 %v8729_v41  ;;  %v16258_v35 = vpop.f32.mrf.mxu1 }
0x4641   :  { %v8738_v50 = vsel %vm422_vm2, %v16258_v35, -inf }
0x4642   :  { %v16260_v42 = vpop.f32.mrf.mxu1 }
0x4643   :  { %v8735_v30 = vsel %vm422_vm2, %v16260_v42, -inf }
0x4644   :  { %8739 = vmax.xlane.f32.xlu0 %v8738_v50  ;;  %v16264_v1 = vpop.f32.mrf.mxu1 }
0x4645   :  { %v8744_v6 = vsel %vm422_vm2, %v16264_v1, -inf }
0x4646   :  { %8745 = vmax.xlane.f32.xlu1 %v8744_v6  ;;  %v16268_v22 = vpop.f32.mrf.mxu1 }
0x4647   :  { %v8741_v11 = vsel %vm422_vm2, %v16268_v22, -inf }
0x4648   :  { %8736 = vmax.xlane.f32.xlu0 %v8735_v30  ;;  %v16272_v60 = vpop.f32.mrf.mxu1 }
0x4649   :  { %v8750_v58 = vsel %vm422_vm2, %v16272_v60, -inf }
0x464a   :  { %8751 = vmax.xlane.f32.xlu1 %v8750_v58  ;;  %v16278_v56 = vpop.f32.mrf.mxu1 }
0x464b   :  { %v8747_v19 = vsel %vm422_vm2, %v16278_v56, -inf }
0x464c   :  { %8742 = vmax.xlane.f32.xlu0 %v8741_v11 }
0x4650   :  { %8748 = vmax.xlane.f32.xlu0 %v8747_v19 }
0x46b4   :  { %v16282_v28 = vpop.f32.mrf.mxu0 }
0x46b5   :  { %v8989_v27 = vsel %vm422_vm2, %v16282_v28, -inf }
0x46b6   :  { %8990 = vmax.xlane.f32.xlu1 %v8989_v27  ;;  %v16286_v36 = vpop.f32.mrf.mxu0 }
0x46b7   :  { %v8986_v52 = vsel %vm422_vm2, %v16286_v36, -inf }
0x46b8   :  { %8987 = vmax.xlane.f32.xlu0 %v8986_v52  ;;  %v16290_v10 = vpop.f32.mrf.mxu0 }
0x46b9   :  { %v8995_v23 = vsel %vm422_vm2, %v16290_v10, -inf }
0x46ba   :  { %v16292_v31 = vpop.f32.mrf.mxu0 }
0x46bb   :  { %v8992_v62 = vsel %vm422_vm2, %v16292_v31, -inf }
0x46bc   :  { %v16294_v53 = vpop.f32.mrf.mxu0 }
0x46bd   :  { %v9001_v40 = vsel %vm422_vm2, %v16294_v53, -inf }
0x46be   :  { %v16300_v21 = vpop.f32.mrf.mxu0 }
0x46bf   :  { %v8998_v37 = vsel %vm422_vm2, %v16300_v21, -inf }
0x46c0   :  { %v16310_v20 = vpop.f32.mrf.mxu0 }
0x46c1   :  { %v9007_v15 = vsel %vm422_vm2, %v16310_v20, -inf }
0x46c2   :  { %v16318_v26 = vpop.f32.mrf.mxu0 }
0x46c3   :  { %v9004_v34 = vsel %vm422_vm2, %v16318_v26, -inf }
0x46c7   :  { %v8734_v4 = vpop.xlane.xlu1 %8733 }
0x46c8   :  { %v8754_v33 = vsub.f32 %v16250_v7, %v8734_v4 }
0x46c9   :  { %v8731_v13 = vpop.xlane.xlu0 %8730 }
0x46ca   :  { %v8753_v32 = vsub.f32 %v16254_v45, %v8731_v13  ;;  %v8763_v49 = vmul.f32 1.442695, %v8754_v33 }
0x46cc   :  { %v8761_v2 = vmul.f32 1.442695, %v8753_v32  ;;  %12195 = vpow2.f32 %v8763_v49 }
0x46cd   :  { %v8740_v3 = vpop.xlane.xlu0 %8739 }
0x46ce   :  { %v8756_v16 = vsub.f32 %v16258_v35, %v8740_v3  ;;  %12197 = vpow2.f32 %v8761_v2 }
0x46cf   :  { %v8746_v38 = vpop.xlane.xlu1 %8745 }
0x46d0   :  { %v16296_v8 = vpop.f32.mrf.mxu1  ;;  %v8767_v0 = vmul.f32 1.442695, %v8756_v16  ;;  %v8758_v45 = vsub.f32 %v16264_v1, %v8746_v38 }
0x46d1   :  { %v9246_v48 = vsel %vm422_vm2, %v16296_v8, -inf  ;;  %v8737_v29 = vpop.xlane.xlu0 %8736 }
0x46d2   :  { %9247 = vmax.xlane.f32.xlu1 %v9246_v48  ;;  %v16302_v51 = vpop.f32.mrf.mxu1  ;;  %v8755_v44 = vsub.f32 %v16260_v42, %v8737_v29  ;;  %12199 = vpow2.f32 %v8767_v0  ;;  %v8771_v11 = vmul.f32 1.442695, %v8758_v45 }
0x46d3   :  { %v9243_v57 = vsel %vm422_vm2, %v16302_v51, -inf  ;;  %v8752_v35 = vpop.xlane.xlu1 %8751 }
0x46d4   :  { %9244 = vmax.xlane.f32.xlu0 %v9243_v57  ;;  %v16306_v18 = vpop.f32.mrf.mxu1  ;;  %v8765_v50 = vmul.f32 1.442695, %v8755_v44  ;;  %v8760_v1 = vsub.f32 %v16272_v60, %v8752_v35 }
0x46d5   :  { %v9252_v47 = vsel %vm422_vm2, %v16306_v18, -inf  ;;  %v16322_v55 = vpop.f32.mrf.mxu0  ;;  %v8743_v17 = vpop.xlane.xlu0 %8742 }
0x46d6   :  { %8996 = vmax.xlane.f32.xlu1 %v8995_v23  ;;  %v16314_v14 = vpop.f32.mrf.mxu1  ;;  %v9503_v41 = vsel %vm422_vm2, %v16322_v55, -inf  ;;  %v8757_v6 = vsub.f32 %v16268_v22, %v8743_v17  ;;  %12201 = vpow2.f32 %v8765_v50  ;;  %v8775_v57 = vmul.f32 1.442695, %v8760_v1 }
0x46d7   :  { %v9249_v9 = vsel %vm422_vm2, %v16314_v14, -inf  ;;  %v16330_v63 = vpop.f32.mrf.mxu0  ;;  %12203 = vpow2.f32 %v8771_v11 }
0x46d8   :  { %8993 = vmax.xlane.f32.xlu0 %v8992_v62  ;;  %v16324_v59 = vpop.f32.mrf.mxu1  ;;  %v9500_v42 = vsel %vm422_vm2, %v16330_v63, -inf  ;;  %v8769_v27 = vmul.f32 1.442695, %v8757_v6 }
0x46d9   :  { %v9258_v12 = vsel %vm422_vm2, %v16324_v59, -inf  ;;  %v16338_v43 = vpop.f32.mrf.mxu0  ;;  %v8749_v30 = vpop.xlane.xlu0 %8748 }
0x46da   :  { %9253 = vmax.xlane.f32.xlu1 %v9252_v47  ;;  %v16332_v46 = vpop.f32.mrf.mxu1  ;;  %v9509_v19 = vsel %vm422_vm2, %v16338_v43, -inf  ;;  %v8759_v52 = vsub.f32 %v16278_v56, %v8749_v30  ;;  %12205 = vpow2.f32 %v8769_v27  ;;  %v16384_v47 = vpop.eup %12195 }
0x46db   :  { %v9255_v25 = vsel %vm422_vm2, %v16332_v46, -inf  ;;  %v16348_v24 = vpop.f32.mrf.mxu0  ;;  %12207 = vpow2.f32 %v8775_v57  ;;  %v16388_v3 = vpop.eup %12197 }
0x46dc   :  { %9250 = vmax.xlane.f32.xlu0 %v9249_v9  ;;  %v16340_v61 = vpop.f32.mrf.mxu1  ;;  %v9506_v22 = vsel %vm422_vm2, %v16348_v24, -inf  ;;  %v8773_v60 = vmul.f32 1.442695, %v8759_v52 }
0x46dd   :  { %v9264_v54 = vsel %vm422_vm2, %v16340_v61, -inf  ;;  %v16358_v7 = vpop.f32.mrf.mxu0 }
0x46de   :  { %9002 = vmax.xlane.f32.xlu1 %v9001_v40  ;;  %v16350_v39 = vpop.f32.mrf.mxu1  ;;  %v9515_v23 = vsel %vm422_vm2, %v16358_v7, -inf  ;;  %12209 = vpow2.f32 %v8773_v60  ;;  %v8780_v40 = vsel %vm422_vm2, %v16384_v47, 0.0 }
0x46df   :  { %v9261_v5 = vsel %vm422_vm2, %v16350_v39, -inf  ;;  %v16366_v58 = vpop.f32.mrf.mxu0 }
0x46e0   :  { %8999 = vmax.xlane.f32.xlu0 %v8998_v37  ;;  %v9512_v13 = vsel %vm422_vm2, %v16366_v58, -inf  ;;  %v16392_v37 = vpop.eup %12199 }
0x46e1   :  { %v16374_v48 = vpop.f32.mrf.mxu0  ;;  %v8786_v29 = vsel %vm422_vm2, %v16392_v37, 0.0 }
0x46e2   :  { %9259 = vmax.xlane.f32.xlu1 %v9258_v12  ;;  %v9521_v56 = vsel %vm422_vm2, %v16374_v48, -inf  ;;  %v8777_v12 = vsel %vm422_vm2, %v16388_v3, 0.0 }
0x46e3   :  { %v16380_v62 = vpop.f32.mrf.mxu0  ;;  %v16396_v4 = vpop.eup %12201 }
0x46e4   :  { %9256 = vmax.xlane.f32.xlu0 %v9255_v25  ;;  %v9518_v9 = vsel %vm422_vm2, %v16380_v62, -inf  ;;  %v16400_v25 = vpop.eup %12203  ;;  %v8783_v33 = vsel %vm422_vm2, %v16396_v4, 0.0 }
0x46e5   :  { %v8792_v32 = vsel %vm422_vm2, %v16400_v25, 0.0 }
0x46e6   :  { %9008 = vmax.xlane.f32.xlu1 %v9007_v15 }
0x46e7   :  { %v16404_v15 = vpop.eup %12205 }
0x46e8   :  { %9005 = vmax.xlane.f32.xlu0 %v9004_v34  ;;  %v16408_v38 = vpop.eup %12207  ;;  %v8789_v34 = vsel %vm422_vm2, %v16404_v15, 0.0 }
0x46e9   :  { %v8798_v16 = vsel %vm422_vm2, %v16408_v38, 0.0 }
0x46ea   :  { %9265 = vmax.xlane.f32.xlu1 %v9264_v54 }
0x46eb   :  { %v16412_v49 = vpop.eup %12209 }
0x46ec   :  { %9262 = vmax.xlane.f32.xlu0 %v9261_v5  ;;  %v8795_v54 = vsel %vm422_vm2, %v16412_v49, 0.0 }
0x46ee   :  { %9504 = vmax.xlane.f32.xlu1 %v9503_v41 }
0x46f0   :  { %9501 = vmax.xlane.f32.xlu0 %v9500_v42 }
0x46f2   :  { %9510 = vmax.xlane.f32.xlu1 %v9509_v19 }
0x46f4   :  { %9507 = vmax.xlane.f32.xlu0 %v9506_v22 }
0x46f6   :  { %9516 = vmax.xlane.f32.xlu1 %v9515_v23 }
0x46f8   :  { %9513 = vmax.xlane.f32.xlu0 %v9512_v13 }
0x46fa   :  { %9522 = vmax.xlane.f32.xlu1 %v9521_v56 }
0x46fc   :  { %9519 = vmax.xlane.f32.xlu0 %v9518_v9 }
0x46fe   :  { %8781 = vadd.xlane.f32.xlu1 %v8780_v40 }
0x4700   :  { %8778 = vadd.xlane.f32.xlu0 %v8777_v12 }
0x4702   :  { %8787 = vadd.xlane.f32.xlu1 %v8786_v29 }
0x4704   :  { %8784 = vadd.xlane.f32.xlu0 %v8783_v33 }
0x4706   :  { %8793 = vadd.xlane.f32.xlu1 %v8792_v32 }
0x4708   :  { %8790 = vadd.xlane.f32.xlu0 %v8789_v34 }
0x470a   :  { %8799 = vadd.xlane.f32.xlu1 %v8798_v16 }
0x470c   :  { %8796 = vadd.xlane.f32.xlu0 %v8795_v54 }
0x473f   :  { %v8991_v17 = vpop.xlane.xlu1 %8990 }
0x4740   :  { %v9011_v2 = vsub.f32 %v16282_v28, %v8991_v17 }
0x4741   :  { %v8988_v44 = vpop.xlane.xlu0 %8987 }
0x4742   :  { %v9020_v5 = vmul.f32 1.442695, %v9011_v2  ;;  %v9010_v0 = vsub.f32 %v16286_v36, %v8988_v44 }
0x4744   :  { %12211 = vpow2.f32 %v9020_v5  ;;  %v9018_v45 = vmul.f32 1.442695, %v9010_v0 }
0x4746   :  { %12213 = vpow2.f32 %v9018_v45 }
0x4751   :  { %v16420_v41 = vpop.eup %12211 }
0x4752   :  { %v9037_v35 = vsel %vm422_vm2, %v16420_v41, 0.0 }
0x4753   :  { %v16424_v50 = vpop.eup %12213  ;;  %9038 = vadd.xlane.f32.xlu1 %v9037_v35 }
0x4754   :  { %v9034_v6 = vsel %vm422_vm2, %v16424_v50, 0.0 }
0x4755   :  { %9035 = vadd.xlane.f32.xlu0 %v9034_v6 }
0x475b   :  { %v9248_v28 = vpop.xlane.xlu1 %9247 }
0x475c   :  { %v9268_v42 = vsub.f32 %v16296_v8, %v9248_v28 }
0x475d   :  { %v9245_v30 = vpop.xlane.xlu0 %9244 }
0x475e   :  { %v9277_v36 = vmul.f32 1.442695, %v9268_v42  ;;  %v9267_v11 = vsub.f32 %v16302_v51, %v9245_v30 }
0x475f   :  { %v8997_v1 = vpop.xlane.xlu1 %8996 }
0x4760   :  { %12215 = vpow2.f32 %v9277_v36  ;;  %v9275_v19 = vmul.f32 1.442695, %v9267_v11  ;;  %v9013_v27 = vsub.f32 %v16290_v10, %v8997_v1 }
0x4761   :  { %v8994_v52 = vpop.xlane.xlu0 %8993 }
0x4762   :  { %12217 = vpow2.f32 %v9275_v19  ;;  %v9024_v22 = vmul.f32 1.442695, %v9013_v27  ;;  %v9012_v57 = vsub.f32 %v16292_v31, %v8994_v52 }
0x4763   :  { %v9254_v23 = vpop.xlane.xlu1 %9253 }
0x4764   :  { %12219 = vpow2.f32 %v9024_v22  ;;  %v9022_v60 = vmul.f32 1.442695, %v9012_v57  ;;  %v9270_v13 = vsub.f32 %v16306_v18, %v9254_v23 }
0x4765   :  { %v9251_v8 = vpop.xlane.xlu0 %9250 }
0x4766   :  { %12221 = vpow2.f32 %v9022_v60  ;;  %v9281_v56 = vmul.f32 1.442695, %v9270_v13  ;;  %v9269_v51 = vsub.f32 %v16314_v14, %v9251_v8 }
0x4767   :  { %v9003_v9 = vpop.xlane.xlu1 %9002 }
0x4768   :  { %12223 = vpow2.f32 %v9281_v56  ;;  %v9279_v40 = vmul.f32 1.442695, %v9269_v51  ;;  %v9015_v10 = vsub.f32 %v16294_v53, %v9003_v9 }
0x4769   :  { %v9000_v12 = vpop.xlane.xlu0 %8999 }
0x476a   :  { %12225 = vpow2.f32 %v9279_v40  ;;  %v9028_v29 = vmul.f32 1.442695, %v9015_v10  ;;  %v9014_v31 = vsub.f32 %v16300_v21, %v9000_v12 }
0x476b   :  { %v9260_v33 = vpop.xlane.xlu1 %9259 }
0x476c   :  { %12227 = vpow2.f32 %v9028_v29  ;;  %v9026_v32 = vmul.f32 1.442695, %v9014_v31  ;;  %v9272_v18 = vsub.f32 %v16324_v59, %v9260_v33 }
0x476d   :  { %v16437_v34 = vpop.eup %12215  ;;  %v9257_v16 = vpop.xlane.xlu0 %9256 }
0x476e   :  { %12229 = vpow2.f32 %v9026_v32  ;;  %v9285_v14 = vmul.f32 1.442695, %v9272_v18  ;;  %v9271_v54 = vsub.f32 %v16332_v46, %v9257_v16  ;;  %v9294_v53 = vsel %vm422_vm2, %v16437_v34, 0.0 }
0x476f   :  { %v16442_v17 = vpop.eup %12217  ;;  %v9009_v2 = vpop.xlane.xlu1 %9008  ;;  %9295 = vadd.xlane.f32.xlu1 %v9294_v53 }
0x4770   :  { %12231 = vpow2.f32 %v9285_v14  ;;  %v9283_v21 = vmul.f32 1.442695, %v9271_v54  ;;  %v9017_v44 = vsub.f32 %v16310_v20, %v9009_v2  ;;  %v9291_v59 = vsel %vm422_vm2, %v16442_v17, 0.0 }
0x4771   :  { %v16447_v5 = vpop.eup %12219  ;;  %9292 = vadd.xlane.f32.xlu0 %v9291_v59  ;;  %v9006_v0 = vpop.xlane.xlu0 %9005 }
0x4772   :  { %12233 = vpow2.f32 %v9283_v21  ;;  %v9032_v46 = vmul.f32 1.442695, %v9017_v44  ;;  %v9016_v45 = vsub.f32 %v16318_v26, %v9006_v0  ;;  %v9043_v35 = vsel %vm422_vm2, %v16447_v5, 0.0 }
0x4773   :  { %v16452_v6 = vpop.eup %12221  ;;  %v9266_v28 = vpop.xlane.xlu1 %9265  ;;  %9044 = vadd.xlane.f32.xlu1 %v9043_v35 }
0x4774   :  { %12235 = vpow2.f32 %v9032_v46  ;;  %v9030_v20 = vmul.f32 1.442695, %v9016_v45  ;;  %v9274_v42 = vsub.f32 %v16340_v61, %v9266_v28  ;;  %v9040_v30 = vsel %vm422_vm2, %v16452_v6, 0.0 }
0x4775   :  { %v16457_v36 = vpop.eup %12223  ;;  %9041 = vadd.xlane.f32.xlu0 %v9040_v30  ;;  %v9263_v11 = vpop.xlane.xlu0 %9262 }
0x4776   :  { %12237 = vpow2.f32 %v9030_v20  ;;  %v9289_v26 = vmul.f32 1.442695, %v9274_v42  ;;  %v9273_v1 = vsub.f32 %v16350_v39, %v9263_v11  ;;  %v9300_v19 = vsel %vm422_vm2, %v16457_v36, 0.0 }
0x4777   :  { %v16462_v27 = vpop.eup %12225  ;;  %v9505_v52 = vpop.xlane.xlu1 %9504  ;;  %9301 = vadd.xlane.f32.xlu1 %v9300_v19 }
0x4778   :  { %12239 = vpow2.f32 %v9289_v26  ;;  %v9287_v61 = vmul.f32 1.442695, %v9273_v1  ;;  %v9525_v22 = vsub.f32 %v16322_v55, %v9505_v52  ;;  %v9297_v57 = vsel %vm422_vm2, %v16462_v27, 0.0 }
0x4779   :  { %v16467_v23 = vpop.eup %12227  ;;  %9298 = vadd.xlane.f32.xlu0 %v9297_v57  ;;  %v9502_v60 = vpop.xlane.xlu0 %9501 }
0x477a   :  { %12241 = vpow2.f32 %v9287_v61  ;;  %v9534_v39 = vmul.f32 1.442695, %v9525_v22  ;;  %v9524_v13 = vsub.f32 %v16330_v63, %v9502_v60  ;;  %v9049_v8 = vsel %vm422_vm2, %v16467_v23, 0.0 }
0x477b   :  { %v16472_v56 = vpop.eup %12229  ;;  %v9511_v51 = vpop.xlane.xlu1 %9510  ;;  %9050 = vadd.xlane.f32.xlu1 %v9049_v8 }
0x477c   :  { %12243 = vpow2.f32 %v9534_v39  ;;  %v9532_v55 = vmul.f32 1.442695, %v9524_v13  ;;  %v9527_v9 = vsub.f32 %v16338_v43, %v9511_v51  ;;  %v9046_v40 = vsel %vm422_vm2, %v16472_v56, 0.0 }
0x477d   :  { %v16477_v10 = vpop.eup %12231  ;;  %9047 = vadd.xlane.f32.xlu0 %v9046_v40  ;;  %v9508_v12 = vpop.xlane.xlu0 %9507 }
0x477e   :  { %12245 = vpow2.f32 %v9532_v55  ;;  %v9538_v63 = vmul.f32 1.442695, %v9527_v9  ;;  %v9526_v29 = vsub.f32 %v16348_v24, %v9508_v12  ;;  %v9306_v31 = vsel %vm422_vm2, %v16477_v10, 0.0 }
0x477f   :  { %v16482_v33 = vpop.eup %12233  ;;  %v9517_v32 = vpop.xlane.xlu1 %9516  ;;  %9307 = vadd.xlane.f32.xlu1 %v9306_v31 }
0x4780   :  { %12247 = vpow2.f32 %v9538_v63  ;;  %v9536_v43 = vmul.f32 1.442695, %v9526_v29  ;;  %v9529_v18 = vsub.f32 %v16358_v7, %v9517_v32  ;;  %v9303_v16 = vsel %vm422_vm2, %v16482_v33, 0.0 }
0x4781   :  { %v16487_v14 = vpop.eup %12235  ;;  %9304 = vadd.xlane.f32.xlu0 %v9303_v16  ;;  %v9514_v54 = vpop.xlane.xlu0 %9513 }
0x4782   :  { %12249 = vpow2.f32 %v9536_v43  ;;  %v9542_v24 = vmul.f32 1.442695, %v9529_v18  ;;  %v9528_v53 = vsub.f32 %v16366_v58, %v9514_v54  ;;  %v9055_v2 = vsel %vm422_vm2, %v16487_v14, 0.0 }
0x4783   :  { %v16492_v21 = vpop.eup %12237  ;;  %v9523_v44 = vpop.xlane.xlu1 %9522  ;;  %9056 = vadd.xlane.f32.xlu1 %v9055_v2 }
0x4784   :  { %12251 = vpow2.f32 %v9542_v24  ;;  %v9540_v7 = vmul.f32 1.442695, %v9528_v53  ;;  %v9531_v59 = vsub.f32 %v16374_v48, %v9523_v44  ;;  %v9052_v0 = vsel %vm422_vm2, %v16492_v21, 0.0 }
0x4785   :  { %v16497_v46 = vpop.eup %12239  ;;  %9053 = vadd.xlane.f32.xlu0 %v9052_v0  ;;  %v9520_v45 = vpop.xlane.xlu0 %9519 }
0x4786   :  { %12253 = vpow2.f32 %v9540_v7  ;;  %v9546_v58 = vmul.f32 1.442695, %v9531_v59  ;;  %v9530_v35 = vsub.f32 %v16380_v62, %v9520_v45  ;;  %v9312_v28 = vsel %vm422_vm2, %v16497_v46, 0.0 }
0x4787   :  { %v16502_v20 = vpop.eup %12241  ;;  %v8782_v42 = vpop.xlane.xlu1 %8781  ;;  %9313 = vadd.xlane.f32.xlu1 %v9312_v28 }
0x4788   :  { %12255 = vpow2.f32 %v9546_v58  ;;  %v9544_v48 = vmul.f32 1.442695, %v9530_v35  ;;  %v9309_v30 = vsel %vm422_vm2, %v16502_v20, 0.0 }
0x4789   :  { %v16506_v11 = vpop.eup %12243  ;;  %12257 = vrcp.f32 %v8782_v42  ;;  %9310 = vadd.xlane.f32.xlu0 %v9309_v30  ;;  %v8779_v26 = vpop.xlane.xlu0 %8778 }
0x478a   :  { %12259 = vpow2.f32 %v9544_v48  ;;  %v9551_v62 = vsel %vm422_vm2, %v16506_v11, 0.0 }
0x478b   :  { %v16510_v1 = vpop.eup %12245  ;;  %12261 = vrcp.f32 %v8779_v26  ;;  %9552 = vadd.xlane.f32.xlu1 %v9551_v62  ;;  %v8788_v19 = vpop.xlane.xlu1 %8787 }
0x478c   :  { %12263 = vrcp.f32 %v8788_v19  ;;  %v9548_v52 = vsel %vm422_vm2, %v16510_v1, 0.0 }
0x478d   :  { %v16514_v61 = vpop.eup %12247  ;;  %9549 = vadd.xlane.f32.xlu0 %v9548_v52  ;;  %v8785_v22 = vpop.xlane.xlu0 %8784 }
0x478e   :  { %12265 = vrcp.f32 %v8785_v22  ;;  %v9557_v57 = vsel %vm422_vm2, %v16514_v61, 0.0 }
0x478f   :  { %v16518_v60 = vpop.eup %12249  ;;  %9558 = vadd.xlane.f32.xlu1 %v9557_v57  ;;  %v8794_v39 = vpop.xlane.xlu1 %8793 }
0x4790   :  { %12267 = vrcp.f32 %v8794_v39  ;;  %v9554_v13 = vsel %vm422_vm2, %v16518_v60, 0.0 }
0x4791   :  { %v16522_v8 = vpop.eup %12251  ;;  %9555 = vadd.xlane.f32.xlu0 %v9554_v13  ;;  %v8791_v51 = vpop.xlane.xlu0 %8790 }
0x4792   :  { %12269 = vrcp.f32 %v8791_v51  ;;  %v9563_v55 = vsel %vm422_vm2, %v16522_v8, 0.0 }
0x4793   :  { %v16526_v9 = vpop.eup %12253  ;;  %9564 = vadd.xlane.f32.xlu1 %v9563_v55  ;;  %v8800_v40 = vpop.xlane.xlu1 %8799 }
0x4794   :  { %12271 = vrcp.f32 %v8800_v40  ;;  %v9560_v12 = vsel %vm422_vm2, %v16526_v9, 0.0 }
0x4795   :  { %v16530_v63 = vpop.eup %12255  ;;  %9561 = vadd.xlane.f32.xlu0 %v9560_v12  ;;  %v8797_v29 = vpop.xlane.xlu0 %8796 }
0x4796   :  { %v12258_v31 = vpop.eup %12257  ;;  %12273 = vrcp.f32 %v8797_v29  ;;  %v9569_v32 = vsel %vm422_vm2, %v16530_v63, 0.0 }
0x4797   :  { %v16534_v43 = vpop.eup %12259  ;;  %v8804_v18 = vmul.f32 %v12258_v31, %v16384_v47  ;;  %9570 = vadd.xlane.f32.xlu1 %v9569_v32 }
0x4798   :  { %v12262_v16 = vpop.eup %12261  ;;  %v9566_v54 = vsel %vm422_vm2, %v16534_v43, 0.0 }
0x4799   :  { %v12264_v24 = vpop.eup %12263  ;;  %9589 = vst.msk [vmem:[#allocation2 + $0x8] sm:$0xff] %vm422_vm2, %v8804_v18  ;;  %v8802_v53 = vmul.f32 %v12262_v16, %v16388_v3  ;;  %9567 = vadd.xlane.f32.xlu0 %v9566_v54 }
0x479a   :  { %v8808_v2 = vmul.f32 %v12264_v24, %v16392_v37 }
0x479b   :  { %v12266_v44 = vpop.eup %12265  ;;  %9588 = vst.msk [vmem:[#allocation2] sm:$0xff] %vm422_vm2, %v8802_v53 }
0x479c   :  { %9591 = vst.msk [vmem:[#allocation2 + $0x18] sm:$0xff] %vm422_vm2, %v8808_v2  ;;  %v8806_v47 = vmul.f32 %v12266_v44, %v16396_v4 }
0x479d   :  { %v12268_v7 = vpop.eup %12267 }
0x479e   :  { %9590 = vst.msk [vmem:[#allocation2 + $0x10] sm:$0xff] %vm422_vm2, %v8806_v47  ;;  %v8812_v59 = vmul.f32 %v12268_v7, %v16400_v25 }
0x479f   :  { %v12270_v0 = vpop.eup %12269 }
0x47a0   :  { %9593 = vst.msk [vmem:[#allocation2 + $0x28] sm:$0xff] %vm422_vm2, %v8812_v59  ;;  %v8810_v3 = vmul.f32 %v12270_v0, %v16404_v15 }
0x47a1   :  { %v12272_v45 = vpop.eup %12271 }
0x47a2   :  { %9592 = vst.msk [vmem:[#allocation2 + $0x20] sm:$0xff] %vm422_vm2, %v8810_v3  ;;  %v8816_v37 = vmul.f32 %v12272_v45, %v16408_v38 }
0x47a3   :  { %v12274_v58 = vpop.eup %12273 }
0x47a4   :  { %9595 = vst.msk [vmem:[#allocation2 + $0x38] sm:$0xff] %vm422_vm2, %v8816_v37  ;;  %v8814_v4 = vmul.f32 %v12274_v58, %v16412_v49 }
0x47a6   :  { %9594 = vst.msk [vmem:[#allocation2 + $0x30] sm:$0xff] %vm422_vm2, %v8814_v4 }
0x47dc   :  { %v9039_v35 = vpop.xlane.xlu1 %9038 }
0x47dd   :  { %12275 = vrcp.f32 %v9039_v35 }
0x47de   :  { %v9036_v25 = vpop.xlane.xlu0 %9035 }
0x47df   :  { %12277 = vrcp.f32 %v9036_v25 }
0x47ea   :  { %v12276_v28 = vpop.eup %12275 }
0x47eb   :  { %v9061_v42 = vmul.f32 %v12276_v28, %v16420_v41 }
0x47ec   :  { %v12278_v15 = vpop.eup %12277 }
0x47ed   :  { %9597 = vst.msk [vmem:[#allocation2 + $0x48] sm:$0xff] %vm422_vm2, %v9061_v42  ;;  %v9059_v48 = vmul.f32 %v12278_v15, %v16424_v50 }
0x47ef   :  { %9596 = vst.msk [vmem:[#allocation2 + $0x40] sm:$0xff] %vm422_vm2, %v9059_v48 }
0x47f8   :  { %v9296_v38 = vpop.xlane.xlu1 %9295 }
0x47f9   :  { %12279 = vrcp.f32 %v9296_v38 }
0x47fa   :  { %v9293_v30 = vpop.xlane.xlu0 %9292 }
0x47fb   :  { %12281 = vrcp.f32 %v9293_v30 }
0x47fc   :  { %v9045_v49 = vpop.xlane.xlu1 %9044 }
0x47fd   :  { %12283 = vrcp.f32 %v9045_v49 }
0x47fe   :  { %v9042_v26 = vpop.xlane.xlu0 %9041 }
0x47ff   :  { %12285 = vrcp.f32 %v9042_v26 }
0x4800   :  { %v9302_v62 = vpop.xlane.xlu1 %9301 }
0x4801   :  { %12287 = vrcp.f32 %v9302_v62 }
0x4802   :  { %v9299_v19 = vpop.xlane.xlu0 %9298 }
0x4803   :  { %12289 = vrcp.f32 %v9299_v19 }
0x4804   :  { %v9051_v41 = vpop.xlane.xlu1 %9050 }
0x4805   :  { %12291 = vrcp.f32 %v9051_v41 }
0x4806   :  { %v12280_v52 = vpop.eup %12279  ;;  %v9048_v22 = vpop.xlane.xlu0 %9047 }
0x4807   :  { %v9318_v50 = vmul.f32 %v12280_v52, %v16437_v34  ;;  %12293 = vrcp.f32 %v9048_v22 }
0x4808   :  { %v12282_v57 = vpop.eup %12281  ;;  %v9308_v39 = vpop.xlane.xlu1 %9307 }
0x4809   :  { %9605 = vst.msk [vmem:[#allocation2 + $0x88] sm:$0xff] %vm422_vm2, %v9318_v50  ;;  %v9316_v13 = vmul.f32 %v12282_v57, %v16442_v17  ;;  %12295 = vrcp.f32 %v9308_v39 }
0x480a   :  { %v12284_v51 = vpop.eup %12283  ;;  %v9305_v55 = vpop.xlane.xlu0 %9304 }
0x480b   :  { %9604 = vst.msk [vmem:[#allocation2 + $0x80] sm:$0xff] %vm422_vm2, %v9316_v13  ;;  %v9065_v40 = vmul.f32 %v12284_v51, %v16447_v5  ;;  %12297 = vrcp.f32 %v9305_v55 }
0x480c   :  { %v12286_v12 = vpop.eup %12285  ;;  %v9057_v29 = vpop.xlane.xlu1 %9056 }
0x480d   :  { %9599 = vst.msk [vmem:[#allocation2 + $0x58] sm:$0xff] %vm422_vm2, %v9065_v40  ;;  %v9063_v34 = vmul.f32 %v12286_v12, %v16452_v6  ;;  %12299 = vrcp.f32 %v9057_v29 }
0x480e   :  { %v12288_v31 = vpop.eup %12287  ;;  %v9054_v32 = vpop.xlane.xlu0 %9053 }
0x480f   :  { %9598 = vst.msk [vmem:[#allocation2 + $0x50] sm:$0xff] %vm422_vm2, %v9063_v34  ;;  %v9322_v17 = vmul.f32 %v12288_v31, %v16457_v36  ;;  %12301 = vrcp.f32 %v9054_v32 }
0x4810   :  { %v12290_v18 = vpop.eup %12289  ;;  %v9314_v16 = vpop.xlane.xlu1 %9313 }
0x4811   :  { %9607 = vst.msk [vmem:[#allocation2 + $0x98] sm:$0xff] %vm422_vm2, %v9322_v17  ;;  %v9320_v5 = vmul.f32 %v12290_v18, %v16462_v27  ;;  %12303 = vrcp.f32 %v9314_v16 }
0x4812   :  { %v12292_v54 = vpop.eup %12291  ;;  %v9311_v24 = vpop.xlane.xlu0 %9310 }
0x4813   :  { %9606 = vst.msk [vmem:[#allocation2 + $0x90] sm:$0xff] %vm422_vm2, %v9320_v5  ;;  %v9069_v6 = vmul.f32 %v12292_v54, %v16467_v23  ;;  %12305 = vrcp.f32 %v9311_v24 }
0x4814   :  { %v12294_v53 = vpop.eup %12293  ;;  %v9553_v2 = vpop.xlane.xlu1 %9552 }
0x4815   :  { %9601 = vst.msk [vmem:[#allocation2 + $0x68] sm:$0xff] %vm422_vm2, %v9069_v6  ;;  %v9067_v36 = vmul.f32 %v12294_v53, %v16472_v56  ;;  %12307 = vrcp.f32 %v9553_v2 }
0x4816   :  { %v12296_v44 = vpop.eup %12295  ;;  %v9550_v47 = vpop.xlane.xlu0 %9549 }
0x4817   :  { %9600 = vst.msk [vmem:[#allocation2 + $0x60] sm:$0xff] %vm422_vm2, %v9067_v36  ;;  %v9326_v27 = vmul.f32 %v12296_v44, %v16477_v10  ;;  %12309 = vrcp.f32 %v9550_v47 }
0x4818   :  { %v12298_v7 = vpop.eup %12297  ;;  %v9559_v59 = vpop.xlane.xlu1 %9558 }
0x4819   :  { %9609 = vst.msk [vmem:[#allocation2 + $0xa8] sm:$0xff] %vm422_vm2, %v9326_v27  ;;  %v9324_v23 = vmul.f32 %v12298_v7, %v16482_v33  ;;  %12311 = vrcp.f32 %v9559_v59 }
0x481a   :  { %v12300_v0 = vpop.eup %12299  ;;  %v9556_v3 = vpop.xlane.xlu0 %9555 }
0x481b   :  { %9608 = vst.msk [vmem:[#allocation2 + $0xa0] sm:$0xff] %vm422_vm2, %v9324_v23  ;;  %v9073_v56 = vmul.f32 %v12300_v0, %v16487_v14  ;;  %12313 = vrcp.f32 %v9556_v3 }
0x481c   :  { %v12302_v45 = vpop.eup %12301  ;;  %v9565_v37 = vpop.xlane.xlu1 %9564 }
0x481d   :  { %9603 = vst.msk [vmem:[#allocation2 + $0x78] sm:$0xff] %vm422_vm2, %v9073_v56  ;;  %v9071_v10 = vmul.f32 %v12302_v45, %v16492_v21  ;;  %12315 = vrcp.f32 %v9565_v37 }
0x481e   :  { %v12304_v58 = vpop.eup %12303  ;;  %v9562_v4 = vpop.xlane.xlu0 %9561 }
0x481f   :  { %9602 = vst.msk [vmem:[#allocation2 + $0x70] sm:$0xff] %vm422_vm2, %v9071_v10  ;;  %v9330_v33 = vmul.f32 %v12304_v58, %v16497_v46  ;;  %12317 = vrcp.f32 %v9562_v4 }
0x4820   :  { %v12306_v35 = vpop.eup %12305  ;;  %v9571_v25 = vpop.xlane.xlu1 %9570 }
0x4821   :  { %9611 = vst.msk [vmem:[#allocation2 + $0xb8] sm:$0xff] %vm422_vm2, %v9330_v33  ;;  %v9328_v14 = vmul.f32 %v12306_v35, %v16502_v20  ;;  %12319 = vrcp.f32 %v9571_v25 }
0x4822   :  { %v12308_v28 = vpop.eup %12307  ;;  %v9568_v42 = vpop.xlane.xlu0 %9567 }
0x4823   :  { %9610 = vst.msk [vmem:[#allocation2 + $0xb0] sm:$0xff] %vm422_vm2, %v9328_v14  ;;  %v9575_v21 = vmul.f32 %v12308_v28, %v16506_v11  ;;  %12321 = vrcp.f32 %v9568_v42 }
0x4824   :  { %v12310_v15 = vpop.eup %12309 }
0x4825   :  { %9613 = vst.msk [vmem:[#allocation2 + $0xc8] sm:$0xff] %vm422_vm2, %v9575_v21  ;;  %v9573_v46 = vmul.f32 %v12310_v15, %v16510_v1 }
0x4826   :  { %v12312_v48 = vpop.eup %12311 }
0x4827   :  { %9612 = vst.msk [vmem:[#allocation2 + $0xc0] sm:$0xff] %vm422_vm2, %v9573_v46  ;;  %v9579_v38 = vmul.f32 %v12312_v48, %v16514_v61 }
0x4828   :  { %v12314_v30 = vpop.eup %12313 }
0x4829   :  { %9615 = vst.msk [vmem:[#allocation2 + $0xd8] sm:$0xff] %vm422_vm2, %v9579_v38  ;;  %v9577_v20 = vmul.f32 %v12314_v30, %v16518_v60 }
0x482a   :  { %v12316_v49 = vpop.eup %12315 }
0x482b   :  { %9614 = vst.msk [vmem:[#allocation2 + $0xd0] sm:$0xff] %vm422_vm2, %v9577_v20  ;;  %v9583_v11 = vmul.f32 %v12316_v49, %v16522_v8 }
0x482c   :  { %v12318_v26 = vpop.eup %12317 }
0x482d   :  { %9617 = vst.msk [vmem:[#allocation2 + $0xe8] sm:$0xff] %vm422_vm2, %v9583_v11  ;;  %v9581_v1 = vmul.f32 %v12318_v26, %v16526_v9 }
0x482e   :  { %v12320_v62 = vpop.eup %12319 }
0x482f   :  { %9616 = vst.msk [vmem:[#allocation2 + $0xe0] sm:$0xff] %vm422_vm2, %v9581_v1  ;;  %v9587_v61 = vmul.f32 %v12320_v62, %v16530_v63 }
0x4830   :  { %v12322_v19 = vpop.eup %12321 }
0x4831   :  { %9619 = vst.msk [vmem:[#allocation2 + $0xf8] sm:$0xff] %vm422_vm2, %v9587_v61  ;;  %v9585_v60 = vmul.f32 %v12322_v19, %v16534_v43 }
0x4833   :  { %9618 = vst.msk [vmem:[#allocation2 + $0xf0] sm:$0xff] %vm422_vm2, %v9585_v60 }
0x4834   :  { %12363 = shalt.err (!%p12360_p4)
}
0x4835   :  { %s12390_s20 = smov 128  }
0x4836   :  { %9631 = dma.vmem_to_hbm [thread:$0]  %s9626_s15, 4096, %s16610_s4, [#allocation3], %s12390_s20, %s12390_s20, %s12387_s28  }
0x4837   :  { %12372 = dma.done.wait [#allocation3], 4096  }
0x4838   :  { %12373 = vsyncadd [#allocation3], 4294963200 }
0x4839   :  { %9635 = vsyncpa [#allocation3], 1 }

</bundles_post_ra>
